<compile_context>
chip_gen: v5e
topology: v5e:2x2
jax: 0.10.0
libtpu: 0.0.40
codegen_flags: <defaults>
</compile_context>

<pallas_src>
import numpy as np
import jax
import jax.numpy as jnp
from jax import lax
from jax.experimental import pallas as pl
from jax.experimental.pallas import tpu as pltpu

H = 32          # lstm_size
L = 2           # lstm_num_layers
NB = 2          # num_branches
TANH_C = 2.5    # tanh_constant
NEG_SYMBOL = "~"
ID2NAME = {0: "AND", 1: "OR"}
BOOK_COLS = 8   # [branch, idx1, idx2, not1, not2, valid, 0, 0]


def _sigm(x):
    # sigmoid via a single tanh (one EUP op instead of exp + divide)
    return 0.5 * (jnp.tanh(0.5 * x) + 1.0)


def _rowsum(x):
    # (B, 1) -> (1, 1) via unrolled sublane slices (B is tiny & static).
    acc = x[0:1, :]
    for bb in range(1, x.shape[0]):
        acc = acc + x[bb:bb + 1, :]
    return acc


def _rowmin(x):
    acc = x[0:1, :]
    for bb in range(1, x.shape[0]):
        acc = jnp.minimum(acc, x[bb:bb + 1, :])
    return acc


def _not_terms(x, u):
    """Categorical(logits=[-x, x]): sample / log_prob / entropy from uniform u."""
    p1 = _sigm(2.0 * x)                                   # P(sample == 1)
    ax = jnp.abs(x)
    lse2 = ax + jnp.log(1.0 + jnp.exp(-2.0 * ax))         # log(e^x + e^-x)
    lp1 = x - lse2
    lp0 = -x - lse2
    s = (u < p1).astype(jnp.float32)
    lp = s * lp1 + (1.0 - s) * lp0
    ent = -((1.0 - p1) * lp0 + p1 * lp1)
    return s, lp, ent


# ------------------------------ fused kernel ------------------------------

def _controller_kernel(item_ref, proj_ref, g_ref, wemb_ref, wsoft_ref,
                       w2_ref, v_ref, w_ref, b_ref, unif_ref,       # inputs
                       book_ref, sums_ref,                          # outputs
                       anchors_ref, aw1_ref, h_ref, c_ref,
                       count_ref, xin_ref, done_ref):               # VMEM scratch
    B, T, _ = item_ref.shape
    Tmax = anchors_ref.shape[1]
    ML = book_ref.shape[0]

    # ---------------- one-time init (single grid step) ----------------
    sums_ref[...] = jnp.zeros_like(sums_ref)
    done_ref[...] = jnp.zeros_like(done_ref)
    h_ref[...] = jnp.zeros_like(h_ref)
    c_ref[...] = jnp.zeros_like(c_ref)
    count_ref[...] = jnp.zeros_like(count_ref)
    xin_ref[...] = g_ref[...] + jnp.zeros((B, H), jnp.float32)
    anchors_ref[...] = jnp.zeros_like(anchors_ref)
    aw1_ref[...] = jnp.zeros_like(aw1_ref)
    anchors_ref[:, 0:T, :] = item_ref[...]
    aw1_ref[:, 0:T, :] = proj_ref[...]          # w_attn_1 projection precomputed by XLA

    col = lax.broadcasted_iota(jnp.int32, (B, Tmax), 1).astype(jnp.float32)

    for layer in range(ML):                     # static unroll; all indices static
        # TODO(synk): layers after the stop condition are still computed and
        # blended away with `act` (no portable scalar branch on VMEM-derived
        # data); every state/output update below is gated, so results match.
        act = 1.0 - done_ref[...]               # (1,1): 1 while running, 0 after stop

        u = unif_ref[layer]                     # (B, 2) precomputed U[0,1)

        # ---------- LSTM step 1 (state carried): fused [x,h] @ [Wih^T;Whh^T] ----------
        cur = xin_ref[...]
        h1s, c1s = [], []
        for li in range(L):
            h_old = h_ref[li]
            c_old = c_ref[li]
            xh = jnp.concatenate([cur, h_old], axis=-1)                       # (B, 2H)
            gates = (jnp.dot(xh, w_ref[li], preferred_element_type=jnp.float32)
                     + b_ref[li])
            i_g = _sigm(gates[:, 0 * H:1 * H])
            f_g = _sigm(gates[:, 1 * H:2 * H])
            g_g = jnp.tanh(gates[:, 2 * H:3 * H])
            o_g = _sigm(gates[:, 3 * H:4 * H])
            c_new = f_g * c_old + i_g * g_g
            h_new = o_g * jnp.tanh(c_new)
            h1s.append(h_new)
            c1s.append(c_new)
            h_ref[li] = h_old + act * (h_new - h_old)      # gated state carry
            c_ref[li] = c_old + act * (c_new - c_old)
            cur = h_new
        h_top = cur                                        # (B, H)

        # ---------- branch decision (deterministic top-1 of the 2 logits) ----------
        sl = TANH_C * jnp.tanh(jnp.dot(h_top, wsoft_ref[...],
                                       preferred_element_type=jnp.float32))   # (B, NB)
        l0 = sl[:, 0:1]
        l1 = sl[:, 1:2]
        mx = jnp.maximum(l0, l1)
        lse_b = mx + jnp.log(jnp.exp(l0 - mx) + jnp.exp(l1 - mx))
        branch = (l1 > l0).astype(jnp.float32)             # 0 -> AND, 1 -> OR
        lp_branch = mx - lse_b                             # chosen log-softmax

        # ---------- LSTM step 2 (state discarded; w_soft on it skipped) ----------
        w0 = wemb_ref[0:1, :]
        w1e = wemb_ref[1:2, :]
        cur2 = w0 + branch * (w1e - w0)                    # (B, H) branch embedding
        for li in range(L):
            xh = jnp.concatenate([cur2, h1s[li]], axis=-1)
            gates = (jnp.dot(xh, w_ref[li], preferred_element_type=jnp.float32)
                     + b_ref[li])
            i_g = _sigm(gates[:, 0 * H:1 * H])
            f_g = _sigm(gates[:, 1 * H:2 * H])
            g_g = jnp.tanh(gates[:, 2 * H:3 * H])
            o_g = _sigm(gates[:, 3 * H:4 * H])
            c2 = f_g * c1s[li] + i_g * g_g
            cur2 = o_g * jnp.tanh(c2)
        output = cur2                                      # (B, H)

        # ---------- attention over the anchors ----------
        q2 = jnp.dot(output, w2_ref[...], preferred_element_type=jnp.float32)  # (B, H)
        query = jnp.tanh(aw1_ref[...] + q2[:, None, :])                        # (B, Tmax, H)
        att = TANH_C * jnp.tanh(jnp.sum(query * v_ref[...], axis=-1))          # (B, Tmax)

        nv = jnp.float32(T + layer)                        # valid anchor count this layer
        cnt = count_ref[...]
        mask = jnp.where(col < nv,
                         jnp.where(cnt > 0.0, jnp.float32(-100.0), jnp.float32(0.0)),
                         jnp.float32(-1e30))
        logits = att + mask                                                    # (B, Tmax)

        m1 = jnp.max(logits, axis=-1, keepdims=True)
        lse = m1 + jnp.log(jnp.sum(jnp.exp(logits - m1), axis=-1, keepdims=True))
        big = jnp.float32(1e9)
        idx1 = jnp.min(jnp.where(logits == m1, col, big), axis=-1, keepdims=True)
        logits2 = jnp.where(col == idx1, jnp.float32(-3e38), logits)
        m2 = jnp.max(logits2, axis=-1, keepdims=True)
        idx2 = jnp.min(jnp.where(logits2 == m2, col, big), axis=-1, keepdims=True)

        # sample_count update (gated by `act`)
        ind = (col == idx1).astype(jnp.float32) + (col == idx2).astype(jnp.float32)
        cnt_next = cnt + act * ind
        count_ref[...] = cnt_next

        # ---------- "not" sampling: Categorical(logits=[-x, x]) ----------
        s0, lp_n0, ent0 = _not_terms(m1, u[:, 0:1])
        s1, lp_n1, ent1 = _not_terms(m2, u[:, 1:2])

        # ---------- log-prob / entropy accumulation (one fused store) ----------
        lp_layer = (_rowsum(lp_branch)
                    + _rowsum(m1 + m2 - 2.0 * lse)
                    + _rowsum(lp_n0 + lp_n1))              # (1, 1)
        ent_layer = _rowsum(ent0 + ent1)                   # (1, 1)
        sums_ref[...] = sums_ref[...] + act * jnp.concatenate([lp_layer, ent_layer],
                                                              axis=-1)

        # ---------- bookkeeping row: built in registers, single store ----------
        valid = act + jnp.zeros((B, 1), jnp.float32)
        book_ref[layer] = jnp.concatenate(
            [branch, idx1, idx2, s0, s1, valid, jnp.zeros((B, 2), jnp.float32)], axis=-1)

        # ---------- next inputs = (anchor[idx1] + anchor[idx2]) / (1 + 2) ----------
        a = anchors_ref[...]                               # (B, Tmax, H)
        num = jnp.sum(ind[:, :, None] * a, axis=1)         # (B, H)
        den = 1.0 + jnp.sum(ind, axis=-1, keepdims=True)   # (B, 1)
        xin_old = xin_ref[...]
        xin_ref[...] = xin_old + act * (num / den - xin_old)

        # ---------- append `output` as a new anchor (single static-row stores) ----------
        # (dead-layer writes only touch rows that only dead layers would read)
        anchors_ref[:, T + layer:T + layer + 1, :] = output[:, None, :]
        aw1_ref[:, T + layer:T + layer + 1, :] = output[:, None, :]

        # ---------- on-device stop condition (checked before the new zero column) ----------
        row_min = jnp.min(jnp.where(col < nv, cnt_next, jnp.float32(1.0)),
                          axis=-1, keepdims=True)          # (B, 1)
        all_pos = (_rowmin(row_min) > 0.0).astype(jnp.float32)   # (1, 1)
        done_ref[...] = jnp.maximum(done_ref[...], all_pos)


# ------------------------------ wrapper ------------------------------

def _build_controller_call(B, T, max_num_layers):
    ML = max_num_layers
    Tmax = T + ML
    in_specs = [
        pl.BlockSpec((B, T, H), lambda i: (0, 0, 0)),         # item_embeds
        pl.BlockSpec((B, T, H), lambda i: (0, 0, 0)),         # w_attn_1(item_embeds) precomputed
        pl.BlockSpec((1, H), lambda i: (0, 0)),               # g_emb
        pl.BlockSpec((NB, H), lambda i: (0, 0)),              # w_emb
        pl.BlockSpec((H, NB), lambda i: (0, 0)),              # w_soft^T
        pl.BlockSpec((H, H), lambda i: (0, 0)),               # w_attn_2^T
        pl.BlockSpec((1, 1, H), lambda i: (0, 0, 0)),         # v_attn
        pl.BlockSpec((L, 2 * H, 4 * H), lambda i: (0, 0, 0)), # fused [W_ih^T ; W_hh^T]
        pl.BlockSpec((L, 1, 4 * H), lambda i: (0, 0, 0)),     # bias
        pl.BlockSpec((ML, B, 2), lambda i: (0, 0, 0)),        # per-layer uniforms
    ]
    out_specs = [
        pl.BlockSpec((ML, B, BOOK_COLS), lambda i: (0, 0, 0)),  # per-layer bookkeeping
        pl.BlockSpec((1, 2), lambda i: (0, 0)),                 # [log_prob_sum, entropy_sum]
    ]
    scratch_shapes = [
        pltpu.VMEM((B, Tmax, H), jnp.float32),   # anchors
        pltpu.VMEM((B, Tmax, H), jnp.float32),   # anchors_w_1
        pltpu.VMEM((L, B, H), jnp.float32),      # h
        pltpu.VMEM((L, B, H), jnp.float32),      # c
        pltpu.VMEM((B, Tmax), jnp.float32),      # sample_count
        pltpu.VMEM((B, H), jnp.float32),         # next-step inputs
        pltpu.VMEM((1, 1), jnp.float32),         # done flag
    ]
    return pl.pallas_call(
        _controller_kernel,
        grid=(1,),
        in_specs=in_specs,
        out_specs=out_specs,
        out_shape=[jax.ShapeDtypeStruct((ML, B, BOOK_COLS), jnp.float32),
                   jax.ShapeDtypeStruct((1, 2), jnp.float32)],
        scratch_shapes=scratch_shapes,
        compiler_params=pltpu.CompilerParams(dimension_semantics=("arbitrary",)),
    )


# --------------------------- parameters / forward ---------------------------

def init_params(key, num_item):
    def u(k, shape):
        return jax.random.uniform(k, shape, jnp.float32, -0.1, 0.1)
    keys = jax.random.split(key, 11)
    wih = u(keys[0], (L, 4 * H, H))            # PyTorch layout (4H, in), gate order i,f,g,o
    whh = u(keys[1], (L, 4 * H, H))
    bih = u(keys[2], (L, 4 * H))
    bhh = u(keys[3], (L, 4 * H))
    wih_t = jnp.transpose(wih, (0, 2, 1))      # (L, H, 4H)
    whh_t = jnp.transpose(whh, (0, 2, 1))      # (L, H, 4H)
    return dict(
        item_emb=u(keys[4], (num_item, H)),
        g_emb=u(keys[5], (1, H)),
        w_emb=u(keys[6], (NB, H)),
        w_soft_t=u(keys[7], (NB, H)).T,        # (H, NB)
        w_attn_1t=u(keys[8], (H, H)).T,        # (H, H)
        w_attn_2t=u(keys[9], (H, H)).T,        # (H, H)
        v_attn=u(keys[10], (1, H)).reshape(1, 1, H),
        w_lstm=jnp.concatenate([wih_t, whh_t], axis=1),   # (L, 2H, 4H) fused K
        b=(bih + bhh).reshape(L, 1, 4 * H),
    )


def controller_forward(params, sequence, max_num_layers, rng_key):
    seq = jnp.asarray(sequence, jnp.int32) - 1               # feed_dict[SEQ] - 1
    B, T = seq.shape
    item_embeds = params['item_emb'][seq]                    # (B, T, H)  (XLA gather)
    item_proj = jnp.dot(item_embeds, params['w_attn_1t'])    # w_attn_1 projection (XLA)

    # TODO(synk): torch.distributions.Categorical RNG cannot be matched
    # bit-exactly; the identical Bernoulli(sigmoid(2x)) law is sampled from
    # precomputed jax.random uniforms instead.
    unif = jax.random.uniform(rng_key, (max_num_layers, B, 2), jnp.float32)

    call = _build_controller_call(B, T, max_num_layers)
    book, sums = call(item_embeds, item_proj, params['g_emb'], params['w_emb'],
                      params['w_soft_t'], params['w_attn_2t'], params['v_attn'],
                      params['w_lstm'], params['b'], unif)

    sample_log_prob = sums[0, 0]
    sample_entropy = sums[0, 1]

    # single device -> host transfer for the architecture-string bookkeeping
    book_np = np.asarray(book)                               # (max_num_layers, B, 8)
    arc_seq = {}
    for layer in range(max_num_layers):
        if book_np[layer, 0, 5] < 0.5:                       # valid flag (global stop)
            break
        rows = []
        for r in range(B):
            bid = int(round(float(book_np[layer, r, 0])))
            i1 = int(round(float(book_np[layer, r, 1])))
            i2 = int(round(float(book_np[layer, r, 2])))
            n1 = int(round(float(book_np[layer, r, 3])))
            n2 = int(round(float(book_np[layer, r, 4])))
            entry = [ID2NAME[bid]]
            pair = [(i1, n1), (i2, n2)]
            order = [0, 1] if i1 < i2 else [1, 0]
            for t in order:
                idx, flag = pair[t]
                entry.append(str(idx) if flag == 1 else NEG_SYMBOL + str(idx))
            rows.append(entry)
        arc_seq[str(layer)] = rows
    seq_string = [';'.join(','.join(arc_seq[str(k)][r]) for k in range(len(arc_seq)))
                  for r in range(B)]
    return sample_log_prob, sample_entropy, arc_seq, seq_string


if __name__ == "__main__":
    num_item = 20
    B, T = 2, 8
    max_num_layers = 4

    root = jax.random.PRNGKey(0)
    kp, ks, kr = jax.random.split(root, 3)
    params = init_params(kp, num_item)
    sequence = jax.random.randint(ks, (B, T), 1, num_item + 1)   # 1-based item ids

    lp, ent, arc, seq_str = controller_forward(params, sequence, max_num_layers, kr)
    jax.block_until_ready((lp, ent))
    print("KERNEL_OK")
</pallas_src>

<mosaic_0001>
module attributes {stable_mosaic.version = 11 : i64} {
  func.func @_controller_kernel(%arg0: i32, %arg1: memref<2x8x32xf32, #tpu.memory_space<vmem>>, %arg2: memref<2x8x32xf32, #tpu.memory_space<vmem>>, %arg3: memref<1x32xf32, #tpu.memory_space<vmem>>, %arg4: memref<2x32xf32, #tpu.memory_space<vmem>>, %arg5: memref<32x2xf32, #tpu.memory_space<vmem>>, %arg6: memref<32x32xf32, #tpu.memory_space<vmem>>, %arg7: memref<1x1x32xf32, #tpu.memory_space<vmem>>, %arg8: memref<2x64x128xf32, #tpu.memory_space<vmem>>, %arg9: memref<2x1x128xf32, #tpu.memory_space<vmem>>, %arg10: memref<4x2x2xf32, #tpu.memory_space<vmem>>, %arg11: memref<4x2x8xf32, #tpu.memory_space<vmem>>, %arg12: memref<1x2xf32, #tpu.memory_space<vmem>>, %arg13: memref<2x12x32xf32, #tpu.memory_space<vmem>>, %arg14: memref<2x12x32xf32, #tpu.memory_space<vmem>>, %arg15: memref<2x2x32xf32, #tpu.memory_space<vmem>>, %arg16: memref<2x2x32xf32, #tpu.memory_space<vmem>>, %arg17: memref<2x12xf32, #tpu.memory_space<vmem>>, %arg18: memref<2x32xf32, #tpu.memory_space<vmem>>, %arg19: memref<1x1xf32, #tpu.memory_space<vmem>>) attributes {dimension_semantics = [#tpu.dimension_semantics<arbitrary>], iteration_bounds = array<i64: 1>, scalar_prefetch = 0 : i64, scratch_operands = 7 : i64, tpu.core_type = #tpu.core_type<tc>, window_params = [{pipeline_mode = #tpu.pipeline_mode<synchronous>, transform_indices = @transform_0, window_bounds = array<i64: 2, 8, 32>}, {pipeline_mode = #tpu.pipeline_mode<synchronous>, transform_indices = @transform_1, window_bounds = array<i64: 2, 8, 32>}, {pipeline_mode = #tpu.pipeline_mode<synchronous>, transform_indices = @transform_2, window_bounds = array<i64: 1, 32>}, {pipeline_mode = #tpu.pipeline_mode<synchronous>, transform_indices = @transform_3, window_bounds = array<i64: 2, 32>}, {pipeline_mode = #tpu.pipeline_mode<synchronous>, transform_indices = @transform_4, window_bounds = array<i64: 32, 2>}, {pipeline_mode = #tpu.pipeline_mode<synchronous>, transform_indices = @transform_5, window_bounds = array<i64: 32, 32>}, {pipeline_mode = #tpu.pipeline_mode<synchronous>, transform_indices = @transform_6, window_bounds = array<i64: 1, 1, 32>}, {pipeline_mode = #tpu.pipeline_mode<synchronous>, transform_indices = @transform_7, window_bounds = array<i64: 2, 64, 128>}, {pipeline_mode = #tpu.pipeline_mode<synchronous>, transform_indices = @transform_8, window_bounds = array<i64: 2, 1, 128>}, {pipeline_mode = #tpu.pipeline_mode<synchronous>, transform_indices = @transform_9, window_bounds = array<i64: 4, 2, 2>}, {pipeline_mode = #tpu.pipeline_mode<synchronous>, transform_indices = @transform_10, window_bounds = array<i64: 4, 2, 8>}, {pipeline_mode = #tpu.pipeline_mode<synchronous>, transform_indices = @transform_11, window_bounds = array<i64: 1, 2>}]} {
    %cst = arith.constant 0.000000e+00 : f32
    %0 = vector.broadcast %cst : f32 to vector<1x2xf32>
    %c0 = arith.constant 0 : index
    %c0_0 = arith.constant 0 : index
    %1 = vector.load %arg12[%c0, %c0_0] : memref<1x2xf32, #tpu.memory_space<vmem>>, vector<1x2xf32>
    tpu.vector_store %arg12[%c0, %c0_0], %0 {strides = array<i32>} : memref<1x2xf32, #tpu.memory_space<vmem>>, vector<1x2xf32>,
    %cst_1 = arith.constant 0.000000e+00 : f32
    %2 = vector.broadcast %cst_1 : f32 to vector<1x1xf32>
    %c0_2 = arith.constant 0 : index
    %c0_3 = arith.constant 0 : index
    %3 = vector.load %arg19[%c0_2, %c0_3] : memref<1x1xf32, #tpu.memory_space<vmem>>, vector<1x1xf32>
    tpu.vector_store %arg19[%c0_2, %c0_3], %2 {strides = array<i32>} : memref<1x1xf32, #tpu.memory_space<vmem>>, vector<1x1xf32>,
    %cst_4 = arith.constant 0.000000e+00 : f32
    %4 = vector.broadcast %cst_4 : f32 to vector<2x2x32xf32>
    %c0_5 = arith.constant 0 : index
    %c0_6 = arith.constant 0 : index
    %c0_7 = arith.constant 0 : index
    %5 = vector.load %arg15[%c0_5, %c0_6, %c0_7] : memref<2x2x32xf32, #tpu.memory_space<vmem>>, vector<2x2x32xf32>
    tpu.vector_store %arg15[%c0_5, %c0_6, %c0_7], %4 {strides = array<i32>} : memref<2x2x32xf32, #tpu.memory_space<vmem>>, vector<2x2x32xf32>,
    %cst_8 = arith.constant 0.000000e+00 : f32
    %6 = vector.broadcast %cst_8 : f32 to vector<2x2x32xf32>
    %c0_9 = arith.constant 0 : index
    %c0_10 = arith.constant 0 : index
    %c0_11 = arith.constant 0 : index
    %7 = vector.load %arg16[%c0_9, %c0_10, %c0_11] : memref<2x2x32xf32, #tpu.memory_space<vmem>>, vector<2x2x32xf32>
    tpu.vector_store %arg16[%c0_9, %c0_10, %c0_11], %6 {strides = array<i32>} : memref<2x2x32xf32, #tpu.memory_space<vmem>>, vector<2x2x32xf32>,
    %cst_12 = arith.constant 0.000000e+00 : f32
    %8 = vector.broadcast %cst_12 : f32 to vector<2x12xf32>
    %c0_13 = arith.constant 0 : index
    %c0_14 = arith.constant 0 : index
    %9 = vector.load %arg17[%c0_13, %c0_14] : memref<2x12xf32, #tpu.memory_space<vmem>>, vector<2x12xf32>
    tpu.vector_store %arg17[%c0_13, %c0_14], %8 {strides = array<i32>} : memref<2x12xf32, #tpu.memory_space<vmem>>, vector<2x12xf32>,
    %c0_15 = arith.constant 0 : index
    %c0_16 = arith.constant 0 : index
    %10 = vector.load %arg3[%c0_15, %c0_16] : memref<1x32xf32, #tpu.memory_space<vmem>>, vector<1x32xf32>
    %cst_17 = arith.constant 0.000000e+00 : f32
    %11 = vector.broadcast %cst_17 : f32 to vector<2x32xf32>
    %12 = vector.broadcast %10 : vector<1x32xf32> to vector<2x32xf32>
    %13 = arith.addf %12, %11 : vector<2x32xf32>
    %c0_18 = arith.constant 0 : index
    %c0_19 = arith.constant 0 : index
    %14 = vector.load %arg18[%c0_18, %c0_19] : memref<2x32xf32, #tpu.memory_space<vmem>>, vector<2x32xf32>
    tpu.vector_store %arg18[%c0_18, %c0_19], %13 {strides = array<i32>} : memref<2x32xf32, #tpu.memory_space<vmem>>, vector<2x32xf32>,
    %cst_20 = arith.constant 0.000000e+00 : f32
    %15 = vector.broadcast %cst_20 : f32 to vector<2x12x32xf32>
    %c0_21 = arith.constant 0 : index
    %c0_22 = arith.constant 0 : index
    %c0_23 = arith.constant 0 : index
    %16 = vector.load %arg13[%c0_21, %c0_22, %c0_23] : memref<2x12x32xf32, #tpu.memory_space<vmem>>, vector<2x12x32xf32>
    tpu.vector_store %arg13[%c0_21, %c0_22, %c0_23], %15 {strides = array<i32>} : memref<2x12x32xf32, #tpu.memory_space<vmem>>, vector<2x12x32xf32>,
    %cst_24 = arith.constant 0.000000e+00 : f32
    %17 = vector.broadcast %cst_24 : f32 to vector<2x12x32xf32>
    %c0_25 = arith.constant 0 : index
    %c0_26 = arith.constant 0 : index
    %c0_27 = arith.constant 0 : index
    %18 = vector.load %arg14[%c0_25, %c0_26, %c0_27] : memref<2x12x32xf32, #tpu.memory_space<vmem>>, vector<2x12x32xf32>
    tpu.vector_store %arg14[%c0_25, %c0_26, %c0_27], %17 {strides = array<i32>} : memref<2x12x32xf32, #tpu.memory_space<vmem>>, vector<2x12x32xf32>,
    %c0_28 = arith.constant 0 : index
    %c0_29 = arith.constant 0 : index
    %c0_30 = arith.constant 0 : index
    %19 = vector.load %arg1[%c0_28, %c0_29, %c0_30] : memref<2x8x32xf32, #tpu.memory_space<vmem>>, vector<2x8x32xf32>
    %c0_31 = arith.constant 0 : index
    %c0_32 = arith.constant 0 : index
    %c0_33 = arith.constant 0 : index
    %20 = vector.load %arg13[%c0_31, %c0_32, %c0_33] : memref<2x12x32xf32, #tpu.memory_space<vmem>>, vector<2x8x32xf32>
    tpu.vector_store %arg13[%c0_31, %c0_32, %c0_33], %19 {strides = array<i32>} : memref<2x12x32xf32, #tpu.memory_space<vmem>>, vector<2x8x32xf32>,
    %c0_34 = arith.constant 0 : index
    %c0_35 = arith.constant 0 : index
    %c0_36 = arith.constant 0 : index
    %21 = vector.load %arg2[%c0_34, %c0_35, %c0_36] : memref<2x8x32xf32, #tpu.memory_space<vmem>>, vector<2x8x32xf32>
    %c0_37 = arith.constant 0 : index
    %c0_38 = arith.constant 0 : index
    %c0_39 = arith.constant 0 : index
    %22 = vector.load %arg14[%c0_37, %c0_38, %c0_39] : memref<2x12x32xf32, #tpu.memory_space<vmem>>, vector<2x8x32xf32>
    tpu.vector_store %arg14[%c0_37, %c0_38, %c0_39], %21 {strides = array<i32>} : memref<2x12x32xf32, #tpu.memory_space<vmem>>, vector<2x8x32xf32>,
    %23 = tpu.iota {dimensions = array<i32: 1>} : vector<2x12xi32>
    %24 = arith.sitofp %23 : vector<2x12xi32> to vector<2x12xf32>
    %c0_40 = arith.constant 0 : index
    %c0_41 = arith.constant 0 : index
    %25 = vector.load %arg19[%c0_40, %c0_41] : memref<1x1xf32, #tpu.memory_space<vmem>>, vector<1x1xf32>
    %cst_42 = arith.constant 1.000000e+00 : f32
    %26 = vector.broadcast %cst_42 : f32 to vector<1x1xf32>
    %27 = arith.subf %26, %25 : vector<1x1xf32>
    %c0_43 = arith.constant 0 : index
    %c0_44 = arith.constant 0 : index
    %c0_45 = arith.constant 0 : index
    %28 = vector.load %arg10[%c0_43, %c0_44, %c0_45] : memref<4x2x2xf32, #tpu.memory_space<vmem>>, vector<1x2x2xf32>
    %29 = vector.shape_cast %28 : vector<1x2x2xf32> to vector<2x2xf32>
    %c0_46 = arith.constant 0 : index
    %c0_47 = arith.constant 0 : index
    %30 = vector.load %arg18[%c0_46, %c0_47] : memref<2x32xf32, #tpu.memory_space<vmem>>, vector<2x32xf32>
    %c0_48 = arith.constant 0 : index
    %c0_49 = arith.constant 0 : index
    %c0_50 = arith.constant 0 : index
    %31 = vector.load %arg15[%c0_48, %c0_49, %c0_50] : memref<2x2x32xf32, #tpu.memory_space<vmem>>, vector<1x2x32xf32>
    %32 = vector.shape_cast %31 : vector<1x2x32xf32> to vector<2x32xf32>
    %c0_51 = arith.constant 0 : index
    %c0_52 = arith.constant 0 : index
    %c0_53 = arith.constant 0 : index
    %33 = vector.load %arg16[%c0_51, %c0_52, %c0_53] : memref<2x2x32xf32, #tpu.memory_space<vmem>>, vector<1x2x32xf32>
    %34 = vector.shape_cast %33 : vector<1x2x32xf32> to vector<2x32xf32>
    %35 = tpu.concatenate %30, %32 in 1 : vector<2x32xf32>, vector<2x32xf32> -> vector<2x64xf32>
    %c0_54 = arith.constant 0 : index
    %c0_55 = arith.constant 0 : index
    %c0_56 = arith.constant 0 : index
    %36 = vector.load %arg8[%c0_54, %c0_55, %c0_56] : memref<2x64x128xf32, #tpu.memory_space<vmem>>, vector<1x64x128xf32>
    %37 = vector.shape_cast %36 : vector<1x64x128xf32> to vector<64x128xf32>
    %cst_57 = arith.constant dense<0.000000e+00> : vector<2x128xf32>
    %38 = tpu.matmul %35, %37, %cst_57 {dimension_numbers = #tpu.dot_dimension_numbers<[1], [0], [0], [1], [0, 0, 1, 1], [], []>} : vector<2x64xf32>, vector<64x128xf32>, vector<2x128xf32> -> vector<2x128xf32>
    %c0_58 = arith.constant 0 : index
    %c0_59 = arith.constant 0 : index
    %c0_60 = arith.constant 0 : index
    %39 = vector.load %arg9[%c0_58, %c0_59, %c0_60] : memref<2x1x128xf32, #tpu.memory_space<vmem>>, vector<1x1x128xf32>
    %40 = vector.shape_cast %39 : vector<1x1x128xf32> to vector<1x128xf32>
    %41 = vector.broadcast %40 : vector<1x128xf32> to vector<2x128xf32>
    %42 = arith.addf %38, %41 : vector<2x128xf32>
    %43 = vector.extract_strided_slice %42 {offsets = [0, 0], sizes = [2, 32], strides = [1, 1]} : vector<2x128xf32> to vector<2x32xf32>
    %cst_61 = arith.constant 5.000000e-01 : f32
    %44 = vector.broadcast %cst_61 : f32 to vector<2x32xf32>
    %45 = arith.mulf %44, %43 : vector<2x32xf32>
    %46 = math.tanh %45 : vector<2x32xf32>
    %cst_62 = arith.constant 1.000000e+00 : f32
    %47 = vector.broadcast %cst_62 : f32 to vector<2x32xf32>
    %48 = arith.addf %46, %47 : vector<2x32xf32>
    %cst_63 = arith.constant 5.000000e-01 : f32
    %49 = vector.broadcast %cst_63 : f32 to vector<2x32xf32>
    %50 = arith.mulf %49, %48 : vector<2x32xf32>
    %51 = vector.extract_strided_slice %42 {offsets = [0, 32], sizes = [2, 32], strides = [1, 1]} : vector<2x128xf32> to vector<2x32xf32>
    %cst_64 = arith.constant 5.000000e-01 : f32
    %52 = vector.broadcast %cst_64 : f32 to vector<2x32xf32>
    %53 = arith.mulf %52, %51 : vector<2x32xf32>
    %54 = math.tanh %53 : vector<2x32xf32>
    %cst_65 = arith.constant 1.000000e+00 : f32
    %55 = vector.broadcast %cst_65 : f32 to vector<2x32xf32>
    %56 = arith.addf %54, %55 : vector<2x32xf32>
    %cst_66 = arith.constant 5.000000e-01 : f32
    %57 = vector.broadcast %cst_66 : f32 to vector<2x32xf32>
    %58 = arith.mulf %57, %56 : vector<2x32xf32>
    %59 = vector.extract_strided_slice %42 {offsets = [0, 64], sizes = [2, 32], strides = [1, 1]} : vector<2x128xf32> to vector<2x32xf32>
    %60 = math.tanh %59 : vector<2x32xf32>
    %61 = vector.extract_strided_slice %42 {offsets = [0, 96], sizes = [2, 32], strides = [1, 1]} : vector<2x128xf32> to vector<2x32xf32>
    %cst_67 = arith.constant 5.000000e-01 : f32
    %62 = vector.broadcast %cst_67 : f32 to vector<2x32xf32>
    %63 = arith.mulf %62, %61 : vector<2x32xf32>
    %64 = math.tanh %63 : vector<2x32xf32>
    %cst_68 = arith.constant 1.000000e+00 : f32
    %65 = vector.broadcast %cst_68 : f32 to vector<2x32xf32>
    %66 = arith.addf %64, %65 : vector<2x32xf32>
    %cst_69 = arith.constant 5.000000e-01 : f32
    %67 = vector.broadcast %cst_69 : f32 to vector<2x32xf32>
    %68 = arith.mulf %67, %66 : vector<2x32xf32>
    %69 = arith.mulf %58, %34 : vector<2x32xf32>
    %70 = arith.mulf %50, %60 : vector<2x32xf32>
    %71 = arith.addf %69, %70 : vector<2x32xf32>
    %72 = math.tanh %71 : vector<2x32xf32>
    %73 = arith.mulf %68, %72 : vector<2x32xf32>
    %74 = arith.subf %73, %32 : vector<2x32xf32>
    %75 = vector.broadcast %27 : vector<1x1xf32> to vector<2x32xf32>
    %76 = arith.mulf %75, %74 : vector<2x32xf32>
    %77 = arith.addf %32, %76 : vector<2x32xf32>
    %c0_70 = arith.constant 0 : index
    %c0_71 = arith.constant 0 : index
    %c0_72 = arith.constant 0 : index
    %78 = vector.load %arg15[%c0_70, %c0_71, %c0_72] : memref<2x2x32xf32, #tpu.memory_space<vmem>>, vector<1x2x32xf32>
    %79 = vector.shape_cast %78 : vector<1x2x32xf32> to vector<2x32xf32>
    %80 = vector.shape_cast %77 : vector<2x32xf32> to vector<1x2x32xf32>
    tpu.vector_store %arg15[%c0_70, %c0_71, %c0_72], %80 {strides = array<i32>} : memref<2x2x32xf32, #tpu.memory_space<vmem>>, vector<1x2x32xf32>,
    %81 = arith.subf %71, %34 : vector<2x32xf32>
    %82 = vector.broadcast %27 : vector<1x1xf32> to vector<2x32xf32>
    %83 = arith.mulf %82, %81 : vector<2x32xf32>
    %84 = arith.addf %34, %83 : vector<2x32xf32>
    %c0_73 = arith.constant 0 : index
    %c0_74 = arith.constant 0 : index
    %c0_75 = arith.constant 0 : index
    %85 = vector.load %arg16[%c0_73, %c0_74, %c0_75] : memref<2x2x32xf32, #tpu.memory_space<vmem>>, vector<1x2x32xf32>
    %86 = vector.shape_cast %85 : vector<1x2x32xf32> to vector<2x32xf32>
    %87 = vector.shape_cast %84 : vector<2x32xf32> to vector<1x2x32xf32>
    tpu.vector_store %arg16[%c0_73, %c0_74, %c0_75], %87 {strides = array<i32>} : memref<2x2x32xf32, #tpu.memory_space<vmem>>, vector<1x2x32xf32>,
    %c1 = arith.constant 1 : index
    %c0_76 = arith.constant 0 : index
    %c0_77 = arith.constant 0 : index
    %88 = vector.load %arg15[%c1, %c0_76, %c0_77] : memref<2x2x32xf32, #tpu.memory_space<vmem>>, vector<1x2x32xf32>
    %89 = vector.shape_cast %88 : vector<1x2x32xf32> to vector<2x32xf32>
    %c1_78 = arith.constant 1 : index
    %c0_79 = arith.constant 0 : index
    %c0_80 = arith.constant 0 : index
    %90 = vector.load %arg16[%c1_78, %c0_79, %c0_80] : memref<2x2x32xf32, #tpu.memory_space<vmem>>, vector<1x2x32xf32>
    %91 = vector.shape_cast %90 : vector<1x2x32xf32> to vector<2x32xf32>
    %92 = tpu.concatenate %73, %89 in 1 : vector<2x32xf32>, vector<2x32xf32> -> vector<2x64xf32>
    %c1_81 = arith.constant 1 : index
    %c0_82 = arith.constant 0 : index
    %c0_83 = arith.constant 0 : index
    %93 = vector.load %arg8[%c1_81, %c0_82, %c0_83] : memref<2x64x128xf32, #tpu.memory_space<vmem>>, vector<1x64x128xf32>
    %94 = vector.shape_cast %93 : vector<1x64x128xf32> to vector<64x128xf32>
    %cst_84 = arith.constant dense<0.000000e+00> : vector<2x128xf32>
    %95 = tpu.matmul %92, %94, %cst_84 {dimension_numbers = #tpu.dot_dimension_numbers<[1], [0], [0], [1], [0, 0, 1, 1], [], []>} : vector<2x64xf32>, vector<64x128xf32>, vector<2x128xf32> -> vector<2x128xf32>
    %c1_85 = arith.constant 1 : index
    %c0_86 = arith.constant 0 : index
    %c0_87 = arith.constant 0 : index
    %96 = vector.load %arg9[%c1_85, %c0_86, %c0_87] : memref<2x1x128xf32, #tpu.memory_space<vmem>>, vector<1x1x128xf32>
    %97 = vector.shape_cast %96 : vector<1x1x128xf32> to vector<1x128xf32>
    %98 = vector.broadcast %97 : vector<1x128xf32> to vector<2x128xf32>
    %99 = arith.addf %95, %98 : vector<2x128xf32>
    %100 = vector.extract_strided_slice %99 {offsets = [0, 0], sizes = [2, 32], strides = [1, 1]} : vector<2x128xf32> to vector<2x32xf32>
    %cst_88 = arith.constant 5.000000e-01 : f32
    %101 = vector.broadcast %cst_88 : f32 to vector<2x32xf32>
    %102 = arith.mulf %101, %100 : vector<2x32xf32>
    %103 = math.tanh %102 : vector<2x32xf32>
    %cst_89 = arith.constant 1.000000e+00 : f32
    %104 = vector.broadcast %cst_89 : f32 to vector<2x32xf32>
    %105 = arith.addf %103, %104 : vector<2x32xf32>
    %cst_90 = arith.constant 5.000000e-01 : f32
    %106 = vector.broadcast %cst_90 : f32 to vector<2x32xf32>
    %107 = arith.mulf %106, %105 : vector<2x32xf32>
    %108 = vector.extract_strided_slice %99 {offsets = [0, 32], sizes = [2, 32], strides = [1, 1]} : vector<2x128xf32> to vector<2x32xf32>
    %cst_91 = arith.constant 5.000000e-01 : f32
    %109 = vector.broadcast %cst_91 : f32 to vector<2x32xf32>
    %110 = arith.mulf %109, %108 : vector<2x32xf32>
    %111 = math.tanh %110 : vector<2x32xf32>
    %cst_92 = arith.constant 1.000000e+00 : f32
    %112 = vector.broadcast %cst_92 : f32 to vector<2x32xf32>
    %113 = arith.addf %111, %112 : vector<2x32xf32>
    %cst_93 = arith.constant 5.000000e-01 : f32
    %114 = vector.broadcast %cst_93 : f32 to vector<2x32xf32>
    %115 = arith.mulf %114, %113 : vector<2x32xf32>
    %116 = vector.extract_strided_slice %99 {offsets = [0, 64], sizes = [2, 32], strides = [1, 1]} : vector<2x128xf32> to vector<2x32xf32>
    %117 = math.tanh %116 : vector<2x32xf32>
    %118 = vector.extract_strided_slice %99 {offsets = [0, 96], sizes = [2, 32], strides = [1, 1]} : vector<2x128xf32> to vector<2x32xf32>
    %cst_94 = arith.constant 5.000000e-01 : f32
    %119 = vector.broadcast %cst_94 : f32 to vector<2x32xf32>
    %120 = arith.mulf %119, %118 : vector<2x32xf32>
    %121 = math.tanh %120 : vector<2x32xf32>
    %cst_95 = arith.constant 1.000000e+00 : f32
    %122 = vector.broadcast %cst_95 : f32 to vector<2x32xf32>
    %123 = arith.addf %121, %122 : vector<2x32xf32>
    %cst_96 = arith.constant 5.000000e-01 : f32
    %124 = vector.broadcast %cst_96 : f32 to vector<2x32xf32>
    %125 = arith.mulf %124, %123 : vector<2x32xf32>
    %126 = arith.mulf %115, %91 : vector<2x32xf32>
    %127 = arith.mulf %107, %117 : vector<2x32xf32>
    %128 = arith.addf %126, %127 : vector<2x32xf32>
    %129 = math.tanh %128 : vector<2x32xf32>
    %130 = arith.mulf %125, %129 : vector<2x32xf32>
    %131 = arith.subf %130, %89 : vector<2x32xf32>
    %132 = vector.broadcast %27 : vector<1x1xf32> to vector<2x32xf32>
    %133 = arith.mulf %132, %131 : vector<2x32xf32>
    %134 = arith.addf %89, %133 : vector<2x32xf32>
    %c1_97 = arith.constant 1 : index
    %c0_98 = arith.constant 0 : index
    %c0_99 = arith.constant 0 : index
    %135 = vector.load %arg15[%c1_97, %c0_98, %c0_99] : memref<2x2x32xf32, #tpu.memory_space<vmem>>, vector<1x2x32xf32>
    %136 = vector.shape_cast %135 : vector<1x2x32xf32> to vector<2x32xf32>
    %137 = vector.shape_cast %134 : vector<2x32xf32> to vector<1x2x32xf32>
    tpu.vector_store %arg15[%c1_97, %c0_98, %c0_99], %137 {strides = array<i32>} : memref<2x2x32xf32, #tpu.memory_space<vmem>>, vector<1x2x32xf32>,
    %138 = arith.subf %128, %91 : vector<2x32xf32>
    %139 = vector.broadcast %27 : vector<1x1xf32> to vector<2x32xf32>
    %140 = arith.mulf %139, %138 : vector<2x32xf32>
    %141 = arith.addf %91, %140 : vector<2x32xf32>
    %c1_100 = arith.constant 1 : index
    %c0_101 = arith.constant 0 : index
    %c0_102 = arith.constant 0 : index
    %142 = vector.load %arg16[%c1_100, %c0_101, %c0_102] : memref<2x2x32xf32, #tpu.memory_space<vmem>>, vector<1x2x32xf32>
    %143 = vector.shape_cast %142 : vector<1x2x32xf32> to vector<2x32xf32>
    %144 = vector.shape_cast %141 : vector<2x32xf32> to vector<1x2x32xf32>
    tpu.vector_store %arg16[%c1_100, %c0_101, %c0_102], %144 {strides = array<i32>} : memref<2x2x32xf32, #tpu.memory_space<vmem>>, vector<1x2x32xf32>,
    %c0_103 = arith.constant 0 : index
    %c0_104 = arith.constant 0 : index
    %145 = vector.load %arg5[%c0_103, %c0_104] : memref<32x2xf32, #tpu.memory_space<vmem>>, vector<32x2xf32>
    %cst_105 = arith.constant dense<0.000000e+00> : vector<2x2xf32>
    %146 = tpu.matmul %130, %145, %cst_105 {dimension_numbers = #tpu.dot_dimension_numbers<[1], [0], [0], [1], [0, 0, 1, 1], [], []>} : vector<2x32xf32>, vector<32x2xf32>, vector<2x2xf32> -> vector<2x2xf32>
    %147 = math.tanh %146 : vector<2x2xf32>
    %cst_106 = arith.constant 2.500000e+00 : f32
    %148 = vector.broadcast %cst_106 : f32 to vector<2x2xf32>
    %149 = arith.mulf %148, %147 : vector<2x2xf32>
    %150 = vector.extract_strided_slice %149 {offsets = [0, 0], sizes = [2, 1], strides = [1, 1]} : vector<2x2xf32> to vector<2x1xf32>
    %151 = vector.extract_strided_slice %149 {offsets = [0, 1], sizes = [2, 1], strides = [1, 1]} : vector<2x2xf32> to vector<2x1xf32>
    %152 = arith.maximumf %150, %151 : vector<2x1xf32>
    %153 = arith.subf %150, %152 : vector<2x1xf32>
    %154 = math.exp %153 : vector<2x1xf32>
    %155 = arith.subf %151, %152 : vector<2x1xf32>
    %156 = math.exp %155 : vector<2x1xf32>
    %157 = arith.addf %154, %156 : vector<2x1xf32>
    %158 = math.log %157 : vector<2x1xf32>
    %159 = arith.addf %152, %158 : vector<2x1xf32>
    %160 = arith.cmpf ogt, %151, %150 : vector<2x1xf32>
    %161 = arith.extui %160 : vector<2x1xi1> to vector<2x1xi32>
    %162 = arith.sitofp %161 : vector<2x1xi32> to vector<2x1xf32>
    %163 = arith.subf %152, %159 : vector<2x1xf32>
    %c0_107 = arith.constant 0 : index
    %c0_108 = arith.constant 0 : index
    %164 = vector.load %arg4[%c0_107, %c0_108] : memref<2x32xf32, #tpu.memory_space<vmem>>, vector<1x32xf32>
    %c1_109 = arith.constant 1 : index
    %c0_110 = arith.constant 0 : index
    %165 = vector.load %arg4[%c1_109, %c0_110] : memref<2x32xf32, #tpu.memory_space<vmem>>, vector<1x32xf32>
    %166 = arith.subf %165, %164 : vector<1x32xf32>
    %167 = vector.broadcast %162 : vector<2x1xf32> to vector<2x32xf32>
    %168 = vector.broadcast %166 : vector<1x32xf32> to vector<2x32xf32>
    %169 = arith.mulf %167, %168 : vector<2x32xf32>
    %170 = vector.broadcast %164 : vector<1x32xf32> to vector<2x32xf32>
    %171 = arith.addf %170, %169 : vector<2x32xf32>
    %172 = tpu.concatenate %171, %73 in 1 : vector<2x32xf32>, vector<2x32xf32> -> vector<2x64xf32>
    %c0_111 = arith.constant 0 : index
    %c0_112 = arith.constant 0 : index
    %c0_113 = arith.constant 0 : index
    %173 = vector.load %arg8[%c0_111, %c0_112, %c0_113] : memref<2x64x128xf32, #tpu.memory_space<vmem>>, vector<1x64x128xf32>
    %174 = vector.shape_cast %173 : vector<1x64x128xf32> to vector<64x128xf32>
    %cst_114 = arith.constant dense<0.000000e+00> : vector<2x128xf32>
    %175 = tpu.matmul %172, %174, %cst_114 {dimension_numbers = #tpu.dot_dimension_numbers<[1], [0], [0], [1], [0, 0, 1, 1], [], []>} : vector<2x64xf32>, vector<64x128xf32>, vector<2x128xf32> -> vector<2x128xf32>
    %c0_115 = arith.constant 0 : index
    %c0_116 = arith.constant 0 : index
    %c0_117 = arith.constant 0 : index
    %176 = vector.load %arg9[%c0_115, %c0_116, %c0_117] : memref<2x1x128xf32, #tpu.memory_space<vmem>>, vector<1x1x128xf32>
    %177 = vector.shape_cast %176 : vector<1x1x128xf32> to vector<1x128xf32>
    %178 = vector.broadcast %177 : vector<1x128xf32> to vector<2x128xf32>
    %179 = arith.addf %175, %178 : vector<2x128xf32>
    %180 = vector.extract_strided_slice %179 {offsets = [0, 0], sizes = [2, 32], strides = [1, 1]} : vector<2x128xf32> to vector<2x32xf32>
    %cst_118 = arith.constant 5.000000e-01 : f32
    %181 = vector.broadcast %cst_118 : f32 to vector<2x32xf32>
    %182 = arith.mulf %181, %180 : vector<2x32xf32>
    %183 = math.tanh %182 : vector<2x32xf32>
    %cst_119 = arith.constant 1.000000e+00 : f32
    %184 = vector.broadcast %cst_119 : f32 to vector<2x32xf32>
    %185 = arith.addf %183, %184 : vector<2x32xf32>
    %cst_120 = arith.constant 5.000000e-01 : f32
    %186 = vector.broadcast %cst_120 : f32 to vector<2x32xf32>
    %187 = arith.mulf %186, %185 : vector<2x32xf32>
    %188 = vector.extract_strided_slice %179 {offsets = [0, 32], sizes = [2, 32], strides = [1, 1]} : vector<2x128xf32> to vector<2x32xf32>
    %cst_121 = arith.constant 5.000000e-01 : f32
    %189 = vector.broadcast %cst_121 : f32 to vector<2x32xf32>
    %190 = arith.mulf %189, %188 : vector<2x32xf32>
    %191 = math.tanh %190 : vector<2x32xf32>
    %cst_122 = arith.constant 1.000000e+00 : f32
    %192 = vector.broadcast %cst_122 : f32 to vector<2x32xf32>
    %193 = arith.addf %191, %192 : vector<2x32xf32>
    %cst_123 = arith.constant 5.000000e-01 : f32
    %194 = vector.broadcast %cst_123 : f32 to vector<2x32xf32>
    %195 = arith.mulf %194, %193 : vector<2x32xf32>
    %196 = vector.extract_strided_slice %179 {offsets = [0, 64], sizes = [2, 32], strides = [1, 1]} : vector<2x128xf32> to vector<2x32xf32>
    %197 = math.tanh %196 : vector<2x32xf32>
    %198 = vector.extract_strided_slice %179 {offsets = [0, 96], sizes = [2, 32], strides = [1, 1]} : vector<2x128xf32> to vector<2x32xf32>
    %cst_124 = arith.constant 5.000000e-01 : f32
    %199 = vector.broadcast %cst_124 : f32 to vector<2x32xf32>
    %200 = arith.mulf %199, %198 : vector<2x32xf32>
    %201 = math.tanh %200 : vector<2x32xf32>
    %cst_125 = arith.constant 1.000000e+00 : f32
    %202 = vector.broadcast %cst_125 : f32 to vector<2x32xf32>
    %203 = arith.addf %201, %202 : vector<2x32xf32>
    %cst_126 = arith.constant 5.000000e-01 : f32
    %204 = vector.broadcast %cst_126 : f32 to vector<2x32xf32>
    %205 = arith.mulf %204, %203 : vector<2x32xf32>
    %206 = arith.mulf %195, %71 : vector<2x32xf32>
    %207 = arith.mulf %187, %197 : vector<2x32xf32>
    %208 = arith.addf %206, %207 : vector<2x32xf32>
    %209 = math.tanh %208 : vector<2x32xf32>
    %210 = arith.mulf %205, %209 : vector<2x32xf32>
    %211 = tpu.concatenate %210, %130 in 1 : vector<2x32xf32>, vector<2x32xf32> -> vector<2x64xf32>
    %c1_127 = arith.constant 1 : index
    %c0_128 = arith.constant 0 : index
    %c0_129 = arith.constant 0 : index
    %212 = vector.load %arg8[%c1_127, %c0_128, %c0_129] : memref<2x64x128xf32, #tpu.memory_space<vmem>>, vector<1x64x128xf32>
    %213 = vector.shape_cast %212 : vector<1x64x128xf32> to vector<64x128xf32>
    %cst_130 = arith.constant dense<0.000000e+00> : vector<2x128xf32>
    %214 = tpu.matmul %211, %213, %cst_130 {dimension_numbers = #tpu.dot_dimension_numbers<[1], [0], [0], [1], [0, 0, 1, 1], [], []>} : vector<2x64xf32>, vector<64x128xf32>, vector<2x128xf32> -> vector<2x128xf32>
    %c1_131 = arith.constant 1 : index
    %c0_132 = arith.constant 0 : index
    %c0_133 = arith.constant 0 : index
    %215 = vector.load %arg9[%c1_131, %c0_132, %c0_133] : memref<2x1x128xf32, #tpu.memory_space<vmem>>, vector<1x1x128xf32>
    %216 = vector.shape_cast %215 : vector<1x1x128xf32> to vector<1x128xf32>
    %217 = vector.broadcast %216 : vector<1x128xf32> to vector<2x128xf32>
    %218 = arith.addf %214, %217 : vector<2x128xf32>
    %219 = vector.extract_strided_slice %218 {offsets = [0, 0], sizes = [2, 32], strides = [1, 1]} : vector<2x128xf32> to vector<2x32xf32>
    %cst_134 = arith.constant 5.000000e-01 : f32
    %220 = vector.broadcast %cst_134 : f32 to vector<2x32xf32>
    %221 = arith.mulf %220, %219 : vector<2x32xf32>
    %222 = math.tanh %221 : vector<2x32xf32>
    %cst_135 = arith.constant 1.000000e+00 : f32
    %223 = vector.broadcast %cst_135 : f32 to vector<2x32xf32>
    %224 = arith.addf %222, %223 : vector<2x32xf32>
    %cst_136 = arith.constant 5.000000e-01 : f32
    %225 = vector.broadcast %cst_136 : f32 to vector<2x32xf32>
    %226 = arith.mulf %225, %224 : vector<2x32xf32>
    %227 = vector.extract_strided_slice %218 {offsets = [0, 32], sizes = [2, 32], strides = [1, 1]} : vector<2x128xf32> to vector<2x32xf32>
    %cst_137 = arith.constant 5.000000e-01 : f32
    %228 = vector.broadcast %cst_137 : f32 to vector<2x32xf32>
    %229 = arith.mulf %228, %227 : vector<2x32xf32>
    %230 = math.tanh %229 : vector<2x32xf32>
    %cst_138 = arith.constant 1.000000e+00 : f32
    %231 = vector.broadcast %cst_138 : f32 to vector<2x32xf32>
    %232 = arith.addf %230, %231 : vector<2x32xf32>
    %cst_139 = arith.constant 5.000000e-01 : f32
    %233 = vector.broadcast %cst_139 : f32 to vector<2x32xf32>
    %234 = arith.mulf %233, %232 : vector<2x32xf32>
    %235 = vector.extract_strided_slice %218 {offsets = [0, 64], sizes = [2, 32], strides = [1, 1]} : vector<2x128xf32> to vector<2x32xf32>
    %236 = math.tanh %235 : vector<2x32xf32>
    %237 = vector.extract_strided_slice %218 {offsets = [0, 96], sizes = [2, 32], strides = [1, 1]} : vector<2x128xf32> to vector<2x32xf32>
    %cst_140 = arith.constant 5.000000e-01 : f32
    %238 = vector.broadcast %cst_140 : f32 to vector<2x32xf32>
    %239 = arith.mulf %238, %237 : vector<2x32xf32>
    %240 = math.tanh %239 : vector<2x32xf32>
    %cst_141 = arith.constant 1.000000e+00 : f32
    %241 = vector.broadcast %cst_141 : f32 to vector<2x32xf32>
    %242 = arith.addf %240, %241 : vector<2x32xf32>
    %cst_142 = arith.constant 5.000000e-01 : f32
    %243 = vector.broadcast %cst_142 : f32 to vector<2x32xf32>
    %244 = arith.mulf %243, %242 : vector<2x32xf32>
    %245 = arith.mulf %234, %128 : vector<2x32xf32>
    %246 = arith.mulf %226, %236 : vector<2x32xf32>
    %247 = arith.addf %245, %246 : vector<2x32xf32>
    %248 = math.tanh %247 : vector<2x32xf32>
    %249 = arith.mulf %244, %248 : vector<2x32xf32>
    %c0_143 = arith.constant 0 : index
    %c0_144 = arith.constant 0 : index
    %250 = vector.load %arg6[%c0_143, %c0_144] : memref<32x32xf32, #tpu.memory_space<vmem>>, vector<32x32xf32>
    %cst_145 = arith.constant dense<0.000000e+00> : vector<2x32xf32>
    %251 = tpu.matmul %249, %250, %cst_145 {dimension_numbers = #tpu.dot_dimension_numbers<[1], [0], [0], [1], [0, 0, 1, 1], [], []>} : vector<2x32xf32>, vector<32x32xf32>, vector<2x32xf32> -> vector<2x32xf32>
    %c0_146 = arith.constant 0 : index
    %c0_147 = arith.constant 0 : index
    %c0_148 = arith.constant 0 : index
    %252 = vector.load %arg14[%c0_146, %c0_147, %c0_148] : memref<2x12x32xf32, #tpu.memory_space<vmem>>, vector<2x12x32xf32>
    %253 = vector.shape_cast %251 : vector<2x32xf32> to vector<2x1x32xf32>
    %254 = vector.broadcast %253 : vector<2x1x32xf32> to vector<2x12x32xf32>
    %255 = arith.addf %252, %254 : vector<2x12x32xf32>
    %256 = math.tanh %255 : vector<2x12x32xf32>
    %c0_149 = arith.constant 0 : index
    %c0_150 = arith.constant 0 : index
    %c0_151 = arith.constant 0 : index
    %257 = vector.load %arg7[%c0_149, %c0_150, %c0_151] : memref<1x1x32xf32, #tpu.memory_space<vmem>>, vector<1x1x32xf32>
    %258 = vector.broadcast %257 : vector<1x1x32xf32> to vector<2x12x32xf32>
    %259 = arith.mulf %256, %258 : vector<2x12x32xf32>
    %cst_152 = arith.constant dense<0.000000e+00> : vector<2x12xf32>
    %260 = vector.multi_reduction <add>, %259, %cst_152 [2] : vector<2x12x32xf32> to vector<2x12xf32>
    %261 = math.tanh %260 : vector<2x12xf32>
    %cst_153 = arith.constant 2.500000e+00 : f32
    %262 = vector.broadcast %cst_153 : f32 to vector<2x12xf32>
    %263 = arith.mulf %262, %261 : vector<2x12xf32>
    %c0_154 = arith.constant 0 : index
    %c0_155 = arith.constant 0 : index
    %264 = vector.load %arg17[%c0_154, %c0_155] : memref<2x12xf32, #tpu.memory_space<vmem>>, vector<2x12xf32>
    %cst_156 = arith.constant 8.000000e+00 : f32
    %265 = vector.broadcast %cst_156 : f32 to vector<2x12xf32>
    %266 = arith.cmpf olt, %24, %265 : vector<2x12xf32>
    %cst_157 = arith.constant 0.000000e+00 : f32
    %267 = vector.broadcast %cst_157 : f32 to vector<2x12xf32>
    %268 = arith.cmpf ogt, %264, %267 : vector<2x12xf32>
    %cst_158 = arith.constant -1.000000e+02 : f32
    %cst_159 = arith.constant 0.000000e+00 : f32
    %269 = vector.broadcast %cst_158 : f32 to vector<2x12xf32>
    %270 = vector.broadcast %cst_159 : f32 to vector<2x12xf32>
    %271 = arith.select %268, %269, %270 : vector<2x12xi1>, vector<2x12xf32>
    %cst_160 = arith.constant -1.000000e+30 : f32
    %272 = vector.broadcast %cst_160 : f32 to vector<2x12xf32>
    %273 = arith.select %266, %271, %272 : vector<2x12xi1>, vector<2x12xf32>
    %274 = arith.addf %263, %273 : vector<2x12xf32>
    %cst_161 = arith.constant dense<0xFF800000> : vector<2xf32>
    %275 = vector.multi_reduction <maximumf>, %274, %cst_161 [1] : vector<2x12xf32> to vector<2xf32>
    %276 = vector.shape_cast %275 : vector<2xf32> to vector<2x1xf32>
    %277 = vector.broadcast %276 : vector<2x1xf32> to vector<2x12xf32>
    %278 = arith.subf %274, %277 : vector<2x12xf32>
    %279 = math.exp %278 : vector<2x12xf32>
    %cst_162 = arith.constant dense<0.000000e+00> : vector<2xf32>
    %280 = vector.multi_reduction <add>, %279, %cst_162 [1] : vector<2x12xf32> to vector<2xf32>
    %281 = vector.shape_cast %280 : vector<2xf32> to vector<2x1xf32>
    %282 = math.log %281 : vector<2x1xf32>
    %283 = arith.addf %276, %282 : vector<2x1xf32>
    %284 = vector.broadcast %276 : vector<2x1xf32> to vector<2x12xf32>
    %285 = arith.cmpf oeq, %274, %284 : vector<2x12xf32>
    %cst_163 = arith.constant 1.000000e+09 : f32
    %286 = vector.broadcast %cst_163 : f32 to vector<2x12xf32>
    %287 = arith.select %285, %24, %286 : vector<2x12xi1>, vector<2x12xf32>
    %cst_164 = arith.constant dense<0x7F800000> : vector<2xf32>
    %288 = vector.multi_reduction <minimumf>, %287, %cst_164 [1] : vector<2x12xf32> to vector<2xf32>
    %289 = vector.shape_cast %288 : vector<2xf32> to vector<2x1xf32>
    %290 = vector.broadcast %289 : vector<2x1xf32> to vector<2x12xf32>
    %291 = arith.cmpf oeq, %24, %290 : vector<2x12xf32>
    %cst_165 = arith.constant -3.000000e+38 : f32
    %292 = vector.broadcast %cst_165 : f32 to vector<2x12xf32>
    %293 = arith.select %291, %292, %274 : vector<2x12xi1>, vector<2x12xf32>
    %cst_166 = arith.constant dense<0xFF800000> : vector<2xf32>
    %294 = vector.multi_reduction <maximumf>, %293, %cst_166 [1] : vector<2x12xf32> to vector<2xf32>
    %295 = vector.shape_cast %294 : vector<2xf32> to vector<2x1xf32>
    %296 = vector.broadcast %295 : vector<2x1xf32> to vector<2x12xf32>
    %297 = arith.cmpf oeq, %293, %296 : vector<2x12xf32>
    %cst_167 = arith.constant 1.000000e+09 : f32
    %298 = vector.broadcast %cst_167 : f32 to vector<2x12xf32>
    %299 = arith.select %297, %24, %298 : vector<2x12xi1>, vector<2x12xf32>
    %cst_168 = arith.constant dense<0x7F800000> : vector<2xf32>
    %300 = vector.multi_reduction <minimumf>, %299, %cst_168 [1] : vector<2x12xf32> to vector<2xf32>
    %301 = vector.shape_cast %300 : vector<2xf32> to vector<2x1xf32>
    %302 = vector.broadcast %289 : vector<2x1xf32> to vector<2x12xf32>
    %303 = arith.cmpf oeq, %24, %302 : vector<2x12xf32>
    %304 = arith.extui %303 : vector<2x12xi1> to vector<2x12xi32>
    %305 = arith.sitofp %304 : vector<2x12xi32> to vector<2x12xf32>
    %306 = vector.broadcast %301 : vector<2x1xf32> to vector<2x12xf32>
    %307 = arith.cmpf oeq, %24, %306 : vector<2x12xf32>
    %308 = arith.extui %307 : vector<2x12xi1> to vector<2x12xi32>
    %309 = arith.sitofp %308 : vector<2x12xi32> to vector<2x12xf32>
    %310 = arith.addf %305, %309 : vector<2x12xf32>
    %311 = vector.broadcast %27 : vector<1x1xf32> to vector<2x12xf32>
    %312 = arith.mulf %311, %310 : vector<2x12xf32>
    %313 = arith.addf %264, %312 : vector<2x12xf32>
    %c0_169 = arith.constant 0 : index
    %c0_170 = arith.constant 0 : index
    %314 = vector.load %arg17[%c0_169, %c0_170] : memref<2x12xf32, #tpu.memory_space<vmem>>, vector<2x12xf32>
    tpu.vector_store %arg17[%c0_169, %c0_170], %313 {strides = array<i32>} : memref<2x12xf32, #tpu.memory_space<vmem>>, vector<2x12xf32>,
    %315 = vector.extract_strided_slice %29 {offsets = [0, 0], sizes = [2, 1], strides = [1, 1]} : vector<2x2xf32> to vector<2x1xf32>
    %cst_171 = arith.constant 2.000000e+00 : f32
    %316 = vector.broadcast %cst_171 : f32 to vector<2x1xf32>
    %317 = arith.mulf %316, %276 : vector<2x1xf32>
    %cst_172 = arith.constant 5.000000e-01 : f32
    %318 = vector.broadcast %cst_172 : f32 to vector<2x1xf32>
    %319 = arith.mulf %318, %317 : vector<2x1xf32>
    %320 = math.tanh %319 : vector<2x1xf32>
    %cst_173 = arith.constant 1.000000e+00 : f32
    %321 = vector.broadcast %cst_173 : f32 to vector<2x1xf32>
    %322 = arith.addf %320, %321 : vector<2x1xf32>
    %cst_174 = arith.constant 5.000000e-01 : f32
    %323 = vector.broadcast %cst_174 : f32 to vector<2x1xf32>
    %324 = arith.mulf %323, %322 : vector<2x1xf32>
    %325 = math.absf %276 : vector<2x1xf32>
    %cst_175 = arith.constant -2.000000e+00 : f32
    %326 = vector.broadcast %cst_175 : f32 to vector<2x1xf32>
    %327 = arith.mulf %326, %325 : vector<2x1xf32>
    %328 = math.exp %327 : vector<2x1xf32>
    %cst_176 = arith.constant 1.000000e+00 : f32
    %329 = vector.broadcast %cst_176 : f32 to vector<2x1xf32>
    %330 = arith.addf %329, %328 : vector<2x1xf32>
    %331 = math.log %330 : vector<2x1xf32>
    %332 = arith.addf %325, %331 : vector<2x1xf32>
    %333 = arith.subf %276, %332 : vector<2x1xf32>
    %cst_177 = arith.constant 0.000000e+00 : f32
    %334 = vector.broadcast %cst_177 : f32 to vector<2x1xf32>
    %335 = arith.subf %334, %276 : vector<2x1xf32>
    %336 = arith.subf %335, %332 : vector<2x1xf32>
    %337 = arith.cmpf olt, %315, %324 : vector<2x1xf32>
    %338 = arith.extui %337 : vector<2x1xi1> to vector<2x1xi32>
    %339 = arith.sitofp %338 : vector<2x1xi32> to vector<2x1xf32>
    %340 = arith.mulf %339, %333 : vector<2x1xf32>
    %cst_178 = arith.constant 1.000000e+00 : f32
    %341 = vector.broadcast %cst_178 : f32 to vector<2x1xf32>
    %342 = arith.subf %341, %339 : vector<2x1xf32>
    %343 = arith.mulf %342, %336 : vector<2x1xf32>
    %344 = arith.addf %340, %343 : vector<2x1xf32>
    %cst_179 = arith.constant 1.000000e+00 : f32
    %345 = vector.broadcast %cst_179 : f32 to vector<2x1xf32>
    %346 = arith.subf %345, %324 : vector<2x1xf32>
    %347 = arith.mulf %346, %336 : vector<2x1xf32>
    %348 = arith.mulf %324, %333 : vector<2x1xf32>
    %349 = arith.addf %347, %348 : vector<2x1xf32>
    %cst_180 = arith.constant 0.000000e+00 : f32
    %350 = vector.broadcast %cst_180 : f32 to vector<2x1xf32>
    %351 = arith.subf %350, %349 : vector<2x1xf32>
    %352 = vector.extract_strided_slice %29 {offsets = [0, 1], sizes = [2, 1], strides = [1, 1]} : vector<2x2xf32> to vector<2x1xf32>
    %cst_181 = arith.constant 2.000000e+00 : f32
    %353 = vector.broadcast %cst_181 : f32 to vector<2x1xf32>
    %354 = arith.mulf %353, %295 : vector<2x1xf32>
    %cst_182 = arith.constant 5.000000e-01 : f32
    %355 = vector.broadcast %cst_182 : f32 to vector<2x1xf32>
    %356 = arith.mulf %355, %354 : vector<2x1xf32>
    %357 = math.tanh %356 : vector<2x1xf32>
    %cst_183 = arith.constant 1.000000e+00 : f32
    %358 = vector.broadcast %cst_183 : f32 to vector<2x1xf32>
    %359 = arith.addf %357, %358 : vector<2x1xf32>
    %cst_184 = arith.constant 5.000000e-01 : f32
    %360 = vector.broadcast %cst_184 : f32 to vector<2x1xf32>
    %361 = arith.mulf %360, %359 : vector<2x1xf32>
    %362 = math.absf %295 : vector<2x1xf32>
    %cst_185 = arith.constant -2.000000e+00 : f32
    %363 = vector.broadcast %cst_185 : f32 to vector<2x1xf32>
    %364 = arith.mulf %363, %362 : vector<2x1xf32>
    %365 = math.exp %364 : vector<2x1xf32>
    %cst_186 = arith.constant 1.000000e+00 : f32
    %366 = vector.broadcast %cst_186 : f32 to vector<2x1xf32>
    %367 = arith.addf %366, %365 : vector<2x1xf32>
    %368 = math.log %367 : vector<2x1xf32>
    %369 = arith.addf %362, %368 : vector<2x1xf32>
    %370 = arith.subf %295, %369 : vector<2x1xf32>
    %cst_187 = arith.constant 0.000000e+00 : f32
    %371 = vector.broadcast %cst_187 : f32 to vector<2x1xf32>
    %372 = arith.subf %371, %295 : vector<2x1xf32>
    %373 = arith.subf %372, %369 : vector<2x1xf32>
    %374 = arith.cmpf olt, %352, %361 : vector<2x1xf32>
    %375 = arith.extui %374 : vector<2x1xi1> to vector<2x1xi32>
    %376 = arith.sitofp %375 : vector<2x1xi32> to vector<2x1xf32>
    %377 = arith.mulf %376, %370 : vector<2x1xf32>
    %cst_188 = arith.constant 1.000000e+00 : f32
    %378 = vector.broadcast %cst_188 : f32 to vector<2x1xf32>
    %379 = arith.subf %378, %376 : vector<2x1xf32>
    %380 = arith.mulf %379, %373 : vector<2x1xf32>
    %381 = arith.addf %377, %380 : vector<2x1xf32>
    %cst_189 = arith.constant 1.000000e+00 : f32
    %382 = vector.broadcast %cst_189 : f32 to vector<2x1xf32>
    %383 = arith.subf %382, %361 : vector<2x1xf32>
    %384 = arith.mulf %383, %373 : vector<2x1xf32>
    %385 = arith.mulf %361, %370 : vector<2x1xf32>
    %386 = arith.addf %384, %385 : vector<2x1xf32>
    %cst_190 = arith.constant 0.000000e+00 : f32
    %387 = vector.broadcast %cst_190 : f32 to vector<2x1xf32>
    %388 = arith.subf %387, %386 : vector<2x1xf32>
    %389 = vector.extract_strided_slice %163 {offsets = [0, 0], sizes = [1, 1], strides = [1, 1]} : vector<2x1xf32> to vector<1x1xf32>
    %390 = vector.extract_strided_slice %163 {offsets = [1, 0], sizes = [1, 1], strides = [1, 1]} : vector<2x1xf32> to vector<1x1xf32>
    %391 = arith.addf %389, %390 : vector<1x1xf32>
    %392 = arith.addf %276, %295 : vector<2x1xf32>
    %cst_191 = arith.constant 2.000000e+00 : f32
    %393 = vector.broadcast %cst_191 : f32 to vector<2x1xf32>
    %394 = arith.mulf %393, %283 : vector<2x1xf32>
    %395 = arith.subf %392, %394 : vector<2x1xf32>
    %396 = vector.extract_strided_slice %395 {offsets = [0, 0], sizes = [1, 1], strides = [1, 1]} : vector<2x1xf32> to vector<1x1xf32>
    %397 = vector.extract_strided_slice %395 {offsets = [1, 0], sizes = [1, 1], strides = [1, 1]} : vector<2x1xf32> to vector<1x1xf32>
    %398 = arith.addf %396, %397 : vector<1x1xf32>
    %399 = arith.addf %391, %398 : vector<1x1xf32>
    %400 = arith.addf %344, %381 : vector<2x1xf32>
    %401 = vector.extract_strided_slice %400 {offsets = [0, 0], sizes = [1, 1], strides = [1, 1]} : vector<2x1xf32> to vector<1x1xf32>
    %402 = vector.extract_strided_slice %400 {offsets = [1, 0], sizes = [1, 1], strides = [1, 1]} : vector<2x1xf32> to vector<1x1xf32>
    %403 = arith.addf %401, %402 : vector<1x1xf32>
    %404 = arith.addf %399, %403 : vector<1x1xf32>
    %405 = arith.addf %351, %388 : vector<2x1xf32>
    %406 = vector.extract_strided_slice %405 {offsets = [0, 0], sizes = [1, 1], strides = [1, 1]} : vector<2x1xf32> to vector<1x1xf32>
    %407 = vector.extract_strided_slice %405 {offsets = [1, 0], sizes = [1, 1], strides = [1, 1]} : vector<2x1xf32> to vector<1x1xf32>
    %408 = arith.addf %406, %407 : vector<1x1xf32>
    %c0_192 = arith.constant 0 : index
    %c0_193 = arith.constant 0 : index
    %409 = vector.load %arg12[%c0_192, %c0_193] : memref<1x2xf32, #tpu.memory_space<vmem>>, vector<1x2xf32>
    %410 = tpu.concatenate %404, %408 in 1 : vector<1x1xf32>, vector<1x1xf32> -> vector<1x2xf32>
    %411 = vector.broadcast %27 : vector<1x1xf32> to vector<1x2xf32>
    %412 = arith.mulf %411, %410 : vector<1x2xf32>
    %413 = arith.addf %409, %412 : vector<1x2xf32>
    %c0_194 = arith.constant 0 : index
    %c0_195 = arith.constant 0 : index
    %414 = vector.load %arg12[%c0_194, %c0_195] : memref<1x2xf32, #tpu.memory_space<vmem>>, vector<1x2xf32>
    tpu.vector_store %arg12[%c0_194, %c0_195], %413 {strides = array<i32>} : memref<1x2xf32, #tpu.memory_space<vmem>>, vector<1x2xf32>,
    %cst_196 = arith.constant 0.000000e+00 : f32
    %415 = vector.broadcast %cst_196 : f32 to vector<2x1xf32>
    %416 = vector.broadcast %27 : vector<1x1xf32> to vector<2x1xf32>
    %417 = arith.addf %416, %415 : vector<2x1xf32>
    %cst_197 = arith.constant 0.000000e+00 : f32
    %418 = vector.broadcast %cst_197 : f32 to vector<2x2xf32>
    %419 = tpu.concatenate %162, %289, %301, %339, %376, %417, %418 in 1 : vector<2x1xf32>, vector<2x1xf32>, vector<2x1xf32>, vector<2x1xf32>, vector<2x1xf32>, vector<2x1xf32>, vector<2x2xf32> -> vector<2x8xf32>
    %c0_198 = arith.constant 0 : index
    %c0_199 = arith.constant 0 : index
    %c0_200 = arith.constant 0 : index
    %420 = vector.load %arg11[%c0_198, %c0_199, %c0_200] : memref<4x2x8xf32, #tpu.memory_space<vmem>>, vector<1x2x8xf32>
    %421 = vector.shape_cast %420 : vector<1x2x8xf32> to vector<2x8xf32>
    %422 = vector.shape_cast %419 : vector<2x8xf32> to vector<1x2x8xf32>
    tpu.vector_store %arg11[%c0_198, %c0_199, %c0_200], %422 {strides = array<i32>} : memref<4x2x8xf32, #tpu.memory_space<vmem>>, vector<1x2x8xf32>,
    %c0_201 = arith.constant 0 : index
    %c0_202 = arith.constant 0 : index
    %c0_203 = arith.constant 0 : index
    %423 = vector.load %arg13[%c0_201, %c0_202, %c0_203] : memref<2x12x32xf32, #tpu.memory_space<vmem>>, vector<2x12x32xf32>
    %424 = vector.shape_cast %310 : vector<2x12xf32> to vector<2x12x1xf32>
    %425 = vector.broadcast %424 : vector<2x12x1xf32> to vector<2x12x32xf32>
    %426 = arith.mulf %425, %423 : vector<2x12x32xf32>
    %cst_204 = arith.constant dense<0.000000e+00> : vector<2x32xf32>
    %427 = vector.multi_reduction <add>, %426, %cst_204 [1] : vector<2x12x32xf32> to vector<2x32xf32>
    %cst_205 = arith.constant dense<0.000000e+00> : vector<2xf32>
    %428 = vector.multi_reduction <add>, %310, %cst_205 [1] : vector<2x12xf32> to vector<2xf32>
    %429 = vector.shape_cast %428 : vector<2xf32> to vector<2x1xf32>
    %cst_206 = arith.constant 1.000000e+00 : f32
    %430 = vector.broadcast %cst_206 : f32 to vector<2x1xf32>
    %431 = arith.addf %430, %429 : vector<2x1xf32>
    %c0_207 = arith.constant 0 : index
    %c0_208 = arith.constant 0 : index
    %432 = vector.load %arg18[%c0_207, %c0_208] : memref<2x32xf32, #tpu.memory_space<vmem>>, vector<2x32xf32>
    %433 = vector.broadcast %431 : vector<2x1xf32> to vector<2x32xf32>
    %434 = arith.divf %427, %433 : vector<2x32xf32>
    %435 = arith.subf %434, %432 : vector<2x32xf32>
    %436 = vector.broadcast %27 : vector<1x1xf32> to vector<2x32xf32>
    %437 = arith.mulf %436, %435 : vector<2x32xf32>
    %438 = arith.addf %432, %437 : vector<2x32xf32>
    %c0_209 = arith.constant 0 : index
    %c0_210 = arith.constant 0 : index
    %439 = vector.load %arg18[%c0_209, %c0_210] : memref<2x32xf32, #tpu.memory_space<vmem>>, vector<2x32xf32>
    tpu.vector_store %arg18[%c0_209, %c0_210], %438 {strides = array<i32>} : memref<2x32xf32, #tpu.memory_space<vmem>>, vector<2x32xf32>,
    %440 = vector.shape_cast %249 : vector<2x32xf32> to vector<2x1x32xf32>
    %c0_211 = arith.constant 0 : index
    %c8 = arith.constant 8 : index
    %c0_212 = arith.constant 0 : index
    %441 = vector.load %arg13[%c0_211, %c8, %c0_212] : memref<2x12x32xf32, #tpu.memory_space<vmem>>, vector<2x1x32xf32>
    tpu.vector_store %arg13[%c0_211, %c8, %c0_212], %440 {strides = array<i32>} : memref<2x12x32xf32, #tpu.memory_space<vmem>>, vector<2x1x32xf32>,
    %442 = vector.shape_cast %249 : vector<2x32xf32> to vector<2x1x32xf32>
    %c0_213 = arith.constant 0 : index
    %c8_214 = arith.constant 8 : index
    %c0_215 = arith.constant 0 : index
    %443 = vector.load %arg14[%c0_213, %c8_214, %c0_215] : memref<2x12x32xf32, #tpu.memory_space<vmem>>, vector<2x1x32xf32>
    tpu.vector_store %arg14[%c0_213, %c8_214, %c0_215], %442 {strides = array<i32>} : memref<2x12x32xf32, #tpu.memory_space<vmem>>, vector<2x1x32xf32>,
    %cst_216 = arith.constant 8.000000e+00 : f32
    %444 = vector.broadcast %cst_216 : f32 to vector<2x12xf32>
    %445 = arith.cmpf olt, %24, %444 : vector<2x12xf32>
    %cst_217 = arith.constant 1.000000e+00 : f32
    %446 = vector.broadcast %cst_217 : f32 to vector<2x12xf32>
    %447 = arith.select %445, %313, %446 : vector<2x12xi1>, vector<2x12xf32>
    %cst_218 = arith.constant dense<0x7F800000> : vector<2xf32>
    %448 = vector.multi_reduction <minimumf>, %447, %cst_218 [1] : vector<2x12xf32> to vector<2xf32>
    %449 = vector.shape_cast %448 : vector<2xf32> to vector<2x1xf32>
    %450 = vector.extract_strided_slice %449 {offsets = [0, 0], sizes = [1, 1], strides = [1, 1]} : vector<2x1xf32> to vector<1x1xf32>
    %451 = vector.extract_strided_slice %449 {offsets = [1, 0], sizes = [1, 1], strides = [1, 1]} : vector<2x1xf32> to vector<1x1xf32>
    %452 = arith.minimumf %450, %451 : vector<1x1xf32>
    %cst_219 = arith.constant 0.000000e+00 : f32
    %453 = vector.broadcast %cst_219 : f32 to vector<1x1xf32>
    %454 = arith.cmpf ogt, %452, %453 : vector<1x1xf32>
    %455 = arith.extui %454 : vector<1x1xi1> to vector<1x1xi32>
    %456 = arith.sitofp %455 : vector<1x1xi32> to vector<1x1xf32>
    %c0_220 = arith.constant 0 : index
    %c0_221 = arith.constant 0 : index
    %457 = vector.load %arg19[%c0_220, %c0_221] : memref<1x1xf32, #tpu.memory_space<vmem>>, vector<1x1xf32>
    %458 = arith.maximumf %457, %456 : vector<1x1xf32>
    %c0_222 = arith.constant 0 : index
    %c0_223 = arith.constant 0 : index
    %459 = vector.load %arg19[%c0_222, %c0_223] : memref<1x1xf32, #tpu.memory_space<vmem>>, vector<1x1xf32>
    tpu.vector_store %arg19[%c0_222, %c0_223], %458 {strides = array<i32>} : memref<1x1xf32, #tpu.memory_space<vmem>>, vector<1x1xf32>,
    %c0_224 = arith.constant 0 : index
    %c0_225 = arith.constant 0 : index
    %460 = vector.load %arg19[%c0_224, %c0_225] : memref<1x1xf32, #tpu.memory_space<vmem>>, vector<1x1xf32>
    %cst_226 = arith.constant 1.000000e+00 : f32
    %461 = vector.broadcast %cst_226 : f32 to vector<1x1xf32>
    %462 = arith.subf %461, %460 : vector<1x1xf32>
    %c1_227 = arith.constant 1 : index
    %c0_228 = arith.constant 0 : index
    %c0_229 = arith.constant 0 : index
    %463 = vector.load %arg10[%c1_227, %c0_228, %c0_229] : memref<4x2x2xf32, #tpu.memory_space<vmem>>, vector<1x2x2xf32>
    %464 = vector.shape_cast %463 : vector<1x2x2xf32> to vector<2x2xf32>
    %c0_230 = arith.constant 0 : index
    %c0_231 = arith.constant 0 : index
    %465 = vector.load %arg18[%c0_230, %c0_231] : memref<2x32xf32, #tpu.memory_space<vmem>>, vector<2x32xf32>
    %c0_232 = arith.constant 0 : index
    %c0_233 = arith.constant 0 : index
    %c0_234 = arith.constant 0 : index
    %466 = vector.load %arg15[%c0_232, %c0_233, %c0_234] : memref<2x2x32xf32, #tpu.memory_space<vmem>>, vector<1x2x32xf32>
    %467 = vector.shape_cast %466 : vector<1x2x32xf32> to vector<2x32xf32>
    %c0_235 = arith.constant 0 : index
    %c0_236 = arith.constant 0 : index
    %c0_237 = arith.constant 0 : index
    %468 = vector.load %arg16[%c0_235, %c0_236, %c0_237] : memref<2x2x32xf32, #tpu.memory_space<vmem>>, vector<1x2x32xf32>
    %469 = vector.shape_cast %468 : vector<1x2x32xf32> to vector<2x32xf32>
    %470 = tpu.concatenate %465, %467 in 1 : vector<2x32xf32>, vector<2x32xf32> -> vector<2x64xf32>
    %c0_238 = arith.constant 0 : index
    %c0_239 = arith.constant 0 : index
    %c0_240 = arith.constant 0 : index
    %471 = vector.load %arg8[%c0_238, %c0_239, %c0_240] : memref<2x64x128xf32, #tpu.memory_space<vmem>>, vector<1x64x128xf32>
    %472 = vector.shape_cast %471 : vector<1x64x128xf32> to vector<64x128xf32>
    %cst_241 = arith.constant dense<0.000000e+00> : vector<2x128xf32>
    %473 = tpu.matmul %470, %472, %cst_241 {dimension_numbers = #tpu.dot_dimension_numbers<[1], [0], [0], [1], [0, 0, 1, 1], [], []>} : vector<2x64xf32>, vector<64x128xf32>, vector<2x128xf32> -> vector<2x128xf32>
    %c0_242 = arith.constant 0 : index
    %c0_243 = arith.constant 0 : index
    %c0_244 = arith.constant 0 : index
    %474 = vector.load %arg9[%c0_242, %c0_243, %c0_244] : memref<2x1x128xf32, #tpu.memory_space<vmem>>, vector<1x1x128xf32>
    %475 = vector.shape_cast %474 : vector<1x1x128xf32> to vector<1x128xf32>
    %476 = vector.broadcast %475 : vector<1x128xf32> to vector<2x128xf32>
    %477 = arith.addf %473, %476 : vector<2x128xf32>
    %478 = vector.extract_strided_slice %477 {offsets = [0, 0], sizes = [2, 32], strides = [1, 1]} : vector<2x128xf32> to vector<2x32xf32>
    %cst_245 = arith.constant 5.000000e-01 : f32
    %479 = vector.broadcast %cst_245 : f32 to vector<2x32xf32>
    %480 = arith.mulf %479, %478 : vector<2x32xf32>
    %481 = math.tanh %480 : vector<2x32xf32>
    %cst_246 = arith.constant 1.000000e+00 : f32
    %482 = vector.broadcast %cst_246 : f32 to vector<2x32xf32>
    %483 = arith.addf %481, %482 : vector<2x32xf32>
    %cst_247 = arith.constant 5.000000e-01 : f32
    %484 = vector.broadcast %cst_247 : f32 to vector<2x32xf32>
    %485 = arith.mulf %484, %483 : vector<2x32xf32>
    %486 = vector.extract_strided_slice %477 {offsets = [0, 32], sizes = [2, 32], strides = [1, 1]} : vector<2x128xf32> to vector<2x32xf32>
    %cst_248 = arith.constant 5.000000e-01 : f32
    %487 = vector.broadcast %cst_248 : f32 to vector<2x32xf32>
    %488 = arith.mulf %487, %486 : vector<2x32xf32>
    %489 = math.tanh %488 : vector<2x32xf32>
    %cst_249 = arith.constant 1.000000e+00 : f32
    %490 = vector.broadcast %cst_249 : f32 to vector<2x32xf32>
    %491 = arith.addf %489, %490 : vector<2x32xf32>
    %cst_250 = arith.constant 5.000000e-01 : f32
    %492 = vector.broadcast %cst_250 : f32 to vector<2x32xf32>
    %493 = arith.mulf %492, %491 : vector<2x32xf32>
    %494 = vector.extract_strided_slice %477 {offsets = [0, 64], sizes = [2, 32], strides = [1, 1]} : vector<2x128xf32> to vector<2x32xf32>
    %495 = math.tanh %494 : vector<2x32xf32>
    %496 = vector.extract_strided_slice %477 {offsets = [0, 96], sizes = [2, 32], strides = [1, 1]} : vector<2x128xf32> to vector<2x32xf32>
    %cst_251 = arith.constant 5.000000e-01 : f32
    %497 = vector.broadcast %cst_251 : f32 to vector<2x32xf32>
    %498 = arith.mulf %497, %496 : vector<2x32xf32>
    %499 = math.tanh %498 : vector<2x32xf32>
    %cst_252 = arith.constant 1.000000e+00 : f32
    %500 = vector.broadcast %cst_252 : f32 to vector<2x32xf32>
    %501 = arith.addf %499, %500 : vector<2x32xf32>
    %cst_253 = arith.constant 5.000000e-01 : f32
    %502 = vector.broadcast %cst_253 : f32 to vector<2x32xf32>
    %503 = arith.mulf %502, %501 : vector<2x32xf32>
    %504 = arith.mulf %493, %469 : vector<2x32xf32>
    %505 = arith.mulf %485, %495 : vector<2x32xf32>
    %506 = arith.addf %504, %505 : vector<2x32xf32>
    %507 = math.tanh %506 : vector<2x32xf32>
    %508 = arith.mulf %503, %507 : vector<2x32xf32>
    %509 = arith.subf %508, %467 : vector<2x32xf32>
    %510 = vector.broadcast %462 : vector<1x1xf32> to vector<2x32xf32>
    %511 = arith.mulf %510, %509 : vector<2x32xf32>
    %512 = arith.addf %467, %511 : vector<2x32xf32>
    %c0_254 = arith.constant 0 : index
    %c0_255 = arith.constant 0 : index
    %c0_256 = arith.constant 0 : index
    %513 = vector.load %arg15[%c0_254, %c0_255, %c0_256] : memref<2x2x32xf32, #tpu.memory_space<vmem>>, vector<1x2x32xf32>
    %514 = vector.shape_cast %513 : vector<1x2x32xf32> to vector<2x32xf32>
    %515 = vector.shape_cast %512 : vector<2x32xf32> to vector<1x2x32xf32>
    tpu.vector_store %arg15[%c0_254, %c0_255, %c0_256], %515 {strides = array<i32>} : memref<2x2x32xf32, #tpu.memory_space<vmem>>, vector<1x2x32xf32>,
    %516 = arith.subf %506, %469 : vector<2x32xf32>
    %517 = vector.broadcast %462 : vector<1x1xf32> to vector<2x32xf32>
    %518 = arith.mulf %517, %516 : vector<2x32xf32>
    %519 = arith.addf %469, %518 : vector<2x32xf32>
    %c0_257 = arith.constant 0 : index
    %c0_258 = arith.constant 0 : index
    %c0_259 = arith.constant 0 : index
    %520 = vector.load %arg16[%c0_257, %c0_258, %c0_259] : memref<2x2x32xf32, #tpu.memory_space<vmem>>, vector<1x2x32xf32>
    %521 = vector.shape_cast %520 : vector<1x2x32xf32> to vector<2x32xf32>
    %522 = vector.shape_cast %519 : vector<2x32xf32> to vector<1x2x32xf32>
    tpu.vector_store %arg16[%c0_257, %c0_258, %c0_259], %522 {strides = array<i32>} : memref<2x2x32xf32, #tpu.memory_space<vmem>>, vector<1x2x32xf32>,
    %c1_260 = arith.constant 1 : index
    %c0_261 = arith.constant 0 : index
    %c0_262 = arith.constant 0 : index
    %523 = vector.load %arg15[%c1_260, %c0_261, %c0_262] : memref<2x2x32xf32, #tpu.memory_space<vmem>>, vector<1x2x32xf32>
    %524 = vector.shape_cast %523 : vector<1x2x32xf32> to vector<2x32xf32>
    %c1_263 = arith.constant 1 : index
    %c0_264 = arith.constant 0 : index
    %c0_265 = arith.constant 0 : index
    %525 = vector.load %arg16[%c1_263, %c0_264, %c0_265] : memref<2x2x32xf32, #tpu.memory_space<vmem>>, vector<1x2x32xf32>
    %526 = vector.shape_cast %525 : vector<1x2x32xf32> to vector<2x32xf32>
    %527 = tpu.concatenate %508, %524 in 1 : vector<2x32xf32>, vector<2x32xf32> -> vector<2x64xf32>
    %c1_266 = arith.constant 1 : index
    %c0_267 = arith.constant 0 : index
    %c0_268 = arith.constant 0 : index
    %528 = vector.load %arg8[%c1_266, %c0_267, %c0_268] : memref<2x64x128xf32, #tpu.memory_space<vmem>>, vector<1x64x128xf32>
    %529 = vector.shape_cast %528 : vector<1x64x128xf32> to vector<64x128xf32>
    %cst_269 = arith.constant dense<0.000000e+00> : vector<2x128xf32>
    %530 = tpu.matmul %527, %529, %cst_269 {dimension_numbers = #tpu.dot_dimension_numbers<[1], [0], [0], [1], [0, 0, 1, 1], [], []>} : vector<2x64xf32>, vector<64x128xf32>, vector<2x128xf32> -> vector<2x128xf32>
    %c1_270 = arith.constant 1 : index
    %c0_271 = arith.constant 0 : index
    %c0_272 = arith.constant 0 : index
    %531 = vector.load %arg9[%c1_270, %c0_271, %c0_272] : memref<2x1x128xf32, #tpu.memory_space<vmem>>, vector<1x1x128xf32>
    %532 = vector.shape_cast %531 : vector<1x1x128xf32> to vector<1x128xf32>
    %533 = vector.broadcast %532 : vector<1x128xf32> to vector<2x128xf32>
    %534 = arith.addf %530, %533 : vector<2x128xf32>
    %535 = vector.extract_strided_slice %534 {offsets = [0, 0], sizes = [2, 32], strides = [1, 1]} : vector<2x128xf32> to vector<2x32xf32>
    %cst_273 = arith.constant 5.000000e-01 : f32
    %536 = vector.broadcast %cst_273 : f32 to vector<2x32xf32>
    %537 = arith.mulf %536, %535 : vector<2x32xf32>
    %538 = math.tanh %537 : vector<2x32xf32>
    %cst_274 = arith.constant 1.000000e+00 : f32
    %539 = vector.broadcast %cst_274 : f32 to vector<2x32xf32>
    %540 = arith.addf %538, %539 : vector<2x32xf32>
    %cst_275 = arith.constant 5.000000e-01 : f32
    %541 = vector.broadcast %cst_275 : f32 to vector<2x32xf32>
    %542 = arith.mulf %541, %540 : vector<2x32xf32>
    %543 = vector.extract_strided_slice %534 {offsets = [0, 32], sizes = [2, 32], strides = [1, 1]} : vector<2x128xf32> to vector<2x32xf32>
    %cst_276 = arith.constant 5.000000e-01 : f32
    %544 = vector.broadcast %cst_276 : f32 to vector<2x32xf32>
    %545 = arith.mulf %544, %543 : vector<2x32xf32>
    %546 = math.tanh %545 : vector<2x32xf32>
    %cst_277 = arith.constant 1.000000e+00 : f32
    %547 = vector.broadcast %cst_277 : f32 to vector<2x32xf32>
    %548 = arith.addf %546, %547 : vector<2x32xf32>
    %cst_278 = arith.constant 5.000000e-01 : f32
    %549 = vector.broadcast %cst_278 : f32 to vector<2x32xf32>
    %550 = arith.mulf %549, %548 : vector<2x32xf32>
    %551 = vector.extract_strided_slice %534 {offsets = [0, 64], sizes = [2, 32], strides = [1, 1]} : vector<2x128xf32> to vector<2x32xf32>
    %552 = math.tanh %551 : vector<2x32xf32>
    %553 = vector.extract_strided_slice %534 {offsets = [0, 96], sizes = [2, 32], strides = [1, 1]} : vector<2x128xf32> to vector<2x32xf32>
    %cst_279 = arith.constant 5.000000e-01 : f32
    %554 = vector.broadcast %cst_279 : f32 to vector<2x32xf32>
    %555 = arith.mulf %554, %553 : vector<2x32xf32>
    %556 = math.tanh %555 : vector<2x32xf32>
    %cst_280 = arith.constant 1.000000e+00 : f32
    %557 = vector.broadcast %cst_280 : f32 to vector<2x32xf32>
    %558 = arith.addf %556, %557 : vector<2x32xf32>
    %cst_281 = arith.constant 5.000000e-01 : f32
    %559 = vector.broadcast %cst_281 : f32 to vector<2x32xf32>
    %560 = arith.mulf %559, %558 : vector<2x32xf32>
    %561 = arith.mulf %550, %526 : vector<2x32xf32>
    %562 = arith.mulf %542, %552 : vector<2x32xf32>
    %563 = arith.addf %561, %562 : vector<2x32xf32>
    %564 = math.tanh %563 : vector<2x32xf32>
    %565 = arith.mulf %560, %564 : vector<2x32xf32>
    %566 = arith.subf %565, %524 : vector<2x32xf32>
    %567 = vector.broadcast %462 : vector<1x1xf32> to vector<2x32xf32>
    %568 = arith.mulf %567, %566 : vector<2x32xf32>
    %569 = arith.addf %524, %568 : vector<2x32xf32>
    %c1_282 = arith.constant 1 : index
    %c0_283 = arith.constant 0 : index
    %c0_284 = arith.constant 0 : index
    %570 = vector.load %arg15[%c1_282, %c0_283, %c0_284] : memref<2x2x32xf32, #tpu.memory_space<vmem>>, vector<1x2x32xf32>
    %571 = vector.shape_cast %570 : vector<1x2x32xf32> to vector<2x32xf32>
    %572 = vector.shape_cast %569 : vector<2x32xf32> to vector<1x2x32xf32>
    tpu.vector_store %arg15[%c1_282, %c0_283, %c0_284], %572 {strides = array<i32>} : memref<2x2x32xf32, #tpu.memory_space<vmem>>, vector<1x2x32xf32>,
    %573 = arith.subf %563, %526 : vector<2x32xf32>
    %574 = vector.broadcast %462 : vector<1x1xf32> to vector<2x32xf32>
    %575 = arith.mulf %574, %573 : vector<2x32xf32>
    %576 = arith.addf %526, %575 : vector<2x32xf32>
    %c1_285 = arith.constant 1 : index
    %c0_286 = arith.constant 0 : index
    %c0_287 = arith.constant 0 : index
    %577 = vector.load %arg16[%c1_285, %c0_286, %c0_287] : memref<2x2x32xf32, #tpu.memory_space<vmem>>, vector<1x2x32xf32>
    %578 = vector.shape_cast %577 : vector<1x2x32xf32> to vector<2x32xf32>
    %579 = vector.shape_cast %576 : vector<2x32xf32> to vector<1x2x32xf32>
    tpu.vector_store %arg16[%c1_285, %c0_286, %c0_287], %579 {strides = array<i32>} : memref<2x2x32xf32, #tpu.memory_space<vmem>>, vector<1x2x32xf32>,
    %c0_288 = arith.constant 0 : index
    %c0_289 = arith.constant 0 : index
    %580 = vector.load %arg5[%c0_288, %c0_289] : memref<32x2xf32, #tpu.memory_space<vmem>>, vector<32x2xf32>
    %cst_290 = arith.constant dense<0.000000e+00> : vector<2x2xf32>
    %581 = tpu.matmul %565, %580, %cst_290 {dimension_numbers = #tpu.dot_dimension_numbers<[1], [0], [0], [1], [0, 0, 1, 1], [], []>} : vector<2x32xf32>, vector<32x2xf32>, vector<2x2xf32> -> vector<2x2xf32>
    %582 = math.tanh %581 : vector<2x2xf32>
    %cst_291 = arith.constant 2.500000e+00 : f32
    %583 = vector.broadcast %cst_291 : f32 to vector<2x2xf32>
    %584 = arith.mulf %583, %582 : vector<2x2xf32>
    %585 = vector.extract_strided_slice %584 {offsets = [0, 0], sizes = [2, 1], strides = [1, 1]} : vector<2x2xf32> to vector<2x1xf32>
    %586 = vector.extract_strided_slice %584 {offsets = [0, 1], sizes = [2, 1], strides = [1, 1]} : vector<2x2xf32> to vector<2x1xf32>
    %587 = arith.maximumf %585, %586 : vector<2x1xf32>
    %588 = arith.subf %585, %587 : vector<2x1xf32>
    %589 = math.exp %588 : vector<2x1xf32>
    %590 = arith.subf %586, %587 : vector<2x1xf32>
    %591 = math.exp %590 : vector<2x1xf32>
    %592 = arith.addf %589, %591 : vector<2x1xf32>
    %593 = math.log %592 : vector<2x1xf32>
    %594 = arith.addf %587, %593 : vector<2x1xf32>
    %595 = arith.cmpf ogt, %586, %585 : vector<2x1xf32>
    %596 = arith.extui %595 : vector<2x1xi1> to vector<2x1xi32>
    %597 = arith.sitofp %596 : vector<2x1xi32> to vector<2x1xf32>
    %598 = arith.subf %587, %594 : vector<2x1xf32>
    %c0_292 = arith.constant 0 : index
    %c0_293 = arith.constant 0 : index
    %599 = vector.load %arg4[%c0_292, %c0_293] : memref<2x32xf32, #tpu.memory_space<vmem>>, vector<1x32xf32>
    %c1_294 = arith.constant 1 : index
    %c0_295 = arith.constant 0 : index
    %600 = vector.load %arg4[%c1_294, %c0_295] : memref<2x32xf32, #tpu.memory_space<vmem>>, vector<1x32xf32>
    %601 = arith.subf %600, %599 : vector<1x32xf32>
    %602 = vector.broadcast %597 : vector<2x1xf32> to vector<2x32xf32>
    %603 = vector.broadcast %601 : vector<1x32xf32> to vector<2x32xf32>
    %604 = arith.mulf %602, %603 : vector<2x32xf32>
    %605 = vector.broadcast %599 : vector<1x32xf32> to vector<2x32xf32>
    %606 = arith.addf %605, %604 : vector<2x32xf32>
    %607 = tpu.concatenate %606, %508 in 1 : vector<2x32xf32>, vector<2x32xf32> -> vector<2x64xf32>
    %c0_296 = arith.constant 0 : index
    %c0_297 = arith.constant 0 : index
    %c0_298 = arith.constant 0 : index
    %608 = vector.load %arg8[%c0_296, %c0_297, %c0_298] : memref<2x64x128xf32, #tpu.memory_space<vmem>>, vector<1x64x128xf32>
    %609 = vector.shape_cast %608 : vector<1x64x128xf32> to vector<64x128xf32>
    %cst_299 = arith.constant dense<0.000000e+00> : vector<2x128xf32>
    %610 = tpu.matmul %607, %609, %cst_299 {dimension_numbers = #tpu.dot_dimension_numbers<[1], [0], [0], [1], [0, 0, 1, 1], [], []>} : vector<2x64xf32>, vector<64x128xf32>, vector<2x128xf32> -> vector<2x128xf32>
    %c0_300 = arith.constant 0 : index
    %c0_301 = arith.constant 0 : index
    %c0_302 = arith.constant 0 : index
    %611 = vector.load %arg9[%c0_300, %c0_301, %c0_302] : memref<2x1x128xf32, #tpu.memory_space<vmem>>, vector<1x1x128xf32>
    %612 = vector.shape_cast %611 : vector<1x1x128xf32> to vector<1x128xf32>
    %613 = vector.broadcast %612 : vector<1x128xf32> to vector<2x128xf32>
    %614 = arith.addf %610, %613 : vector<2x128xf32>
    %615 = vector.extract_strided_slice %614 {offsets = [0, 0], sizes = [2, 32], strides = [1, 1]} : vector<2x128xf32> to vector<2x32xf32>
    %cst_303 = arith.constant 5.000000e-01 : f32
    %616 = vector.broadcast %cst_303 : f32 to vector<2x32xf32>
    %617 = arith.mulf %616, %615 : vector<2x32xf32>
    %618 = math.tanh %617 : vector<2x32xf32>
    %cst_304 = arith.constant 1.000000e+00 : f32
    %619 = vector.broadcast %cst_304 : f32 to vector<2x32xf32>
    %620 = arith.addf %618, %619 : vector<2x32xf32>
    %cst_305 = arith.constant 5.000000e-01 : f32
    %621 = vector.broadcast %cst_305 : f32 to vector<2x32xf32>
    %622 = arith.mulf %621, %620 : vector<2x32xf32>
    %623 = vector.extract_strided_slice %614 {offsets = [0, 32], sizes = [2, 32], strides = [1, 1]} : vector<2x128xf32> to vector<2x32xf32>
    %cst_306 = arith.constant 5.000000e-01 : f32
    %624 = vector.broadcast %cst_306 : f32 to vector<2x32xf32>
    %625 = arith.mulf %624, %623 : vector<2x32xf32>
    %626 = math.tanh %625 : vector<2x32xf32>
    %cst_307 = arith.constant 1.000000e+00 : f32
    %627 = vector.broadcast %cst_307 : f32 to vector<2x32xf32>
    %628 = arith.addf %626, %627 : vector<2x32xf32>
    %cst_308 = arith.constant 5.000000e-01 : f32
    %629 = vector.broadcast %cst_308 : f32 to vector<2x32xf32>
    %630 = arith.mulf %629, %628 : vector<2x32xf32>
    %631 = vector.extract_strided_slice %614 {offsets = [0, 64], sizes = [2, 32], strides = [1, 1]} : vector<2x128xf32> to vector<2x32xf32>
    %632 = math.tanh %631 : vector<2x32xf32>
    %633 = vector.extract_strided_slice %614 {offsets = [0, 96], sizes = [2, 32], strides = [1, 1]} : vector<2x128xf32> to vector<2x32xf32>
    %cst_309 = arith.constant 5.000000e-01 : f32
    %634 = vector.broadcast %cst_309 : f32 to vector<2x32xf32>
    %635 = arith.mulf %634, %633 : vector<2x32xf32>
    %636 = math.tanh %635 : vector<2x32xf32>
    %cst_310 = arith.constant 1.000000e+00 : f32
    %637 = vector.broadcast %cst_310 : f32 to vector<2x32xf32>
    %638 = arith.addf %636, %637 : vector<2x32xf32>
    %cst_311 = arith.constant 5.000000e-01 : f32
    %639 = vector.broadcast %cst_311 : f32 to vector<2x32xf32>
    %640 = arith.mulf %639, %638 : vector<2x32xf32>
    %641 = arith.mulf %630, %506 : vector<2x32xf32>
    %642 = arith.mulf %622, %632 : vector<2x32xf32>
    %643 = arith.addf %641, %642 : vector<2x32xf32>
    %644 = math.tanh %643 : vector<2x32xf32>
    %645 = arith.mulf %640, %644 : vector<2x32xf32>
    %646 = tpu.concatenate %645, %565 in 1 : vector<2x32xf32>, vector<2x32xf32> -> vector<2x64xf32>
    %c1_312 = arith.constant 1 : index
    %c0_313 = arith.constant 0 : index
    %c0_314 = arith.constant 0 : index
    %647 = vector.load %arg8[%c1_312, %c0_313, %c0_314] : memref<2x64x128xf32, #tpu.memory_space<vmem>>, vector<1x64x128xf32>
    %648 = vector.shape_cast %647 : vector<1x64x128xf32> to vector<64x128xf32>
    %cst_315 = arith.constant dense<0.000000e+00> : vector<2x128xf32>
    %649 = tpu.matmul %646, %648, %cst_315 {dimension_numbers = #tpu.dot_dimension_numbers<[1], [0], [0], [1], [0, 0, 1, 1], [], []>} : vector<2x64xf32>, vector<64x128xf32>, vector<2x128xf32> -> vector<2x128xf32>
    %c1_316 = arith.constant 1 : index
    %c0_317 = arith.constant 0 : index
    %c0_318 = arith.constant 0 : index
    %650 = vector.load %arg9[%c1_316, %c0_317, %c0_318] : memref<2x1x128xf32, #tpu.memory_space<vmem>>, vector<1x1x128xf32>
    %651 = vector.shape_cast %650 : vector<1x1x128xf32> to vector<1x128xf32>
    %652 = vector.broadcast %651 : vector<1x128xf32> to vector<2x128xf32>
    %653 = arith.addf %649, %652 : vector<2x128xf32>
    %654 = vector.extract_strided_slice %653 {offsets = [0, 0], sizes = [2, 32], strides = [1, 1]} : vector<2x128xf32> to vector<2x32xf32>
    %cst_319 = arith.constant 5.000000e-01 : f32
    %655 = vector.broadcast %cst_319 : f32 to vector<2x32xf32>
    %656 = arith.mulf %655, %654 : vector<2x32xf32>
    %657 = math.tanh %656 : vector<2x32xf32>
    %cst_320 = arith.constant 1.000000e+00 : f32
    %658 = vector.broadcast %cst_320 : f32 to vector<2x32xf32>
    %659 = arith.addf %657, %658 : vector<2x32xf32>
    %cst_321 = arith.constant 5.000000e-01 : f32
    %660 = vector.broadcast %cst_321 : f32 to vector<2x32xf32>
    %661 = arith.mulf %660, %659 : vector<2x32xf32>
    %662 = vector.extract_strided_slice %653 {offsets = [0, 32], sizes = [2, 32], strides = [1, 1]} : vector<2x128xf32> to vector<2x32xf32>
    %cst_322 = arith.constant 5.000000e-01 : f32
    %663 = vector.broadcast %cst_322 : f32 to vector<2x32xf32>
    %664 = arith.mulf %663, %662 : vector<2x32xf32>
    %665 = math.tanh %664 : vector<2x32xf32>
    %cst_323 = arith.constant 1.000000e+00 : f32
    %666 = vector.broadcast %cst_323 : f32 to vector<2x32xf32>
    %667 = arith.addf %665, %666 : vector<2x32xf32>
    %cst_324 = arith.constant 5.000000e-01 : f32
    %668 = vector.broadcast %cst_324 : f32 to vector<2x32xf32>
    %669 = arith.mulf %668, %667 : vector<2x32xf32>
    %670 = vector.extract_strided_slice %653 {offsets = [0, 64], sizes = [2, 32], strides = [1, 1]} : vector<2x128xf32> to vector<2x32xf32>
    %671 = math.tanh %670 : vector<2x32xf32>
    %672 = vector.extract_strided_slice %653 {offsets = [0, 96], sizes = [2, 32], strides = [1, 1]} : vector<2x128xf32> to vector<2x32xf32>
    %cst_325 = arith.constant 5.000000e-01 : f32
    %673 = vector.broadcast %cst_325 : f32 to vector<2x32xf32>
    %674 = arith.mulf %673, %672 : vector<2x32xf32>
    %675 = math.tanh %674 : vector<2x32xf32>
    %cst_326 = arith.constant 1.000000e+00 : f32
    %676 = vector.broadcast %cst_326 : f32 to vector<2x32xf32>
    %677 = arith.addf %675, %676 : vector<2x32xf32>
    %cst_327 = arith.constant 5.000000e-01 : f32
    %678 = vector.broadcast %cst_327 : f32 to vector<2x32xf32>
    %679 = arith.mulf %678, %677 : vector<2x32xf32>
    %680 = arith.mulf %669, %563 : vector<2x32xf32>
    %681 = arith.mulf %661, %671 : vector<2x32xf32>
    %682 = arith.addf %680, %681 : vector<2x32xf32>
    %683 = math.tanh %682 : vector<2x32xf32>
    %684 = arith.mulf %679, %683 : vector<2x32xf32>
    %c0_328 = arith.constant 0 : index
    %c0_329 = arith.constant 0 : index
    %685 = vector.load %arg6[%c0_328, %c0_329] : memref<32x32xf32, #tpu.memory_space<vmem>>, vector<32x32xf32>
    %cst_330 = arith.constant dense<0.000000e+00> : vector<2x32xf32>
    %686 = tpu.matmul %684, %685, %cst_330 {dimension_numbers = #tpu.dot_dimension_numbers<[1], [0], [0], [1], [0, 0, 1, 1], [], []>} : vector<2x32xf32>, vector<32x32xf32>, vector<2x32xf32> -> vector<2x32xf32>
    %c0_331 = arith.constant 0 : index
    %c0_332 = arith.constant 0 : index
    %c0_333 = arith.constant 0 : index
    %687 = vector.load %arg14[%c0_331, %c0_332, %c0_333] : memref<2x12x32xf32, #tpu.memory_space<vmem>>, vector<2x12x32xf32>
    %688 = vector.shape_cast %686 : vector<2x32xf32> to vector<2x1x32xf32>
    %689 = vector.broadcast %688 : vector<2x1x32xf32> to vector<2x12x32xf32>
    %690 = arith.addf %687, %689 : vector<2x12x32xf32>
    %691 = math.tanh %690 : vector<2x12x32xf32>
    %c0_334 = arith.constant 0 : index
    %c0_335 = arith.constant 0 : index
    %c0_336 = arith.constant 0 : index
    %692 = vector.load %arg7[%c0_334, %c0_335, %c0_336] : memref<1x1x32xf32, #tpu.memory_space<vmem>>, vector<1x1x32xf32>
    %693 = vector.broadcast %692 : vector<1x1x32xf32> to vector<2x12x32xf32>
    %694 = arith.mulf %691, %693 : vector<2x12x32xf32>
    %cst_337 = arith.constant dense<0.000000e+00> : vector<2x12xf32>
    %695 = vector.multi_reduction <add>, %694, %cst_337 [2] : vector<2x12x32xf32> to vector<2x12xf32>
    %696 = math.tanh %695 : vector<2x12xf32>
    %cst_338 = arith.constant 2.500000e+00 : f32
    %697 = vector.broadcast %cst_338 : f32 to vector<2x12xf32>
    %698 = arith.mulf %697, %696 : vector<2x12xf32>
    %c0_339 = arith.constant 0 : index
    %c0_340 = arith.constant 0 : index
    %699 = vector.load %arg17[%c0_339, %c0_340] : memref<2x12xf32, #tpu.memory_space<vmem>>, vector<2x12xf32>
    %cst_341 = arith.constant 9.000000e+00 : f32
    %700 = vector.broadcast %cst_341 : f32 to vector<2x12xf32>
    %701 = arith.cmpf olt, %24, %700 : vector<2x12xf32>
    %cst_342 = arith.constant 0.000000e+00 : f32
    %702 = vector.broadcast %cst_342 : f32 to vector<2x12xf32>
    %703 = arith.cmpf ogt, %699, %702 : vector<2x12xf32>
    %cst_343 = arith.constant -1.000000e+02 : f32
    %cst_344 = arith.constant 0.000000e+00 : f32
    %704 = vector.broadcast %cst_343 : f32 to vector<2x12xf32>
    %705 = vector.broadcast %cst_344 : f32 to vector<2x12xf32>
    %706 = arith.select %703, %704, %705 : vector<2x12xi1>, vector<2x12xf32>
    %cst_345 = arith.constant -1.000000e+30 : f32
    %707 = vector.broadcast %cst_345 : f32 to vector<2x12xf32>
    %708 = arith.select %701, %706, %707 : vector<2x12xi1>, vector<2x12xf32>
    %709 = arith.addf %698, %708 : vector<2x12xf32>
    %cst_346 = arith.constant dense<0xFF800000> : vector<2xf32>
    %710 = vector.multi_reduction <maximumf>, %709, %cst_346 [1] : vector<2x12xf32> to vector<2xf32>
    %711 = vector.shape_cast %710 : vector<2xf32> to vector<2x1xf32>
    %712 = vector.broadcast %711 : vector<2x1xf32> to vector<2x12xf32>
    %713 = arith.subf %709, %712 : vector<2x12xf32>
    %714 = math.exp %713 : vector<2x12xf32>
    %cst_347 = arith.constant dense<0.000000e+00> : vector<2xf32>
    %715 = vector.multi_reduction <add>, %714, %cst_347 [1] : vector<2x12xf32> to vector<2xf32>
    %716 = vector.shape_cast %715 : vector<2xf32> to vector<2x1xf32>
    %717 = math.log %716 : vector<2x1xf32>
    %718 = arith.addf %711, %717 : vector<2x1xf32>
    %719 = vector.broadcast %711 : vector<2x1xf32> to vector<2x12xf32>
    %720 = arith.cmpf oeq, %709, %719 : vector<2x12xf32>
    %cst_348 = arith.constant 1.000000e+09 : f32
    %721 = vector.broadcast %cst_348 : f32 to vector<2x12xf32>
    %722 = arith.select %720, %24, %721 : vector<2x12xi1>, vector<2x12xf32>
    %cst_349 = arith.constant dense<0x7F800000> : vector<2xf32>
    %723 = vector.multi_reduction <minimumf>, %722, %cst_349 [1] : vector<2x12xf32> to vector<2xf32>
    %724 = vector.shape_cast %723 : vector<2xf32> to vector<2x1xf32>
    %725 = vector.broadcast %724 : vector<2x1xf32> to vector<2x12xf32>
    %726 = arith.cmpf oeq, %24, %725 : vector<2x12xf32>
    %cst_350 = arith.constant -3.000000e+38 : f32
    %727 = vector.broadcast %cst_350 : f32 to vector<2x12xf32>
    %728 = arith.select %726, %727, %709 : vector<2x12xi1>, vector<2x12xf32>
    %cst_351 = arith.constant dense<0xFF800000> : vector<2xf32>
    %729 = vector.multi_reduction <maximumf>, %728, %cst_351 [1] : vector<2x12xf32> to vector<2xf32>
    %730 = vector.shape_cast %729 : vector<2xf32> to vector<2x1xf32>
    %731 = vector.broadcast %730 : vector<2x1xf32> to vector<2x12xf32>
    %732 = arith.cmpf oeq, %728, %731 : vector<2x12xf32>
    %cst_352 = arith.constant 1.000000e+09 : f32
    %733 = vector.broadcast %cst_352 : f32 to vector<2x12xf32>
    %734 = arith.select %732, %24, %733 : vector<2x12xi1>, vector<2x12xf32>
    %cst_353 = arith.constant dense<0x7F800000> : vector<2xf32>
    %735 = vector.multi_reduction <minimumf>, %734, %cst_353 [1] : vector<2x12xf32> to vector<2xf32>
    %736 = vector.shape_cast %735 : vector<2xf32> to vector<2x1xf32>
    %737 = vector.broadcast %724 : vector<2x1xf32> to vector<2x12xf32>
    %738 = arith.cmpf oeq, %24, %737 : vector<2x12xf32>
    %739 = arith.extui %738 : vector<2x12xi1> to vector<2x12xi32>
    %740 = arith.sitofp %739 : vector<2x12xi32> to vector<2x12xf32>
    %741 = vector.broadcast %736 : vector<2x1xf32> to vector<2x12xf32>
    %742 = arith.cmpf oeq, %24, %741 : vector<2x12xf32>
    %743 = arith.extui %742 : vector<2x12xi1> to vector<2x12xi32>
    %744 = arith.sitofp %743 : vector<2x12xi32> to vector<2x12xf32>
    %745 = arith.addf %740, %744 : vector<2x12xf32>
    %746 = vector.broadcast %462 : vector<1x1xf32> to vector<2x12xf32>
    %747 = arith.mulf %746, %745 : vector<2x12xf32>
    %748 = arith.addf %699, %747 : vector<2x12xf32>
    %c0_354 = arith.constant 0 : index
    %c0_355 = arith.constant 0 : index
    %749 = vector.load %arg17[%c0_354, %c0_355] : memref<2x12xf32, #tpu.memory_space<vmem>>, vector<2x12xf32>
    tpu.vector_store %arg17[%c0_354, %c0_355], %748 {strides = array<i32>} : memref<2x12xf32, #tpu.memory_space<vmem>>, vector<2x12xf32>,
    %750 = vector.extract_strided_slice %464 {offsets = [0, 0], sizes = [2, 1], strides = [1, 1]} : vector<2x2xf32> to vector<2x1xf32>
    %cst_356 = arith.constant 2.000000e+00 : f32
    %751 = vector.broadcast %cst_356 : f32 to vector<2x1xf32>
    %752 = arith.mulf %751, %711 : vector<2x1xf32>
    %cst_357 = arith.constant 5.000000e-01 : f32
    %753 = vector.broadcast %cst_357 : f32 to vector<2x1xf32>
    %754 = arith.mulf %753, %752 : vector<2x1xf32>
    %755 = math.tanh %754 : vector<2x1xf32>
    %cst_358 = arith.constant 1.000000e+00 : f32
    %756 = vector.broadcast %cst_358 : f32 to vector<2x1xf32>
    %757 = arith.addf %755, %756 : vector<2x1xf32>
    %cst_359 = arith.constant 5.000000e-01 : f32
    %758 = vector.broadcast %cst_359 : f32 to vector<2x1xf32>
    %759 = arith.mulf %758, %757 : vector<2x1xf32>
    %760 = math.absf %711 : vector<2x1xf32>
    %cst_360 = arith.constant -2.000000e+00 : f32
    %761 = vector.broadcast %cst_360 : f32 to vector<2x1xf32>
    %762 = arith.mulf %761, %760 : vector<2x1xf32>
    %763 = math.exp %762 : vector<2x1xf32>
    %cst_361 = arith.constant 1.000000e+00 : f32
    %764 = vector.broadcast %cst_361 : f32 to vector<2x1xf32>
    %765 = arith.addf %764, %763 : vector<2x1xf32>
    %766 = math.log %765 : vector<2x1xf32>
    %767 = arith.addf %760, %766 : vector<2x1xf32>
    %768 = arith.subf %711, %767 : vector<2x1xf32>
    %cst_362 = arith.constant 0.000000e+00 : f32
    %769 = vector.broadcast %cst_362 : f32 to vector<2x1xf32>
    %770 = arith.subf %769, %711 : vector<2x1xf32>
    %771 = arith.subf %770, %767 : vector<2x1xf32>
    %772 = arith.cmpf olt, %750, %759 : vector<2x1xf32>
    %773 = arith.extui %772 : vector<2x1xi1> to vector<2x1xi32>
    %774 = arith.sitofp %773 : vector<2x1xi32> to vector<2x1xf32>
    %775 = arith.mulf %774, %768 : vector<2x1xf32>
    %cst_363 = arith.constant 1.000000e+00 : f32
    %776 = vector.broadcast %cst_363 : f32 to vector<2x1xf32>
    %777 = arith.subf %776, %774 : vector<2x1xf32>
    %778 = arith.mulf %777, %771 : vector<2x1xf32>
    %779 = arith.addf %775, %778 : vector<2x1xf32>
    %cst_364 = arith.constant 1.000000e+00 : f32
    %780 = vector.broadcast %cst_364 : f32 to vector<2x1xf32>
    %781 = arith.subf %780, %759 : vector<2x1xf32>
    %782 = arith.mulf %781, %771 : vector<2x1xf32>
    %783 = arith.mulf %759, %768 : vector<2x1xf32>
    %784 = arith.addf %782, %783 : vector<2x1xf32>
    %cst_365 = arith.constant 0.000000e+00 : f32
    %785 = vector.broadcast %cst_365 : f32 to vector<2x1xf32>
    %786 = arith.subf %785, %784 : vector<2x1xf32>
    %787 = vector.extract_strided_slice %464 {offsets = [0, 1], sizes = [2, 1], strides = [1, 1]} : vector<2x2xf32> to vector<2x1xf32>
    %cst_366 = arith.constant 2.000000e+00 : f32
    %788 = vector.broadcast %cst_366 : f32 to vector<2x1xf32>
    %789 = arith.mulf %788, %730 : vector<2x1xf32>
    %cst_367 = arith.constant 5.000000e-01 : f32
    %790 = vector.broadcast %cst_367 : f32 to vector<2x1xf32>
    %791 = arith.mulf %790, %789 : vector<2x1xf32>
    %792 = math.tanh %791 : vector<2x1xf32>
    %cst_368 = arith.constant 1.000000e+00 : f32
    %793 = vector.broadcast %cst_368 : f32 to vector<2x1xf32>
    %794 = arith.addf %792, %793 : vector<2x1xf32>
    %cst_369 = arith.constant 5.000000e-01 : f32
    %795 = vector.broadcast %cst_369 : f32 to vector<2x1xf32>
    %796 = arith.mulf %795, %794 : vector<2x1xf32>
    %797 = math.absf %730 : vector<2x1xf32>
    %cst_370 = arith.constant -2.000000e+00 : f32
    %798 = vector.broadcast %cst_370 : f32 to vector<2x1xf32>
    %799 = arith.mulf %798, %797 : vector<2x1xf32>
    %800 = math.exp %799 : vector<2x1xf32>
    %cst_371 = arith.constant 1.000000e+00 : f32
    %801 = vector.broadcast %cst_371 : f32 to vector<2x1xf32>
    %802 = arith.addf %801, %800 : vector<2x1xf32>
    %803 = math.log %802 : vector<2x1xf32>
    %804 = arith.addf %797, %803 : vector<2x1xf32>
    %805 = arith.subf %730, %804 : vector<2x1xf32>
    %cst_372 = arith.constant 0.000000e+00 : f32
    %806 = vector.broadcast %cst_372 : f32 to vector<2x1xf32>
    %807 = arith.subf %806, %730 : vector<2x1xf32>
    %808 = arith.subf %807, %804 : vector<2x1xf32>
    %809 = arith.cmpf olt, %787, %796 : vector<2x1xf32>
    %810 = arith.extui %809 : vector<2x1xi1> to vector<2x1xi32>
    %811 = arith.sitofp %810 : vector<2x1xi32> to vector<2x1xf32>
    %812 = arith.mulf %811, %805 : vector<2x1xf32>
    %cst_373 = arith.constant 1.000000e+00 : f32
    %813 = vector.broadcast %cst_373 : f32 to vector<2x1xf32>
    %814 = arith.subf %813, %811 : vector<2x1xf32>
    %815 = arith.mulf %814, %808 : vector<2x1xf32>
    %816 = arith.addf %812, %815 : vector<2x1xf32>
    %cst_374 = arith.constant 1.000000e+00 : f32
    %817 = vector.broadcast %cst_374 : f32 to vector<2x1xf32>
    %818 = arith.subf %817, %796 : vector<2x1xf32>
    %819 = arith.mulf %818, %808 : vector<2x1xf32>
    %820 = arith.mulf %796, %805 : vector<2x1xf32>
    %821 = arith.addf %819, %820 : vector<2x1xf32>
    %cst_375 = arith.constant 0.000000e+00 : f32
    %822 = vector.broadcast %cst_375 : f32 to vector<2x1xf32>
    %823 = arith.subf %822, %821 : vector<2x1xf32>
    %824 = vector.extract_strided_slice %598 {offsets = [0, 0], sizes = [1, 1], strides = [1, 1]} : vector<2x1xf32> to vector<1x1xf32>
    %825 = vector.extract_strided_slice %598 {offsets = [1, 0], sizes = [1, 1], strides = [1, 1]} : vector<2x1xf32> to vector<1x1xf32>
    %826 = arith.addf %824, %825 : vector<1x1xf32>
    %827 = arith.addf %711, %730 : vector<2x1xf32>
    %cst_376 = arith.constant 2.000000e+00 : f32
    %828 = vector.broadcast %cst_376 : f32 to vector<2x1xf32>
    %829 = arith.mulf %828, %718 : vector<2x1xf32>
    %830 = arith.subf %827, %829 : vector<2x1xf32>
    %831 = vector.extract_strided_slice %830 {offsets = [0, 0], sizes = [1, 1], strides = [1, 1]} : vector<2x1xf32> to vector<1x1xf32>
    %832 = vector.extract_strided_slice %830 {offsets = [1, 0], sizes = [1, 1], strides = [1, 1]} : vector<2x1xf32> to vector<1x1xf32>
    %833 = arith.addf %831, %832 : vector<1x1xf32>
    %834 = arith.addf %826, %833 : vector<1x1xf32>
    %835 = arith.addf %779, %816 : vector<2x1xf32>
    %836 = vector.extract_strided_slice %835 {offsets = [0, 0], sizes = [1, 1], strides = [1, 1]} : vector<2x1xf32> to vector<1x1xf32>
    %837 = vector.extract_strided_slice %835 {offsets = [1, 0], sizes = [1, 1], strides = [1, 1]} : vector<2x1xf32> to vector<1x1xf32>
    %838 = arith.addf %836, %837 : vector<1x1xf32>
    %839 = arith.addf %834, %838 : vector<1x1xf32>
    %840 = arith.addf %786, %823 : vector<2x1xf32>
    %841 = vector.extract_strided_slice %840 {offsets = [0, 0], sizes = [1, 1], strides = [1, 1]} : vector<2x1xf32> to vector<1x1xf32>
    %842 = vector.extract_strided_slice %840 {offsets = [1, 0], sizes = [1, 1], strides = [1, 1]} : vector<2x1xf32> to vector<1x1xf32>
    %843 = arith.addf %841, %842 : vector<1x1xf32>
    %c0_377 = arith.constant 0 : index
    %c0_378 = arith.constant 0 : index
    %844 = vector.load %arg12[%c0_377, %c0_378] : memref<1x2xf32, #tpu.memory_space<vmem>>, vector<1x2xf32>
    %845 = tpu.concatenate %839, %843 in 1 : vector<1x1xf32>, vector<1x1xf32> -> vector<1x2xf32>
    %846 = vector.broadcast %462 : vector<1x1xf32> to vector<1x2xf32>
    %847 = arith.mulf %846, %845 : vector<1x2xf32>
    %848 = arith.addf %844, %847 : vector<1x2xf32>
    %c0_379 = arith.constant 0 : index
    %c0_380 = arith.constant 0 : index
    %849 = vector.load %arg12[%c0_379, %c0_380] : memref<1x2xf32, #tpu.memory_space<vmem>>, vector<1x2xf32>
    tpu.vector_store %arg12[%c0_379, %c0_380], %848 {strides = array<i32>} : memref<1x2xf32, #tpu.memory_space<vmem>>, vector<1x2xf32>,
    %cst_381 = arith.constant 0.000000e+00 : f32
    %850 = vector.broadcast %cst_381 : f32 to vector<2x1xf32>
    %851 = vector.broadcast %462 : vector<1x1xf32> to vector<2x1xf32>
    %852 = arith.addf %851, %850 : vector<2x1xf32>
    %cst_382 = arith.constant 0.000000e+00 : f32
    %853 = vector.broadcast %cst_382 : f32 to vector<2x2xf32>
    %854 = tpu.concatenate %597, %724, %736, %774, %811, %852, %853 in 1 : vector<2x1xf32>, vector<2x1xf32>, vector<2x1xf32>, vector<2x1xf32>, vector<2x1xf32>, vector<2x1xf32>, vector<2x2xf32> -> vector<2x8xf32>
    %c1_383 = arith.constant 1 : index
    %c0_384 = arith.constant 0 : index
    %c0_385 = arith.constant 0 : index
    %855 = vector.load %arg11[%c1_383, %c0_384, %c0_385] : memref<4x2x8xf32, #tpu.memory_space<vmem>>, vector<1x2x8xf32>
    %856 = vector.shape_cast %855 : vector<1x2x8xf32> to vector<2x8xf32>
    %857 = vector.shape_cast %854 : vector<2x8xf32> to vector<1x2x8xf32>
    tpu.vector_store %arg11[%c1_383, %c0_384, %c0_385], %857 {strides = array<i32>} : memref<4x2x8xf32, #tpu.memory_space<vmem>>, vector<1x2x8xf32>,
    %c0_386 = arith.constant 0 : index
    %c0_387 = arith.constant 0 : index
    %c0_388 = arith.constant 0 : index
    %858 = vector.load %arg13[%c0_386, %c0_387, %c0_388] : memref<2x12x32xf32, #tpu.memory_space<vmem>>, vector<2x12x32xf32>
    %859 = vector.shape_cast %745 : vector<2x12xf32> to vector<2x12x1xf32>
    %860 = vector.broadcast %859 : vector<2x12x1xf32> to vector<2x12x32xf32>
    %861 = arith.mulf %860, %858 : vector<2x12x32xf32>
    %cst_389 = arith.constant dense<0.000000e+00> : vector<2x32xf32>
    %862 = vector.multi_reduction <add>, %861, %cst_389 [1] : vector<2x12x32xf32> to vector<2x32xf32>
    %cst_390 = arith.constant dense<0.000000e+00> : vector<2xf32>
    %863 = vector.multi_reduction <add>, %745, %cst_390 [1] : vector<2x12xf32> to vector<2xf32>
    %864 = vector.shape_cast %863 : vector<2xf32> to vector<2x1xf32>
    %cst_391 = arith.constant 1.000000e+00 : f32
    %865 = vector.broadcast %cst_391 : f32 to vector<2x1xf32>
    %866 = arith.addf %865, %864 : vector<2x1xf32>
    %c0_392 = arith.constant 0 : index
    %c0_393 = arith.constant 0 : index
    %867 = vector.load %arg18[%c0_392, %c0_393] : memref<2x32xf32, #tpu.memory_space<vmem>>, vector<2x32xf32>
    %868 = vector.broadcast %866 : vector<2x1xf32> to vector<2x32xf32>
    %869 = arith.divf %862, %868 : vector<2x32xf32>
    %870 = arith.subf %869, %867 : vector<2x32xf32>
    %871 = vector.broadcast %462 : vector<1x1xf32> to vector<2x32xf32>
    %872 = arith.mulf %871, %870 : vector<2x32xf32>
    %873 = arith.addf %867, %872 : vector<2x32xf32>
    %c0_394 = arith.constant 0 : index
    %c0_395 = arith.constant 0 : index
    %874 = vector.load %arg18[%c0_394, %c0_395] : memref<2x32xf32, #tpu.memory_space<vmem>>, vector<2x32xf32>
    tpu.vector_store %arg18[%c0_394, %c0_395], %873 {strides = array<i32>} : memref<2x32xf32, #tpu.memory_space<vmem>>, vector<2x32xf32>,
    %875 = vector.shape_cast %684 : vector<2x32xf32> to vector<2x1x32xf32>
    %c0_396 = arith.constant 0 : index
    %c9 = arith.constant 9 : index
    %c0_397 = arith.constant 0 : index
    %876 = vector.load %arg13[%c0_396, %c9, %c0_397] : memref<2x12x32xf32, #tpu.memory_space<vmem>>, vector<2x1x32xf32>
    tpu.vector_store %arg13[%c0_396, %c9, %c0_397], %875 {strides = array<i32>} : memref<2x12x32xf32, #tpu.memory_space<vmem>>, vector<2x1x32xf32>,
    %877 = vector.shape_cast %684 : vector<2x32xf32> to vector<2x1x32xf32>
    %c0_398 = arith.constant 0 : index
    %c9_399 = arith.constant 9 : index
    %c0_400 = arith.constant 0 : index
    %878 = vector.load %arg14[%c0_398, %c9_399, %c0_400] : memref<2x12x32xf32, #tpu.memory_space<vmem>>, vector<2x1x32xf32>
    tpu.vector_store %arg14[%c0_398, %c9_399, %c0_400], %877 {strides = array<i32>} : memref<2x12x32xf32, #tpu.memory_space<vmem>>, vector<2x1x32xf32>,
    %cst_401 = arith.constant 9.000000e+00 : f32
    %879 = vector.broadcast %cst_401 : f32 to vector<2x12xf32>
    %880 = arith.cmpf olt, %24, %879 : vector<2x12xf32>
    %cst_402 = arith.constant 1.000000e+00 : f32
    %881 = vector.broadcast %cst_402 : f32 to vector<2x12xf32>
    %882 = arith.select %880, %748, %881 : vector<2x12xi1>, vector<2x12xf32>
    %cst_403 = arith.constant dense<0x7F800000> : vector<2xf32>
    %883 = vector.multi_reduction <minimumf>, %882, %cst_403 [1] : vector<2x12xf32> to vector<2xf32>
    %884 = vector.shape_cast %883 : vector<2xf32> to vector<2x1xf32>
    %885 = vector.extract_strided_slice %884 {offsets = [0, 0], sizes = [1, 1], strides = [1, 1]} : vector<2x1xf32> to vector<1x1xf32>
    %886 = vector.extract_strided_slice %884 {offsets = [1, 0], sizes = [1, 1], strides = [1, 1]} : vector<2x1xf32> to vector<1x1xf32>
    %887 = arith.minimumf %885, %886 : vector<1x1xf32>
    %cst_404 = arith.constant 0.000000e+00 : f32
    %888 = vector.broadcast %cst_404 : f32 to vector<1x1xf32>
    %889 = arith.cmpf ogt, %887, %888 : vector<1x1xf32>
    %890 = arith.extui %889 : vector<1x1xi1> to vector<1x1xi32>
    %891 = arith.sitofp %890 : vector<1x1xi32> to vector<1x1xf32>
    %c0_405 = arith.constant 0 : index
    %c0_406 = arith.constant 0 : index
    %892 = vector.load %arg19[%c0_405, %c0_406] : memref<1x1xf32, #tpu.memory_space<vmem>>, vector<1x1xf32>
    %893 = arith.maximumf %892, %891 : vector<1x1xf32>
    %c0_407 = arith.constant 0 : index
    %c0_408 = arith.constant 0 : index
    %894 = vector.load %arg19[%c0_407, %c0_408] : memref<1x1xf32, #tpu.memory_space<vmem>>, vector<1x1xf32>
    tpu.vector_store %arg19[%c0_407, %c0_408], %893 {strides = array<i32>} : memref<1x1xf32, #tpu.memory_space<vmem>>, vector<1x1xf32>,
    %c0_409 = arith.constant 0 : index
    %c0_410 = arith.constant 0 : index
    %895 = vector.load %arg19[%c0_409, %c0_410] : memref<1x1xf32, #tpu.memory_space<vmem>>, vector<1x1xf32>
    %cst_411 = arith.constant 1.000000e+00 : f32
    %896 = vector.broadcast %cst_411 : f32 to vector<1x1xf32>
    %897 = arith.subf %896, %895 : vector<1x1xf32>
    %c2 = arith.constant 2 : index
    %c0_412 = arith.constant 0 : index
    %c0_413 = arith.constant 0 : index
    %898 = vector.load %arg10[%c2, %c0_412, %c0_413] : memref<4x2x2xf32, #tpu.memory_space<vmem>>, vector<1x2x2xf32>
    %899 = vector.shape_cast %898 : vector<1x2x2xf32> to vector<2x2xf32>
    %c0_414 = arith.constant 0 : index
    %c0_415 = arith.constant 0 : index
    %900 = vector.load %arg18[%c0_414, %c0_415] : memref<2x32xf32, #tpu.memory_space<vmem>>, vector<2x32xf32>
    %c0_416 = arith.constant 0 : index
    %c0_417 = arith.constant 0 : index
    %c0_418 = arith.constant 0 : index
    %901 = vector.load %arg15[%c0_416, %c0_417, %c0_418] : memref<2x2x32xf32, #tpu.memory_space<vmem>>, vector<1x2x32xf32>
    %902 = vector.shape_cast %901 : vector<1x2x32xf32> to vector<2x32xf32>
    %c0_419 = arith.constant 0 : index
    %c0_420 = arith.constant 0 : index
    %c0_421 = arith.constant 0 : index
    %903 = vector.load %arg16[%c0_419, %c0_420, %c0_421] : memref<2x2x32xf32, #tpu.memory_space<vmem>>, vector<1x2x32xf32>
    %904 = vector.shape_cast %903 : vector<1x2x32xf32> to vector<2x32xf32>
    %905 = tpu.concatenate %900, %902 in 1 : vector<2x32xf32>, vector<2x32xf32> -> vector<2x64xf32>
    %c0_422 = arith.constant 0 : index
    %c0_423 = arith.constant 0 : index
    %c0_424 = arith.constant 0 : index
    %906 = vector.load %arg8[%c0_422, %c0_423, %c0_424] : memref<2x64x128xf32, #tpu.memory_space<vmem>>, vector<1x64x128xf32>
    %907 = vector.shape_cast %906 : vector<1x64x128xf32> to vector<64x128xf32>
    %cst_425 = arith.constant dense<0.000000e+00> : vector<2x128xf32>
    %908 = tpu.matmul %905, %907, %cst_425 {dimension_numbers = #tpu.dot_dimension_numbers<[1], [0], [0], [1], [0, 0, 1, 1], [], []>} : vector<2x64xf32>, vector<64x128xf32>, vector<2x128xf32> -> vector<2x128xf32>
    %c0_426 = arith.constant 0 : index
    %c0_427 = arith.constant 0 : index
    %c0_428 = arith.constant 0 : index
    %909 = vector.load %arg9[%c0_426, %c0_427, %c0_428] : memref<2x1x128xf32, #tpu.memory_space<vmem>>, vector<1x1x128xf32>
    %910 = vector.shape_cast %909 : vector<1x1x128xf32> to vector<1x128xf32>
    %911 = vector.broadcast %910 : vector<1x128xf32> to vector<2x128xf32>
    %912 = arith.addf %908, %911 : vector<2x128xf32>
    %913 = vector.extract_strided_slice %912 {offsets = [0, 0], sizes = [2, 32], strides = [1, 1]} : vector<2x128xf32> to vector<2x32xf32>
    %cst_429 = arith.constant 5.000000e-01 : f32
    %914 = vector.broadcast %cst_429 : f32 to vector<2x32xf32>
    %915 = arith.mulf %914, %913 : vector<2x32xf32>
    %916 = math.tanh %915 : vector<2x32xf32>
    %cst_430 = arith.constant 1.000000e+00 : f32
    %917 = vector.broadcast %cst_430 : f32 to vector<2x32xf32>
    %918 = arith.addf %916, %917 : vector<2x32xf32>
    %cst_431 = arith.constant 5.000000e-01 : f32
    %919 = vector.broadcast %cst_431 : f32 to vector<2x32xf32>
    %920 = arith.mulf %919, %918 : vector<2x32xf32>
    %921 = vector.extract_strided_slice %912 {offsets = [0, 32], sizes = [2, 32], strides = [1, 1]} : vector<2x128xf32> to vector<2x32xf32>
    %cst_432 = arith.constant 5.000000e-01 : f32
    %922 = vector.broadcast %cst_432 : f32 to vector<2x32xf32>
    %923 = arith.mulf %922, %921 : vector<2x32xf32>
    %924 = math.tanh %923 : vector<2x32xf32>
    %cst_433 = arith.constant 1.000000e+00 : f32
    %925 = vector.broadcast %cst_433 : f32 to vector<2x32xf32>
    %926 = arith.addf %924, %925 : vector<2x32xf32>
    %cst_434 = arith.constant 5.000000e-01 : f32
    %927 = vector.broadcast %cst_434 : f32 to vector<2x32xf32>
    %928 = arith.mulf %927, %926 : vector<2x32xf32>
    %929 = vector.extract_strided_slice %912 {offsets = [0, 64], sizes = [2, 32], strides = [1, 1]} : vector<2x128xf32> to vector<2x32xf32>
    %930 = math.tanh %929 : vector<2x32xf32>
    %931 = vector.extract_strided_slice %912 {offsets = [0, 96], sizes = [2, 32], strides = [1, 1]} : vector<2x128xf32> to vector<2x32xf32>
    %cst_435 = arith.constant 5.000000e-01 : f32
    %932 = vector.broadcast %cst_435 : f32 to vector<2x32xf32>
    %933 = arith.mulf %932, %931 : vector<2x32xf32>
    %934 = math.tanh %933 : vector<2x32xf32>
    %cst_436 = arith.constant 1.000000e+00 : f32
    %935 = vector.broadcast %cst_436 : f32 to vector<2x32xf32>
    %936 = arith.addf %934, %935 : vector<2x32xf32>
    %cst_437 = arith.constant 5.000000e-01 : f32
    %937 = vector.broadcast %cst_437 : f32 to vector<2x32xf32>
    %938 = arith.mulf %937, %936 : vector<2x32xf32>
    %939 = arith.mulf %928, %904 : vector<2x32xf32>
    %940 = arith.mulf %920, %930 : vector<2x32xf32>
    %941 = arith.addf %939, %940 : vector<2x32xf32>
    %942 = math.tanh %941 : vector<2x32xf32>
    %943 = arith.mulf %938, %942 : vector<2x32xf32>
    %944 = arith.subf %943, %902 : vector<2x32xf32>
    %945 = vector.broadcast %897 : vector<1x1xf32> to vector<2x32xf32>
    %946 = arith.mulf %945, %944 : vector<2x32xf32>
    %947 = arith.addf %902, %946 : vector<2x32xf32>
    %c0_438 = arith.constant 0 : index
    %c0_439 = arith.constant 0 : index
    %c0_440 = arith.constant 0 : index
    %948 = vector.load %arg15[%c0_438, %c0_439, %c0_440] : memref<2x2x32xf32, #tpu.memory_space<vmem>>, vector<1x2x32xf32>
    %949 = vector.shape_cast %948 : vector<1x2x32xf32> to vector<2x32xf32>
    %950 = vector.shape_cast %947 : vector<2x32xf32> to vector<1x2x32xf32>
    tpu.vector_store %arg15[%c0_438, %c0_439, %c0_440], %950 {strides = array<i32>} : memref<2x2x32xf32, #tpu.memory_space<vmem>>, vector<1x2x32xf32>,
    %951 = arith.subf %941, %904 : vector<2x32xf32>
    %952 = vector.broadcast %897 : vector<1x1xf32> to vector<2x32xf32>
    %953 = arith.mulf %952, %951 : vector<2x32xf32>
    %954 = arith.addf %904, %953 : vector<2x32xf32>
    %c0_441 = arith.constant 0 : index
    %c0_442 = arith.constant 0 : index
    %c0_443 = arith.constant 0 : index
    %955 = vector.load %arg16[%c0_441, %c0_442, %c0_443] : memref<2x2x32xf32, #tpu.memory_space<vmem>>, vector<1x2x32xf32>
    %956 = vector.shape_cast %955 : vector<1x2x32xf32> to vector<2x32xf32>
    %957 = vector.shape_cast %954 : vector<2x32xf32> to vector<1x2x32xf32>
    tpu.vector_store %arg16[%c0_441, %c0_442, %c0_443], %957 {strides = array<i32>} : memref<2x2x32xf32, #tpu.memory_space<vmem>>, vector<1x2x32xf32>,
    %c1_444 = arith.constant 1 : index
    %c0_445 = arith.constant 0 : index
    %c0_446 = arith.constant 0 : index
    %958 = vector.load %arg15[%c1_444, %c0_445, %c0_446] : memref<2x2x32xf32, #tpu.memory_space<vmem>>, vector<1x2x32xf32>
    %959 = vector.shape_cast %958 : vector<1x2x32xf32> to vector<2x32xf32>
    %c1_447 = arith.constant 1 : index
    %c0_448 = arith.constant 0 : index
    %c0_449 = arith.constant 0 : index
    %960 = vector.load %arg16[%c1_447, %c0_448, %c0_449] : memref<2x2x32xf32, #tpu.memory_space<vmem>>, vector<1x2x32xf32>
    %961 = vector.shape_cast %960 : vector<1x2x32xf32> to vector<2x32xf32>
    %962 = tpu.concatenate %943, %959 in 1 : vector<2x32xf32>, vector<2x32xf32> -> vector<2x64xf32>
    %c1_450 = arith.constant 1 : index
    %c0_451 = arith.constant 0 : index
    %c0_452 = arith.constant 0 : index
    %963 = vector.load %arg8[%c1_450, %c0_451, %c0_452] : memref<2x64x128xf32, #tpu.memory_space<vmem>>, vector<1x64x128xf32>
    %964 = vector.shape_cast %963 : vector<1x64x128xf32> to vector<64x128xf32>
    %cst_453 = arith.constant dense<0.000000e+00> : vector<2x128xf32>
    %965 = tpu.matmul %962, %964, %cst_453 {dimension_numbers = #tpu.dot_dimension_numbers<[1], [0], [0], [1], [0, 0, 1, 1], [], []>} : vector<2x64xf32>, vector<64x128xf32>, vector<2x128xf32> -> vector<2x128xf32>
    %c1_454 = arith.constant 1 : index
    %c0_455 = arith.constant 0 : index
    %c0_456 = arith.constant 0 : index
    %966 = vector.load %arg9[%c1_454, %c0_455, %c0_456] : memref<2x1x128xf32, #tpu.memory_space<vmem>>, vector<1x1x128xf32>
    %967 = vector.shape_cast %966 : vector<1x1x128xf32> to vector<1x128xf32>
    %968 = vector.broadcast %967 : vector<1x128xf32> to vector<2x128xf32>
    %969 = arith.addf %965, %968 : vector<2x128xf32>
    %970 = vector.extract_strided_slice %969 {offsets = [0, 0], sizes = [2, 32], strides = [1, 1]} : vector<2x128xf32> to vector<2x32xf32>
    %cst_457 = arith.constant 5.000000e-01 : f32
    %971 = vector.broadcast %cst_457 : f32 to vector<2x32xf32>
    %972 = arith.mulf %971, %970 : vector<2x32xf32>
    %973 = math.tanh %972 : vector<2x32xf32>
    %cst_458 = arith.constant 1.000000e+00 : f32
    %974 = vector.broadcast %cst_458 : f32 to vector<2x32xf32>
    %975 = arith.addf %973, %974 : vector<2x32xf32>
    %cst_459 = arith.constant 5.000000e-01 : f32
    %976 = vector.broadcast %cst_459 : f32 to vector<2x32xf32>
    %977 = arith.mulf %976, %975 : vector<2x32xf32>
    %978 = vector.extract_strided_slice %969 {offsets = [0, 32], sizes = [2, 32], strides = [1, 1]} : vector<2x128xf32> to vector<2x32xf32>
    %cst_460 = arith.constant 5.000000e-01 : f32
    %979 = vector.broadcast %cst_460 : f32 to vector<2x32xf32>
    %980 = arith.mulf %979, %978 : vector<2x32xf32>
    %981 = math.tanh %980 : vector<2x32xf32>
    %cst_461 = arith.constant 1.000000e+00 : f32
    %982 = vector.broadcast %cst_461 : f32 to vector<2x32xf32>
    %983 = arith.addf %981, %982 : vector<2x32xf32>
    %cst_462 = arith.constant 5.000000e-01 : f32
    %984 = vector.broadcast %cst_462 : f32 to vector<2x32xf32>
    %985 = arith.mulf %984, %983 : vector<2x32xf32>
    %986 = vector.extract_strided_slice %969 {offsets = [0, 64], sizes = [2, 32], strides = [1, 1]} : vector<2x128xf32> to vector<2x32xf32>
    %987 = math.tanh %986 : vector<2x32xf32>
    %988 = vector.extract_strided_slice %969 {offsets = [0, 96], sizes = [2, 32], strides = [1, 1]} : vector<2x128xf32> to vector<2x32xf32>
    %cst_463 = arith.constant 5.000000e-01 : f32
    %989 = vector.broadcast %cst_463 : f32 to vector<2x32xf32>
    %990 = arith.mulf %989, %988 : vector<2x32xf32>
    %991 = math.tanh %990 : vector<2x32xf32>
    %cst_464 = arith.constant 1.000000e+00 : f32
    %992 = vector.broadcast %cst_464 : f32 to vector<2x32xf32>
    %993 = arith.addf %991, %992 : vector<2x32xf32>
    %cst_465 = arith.constant 5.000000e-01 : f32
    %994 = vector.broadcast %cst_465 : f32 to vector<2x32xf32>
    %995 = arith.mulf %994, %993 : vector<2x32xf32>
    %996 = arith.mulf %985, %961 : vector<2x32xf32>
    %997 = arith.mulf %977, %987 : vector<2x32xf32>
    %998 = arith.addf %996, %997 : vector<2x32xf32>
    %999 = math.tanh %998 : vector<2x32xf32>
    %1000 = arith.mulf %995, %999 : vector<2x32xf32>
    %1001 = arith.subf %1000, %959 : vector<2x32xf32>
    %1002 = vector.broadcast %897 : vector<1x1xf32> to vector<2x32xf32>
    %1003 = arith.mulf %1002, %1001 : vector<2x32xf32>
    %1004 = arith.addf %959, %1003 : vector<2x32xf32>
    %c1_466 = arith.constant 1 : index
    %c0_467 = arith.constant 0 : index
    %c0_468 = arith.constant 0 : index
    %1005 = vector.load %arg15[%c1_466, %c0_467, %c0_468] : memref<2x2x32xf32, #tpu.memory_space<vmem>>, vector<1x2x32xf32>
    %1006 = vector.shape_cast %1005 : vector<1x2x32xf32> to vector<2x32xf32>
    %1007 = vector.shape_cast %1004 : vector<2x32xf32> to vector<1x2x32xf32>
    tpu.vector_store %arg15[%c1_466, %c0_467, %c0_468], %1007 {strides = array<i32>} : memref<2x2x32xf32, #tpu.memory_space<vmem>>, vector<1x2x32xf32>,
    %1008 = arith.subf %998, %961 : vector<2x32xf32>
    %1009 = vector.broadcast %897 : vector<1x1xf32> to vector<2x32xf32>
    %1010 = arith.mulf %1009, %1008 : vector<2x32xf32>
    %1011 = arith.addf %961, %1010 : vector<2x32xf32>
    %c1_469 = arith.constant 1 : index
    %c0_470 = arith.constant 0 : index
    %c0_471 = arith.constant 0 : index
    %1012 = vector.load %arg16[%c1_469, %c0_470, %c0_471] : memref<2x2x32xf32, #tpu.memory_space<vmem>>, vector<1x2x32xf32>
    %1013 = vector.shape_cast %1012 : vector<1x2x32xf32> to vector<2x32xf32>
    %1014 = vector.shape_cast %1011 : vector<2x32xf32> to vector<1x2x32xf32>
    tpu.vector_store %arg16[%c1_469, %c0_470, %c0_471], %1014 {strides = array<i32>} : memref<2x2x32xf32, #tpu.memory_space<vmem>>, vector<1x2x32xf32>,
    %c0_472 = arith.constant 0 : index
    %c0_473 = arith.constant 0 : index
    %1015 = vector.load %arg5[%c0_472, %c0_473] : memref<32x2xf32, #tpu.memory_space<vmem>>, vector<32x2xf32>
    %cst_474 = arith.constant dense<0.000000e+00> : vector<2x2xf32>
    %1016 = tpu.matmul %1000, %1015, %cst_474 {dimension_numbers = #tpu.dot_dimension_numbers<[1], [0], [0], [1], [0, 0, 1, 1], [], []>} : vector<2x32xf32>, vector<32x2xf32>, vector<2x2xf32> -> vector<2x2xf32>
    %1017 = math.tanh %1016 : vector<2x2xf32>
    %cst_475 = arith.constant 2.500000e+00 : f32
    %1018 = vector.broadcast %cst_475 : f32 to vector<2x2xf32>
    %1019 = arith.mulf %1018, %1017 : vector<2x2xf32>
    %1020 = vector.extract_strided_slice %1019 {offsets = [0, 0], sizes = [2, 1], strides = [1, 1]} : vector<2x2xf32> to vector<2x1xf32>
    %1021 = vector.extract_strided_slice %1019 {offsets = [0, 1], sizes = [2, 1], strides = [1, 1]} : vector<2x2xf32> to vector<2x1xf32>
    %1022 = arith.maximumf %1020, %1021 : vector<2x1xf32>
    %1023 = arith.subf %1020, %1022 : vector<2x1xf32>
    %1024 = math.exp %1023 : vector<2x1xf32>
    %1025 = arith.subf %1021, %1022 : vector<2x1xf32>
    %1026 = math.exp %1025 : vector<2x1xf32>
    %1027 = arith.addf %1024, %1026 : vector<2x1xf32>
    %1028 = math.log %1027 : vector<2x1xf32>
    %1029 = arith.addf %1022, %1028 : vector<2x1xf32>
    %1030 = arith.cmpf ogt, %1021, %1020 : vector<2x1xf32>
    %1031 = arith.extui %1030 : vector<2x1xi1> to vector<2x1xi32>
    %1032 = arith.sitofp %1031 : vector<2x1xi32> to vector<2x1xf32>
    %1033 = arith.subf %1022, %1029 : vector<2x1xf32>
    %c0_476 = arith.constant 0 : index
    %c0_477 = arith.constant 0 : index
    %1034 = vector.load %arg4[%c0_476, %c0_477] : memref<2x32xf32, #tpu.memory_space<vmem>>, vector<1x32xf32>
    %c1_478 = arith.constant 1 : index
    %c0_479 = arith.constant 0 : index
    %1035 = vector.load %arg4[%c1_478, %c0_479] : memref<2x32xf32, #tpu.memory_space<vmem>>, vector<1x32xf32>
    %1036 = arith.subf %1035, %1034 : vector<1x32xf32>
    %1037 = vector.broadcast %1032 : vector<2x1xf32> to vector<2x32xf32>
    %1038 = vector.broadcast %1036 : vector<1x32xf32> to vector<2x32xf32>
    %1039 = arith.mulf %1037, %1038 : vector<2x32xf32>
    %1040 = vector.broadcast %1034 : vector<1x32xf32> to vector<2x32xf32>
    %1041 = arith.addf %1040, %1039 : vector<2x32xf32>
    %1042 = tpu.concatenate %1041, %943 in 1 : vector<2x32xf32>, vector<2x32xf32> -> vector<2x64xf32>
    %c0_480 = arith.constant 0 : index
    %c0_481 = arith.constant 0 : index
    %c0_482 = arith.constant 0 : index
    %1043 = vector.load %arg8[%c0_480, %c0_481, %c0_482] : memref<2x64x128xf32, #tpu.memory_space<vmem>>, vector<1x64x128xf32>
    %1044 = vector.shape_cast %1043 : vector<1x64x128xf32> to vector<64x128xf32>
    %cst_483 = arith.constant dense<0.000000e+00> : vector<2x128xf32>
    %1045 = tpu.matmul %1042, %1044, %cst_483 {dimension_numbers = #tpu.dot_dimension_numbers<[1], [0], [0], [1], [0, 0, 1, 1], [], []>} : vector<2x64xf32>, vector<64x128xf32>, vector<2x128xf32> -> vector<2x128xf32>
    %c0_484 = arith.constant 0 : index
    %c0_485 = arith.constant 0 : index
    %c0_486 = arith.constant 0 : index
    %1046 = vector.load %arg9[%c0_484, %c0_485, %c0_486] : memref<2x1x128xf32, #tpu.memory_space<vmem>>, vector<1x1x128xf32>
    %1047 = vector.shape_cast %1046 : vector<1x1x128xf32> to vector<1x128xf32>
    %1048 = vector.broadcast %1047 : vector<1x128xf32> to vector<2x128xf32>
    %1049 = arith.addf %1045, %1048 : vector<2x128xf32>
    %1050 = vector.extract_strided_slice %1049 {offsets = [0, 0], sizes = [2, 32], strides = [1, 1]} : vector<2x128xf32> to vector<2x32xf32>
    %cst_487 = arith.constant 5.000000e-01 : f32
    %1051 = vector.broadcast %cst_487 : f32 to vector<2x32xf32>
    %1052 = arith.mulf %1051, %1050 : vector<2x32xf32>
    %1053 = math.tanh %1052 : vector<2x32xf32>
    %cst_488 = arith.constant 1.000000e+00 : f32
    %1054 = vector.broadcast %cst_488 : f32 to vector<2x32xf32>
    %1055 = arith.addf %1053, %1054 : vector<2x32xf32>
    %cst_489 = arith.constant 5.000000e-01 : f32
    %1056 = vector.broadcast %cst_489 : f32 to vector<2x32xf32>
    %1057 = arith.mulf %1056, %1055 : vector<2x32xf32>
    %1058 = vector.extract_strided_slice %1049 {offsets = [0, 32], sizes = [2, 32], strides = [1, 1]} : vector<2x128xf32> to vector<2x32xf32>
    %cst_490 = arith.constant 5.000000e-01 : f32
    %1059 = vector.broadcast %cst_490 : f32 to vector<2x32xf32>
    %1060 = arith.mulf %1059, %1058 : vector<2x32xf32>
    %1061 = math.tanh %1060 : vector<2x32xf32>
    %cst_491 = arith.constant 1.000000e+00 : f32
    %1062 = vector.broadcast %cst_491 : f32 to vector<2x32xf32>
    %1063 = arith.addf %1061, %1062 : vector<2x32xf32>
    %cst_492 = arith.constant 5.000000e-01 : f32
    %1064 = vector.broadcast %cst_492 : f32 to vector<2x32xf32>
    %1065 = arith.mulf %1064, %1063 : vector<2x32xf32>
    %1066 = vector.extract_strided_slice %1049 {offsets = [0, 64], sizes = [2, 32], strides = [1, 1]} : vector<2x128xf32> to vector<2x32xf32>
    %1067 = math.tanh %1066 : vector<2x32xf32>
    %1068 = vector.extract_strided_slice %1049 {offsets = [0, 96], sizes = [2, 32], strides = [1, 1]} : vector<2x128xf32> to vector<2x32xf32>
    %cst_493 = arith.constant 5.000000e-01 : f32
    %1069 = vector.broadcast %cst_493 : f32 to vector<2x32xf32>
    %1070 = arith.mulf %1069, %1068 : vector<2x32xf32>
    %1071 = math.tanh %1070 : vector<2x32xf32>
    %cst_494 = arith.constant 1.000000e+00 : f32
    %1072 = vector.broadcast %cst_494 : f32 to vector<2x32xf32>
    %1073 = arith.addf %1071, %1072 : vector<2x32xf32>
    %cst_495 = arith.constant 5.000000e-01 : f32
    %1074 = vector.broadcast %cst_495 : f32 to vector<2x32xf32>
    %1075 = arith.mulf %1074, %1073 : vector<2x32xf32>
    %1076 = arith.mulf %1065, %941 : vector<2x32xf32>
    %1077 = arith.mulf %1057, %1067 : vector<2x32xf32>
    %1078 = arith.addf %1076, %1077 : vector<2x32xf32>
    %1079 = math.tanh %1078 : vector<2x32xf32>
    %1080 = arith.mulf %1075, %1079 : vector<2x32xf32>
    %1081 = tpu.concatenate %1080, %1000 in 1 : vector<2x32xf32>, vector<2x32xf32> -> vector<2x64xf32>
    %c1_496 = arith.constant 1 : index
    %c0_497 = arith.constant 0 : index
    %c0_498 = arith.constant 0 : index
    %1082 = vector.load %arg8[%c1_496, %c0_497, %c0_498] : memref<2x64x128xf32, #tpu.memory_space<vmem>>, vector<1x64x128xf32>
    %1083 = vector.shape_cast %1082 : vector<1x64x128xf32> to vector<64x128xf32>
    %cst_499 = arith.constant dense<0.000000e+00> : vector<2x128xf32>
    %1084 = tpu.matmul %1081, %1083, %cst_499 {dimension_numbers = #tpu.dot_dimension_numbers<[1], [0], [0], [1], [0, 0, 1, 1], [], []>} : vector<2x64xf32>, vector<64x128xf32>, vector<2x128xf32> -> vector<2x128xf32>
    %c1_500 = arith.constant 1 : index
    %c0_501 = arith.constant 0 : index
    %c0_502 = arith.constant 0 : index
    %1085 = vector.load %arg9[%c1_500, %c0_501, %c0_502] : memref<2x1x128xf32, #tpu.memory_space<vmem>>, vector<1x1x128xf32>
    %1086 = vector.shape_cast %1085 : vector<1x1x128xf32> to vector<1x128xf32>
    %1087 = vector.broadcast %1086 : vector<1x128xf32> to vector<2x128xf32>
    %1088 = arith.addf %1084, %1087 : vector<2x128xf32>
    %1089 = vector.extract_strided_slice %1088 {offsets = [0, 0], sizes = [2, 32], strides = [1, 1]} : vector<2x128xf32> to vector<2x32xf32>
    %cst_503 = arith.constant 5.000000e-01 : f32
    %1090 = vector.broadcast %cst_503 : f32 to vector<2x32xf32>
    %1091 = arith.mulf %1090, %1089 : vector<2x32xf32>
    %1092 = math.tanh %1091 : vector<2x32xf32>
    %cst_504 = arith.constant 1.000000e+00 : f32
    %1093 = vector.broadcast %cst_504 : f32 to vector<2x32xf32>
    %1094 = arith.addf %1092, %1093 : vector<2x32xf32>
    %cst_505 = arith.constant 5.000000e-01 : f32
    %1095 = vector.broadcast %cst_505 : f32 to vector<2x32xf32>
    %1096 = arith.mulf %1095, %1094 : vector<2x32xf32>
    %1097 = vector.extract_strided_slice %1088 {offsets = [0, 32], sizes = [2, 32], strides = [1, 1]} : vector<2x128xf32> to vector<2x32xf32>
    %cst_506 = arith.constant 5.000000e-01 : f32
    %1098 = vector.broadcast %cst_506 : f32 to vector<2x32xf32>
    %1099 = arith.mulf %1098, %1097 : vector<2x32xf32>
    %1100 = math.tanh %1099 : vector<2x32xf32>
    %cst_507 = arith.constant 1.000000e+00 : f32
    %1101 = vector.broadcast %cst_507 : f32 to vector<2x32xf32>
    %1102 = arith.addf %1100, %1101 : vector<2x32xf32>
    %cst_508 = arith.constant 5.000000e-01 : f32
    %1103 = vector.broadcast %cst_508 : f32 to vector<2x32xf32>
    %1104 = arith.mulf %1103, %1102 : vector<2x32xf32>
    %1105 = vector.extract_strided_slice %1088 {offsets = [0, 64], sizes = [2, 32], strides = [1, 1]} : vector<2x128xf32> to vector<2x32xf32>
    %1106 = math.tanh %1105 : vector<2x32xf32>
    %1107 = vector.extract_strided_slice %1088 {offsets = [0, 96], sizes = [2, 32], strides = [1, 1]} : vector<2x128xf32> to vector<2x32xf32>
    %cst_509 = arith.constant 5.000000e-01 : f32
    %1108 = vector.broadcast %cst_509 : f32 to vector<2x32xf32>
    %1109 = arith.mulf %1108, %1107 : vector<2x32xf32>
    %1110 = math.tanh %1109 : vector<2x32xf32>
    %cst_510 = arith.constant 1.000000e+00 : f32
    %1111 = vector.broadcast %cst_510 : f32 to vector<2x32xf32>
    %1112 = arith.addf %1110, %1111 : vector<2x32xf32>
    %cst_511 = arith.constant 5.000000e-01 : f32
    %1113 = vector.broadcast %cst_511 : f32 to vector<2x32xf32>
    %1114 = arith.mulf %1113, %1112 : vector<2x32xf32>
    %1115 = arith.mulf %1104, %998 : vector<2x32xf32>
    %1116 = arith.mulf %1096, %1106 : vector<2x32xf32>
    %1117 = arith.addf %1115, %1116 : vector<2x32xf32>
    %1118 = math.tanh %1117 : vector<2x32xf32>
    %1119 = arith.mulf %1114, %1118 : vector<2x32xf32>
    %c0_512 = arith.constant 0 : index
    %c0_513 = arith.constant 0 : index
    %1120 = vector.load %arg6[%c0_512, %c0_513] : memref<32x32xf32, #tpu.memory_space<vmem>>, vector<32x32xf32>
    %cst_514 = arith.constant dense<0.000000e+00> : vector<2x32xf32>
    %1121 = tpu.matmul %1119, %1120, %cst_514 {dimension_numbers = #tpu.dot_dimension_numbers<[1], [0], [0], [1], [0, 0, 1, 1], [], []>} : vector<2x32xf32>, vector<32x32xf32>, vector<2x32xf32> -> vector<2x32xf32>
    %c0_515 = arith.constant 0 : index
    %c0_516 = arith.constant 0 : index
    %c0_517 = arith.constant 0 : index
    %1122 = vector.load %arg14[%c0_515, %c0_516, %c0_517] : memref<2x12x32xf32, #tpu.memory_space<vmem>>, vector<2x12x32xf32>
    %1123 = vector.shape_cast %1121 : vector<2x32xf32> to vector<2x1x32xf32>
    %1124 = vector.broadcast %1123 : vector<2x1x32xf32> to vector<2x12x32xf32>
    %1125 = arith.addf %1122, %1124 : vector<2x12x32xf32>
    %1126 = math.tanh %1125 : vector<2x12x32xf32>
    %c0_518 = arith.constant 0 : index
    %c0_519 = arith.constant 0 : index
    %c0_520 = arith.constant 0 : index
    %1127 = vector.load %arg7[%c0_518, %c0_519, %c0_520] : memref<1x1x32xf32, #tpu.memory_space<vmem>>, vector<1x1x32xf32>
    %1128 = vector.broadcast %1127 : vector<1x1x32xf32> to vector<2x12x32xf32>
    %1129 = arith.mulf %1126, %1128 : vector<2x12x32xf32>
    %cst_521 = arith.constant dense<0.000000e+00> : vector<2x12xf32>
    %1130 = vector.multi_reduction <add>, %1129, %cst_521 [2] : vector<2x12x32xf32> to vector<2x12xf32>
    %1131 = math.tanh %1130 : vector<2x12xf32>
    %cst_522 = arith.constant 2.500000e+00 : f32
    %1132 = vector.broadcast %cst_522 : f32 to vector<2x12xf32>
    %1133 = arith.mulf %1132, %1131 : vector<2x12xf32>
    %c0_523 = arith.constant 0 : index
    %c0_524 = arith.constant 0 : index
    %1134 = vector.load %arg17[%c0_523, %c0_524] : memref<2x12xf32, #tpu.memory_space<vmem>>, vector<2x12xf32>
    %cst_525 = arith.constant 1.000000e+01 : f32
    %1135 = vector.broadcast %cst_525 : f32 to vector<2x12xf32>
    %1136 = arith.cmpf olt, %24, %1135 : vector<2x12xf32>
    %cst_526 = arith.constant 0.000000e+00 : f32
    %1137 = vector.broadcast %cst_526 : f32 to vector<2x12xf32>
    %1138 = arith.cmpf ogt, %1134, %1137 : vector<2x12xf32>
    %cst_527 = arith.constant -1.000000e+02 : f32
    %cst_528 = arith.constant 0.000000e+00 : f32
    %1139 = vector.broadcast %cst_527 : f32 to vector<2x12xf32>
    %1140 = vector.broadcast %cst_528 : f32 to vector<2x12xf32>
    %1141 = arith.select %1138, %1139, %1140 : vector<2x12xi1>, vector<2x12xf32>
    %cst_529 = arith.constant -1.000000e+30 : f32
    %1142 = vector.broadcast %cst_529 : f32 to vector<2x12xf32>
    %1143 = arith.select %1136, %1141, %1142 : vector<2x12xi1>, vector<2x12xf32>
    %1144 = arith.addf %1133, %1143 : vector<2x12xf32>
    %cst_530 = arith.constant dense<0xFF800000> : vector<2xf32>
    %1145 = vector.multi_reduction <maximumf>, %1144, %cst_530 [1] : vector<2x12xf32> to vector<2xf32>
    %1146 = vector.shape_cast %1145 : vector<2xf32> to vector<2x1xf32>
    %1147 = vector.broadcast %1146 : vector<2x1xf32> to vector<2x12xf32>
    %1148 = arith.subf %1144, %1147 : vector<2x12xf32>
    %1149 = math.exp %1148 : vector<2x12xf32>
    %cst_531 = arith.constant dense<0.000000e+00> : vector<2xf32>
    %1150 = vector.multi_reduction <add>, %1149, %cst_531 [1] : vector<2x12xf32> to vector<2xf32>
    %1151 = vector.shape_cast %1150 : vector<2xf32> to vector<2x1xf32>
    %1152 = math.log %1151 : vector<2x1xf32>
    %1153 = arith.addf %1146, %1152 : vector<2x1xf32>
    %1154 = vector.broadcast %1146 : vector<2x1xf32> to vector<2x12xf32>
    %1155 = arith.cmpf oeq, %1144, %1154 : vector<2x12xf32>
    %cst_532 = arith.constant 1.000000e+09 : f32
    %1156 = vector.broadcast %cst_532 : f32 to vector<2x12xf32>
    %1157 = arith.select %1155, %24, %1156 : vector<2x12xi1>, vector<2x12xf32>
    %cst_533 = arith.constant dense<0x7F800000> : vector<2xf32>
    %1158 = vector.multi_reduction <minimumf>, %1157, %cst_533 [1] : vector<2x12xf32> to vector<2xf32>
    %1159 = vector.shape_cast %1158 : vector<2xf32> to vector<2x1xf32>
    %1160 = vector.broadcast %1159 : vector<2x1xf32> to vector<2x12xf32>
    %1161 = arith.cmpf oeq, %24, %1160 : vector<2x12xf32>
    %cst_534 = arith.constant -3.000000e+38 : f32
    %1162 = vector.broadcast %cst_534 : f32 to vector<2x12xf32>
    %1163 = arith.select %1161, %1162, %1144 : vector<2x12xi1>, vector<2x12xf32>
    %cst_535 = arith.constant dense<0xFF800000> : vector<2xf32>
    %1164 = vector.multi_reduction <maximumf>, %1163, %cst_535 [1] : vector<2x12xf32> to vector<2xf32>
    %1165 = vector.shape_cast %1164 : vector<2xf32> to vector<2x1xf32>
    %1166 = vector.broadcast %1165 : vector<2x1xf32> to vector<2x12xf32>
    %1167 = arith.cmpf oeq, %1163, %1166 : vector<2x12xf32>
    %cst_536 = arith.constant 1.000000e+09 : f32
    %1168 = vector.broadcast %cst_536 : f32 to vector<2x12xf32>
    %1169 = arith.select %1167, %24, %1168 : vector<2x12xi1>, vector<2x12xf32>
    %cst_537 = arith.constant dense<0x7F800000> : vector<2xf32>
    %1170 = vector.multi_reduction <minimumf>, %1169, %cst_537 [1] : vector<2x12xf32> to vector<2xf32>
    %1171 = vector.shape_cast %1170 : vector<2xf32> to vector<2x1xf32>
    %1172 = vector.broadcast %1159 : vector<2x1xf32> to vector<2x12xf32>
    %1173 = arith.cmpf oeq, %24, %1172 : vector<2x12xf32>
    %1174 = arith.extui %1173 : vector<2x12xi1> to vector<2x12xi32>
    %1175 = arith.sitofp %1174 : vector<2x12xi32> to vector<2x12xf32>
    %1176 = vector.broadcast %1171 : vector<2x1xf32> to vector<2x12xf32>
    %1177 = arith.cmpf oeq, %24, %1176 : vector<2x12xf32>
    %1178 = arith.extui %1177 : vector<2x12xi1> to vector<2x12xi32>
    %1179 = arith.sitofp %1178 : vector<2x12xi32> to vector<2x12xf32>
    %1180 = arith.addf %1175, %1179 : vector<2x12xf32>
    %1181 = vector.broadcast %897 : vector<1x1xf32> to vector<2x12xf32>
    %1182 = arith.mulf %1181, %1180 : vector<2x12xf32>
    %1183 = arith.addf %1134, %1182 : vector<2x12xf32>
    %c0_538 = arith.constant 0 : index
    %c0_539 = arith.constant 0 : index
    %1184 = vector.load %arg17[%c0_538, %c0_539] : memref<2x12xf32, #tpu.memory_space<vmem>>, vector<2x12xf32>
    tpu.vector_store %arg17[%c0_538, %c0_539], %1183 {strides = array<i32>} : memref<2x12xf32, #tpu.memory_space<vmem>>, vector<2x12xf32>,
    %1185 = vector.extract_strided_slice %899 {offsets = [0, 0], sizes = [2, 1], strides = [1, 1]} : vector<2x2xf32> to vector<2x1xf32>
    %cst_540 = arith.constant 2.000000e+00 : f32
    %1186 = vector.broadcast %cst_540 : f32 to vector<2x1xf32>
    %1187 = arith.mulf %1186, %1146 : vector<2x1xf32>
    %cst_541 = arith.constant 5.000000e-01 : f32
    %1188 = vector.broadcast %cst_541 : f32 to vector<2x1xf32>
    %1189 = arith.mulf %1188, %1187 : vector<2x1xf32>
    %1190 = math.tanh %1189 : vector<2x1xf32>
    %cst_542 = arith.constant 1.000000e+00 : f32
    %1191 = vector.broadcast %cst_542 : f32 to vector<2x1xf32>
    %1192 = arith.addf %1190, %1191 : vector<2x1xf32>
    %cst_543 = arith.constant 5.000000e-01 : f32
    %1193 = vector.broadcast %cst_543 : f32 to vector<2x1xf32>
    %1194 = arith.mulf %1193, %1192 : vector<2x1xf32>
    %1195 = math.absf %1146 : vector<2x1xf32>
    %cst_544 = arith.constant -2.000000e+00 : f32
    %1196 = vector.broadcast %cst_544 : f32 to vector<2x1xf32>
    %1197 = arith.mulf %1196, %1195 : vector<2x1xf32>
    %1198 = math.exp %1197 : vector<2x1xf32>
    %cst_545 = arith.constant 1.000000e+00 : f32
    %1199 = vector.broadcast %cst_545 : f32 to vector<2x1xf32>
    %1200 = arith.addf %1199, %1198 : vector<2x1xf32>
    %1201 = math.log %1200 : vector<2x1xf32>
    %1202 = arith.addf %1195, %1201 : vector<2x1xf32>
    %1203 = arith.subf %1146, %1202 : vector<2x1xf32>
    %cst_546 = arith.constant 0.000000e+00 : f32
    %1204 = vector.broadcast %cst_546 : f32 to vector<2x1xf32>
    %1205 = arith.subf %1204, %1146 : vector<2x1xf32>
    %1206 = arith.subf %1205, %1202 : vector<2x1xf32>
    %1207 = arith.cmpf olt, %1185, %1194 : vector<2x1xf32>
    %1208 = arith.extui %1207 : vector<2x1xi1> to vector<2x1xi32>
    %1209 = arith.sitofp %1208 : vector<2x1xi32> to vector<2x1xf32>
    %1210 = arith.mulf %1209, %1203 : vector<2x1xf32>
    %cst_547 = arith.constant 1.000000e+00 : f32
    %1211 = vector.broadcast %cst_547 : f32 to vector<2x1xf32>
    %1212 = arith.subf %1211, %1209 : vector<2x1xf32>
    %1213 = arith.mulf %1212, %1206 : vector<2x1xf32>
    %1214 = arith.addf %1210, %1213 : vector<2x1xf32>
    %cst_548 = arith.constant 1.000000e+00 : f32
    %1215 = vector.broadcast %cst_548 : f32 to vector<2x1xf32>
    %1216 = arith.subf %1215, %1194 : vector<2x1xf32>
    %1217 = arith.mulf %1216, %1206 : vector<2x1xf32>
    %1218 = arith.mulf %1194, %1203 : vector<2x1xf32>
    %1219 = arith.addf %1217, %1218 : vector<2x1xf32>
    %cst_549 = arith.constant 0.000000e+00 : f32
    %1220 = vector.broadcast %cst_549 : f32 to vector<2x1xf32>
    %1221 = arith.subf %1220, %1219 : vector<2x1xf32>
    %1222 = vector.extract_strided_slice %899 {offsets = [0, 1], sizes = [2, 1], strides = [1, 1]} : vector<2x2xf32> to vector<2x1xf32>
    %cst_550 = arith.constant 2.000000e+00 : f32
    %1223 = vector.broadcast %cst_550 : f32 to vector<2x1xf32>
    %1224 = arith.mulf %1223, %1165 : vector<2x1xf32>
    %cst_551 = arith.constant 5.000000e-01 : f32
    %1225 = vector.broadcast %cst_551 : f32 to vector<2x1xf32>
    %1226 = arith.mulf %1225, %1224 : vector<2x1xf32>
    %1227 = math.tanh %1226 : vector<2x1xf32>
    %cst_552 = arith.constant 1.000000e+00 : f32
    %1228 = vector.broadcast %cst_552 : f32 to vector<2x1xf32>
    %1229 = arith.addf %1227, %1228 : vector<2x1xf32>
    %cst_553 = arith.constant 5.000000e-01 : f32
    %1230 = vector.broadcast %cst_553 : f32 to vector<2x1xf32>
    %1231 = arith.mulf %1230, %1229 : vector<2x1xf32>
    %1232 = math.absf %1165 : vector<2x1xf32>
    %cst_554 = arith.constant -2.000000e+00 : f32
    %1233 = vector.broadcast %cst_554 : f32 to vector<2x1xf32>
    %1234 = arith.mulf %1233, %1232 : vector<2x1xf32>
    %1235 = math.exp %1234 : vector<2x1xf32>
    %cst_555 = arith.constant 1.000000e+00 : f32
    %1236 = vector.broadcast %cst_555 : f32 to vector<2x1xf32>
    %1237 = arith.addf %1236, %1235 : vector<2x1xf32>
    %1238 = math.log %1237 : vector<2x1xf32>
    %1239 = arith.addf %1232, %1238 : vector<2x1xf32>
    %1240 = arith.subf %1165, %1239 : vector<2x1xf32>
    %cst_556 = arith.constant 0.000000e+00 : f32
    %1241 = vector.broadcast %cst_556 : f32 to vector<2x1xf32>
    %1242 = arith.subf %1241, %1165 : vector<2x1xf32>
    %1243 = arith.subf %1242, %1239 : vector<2x1xf32>
    %1244 = arith.cmpf olt, %1222, %1231 : vector<2x1xf32>
    %1245 = arith.extui %1244 : vector<2x1xi1> to vector<2x1xi32>
    %1246 = arith.sitofp %1245 : vector<2x1xi32> to vector<2x1xf32>
    %1247 = arith.mulf %1246, %1240 : vector<2x1xf32>
    %cst_557 = arith.constant 1.000000e+00 : f32
    %1248 = vector.broadcast %cst_557 : f32 to vector<2x1xf32>
    %1249 = arith.subf %1248, %1246 : vector<2x1xf32>
    %1250 = arith.mulf %1249, %1243 : vector<2x1xf32>
    %1251 = arith.addf %1247, %1250 : vector<2x1xf32>
    %cst_558 = arith.constant 1.000000e+00 : f32
    %1252 = vector.broadcast %cst_558 : f32 to vector<2x1xf32>
    %1253 = arith.subf %1252, %1231 : vector<2x1xf32>
    %1254 = arith.mulf %1253, %1243 : vector<2x1xf32>
    %1255 = arith.mulf %1231, %1240 : vector<2x1xf32>
    %1256 = arith.addf %1254, %1255 : vector<2x1xf32>
    %cst_559 = arith.constant 0.000000e+00 : f32
    %1257 = vector.broadcast %cst_559 : f32 to vector<2x1xf32>
    %1258 = arith.subf %1257, %1256 : vector<2x1xf32>
    %1259 = vector.extract_strided_slice %1033 {offsets = [0, 0], sizes = [1, 1], strides = [1, 1]} : vector<2x1xf32> to vector<1x1xf32>
    %1260 = vector.extract_strided_slice %1033 {offsets = [1, 0], sizes = [1, 1], strides = [1, 1]} : vector<2x1xf32> to vector<1x1xf32>
    %1261 = arith.addf %1259, %1260 : vector<1x1xf32>
    %1262 = arith.addf %1146, %1165 : vector<2x1xf32>
    %cst_560 = arith.constant 2.000000e+00 : f32
    %1263 = vector.broadcast %cst_560 : f32 to vector<2x1xf32>
    %1264 = arith.mulf %1263, %1153 : vector<2x1xf32>
    %1265 = arith.subf %1262, %1264 : vector<2x1xf32>
    %1266 = vector.extract_strided_slice %1265 {offsets = [0, 0], sizes = [1, 1], strides = [1, 1]} : vector<2x1xf32> to vector<1x1xf32>
    %1267 = vector.extract_strided_slice %1265 {offsets = [1, 0], sizes = [1, 1], strides = [1, 1]} : vector<2x1xf32> to vector<1x1xf32>
    %1268 = arith.addf %1266, %1267 : vector<1x1xf32>
    %1269 = arith.addf %1261, %1268 : vector<1x1xf32>
    %1270 = arith.addf %1214, %1251 : vector<2x1xf32>
    %1271 = vector.extract_strided_slice %1270 {offsets = [0, 0], sizes = [1, 1], strides = [1, 1]} : vector<2x1xf32> to vector<1x1xf32>
    %1272 = vector.extract_strided_slice %1270 {offsets = [1, 0], sizes = [1, 1], strides = [1, 1]} : vector<2x1xf32> to vector<1x1xf32>
    %1273 = arith.addf %1271, %1272 : vector<1x1xf32>
    %1274 = arith.addf %1269, %1273 : vector<1x1xf32>
    %1275 = arith.addf %1221, %1258 : vector<2x1xf32>
    %1276 = vector.extract_strided_slice %1275 {offsets = [0, 0], sizes = [1, 1], strides = [1, 1]} : vector<2x1xf32> to vector<1x1xf32>
    %1277 = vector.extract_strided_slice %1275 {offsets = [1, 0], sizes = [1, 1], strides = [1, 1]} : vector<2x1xf32> to vector<1x1xf32>
    %1278 = arith.addf %1276, %1277 : vector<1x1xf32>
    %c0_561 = arith.constant 0 : index
    %c0_562 = arith.constant 0 : index
    %1279 = vector.load %arg12[%c0_561, %c0_562] : memref<1x2xf32, #tpu.memory_space<vmem>>, vector<1x2xf32>
    %1280 = tpu.concatenate %1274, %1278 in 1 : vector<1x1xf32>, vector<1x1xf32> -> vector<1x2xf32>
    %1281 = vector.broadcast %897 : vector<1x1xf32> to vector<1x2xf32>
    %1282 = arith.mulf %1281, %1280 : vector<1x2xf32>
    %1283 = arith.addf %1279, %1282 : vector<1x2xf32>
    %c0_563 = arith.constant 0 : index
    %c0_564 = arith.constant 0 : index
    %1284 = vector.load %arg12[%c0_563, %c0_564] : memref<1x2xf32, #tpu.memory_space<vmem>>, vector<1x2xf32>
    tpu.vector_store %arg12[%c0_563, %c0_564], %1283 {strides = array<i32>} : memref<1x2xf32, #tpu.memory_space<vmem>>, vector<1x2xf32>,
    %cst_565 = arith.constant 0.000000e+00 : f32
    %1285 = vector.broadcast %cst_565 : f32 to vector<2x1xf32>
    %1286 = vector.broadcast %897 : vector<1x1xf32> to vector<2x1xf32>
    %1287 = arith.addf %1286, %1285 : vector<2x1xf32>
    %cst_566 = arith.constant 0.000000e+00 : f32
    %1288 = vector.broadcast %cst_566 : f32 to vector<2x2xf32>
    %1289 = tpu.concatenate %1032, %1159, %1171, %1209, %1246, %1287, %1288 in 1 : vector<2x1xf32>, vector<2x1xf32>, vector<2x1xf32>, vector<2x1xf32>, vector<2x1xf32>, vector<2x1xf32>, vector<2x2xf32> -> vector<2x8xf32>
    %c2_567 = arith.constant 2 : index
    %c0_568 = arith.constant 0 : index
    %c0_569 = arith.constant 0 : index
    %1290 = vector.load %arg11[%c2_567, %c0_568, %c0_569] : memref<4x2x8xf32, #tpu.memory_space<vmem>>, vector<1x2x8xf32>
    %1291 = vector.shape_cast %1290 : vector<1x2x8xf32> to vector<2x8xf32>
    %1292 = vector.shape_cast %1289 : vector<2x8xf32> to vector<1x2x8xf32>
    tpu.vector_store %arg11[%c2_567, %c0_568, %c0_569], %1292 {strides = array<i32>} : memref<4x2x8xf32, #tpu.memory_space<vmem>>, vector<1x2x8xf32>,
    %c0_570 = arith.constant 0 : index
    %c0_571 = arith.constant 0 : index
    %c0_572 = arith.constant 0 : index
    %1293 = vector.load %arg13[%c0_570, %c0_571, %c0_572] : memref<2x12x32xf32, #tpu.memory_space<vmem>>, vector<2x12x32xf32>
    %1294 = vector.shape_cast %1180 : vector<2x12xf32> to vector<2x12x1xf32>
    %1295 = vector.broadcast %1294 : vector<2x12x1xf32> to vector<2x12x32xf32>
    %1296 = arith.mulf %1295, %1293 : vector<2x12x32xf32>
    %cst_573 = arith.constant dense<0.000000e+00> : vector<2x32xf32>
    %1297 = vector.multi_reduction <add>, %1296, %cst_573 [1] : vector<2x12x32xf32> to vector<2x32xf32>
    %cst_574 = arith.constant dense<0.000000e+00> : vector<2xf32>
    %1298 = vector.multi_reduction <add>, %1180, %cst_574 [1] : vector<2x12xf32> to vector<2xf32>
    %1299 = vector.shape_cast %1298 : vector<2xf32> to vector<2x1xf32>
    %cst_575 = arith.constant 1.000000e+00 : f32
    %1300 = vector.broadcast %cst_575 : f32 to vector<2x1xf32>
    %1301 = arith.addf %1300, %1299 : vector<2x1xf32>
    %c0_576 = arith.constant 0 : index
    %c0_577 = arith.constant 0 : index
    %1302 = vector.load %arg18[%c0_576, %c0_577] : memref<2x32xf32, #tpu.memory_space<vmem>>, vector<2x32xf32>
    %1303 = vector.broadcast %1301 : vector<2x1xf32> to vector<2x32xf32>
    %1304 = arith.divf %1297, %1303 : vector<2x32xf32>
    %1305 = arith.subf %1304, %1302 : vector<2x32xf32>
    %1306 = vector.broadcast %897 : vector<1x1xf32> to vector<2x32xf32>
    %1307 = arith.mulf %1306, %1305 : vector<2x32xf32>
    %1308 = arith.addf %1302, %1307 : vector<2x32xf32>
    %c0_578 = arith.constant 0 : index
    %c0_579 = arith.constant 0 : index
    %1309 = vector.load %arg18[%c0_578, %c0_579] : memref<2x32xf32, #tpu.memory_space<vmem>>, vector<2x32xf32>
    tpu.vector_store %arg18[%c0_578, %c0_579], %1308 {strides = array<i32>} : memref<2x32xf32, #tpu.memory_space<vmem>>, vector<2x32xf32>,
    %1310 = vector.shape_cast %1119 : vector<2x32xf32> to vector<2x1x32xf32>
    %c0_580 = arith.constant 0 : index
    %c10 = arith.constant 10 : index
    %c0_581 = arith.constant 0 : index
    %1311 = vector.load %arg13[%c0_580, %c10, %c0_581] : memref<2x12x32xf32, #tpu.memory_space<vmem>>, vector<2x1x32xf32>
    tpu.vector_store %arg13[%c0_580, %c10, %c0_581], %1310 {strides = array<i32>} : memref<2x12x32xf32, #tpu.memory_space<vmem>>, vector<2x1x32xf32>,
    %1312 = vector.shape_cast %1119 : vector<2x32xf32> to vector<2x1x32xf32>
    %c0_582 = arith.constant 0 : index
    %c10_583 = arith.constant 10 : index
    %c0_584 = arith.constant 0 : index
    %1313 = vector.load %arg14[%c0_582, %c10_583, %c0_584] : memref<2x12x32xf32, #tpu.memory_space<vmem>>, vector<2x1x32xf32>
    tpu.vector_store %arg14[%c0_582, %c10_583, %c0_584], %1312 {strides = array<i32>} : memref<2x12x32xf32, #tpu.memory_space<vmem>>, vector<2x1x32xf32>,
    %cst_585 = arith.constant 1.000000e+01 : f32
    %1314 = vector.broadcast %cst_585 : f32 to vector<2x12xf32>
    %1315 = arith.cmpf olt, %24, %1314 : vector<2x12xf32>
    %cst_586 = arith.constant 1.000000e+00 : f32
    %1316 = vector.broadcast %cst_586 : f32 to vector<2x12xf32>
    %1317 = arith.select %1315, %1183, %1316 : vector<2x12xi1>, vector<2x12xf32>
    %cst_587 = arith.constant dense<0x7F800000> : vector<2xf32>
    %1318 = vector.multi_reduction <minimumf>, %1317, %cst_587 [1] : vector<2x12xf32> to vector<2xf32>
    %1319 = vector.shape_cast %1318 : vector<2xf32> to vector<2x1xf32>
    %1320 = vector.extract_strided_slice %1319 {offsets = [0, 0], sizes = [1, 1], strides = [1, 1]} : vector<2x1xf32> to vector<1x1xf32>
    %1321 = vector.extract_strided_slice %1319 {offsets = [1, 0], sizes = [1, 1], strides = [1, 1]} : vector<2x1xf32> to vector<1x1xf32>
    %1322 = arith.minimumf %1320, %1321 : vector<1x1xf32>
    %cst_588 = arith.constant 0.000000e+00 : f32
    %1323 = vector.broadcast %cst_588 : f32 to vector<1x1xf32>
    %1324 = arith.cmpf ogt, %1322, %1323 : vector<1x1xf32>
    %1325 = arith.extui %1324 : vector<1x1xi1> to vector<1x1xi32>
    %1326 = arith.sitofp %1325 : vector<1x1xi32> to vector<1x1xf32>
    %c0_589 = arith.constant 0 : index
    %c0_590 = arith.constant 0 : index
    %1327 = vector.load %arg19[%c0_589, %c0_590] : memref<1x1xf32, #tpu.memory_space<vmem>>, vector<1x1xf32>
    %1328 = arith.maximumf %1327, %1326 : vector<1x1xf32>
    %c0_591 = arith.constant 0 : index
    %c0_592 = arith.constant 0 : index
    %1329 = vector.load %arg19[%c0_591, %c0_592] : memref<1x1xf32, #tpu.memory_space<vmem>>, vector<1x1xf32>
    tpu.vector_store %arg19[%c0_591, %c0_592], %1328 {strides = array<i32>} : memref<1x1xf32, #tpu.memory_space<vmem>>, vector<1x1xf32>,
    %c0_593 = arith.constant 0 : index
    %c0_594 = arith.constant 0 : index
    %1330 = vector.load %arg19[%c0_593, %c0_594] : memref<1x1xf32, #tpu.memory_space<vmem>>, vector<1x1xf32>
    %cst_595 = arith.constant 1.000000e+00 : f32
    %1331 = vector.broadcast %cst_595 : f32 to vector<1x1xf32>
    %1332 = arith.subf %1331, %1330 : vector<1x1xf32>
    %c3 = arith.constant 3 : index
    %c0_596 = arith.constant 0 : index
    %c0_597 = arith.constant 0 : index
    %1333 = vector.load %arg10[%c3, %c0_596, %c0_597] : memref<4x2x2xf32, #tpu.memory_space<vmem>>, vector<1x2x2xf32>
    %1334 = vector.shape_cast %1333 : vector<1x2x2xf32> to vector<2x2xf32>
    %c0_598 = arith.constant 0 : index
    %c0_599 = arith.constant 0 : index
    %1335 = vector.load %arg18[%c0_598, %c0_599] : memref<2x32xf32, #tpu.memory_space<vmem>>, vector<2x32xf32>
    %c0_600 = arith.constant 0 : index
    %c0_601 = arith.constant 0 : index
    %c0_602 = arith.constant 0 : index
    %1336 = vector.load %arg15[%c0_600, %c0_601, %c0_602] : memref<2x2x32xf32, #tpu.memory_space<vmem>>, vector<1x2x32xf32>
    %1337 = vector.shape_cast %1336 : vector<1x2x32xf32> to vector<2x32xf32>
    %c0_603 = arith.constant 0 : index
    %c0_604 = arith.constant 0 : index
    %c0_605 = arith.constant 0 : index
    %1338 = vector.load %arg16[%c0_603, %c0_604, %c0_605] : memref<2x2x32xf32, #tpu.memory_space<vmem>>, vector<1x2x32xf32>
    %1339 = vector.shape_cast %1338 : vector<1x2x32xf32> to vector<2x32xf32>
    %1340 = tpu.concatenate %1335, %1337 in 1 : vector<2x32xf32>, vector<2x32xf32> -> vector<2x64xf32>
    %c0_606 = arith.constant 0 : index
    %c0_607 = arith.constant 0 : index
    %c0_608 = arith.constant 0 : index
    %1341 = vector.load %arg8[%c0_606, %c0_607, %c0_608] : memref<2x64x128xf32, #tpu.memory_space<vmem>>, vector<1x64x128xf32>
    %1342 = vector.shape_cast %1341 : vector<1x64x128xf32> to vector<64x128xf32>
    %cst_609 = arith.constant dense<0.000000e+00> : vector<2x128xf32>
    %1343 = tpu.matmul %1340, %1342, %cst_609 {dimension_numbers = #tpu.dot_dimension_numbers<[1], [0], [0], [1], [0, 0, 1, 1], [], []>} : vector<2x64xf32>, vector<64x128xf32>, vector<2x128xf32> -> vector<2x128xf32>
    %c0_610 = arith.constant 0 : index
    %c0_611 = arith.constant 0 : index
    %c0_612 = arith.constant 0 : index
    %1344 = vector.load %arg9[%c0_610, %c0_611, %c0_612] : memref<2x1x128xf32, #tpu.memory_space<vmem>>, vector<1x1x128xf32>
    %1345 = vector.shape_cast %1344 : vector<1x1x128xf32> to vector<1x128xf32>
    %1346 = vector.broadcast %1345 : vector<1x128xf32> to vector<2x128xf32>
    %1347 = arith.addf %1343, %1346 : vector<2x128xf32>
    %1348 = vector.extract_strided_slice %1347 {offsets = [0, 0], sizes = [2, 32], strides = [1, 1]} : vector<2x128xf32> to vector<2x32xf32>
    %cst_613 = arith.constant 5.000000e-01 : f32
    %1349 = vector.broadcast %cst_613 : f32 to vector<2x32xf32>
    %1350 = arith.mulf %1349, %1348 : vector<2x32xf32>
    %1351 = math.tanh %1350 : vector<2x32xf32>
    %cst_614 = arith.constant 1.000000e+00 : f32
    %1352 = vector.broadcast %cst_614 : f32 to vector<2x32xf32>
    %1353 = arith.addf %1351, %1352 : vector<2x32xf32>
    %cst_615 = arith.constant 5.000000e-01 : f32
    %1354 = vector.broadcast %cst_615 : f32 to vector<2x32xf32>
    %1355 = arith.mulf %1354, %1353 : vector<2x32xf32>
    %1356 = vector.extract_strided_slice %1347 {offsets = [0, 32], sizes = [2, 32], strides = [1, 1]} : vector<2x128xf32> to vector<2x32xf32>
    %cst_616 = arith.constant 5.000000e-01 : f32
    %1357 = vector.broadcast %cst_616 : f32 to vector<2x32xf32>
    %1358 = arith.mulf %1357, %1356 : vector<2x32xf32>
    %1359 = math.tanh %1358 : vector<2x32xf32>
    %cst_617 = arith.constant 1.000000e+00 : f32
    %1360 = vector.broadcast %cst_617 : f32 to vector<2x32xf32>
    %1361 = arith.addf %1359, %1360 : vector<2x32xf32>
    %cst_618 = arith.constant 5.000000e-01 : f32
    %1362 = vector.broadcast %cst_618 : f32 to vector<2x32xf32>
    %1363 = arith.mulf %1362, %1361 : vector<2x32xf32>
    %1364 = vector.extract_strided_slice %1347 {offsets = [0, 64], sizes = [2, 32], strides = [1, 1]} : vector<2x128xf32> to vector<2x32xf32>
    %1365 = math.tanh %1364 : vector<2x32xf32>
    %1366 = vector.extract_strided_slice %1347 {offsets = [0, 96], sizes = [2, 32], strides = [1, 1]} : vector<2x128xf32> to vector<2x32xf32>
    %cst_619 = arith.constant 5.000000e-01 : f32
    %1367 = vector.broadcast %cst_619 : f32 to vector<2x32xf32>
    %1368 = arith.mulf %1367, %1366 : vector<2x32xf32>
    %1369 = math.tanh %1368 : vector<2x32xf32>
    %cst_620 = arith.constant 1.000000e+00 : f32
    %1370 = vector.broadcast %cst_620 : f32 to vector<2x32xf32>
    %1371 = arith.addf %1369, %1370 : vector<2x32xf32>
    %cst_621 = arith.constant 5.000000e-01 : f32
    %1372 = vector.broadcast %cst_621 : f32 to vector<2x32xf32>
    %1373 = arith.mulf %1372, %1371 : vector<2x32xf32>
    %1374 = arith.mulf %1363, %1339 : vector<2x32xf32>
    %1375 = arith.mulf %1355, %1365 : vector<2x32xf32>
    %1376 = arith.addf %1374, %1375 : vector<2x32xf32>
    %1377 = math.tanh %1376 : vector<2x32xf32>
    %1378 = arith.mulf %1373, %1377 : vector<2x32xf32>
    %1379 = arith.subf %1378, %1337 : vector<2x32xf32>
    %1380 = vector.broadcast %1332 : vector<1x1xf32> to vector<2x32xf32>
    %1381 = arith.mulf %1380, %1379 : vector<2x32xf32>
    %1382 = arith.addf %1337, %1381 : vector<2x32xf32>
    %c0_622 = arith.constant 0 : index
    %c0_623 = arith.constant 0 : index
    %c0_624 = arith.constant 0 : index
    %1383 = vector.load %arg15[%c0_622, %c0_623, %c0_624] : memref<2x2x32xf32, #tpu.memory_space<vmem>>, vector<1x2x32xf32>
    %1384 = vector.shape_cast %1383 : vector<1x2x32xf32> to vector<2x32xf32>
    %1385 = vector.shape_cast %1382 : vector<2x32xf32> to vector<1x2x32xf32>
    tpu.vector_store %arg15[%c0_622, %c0_623, %c0_624], %1385 {strides = array<i32>} : memref<2x2x32xf32, #tpu.memory_space<vmem>>, vector<1x2x32xf32>,
    %1386 = arith.subf %1376, %1339 : vector<2x32xf32>
    %1387 = vector.broadcast %1332 : vector<1x1xf32> to vector<2x32xf32>
    %1388 = arith.mulf %1387, %1386 : vector<2x32xf32>
    %1389 = arith.addf %1339, %1388 : vector<2x32xf32>
    %c0_625 = arith.constant 0 : index
    %c0_626 = arith.constant 0 : index
    %c0_627 = arith.constant 0 : index
    %1390 = vector.load %arg16[%c0_625, %c0_626, %c0_627] : memref<2x2x32xf32, #tpu.memory_space<vmem>>, vector<1x2x32xf32>
    %1391 = vector.shape_cast %1390 : vector<1x2x32xf32> to vector<2x32xf32>
    %1392 = vector.shape_cast %1389 : vector<2x32xf32> to vector<1x2x32xf32>
    tpu.vector_store %arg16[%c0_625, %c0_626, %c0_627], %1392 {strides = array<i32>} : memref<2x2x32xf32, #tpu.memory_space<vmem>>, vector<1x2x32xf32>,
    %c1_628 = arith.constant 1 : index
    %c0_629 = arith.constant 0 : index
    %c0_630 = arith.constant 0 : index
    %1393 = vector.load %arg15[%c1_628, %c0_629, %c0_630] : memref<2x2x32xf32, #tpu.memory_space<vmem>>, vector<1x2x32xf32>
    %1394 = vector.shape_cast %1393 : vector<1x2x32xf32> to vector<2x32xf32>
    %c1_631 = arith.constant 1 : index
    %c0_632 = arith.constant 0 : index
    %c0_633 = arith.constant 0 : index
    %1395 = vector.load %arg16[%c1_631, %c0_632, %c0_633] : memref<2x2x32xf32, #tpu.memory_space<vmem>>, vector<1x2x32xf32>
    %1396 = vector.shape_cast %1395 : vector<1x2x32xf32> to vector<2x32xf32>
    %1397 = tpu.concatenate %1378, %1394 in 1 : vector<2x32xf32>, vector<2x32xf32> -> vector<2x64xf32>
    %c1_634 = arith.constant 1 : index
    %c0_635 = arith.constant 0 : index
    %c0_636 = arith.constant 0 : index
    %1398 = vector.load %arg8[%c1_634, %c0_635, %c0_636] : memref<2x64x128xf32, #tpu.memory_space<vmem>>, vector<1x64x128xf32>
    %1399 = vector.shape_cast %1398 : vector<1x64x128xf32> to vector<64x128xf32>
    %cst_637 = arith.constant dense<0.000000e+00> : vector<2x128xf32>
    %1400 = tpu.matmul %1397, %1399, %cst_637 {dimension_numbers = #tpu.dot_dimension_numbers<[1], [0], [0], [1], [0, 0, 1, 1], [], []>} : vector<2x64xf32>, vector<64x128xf32>, vector<2x128xf32> -> vector<2x128xf32>
    %c1_638 = arith.constant 1 : index
    %c0_639 = arith.constant 0 : index
    %c0_640 = arith.constant 0 : index
    %1401 = vector.load %arg9[%c1_638, %c0_639, %c0_640] : memref<2x1x128xf32, #tpu.memory_space<vmem>>, vector<1x1x128xf32>
    %1402 = vector.shape_cast %1401 : vector<1x1x128xf32> to vector<1x128xf32>
    %1403 = vector.broadcast %1402 : vector<1x128xf32> to vector<2x128xf32>
    %1404 = arith.addf %1400, %1403 : vector<2x128xf32>
    %1405 = vector.extract_strided_slice %1404 {offsets = [0, 0], sizes = [2, 32], strides = [1, 1]} : vector<2x128xf32> to vector<2x32xf32>
    %cst_641 = arith.constant 5.000000e-01 : f32
    %1406 = vector.broadcast %cst_641 : f32 to vector<2x32xf32>
    %1407 = arith.mulf %1406, %1405 : vector<2x32xf32>
    %1408 = math.tanh %1407 : vector<2x32xf32>
    %cst_642 = arith.constant 1.000000e+00 : f32
    %1409 = vector.broadcast %cst_642 : f32 to vector<2x32xf32>
    %1410 = arith.addf %1408, %1409 : vector<2x32xf32>
    %cst_643 = arith.constant 5.000000e-01 : f32
    %1411 = vector.broadcast %cst_643 : f32 to vector<2x32xf32>
    %1412 = arith.mulf %1411, %1410 : vector<2x32xf32>
    %1413 = vector.extract_strided_slice %1404 {offsets = [0, 32], sizes = [2, 32], strides = [1, 1]} : vector<2x128xf32> to vector<2x32xf32>
    %cst_644 = arith.constant 5.000000e-01 : f32
    %1414 = vector.broadcast %cst_644 : f32 to vector<2x32xf32>
    %1415 = arith.mulf %1414, %1413 : vector<2x32xf32>
    %1416 = math.tanh %1415 : vector<2x32xf32>
    %cst_645 = arith.constant 1.000000e+00 : f32
    %1417 = vector.broadcast %cst_645 : f32 to vector<2x32xf32>
    %1418 = arith.addf %1416, %1417 : vector<2x32xf32>
    %cst_646 = arith.constant 5.000000e-01 : f32
    %1419 = vector.broadcast %cst_646 : f32 to vector<2x32xf32>
    %1420 = arith.mulf %1419, %1418 : vector<2x32xf32>
    %1421 = vector.extract_strided_slice %1404 {offsets = [0, 64], sizes = [2, 32], strides = [1, 1]} : vector<2x128xf32> to vector<2x32xf32>
    %1422 = math.tanh %1421 : vector<2x32xf32>
    %1423 = vector.extract_strided_slice %1404 {offsets = [0, 96], sizes = [2, 32], strides = [1, 1]} : vector<2x128xf32> to vector<2x32xf32>
    %cst_647 = arith.constant 5.000000e-01 : f32
    %1424 = vector.broadcast %cst_647 : f32 to vector<2x32xf32>
    %1425 = arith.mulf %1424, %1423 : vector<2x32xf32>
    %1426 = math.tanh %1425 : vector<2x32xf32>
    %cst_648 = arith.constant 1.000000e+00 : f32
    %1427 = vector.broadcast %cst_648 : f32 to vector<2x32xf32>
    %1428 = arith.addf %1426, %1427 : vector<2x32xf32>
    %cst_649 = arith.constant 5.000000e-01 : f32
    %1429 = vector.broadcast %cst_649 : f32 to vector<2x32xf32>
    %1430 = arith.mulf %1429, %1428 : vector<2x32xf32>
    %1431 = arith.mulf %1420, %1396 : vector<2x32xf32>
    %1432 = arith.mulf %1412, %1422 : vector<2x32xf32>
    %1433 = arith.addf %1431, %1432 : vector<2x32xf32>
    %1434 = math.tanh %1433 : vector<2x32xf32>
    %1435 = arith.mulf %1430, %1434 : vector<2x32xf32>
    %1436 = arith.subf %1435, %1394 : vector<2x32xf32>
    %1437 = vector.broadcast %1332 : vector<1x1xf32> to vector<2x32xf32>
    %1438 = arith.mulf %1437, %1436 : vector<2x32xf32>
    %1439 = arith.addf %1394, %1438 : vector<2x32xf32>
    %c1_650 = arith.constant 1 : index
    %c0_651 = arith.constant 0 : index
    %c0_652 = arith.constant 0 : index
    %1440 = vector.load %arg15[%c1_650, %c0_651, %c0_652] : memref<2x2x32xf32, #tpu.memory_space<vmem>>, vector<1x2x32xf32>
    %1441 = vector.shape_cast %1440 : vector<1x2x32xf32> to vector<2x32xf32>
    %1442 = vector.shape_cast %1439 : vector<2x32xf32> to vector<1x2x32xf32>
    tpu.vector_store %arg15[%c1_650, %c0_651, %c0_652], %1442 {strides = array<i32>} : memref<2x2x32xf32, #tpu.memory_space<vmem>>, vector<1x2x32xf32>,
    %1443 = arith.subf %1433, %1396 : vector<2x32xf32>
    %1444 = vector.broadcast %1332 : vector<1x1xf32> to vector<2x32xf32>
    %1445 = arith.mulf %1444, %1443 : vector<2x32xf32>
    %1446 = arith.addf %1396, %1445 : vector<2x32xf32>
    %c1_653 = arith.constant 1 : index
    %c0_654 = arith.constant 0 : index
    %c0_655 = arith.constant 0 : index
    %1447 = vector.load %arg16[%c1_653, %c0_654, %c0_655] : memref<2x2x32xf32, #tpu.memory_space<vmem>>, vector<1x2x32xf32>
    %1448 = vector.shape_cast %1447 : vector<1x2x32xf32> to vector<2x32xf32>
    %1449 = vector.shape_cast %1446 : vector<2x32xf32> to vector<1x2x32xf32>
    tpu.vector_store %arg16[%c1_653, %c0_654, %c0_655], %1449 {strides = array<i32>} : memref<2x2x32xf32, #tpu.memory_space<vmem>>, vector<1x2x32xf32>,
    %c0_656 = arith.constant 0 : index
    %c0_657 = arith.constant 0 : index
    %1450 = vector.load %arg5[%c0_656, %c0_657] : memref<32x2xf32, #tpu.memory_space<vmem>>, vector<32x2xf32>
    %cst_658 = arith.constant dense<0.000000e+00> : vector<2x2xf32>
    %1451 = tpu.matmul %1435, %1450, %cst_658 {dimension_numbers = #tpu.dot_dimension_numbers<[1], [0], [0], [1], [0, 0, 1, 1], [], []>} : vector<2x32xf32>, vector<32x2xf32>, vector<2x2xf32> -> vector<2x2xf32>
    %1452 = math.tanh %1451 : vector<2x2xf32>
    %cst_659 = arith.constant 2.500000e+00 : f32
    %1453 = vector.broadcast %cst_659 : f32 to vector<2x2xf32>
    %1454 = arith.mulf %1453, %1452 : vector<2x2xf32>
    %1455 = vector.extract_strided_slice %1454 {offsets = [0, 0], sizes = [2, 1], strides = [1, 1]} : vector<2x2xf32> to vector<2x1xf32>
    %1456 = vector.extract_strided_slice %1454 {offsets = [0, 1], sizes = [2, 1], strides = [1, 1]} : vector<2x2xf32> to vector<2x1xf32>
    %1457 = arith.maximumf %1455, %1456 : vector<2x1xf32>
    %1458 = arith.subf %1455, %1457 : vector<2x1xf32>
    %1459 = math.exp %1458 : vector<2x1xf32>
    %1460 = arith.subf %1456, %1457 : vector<2x1xf32>
    %1461 = math.exp %1460 : vector<2x1xf32>
    %1462 = arith.addf %1459, %1461 : vector<2x1xf32>
    %1463 = math.log %1462 : vector<2x1xf32>
    %1464 = arith.addf %1457, %1463 : vector<2x1xf32>
    %1465 = arith.cmpf ogt, %1456, %1455 : vector<2x1xf32>
    %1466 = arith.extui %1465 : vector<2x1xi1> to vector<2x1xi32>
    %1467 = arith.sitofp %1466 : vector<2x1xi32> to vector<2x1xf32>
    %1468 = arith.subf %1457, %1464 : vector<2x1xf32>
    %c0_660 = arith.constant 0 : index
    %c0_661 = arith.constant 0 : index
    %1469 = vector.load %arg4[%c0_660, %c0_661] : memref<2x32xf32, #tpu.memory_space<vmem>>, vector<1x32xf32>
    %c1_662 = arith.constant 1 : index
    %c0_663 = arith.constant 0 : index
    %1470 = vector.load %arg4[%c1_662, %c0_663] : memref<2x32xf32, #tpu.memory_space<vmem>>, vector<1x32xf32>
    %1471 = arith.subf %1470, %1469 : vector<1x32xf32>
    %1472 = vector.broadcast %1467 : vector<2x1xf32> to vector<2x32xf32>
    %1473 = vector.broadcast %1471 : vector<1x32xf32> to vector<2x32xf32>
    %1474 = arith.mulf %1472, %1473 : vector<2x32xf32>
    %1475 = vector.broadcast %1469 : vector<1x32xf32> to vector<2x32xf32>
    %1476 = arith.addf %1475, %1474 : vector<2x32xf32>
    %1477 = tpu.concatenate %1476, %1378 in 1 : vector<2x32xf32>, vector<2x32xf32> -> vector<2x64xf32>
    %c0_664 = arith.constant 0 : index
    %c0_665 = arith.constant 0 : index
    %c0_666 = arith.constant 0 : index
    %1478 = vector.load %arg8[%c0_664, %c0_665, %c0_666] : memref<2x64x128xf32, #tpu.memory_space<vmem>>, vector<1x64x128xf32>
    %1479 = vector.shape_cast %1478 : vector<1x64x128xf32> to vector<64x128xf32>
    %cst_667 = arith.constant dense<0.000000e+00> : vector<2x128xf32>
    %1480 = tpu.matmul %1477, %1479, %cst_667 {dimension_numbers = #tpu.dot_dimension_numbers<[1], [0], [0], [1], [0, 0, 1, 1], [], []>} : vector<2x64xf32>, vector<64x128xf32>, vector<2x128xf32> -> vector<2x128xf32>
    %c0_668 = arith.constant 0 : index
    %c0_669 = arith.constant 0 : index
    %c0_670 = arith.constant 0 : index
    %1481 = vector.load %arg9[%c0_668, %c0_669, %c0_670] : memref<2x1x128xf32, #tpu.memory_space<vmem>>, vector<1x1x128xf32>
    %1482 = vector.shape_cast %1481 : vector<1x1x128xf32> to vector<1x128xf32>
    %1483 = vector.broadcast %1482 : vector<1x128xf32> to vector<2x128xf32>
    %1484 = arith.addf %1480, %1483 : vector<2x128xf32>
    %1485 = vector.extract_strided_slice %1484 {offsets = [0, 0], sizes = [2, 32], strides = [1, 1]} : vector<2x128xf32> to vector<2x32xf32>
    %cst_671 = arith.constant 5.000000e-01 : f32
    %1486 = vector.broadcast %cst_671 : f32 to vector<2x32xf32>
    %1487 = arith.mulf %1486, %1485 : vector<2x32xf32>
    %1488 = math.tanh %1487 : vector<2x32xf32>
    %cst_672 = arith.constant 1.000000e+00 : f32
    %1489 = vector.broadcast %cst_672 : f32 to vector<2x32xf32>
    %1490 = arith.addf %1488, %1489 : vector<2x32xf32>
    %cst_673 = arith.constant 5.000000e-01 : f32
    %1491 = vector.broadcast %cst_673 : f32 to vector<2x32xf32>
    %1492 = arith.mulf %1491, %1490 : vector<2x32xf32>
    %1493 = vector.extract_strided_slice %1484 {offsets = [0, 32], sizes = [2, 32], strides = [1, 1]} : vector<2x128xf32> to vector<2x32xf32>
    %cst_674 = arith.constant 5.000000e-01 : f32
    %1494 = vector.broadcast %cst_674 : f32 to vector<2x32xf32>
    %1495 = arith.mulf %1494, %1493 : vector<2x32xf32>
    %1496 = math.tanh %1495 : vector<2x32xf32>
    %cst_675 = arith.constant 1.000000e+00 : f32
    %1497 = vector.broadcast %cst_675 : f32 to vector<2x32xf32>
    %1498 = arith.addf %1496, %1497 : vector<2x32xf32>
    %cst_676 = arith.constant 5.000000e-01 : f32
    %1499 = vector.broadcast %cst_676 : f32 to vector<2x32xf32>
    %1500 = arith.mulf %1499, %1498 : vector<2x32xf32>
    %1501 = vector.extract_strided_slice %1484 {offsets = [0, 64], sizes = [2, 32], strides = [1, 1]} : vector<2x128xf32> to vector<2x32xf32>
    %1502 = math.tanh %1501 : vector<2x32xf32>
    %1503 = vector.extract_strided_slice %1484 {offsets = [0, 96], sizes = [2, 32], strides = [1, 1]} : vector<2x128xf32> to vector<2x32xf32>
    %cst_677 = arith.constant 5.000000e-01 : f32
    %1504 = vector.broadcast %cst_677 : f32 to vector<2x32xf32>
    %1505 = arith.mulf %1504, %1503 : vector<2x32xf32>
    %1506 = math.tanh %1505 : vector<2x32xf32>
    %cst_678 = arith.constant 1.000000e+00 : f32
    %1507 = vector.broadcast %cst_678 : f32 to vector<2x32xf32>
    %1508 = arith.addf %1506, %1507 : vector<2x32xf32>
    %cst_679 = arith.constant 5.000000e-01 : f32
    %1509 = vector.broadcast %cst_679 : f32 to vector<2x32xf32>
    %1510 = arith.mulf %1509, %1508 : vector<2x32xf32>
    %1511 = arith.mulf %1500, %1376 : vector<2x32xf32>
    %1512 = arith.mulf %1492, %1502 : vector<2x32xf32>
    %1513 = arith.addf %1511, %1512 : vector<2x32xf32>
    %1514 = math.tanh %1513 : vector<2x32xf32>
    %1515 = arith.mulf %1510, %1514 : vector<2x32xf32>
    %1516 = tpu.concatenate %1515, %1435 in 1 : vector<2x32xf32>, vector<2x32xf32> -> vector<2x64xf32>
    %c1_680 = arith.constant 1 : index
    %c0_681 = arith.constant 0 : index
    %c0_682 = arith.constant 0 : index
    %1517 = vector.load %arg8[%c1_680, %c0_681, %c0_682] : memref<2x64x128xf32, #tpu.memory_space<vmem>>, vector<1x64x128xf32>
    %1518 = vector.shape_cast %1517 : vector<1x64x128xf32> to vector<64x128xf32>
    %cst_683 = arith.constant dense<0.000000e+00> : vector<2x128xf32>
    %1519 = tpu.matmul %1516, %1518, %cst_683 {dimension_numbers = #tpu.dot_dimension_numbers<[1], [0], [0], [1], [0, 0, 1, 1], [], []>} : vector<2x64xf32>, vector<64x128xf32>, vector<2x128xf32> -> vector<2x128xf32>
    %c1_684 = arith.constant 1 : index
    %c0_685 = arith.constant 0 : index
    %c0_686 = arith.constant 0 : index
    %1520 = vector.load %arg9[%c1_684, %c0_685, %c0_686] : memref<2x1x128xf32, #tpu.memory_space<vmem>>, vector<1x1x128xf32>
    %1521 = vector.shape_cast %1520 : vector<1x1x128xf32> to vector<1x128xf32>
    %1522 = vector.broadcast %1521 : vector<1x128xf32> to vector<2x128xf32>
    %1523 = arith.addf %1519, %1522 : vector<2x128xf32>
    %1524 = vector.extract_strided_slice %1523 {offsets = [0, 0], sizes = [2, 32], strides = [1, 1]} : vector<2x128xf32> to vector<2x32xf32>
    %cst_687 = arith.constant 5.000000e-01 : f32
    %1525 = vector.broadcast %cst_687 : f32 to vector<2x32xf32>
    %1526 = arith.mulf %1525, %1524 : vector<2x32xf32>
    %1527 = math.tanh %1526 : vector<2x32xf32>
    %cst_688 = arith.constant 1.000000e+00 : f32
    %1528 = vector.broadcast %cst_688 : f32 to vector<2x32xf32>
    %1529 = arith.addf %1527, %1528 : vector<2x32xf32>
    %cst_689 = arith.constant 5.000000e-01 : f32
    %1530 = vector.broadcast %cst_689 : f32 to vector<2x32xf32>
    %1531 = arith.mulf %1530, %1529 : vector<2x32xf32>
    %1532 = vector.extract_strided_slice %1523 {offsets = [0, 32], sizes = [2, 32], strides = [1, 1]} : vector<2x128xf32> to vector<2x32xf32>
    %cst_690 = arith.constant 5.000000e-01 : f32
    %1533 = vector.broadcast %cst_690 : f32 to vector<2x32xf32>
    %1534 = arith.mulf %1533, %1532 : vector<2x32xf32>
    %1535 = math.tanh %1534 : vector<2x32xf32>
    %cst_691 = arith.constant 1.000000e+00 : f32
    %1536 = vector.broadcast %cst_691 : f32 to vector<2x32xf32>
    %1537 = arith.addf %1535, %1536 : vector<2x32xf32>
    %cst_692 = arith.constant 5.000000e-01 : f32
    %1538 = vector.broadcast %cst_692 : f32 to vector<2x32xf32>
    %1539 = arith.mulf %1538, %1537 : vector<2x32xf32>
    %1540 = vector.extract_strided_slice %1523 {offsets = [0, 64], sizes = [2, 32], strides = [1, 1]} : vector<2x128xf32> to vector<2x32xf32>
    %1541 = math.tanh %1540 : vector<2x32xf32>
    %1542 = vector.extract_strided_slice %1523 {offsets = [0, 96], sizes = [2, 32], strides = [1, 1]} : vector<2x128xf32> to vector<2x32xf32>
    %cst_693 = arith.constant 5.000000e-01 : f32
    %1543 = vector.broadcast %cst_693 : f32 to vector<2x32xf32>
    %1544 = arith.mulf %1543, %1542 : vector<2x32xf32>
    %1545 = math.tanh %1544 : vector<2x32xf32>
    %cst_694 = arith.constant 1.000000e+00 : f32
    %1546 = vector.broadcast %cst_694 : f32 to vector<2x32xf32>
    %1547 = arith.addf %1545, %1546 : vector<2x32xf32>
    %cst_695 = arith.constant 5.000000e-01 : f32
    %1548 = vector.broadcast %cst_695 : f32 to vector<2x32xf32>
    %1549 = arith.mulf %1548, %1547 : vector<2x32xf32>
    %1550 = arith.mulf %1539, %1433 : vector<2x32xf32>
    %1551 = arith.mulf %1531, %1541 : vector<2x32xf32>
    %1552 = arith.addf %1550, %1551 : vector<2x32xf32>
    %1553 = math.tanh %1552 : vector<2x32xf32>
    %1554 = arith.mulf %1549, %1553 : vector<2x32xf32>
    %c0_696 = arith.constant 0 : index
    %c0_697 = arith.constant 0 : index
    %1555 = vector.load %arg6[%c0_696, %c0_697] : memref<32x32xf32, #tpu.memory_space<vmem>>, vector<32x32xf32>
    %cst_698 = arith.constant dense<0.000000e+00> : vector<2x32xf32>
    %1556 = tpu.matmul %1554, %1555, %cst_698 {dimension_numbers = #tpu.dot_dimension_numbers<[1], [0], [0], [1], [0, 0, 1, 1], [], []>} : vector<2x32xf32>, vector<32x32xf32>, vector<2x32xf32> -> vector<2x32xf32>
    %c0_699 = arith.constant 0 : index
    %c0_700 = arith.constant 0 : index
    %c0_701 = arith.constant 0 : index
    %1557 = vector.load %arg14[%c0_699, %c0_700, %c0_701] : memref<2x12x32xf32, #tpu.memory_space<vmem>>, vector<2x12x32xf32>
    %1558 = vector.shape_cast %1556 : vector<2x32xf32> to vector<2x1x32xf32>
    %1559 = vector.broadcast %1558 : vector<2x1x32xf32> to vector<2x12x32xf32>
    %1560 = arith.addf %1557, %1559 : vector<2x12x32xf32>
    %1561 = math.tanh %1560 : vector<2x12x32xf32>
    %c0_702 = arith.constant 0 : index
    %c0_703 = arith.constant 0 : index
    %c0_704 = arith.constant 0 : index
    %1562 = vector.load %arg7[%c0_702, %c0_703, %c0_704] : memref<1x1x32xf32, #tpu.memory_space<vmem>>, vector<1x1x32xf32>
    %1563 = vector.broadcast %1562 : vector<1x1x32xf32> to vector<2x12x32xf32>
    %1564 = arith.mulf %1561, %1563 : vector<2x12x32xf32>
    %cst_705 = arith.constant dense<0.000000e+00> : vector<2x12xf32>
    %1565 = vector.multi_reduction <add>, %1564, %cst_705 [2] : vector<2x12x32xf32> to vector<2x12xf32>
    %1566 = math.tanh %1565 : vector<2x12xf32>
    %cst_706 = arith.constant 2.500000e+00 : f32
    %1567 = vector.broadcast %cst_706 : f32 to vector<2x12xf32>
    %1568 = arith.mulf %1567, %1566 : vector<2x12xf32>
    %c0_707 = arith.constant 0 : index
    %c0_708 = arith.constant 0 : index
    %1569 = vector.load %arg17[%c0_707, %c0_708] : memref<2x12xf32, #tpu.memory_space<vmem>>, vector<2x12xf32>
    %cst_709 = arith.constant 1.100000e+01 : f32
    %1570 = vector.broadcast %cst_709 : f32 to vector<2x12xf32>
    %1571 = arith.cmpf olt, %24, %1570 : vector<2x12xf32>
    %cst_710 = arith.constant 0.000000e+00 : f32
    %1572 = vector.broadcast %cst_710 : f32 to vector<2x12xf32>
    %1573 = arith.cmpf ogt, %1569, %1572 : vector<2x12xf32>
    %cst_711 = arith.constant -1.000000e+02 : f32
    %cst_712 = arith.constant 0.000000e+00 : f32
    %1574 = vector.broadcast %cst_711 : f32 to vector<2x12xf32>
    %1575 = vector.broadcast %cst_712 : f32 to vector<2x12xf32>
    %1576 = arith.select %1573, %1574, %1575 : vector<2x12xi1>, vector<2x12xf32>
    %cst_713 = arith.constant -1.000000e+30 : f32
    %1577 = vector.broadcast %cst_713 : f32 to vector<2x12xf32>
    %1578 = arith.select %1571, %1576, %1577 : vector<2x12xi1>, vector<2x12xf32>
    %1579 = arith.addf %1568, %1578 : vector<2x12xf32>
    %cst_714 = arith.constant dense<0xFF800000> : vector<2xf32>
    %1580 = vector.multi_reduction <maximumf>, %1579, %cst_714 [1] : vector<2x12xf32> to vector<2xf32>
    %1581 = vector.shape_cast %1580 : vector<2xf32> to vector<2x1xf32>
    %1582 = vector.broadcast %1581 : vector<2x1xf32> to vector<2x12xf32>
    %1583 = arith.subf %1579, %1582 : vector<2x12xf32>
    %1584 = math.exp %1583 : vector<2x12xf32>
    %cst_715 = arith.constant dense<0.000000e+00> : vector<2xf32>
    %1585 = vector.multi_reduction <add>, %1584, %cst_715 [1] : vector<2x12xf32> to vector<2xf32>
    %1586 = vector.shape_cast %1585 : vector<2xf32> to vector<2x1xf32>
    %1587 = math.log %1586 : vector<2x1xf32>
    %1588 = arith.addf %1581, %1587 : vector<2x1xf32>
    %1589 = vector.broadcast %1581 : vector<2x1xf32> to vector<2x12xf32>
    %1590 = arith.cmpf oeq, %1579, %1589 : vector<2x12xf32>
    %cst_716 = arith.constant 1.000000e+09 : f32
    %1591 = vector.broadcast %cst_716 : f32 to vector<2x12xf32>
    %1592 = arith.select %1590, %24, %1591 : vector<2x12xi1>, vector<2x12xf32>
    %cst_717 = arith.constant dense<0x7F800000> : vector<2xf32>
    %1593 = vector.multi_reduction <minimumf>, %1592, %cst_717 [1] : vector<2x12xf32> to vector<2xf32>
    %1594 = vector.shape_cast %1593 : vector<2xf32> to vector<2x1xf32>
    %1595 = vector.broadcast %1594 : vector<2x1xf32> to vector<2x12xf32>
    %1596 = arith.cmpf oeq, %24, %1595 : vector<2x12xf32>
    %cst_718 = arith.constant -3.000000e+38 : f32
    %1597 = vector.broadcast %cst_718 : f32 to vector<2x12xf32>
    %1598 = arith.select %1596, %1597, %1579 : vector<2x12xi1>, vector<2x12xf32>
    %cst_719 = arith.constant dense<0xFF800000> : vector<2xf32>
    %1599 = vector.multi_reduction <maximumf>, %1598, %cst_719 [1] : vector<2x12xf32> to vector<2xf32>
    %1600 = vector.shape_cast %1599 : vector<2xf32> to vector<2x1xf32>
    %1601 = vector.broadcast %1600 : vector<2x1xf32> to vector<2x12xf32>
    %1602 = arith.cmpf oeq, %1598, %1601 : vector<2x12xf32>
    %cst_720 = arith.constant 1.000000e+09 : f32
    %1603 = vector.broadcast %cst_720 : f32 to vector<2x12xf32>
    %1604 = arith.select %1602, %24, %1603 : vector<2x12xi1>, vector<2x12xf32>
    %cst_721 = arith.constant dense<0x7F800000> : vector<2xf32>
    %1605 = vector.multi_reduction <minimumf>, %1604, %cst_721 [1] : vector<2x12xf32> to vector<2xf32>
    %1606 = vector.shape_cast %1605 : vector<2xf32> to vector<2x1xf32>
    %1607 = vector.broadcast %1594 : vector<2x1xf32> to vector<2x12xf32>
    %1608 = arith.cmpf oeq, %24, %1607 : vector<2x12xf32>
    %1609 = arith.extui %1608 : vector<2x12xi1> to vector<2x12xi32>
    %1610 = arith.sitofp %1609 : vector<2x12xi32> to vector<2x12xf32>
    %1611 = vector.broadcast %1606 : vector<2x1xf32> to vector<2x12xf32>
    %1612 = arith.cmpf oeq, %24, %1611 : vector<2x12xf32>
    %1613 = arith.extui %1612 : vector<2x12xi1> to vector<2x12xi32>
    %1614 = arith.sitofp %1613 : vector<2x12xi32> to vector<2x12xf32>
    %1615 = arith.addf %1610, %1614 : vector<2x12xf32>
    %1616 = vector.broadcast %1332 : vector<1x1xf32> to vector<2x12xf32>
    %1617 = arith.mulf %1616, %1615 : vector<2x12xf32>
    %1618 = arith.addf %1569, %1617 : vector<2x12xf32>
    %c0_722 = arith.constant 0 : index
    %c0_723 = arith.constant 0 : index
    %1619 = vector.load %arg17[%c0_722, %c0_723] : memref<2x12xf32, #tpu.memory_space<vmem>>, vector<2x12xf32>
    tpu.vector_store %arg17[%c0_722, %c0_723], %1618 {strides = array<i32>} : memref<2x12xf32, #tpu.memory_space<vmem>>, vector<2x12xf32>,
    %1620 = vector.extract_strided_slice %1334 {offsets = [0, 0], sizes = [2, 1], strides = [1, 1]} : vector<2x2xf32> to vector<2x1xf32>
    %cst_724 = arith.constant 2.000000e+00 : f32
    %1621 = vector.broadcast %cst_724 : f32 to vector<2x1xf32>
    %1622 = arith.mulf %1621, %1581 : vector<2x1xf32>
    %cst_725 = arith.constant 5.000000e-01 : f32
    %1623 = vector.broadcast %cst_725 : f32 to vector<2x1xf32>
    %1624 = arith.mulf %1623, %1622 : vector<2x1xf32>
    %1625 = math.tanh %1624 : vector<2x1xf32>
    %cst_726 = arith.constant 1.000000e+00 : f32
    %1626 = vector.broadcast %cst_726 : f32 to vector<2x1xf32>
    %1627 = arith.addf %1625, %1626 : vector<2x1xf32>
    %cst_727 = arith.constant 5.000000e-01 : f32
    %1628 = vector.broadcast %cst_727 : f32 to vector<2x1xf32>
    %1629 = arith.mulf %1628, %1627 : vector<2x1xf32>
    %1630 = math.absf %1581 : vector<2x1xf32>
    %cst_728 = arith.constant -2.000000e+00 : f32
    %1631 = vector.broadcast %cst_728 : f32 to vector<2x1xf32>
    %1632 = arith.mulf %1631, %1630 : vector<2x1xf32>
    %1633 = math.exp %1632 : vector<2x1xf32>
    %cst_729 = arith.constant 1.000000e+00 : f32
    %1634 = vector.broadcast %cst_729 : f32 to vector<2x1xf32>
    %1635 = arith.addf %1634, %1633 : vector<2x1xf32>
    %1636 = math.log %1635 : vector<2x1xf32>
    %1637 = arith.addf %1630, %1636 : vector<2x1xf32>
    %1638 = arith.subf %1581, %1637 : vector<2x1xf32>
    %cst_730 = arith.constant 0.000000e+00 : f32
    %1639 = vector.broadcast %cst_730 : f32 to vector<2x1xf32>
    %1640 = arith.subf %1639, %1581 : vector<2x1xf32>
    %1641 = arith.subf %1640, %1637 : vector<2x1xf32>
    %1642 = arith.cmpf olt, %1620, %1629 : vector<2x1xf32>
    %1643 = arith.extui %1642 : vector<2x1xi1> to vector<2x1xi32>
    %1644 = arith.sitofp %1643 : vector<2x1xi32> to vector<2x1xf32>
    %1645 = arith.mulf %1644, %1638 : vector<2x1xf32>
    %cst_731 = arith.constant 1.000000e+00 : f32
    %1646 = vector.broadcast %cst_731 : f32 to vector<2x1xf32>
    %1647 = arith.subf %1646, %1644 : vector<2x1xf32>
    %1648 = arith.mulf %1647, %1641 : vector<2x1xf32>
    %1649 = arith.addf %1645, %1648 : vector<2x1xf32>
    %cst_732 = arith.constant 1.000000e+00 : f32
    %1650 = vector.broadcast %cst_732 : f32 to vector<2x1xf32>
    %1651 = arith.subf %1650, %1629 : vector<2x1xf32>
    %1652 = arith.mulf %1651, %1641 : vector<2x1xf32>
    %1653 = arith.mulf %1629, %1638 : vector<2x1xf32>
    %1654 = arith.addf %1652, %1653 : vector<2x1xf32>
    %cst_733 = arith.constant 0.000000e+00 : f32
    %1655 = vector.broadcast %cst_733 : f32 to vector<2x1xf32>
    %1656 = arith.subf %1655, %1654 : vector<2x1xf32>
    %1657 = vector.extract_strided_slice %1334 {offsets = [0, 1], sizes = [2, 1], strides = [1, 1]} : vector<2x2xf32> to vector<2x1xf32>
    %cst_734 = arith.constant 2.000000e+00 : f32
    %1658 = vector.broadcast %cst_734 : f32 to vector<2x1xf32>
    %1659 = arith.mulf %1658, %1600 : vector<2x1xf32>
    %cst_735 = arith.constant 5.000000e-01 : f32
    %1660 = vector.broadcast %cst_735 : f32 to vector<2x1xf32>
    %1661 = arith.mulf %1660, %1659 : vector<2x1xf32>
    %1662 = math.tanh %1661 : vector<2x1xf32>
    %cst_736 = arith.constant 1.000000e+00 : f32
    %1663 = vector.broadcast %cst_736 : f32 to vector<2x1xf32>
    %1664 = arith.addf %1662, %1663 : vector<2x1xf32>
    %cst_737 = arith.constant 5.000000e-01 : f32
    %1665 = vector.broadcast %cst_737 : f32 to vector<2x1xf32>
    %1666 = arith.mulf %1665, %1664 : vector<2x1xf32>
    %1667 = math.absf %1600 : vector<2x1xf32>
    %cst_738 = arith.constant -2.000000e+00 : f32
    %1668 = vector.broadcast %cst_738 : f32 to vector<2x1xf32>
    %1669 = arith.mulf %1668, %1667 : vector<2x1xf32>
    %1670 = math.exp %1669 : vector<2x1xf32>
    %cst_739 = arith.constant 1.000000e+00 : f32
    %1671 = vector.broadcast %cst_739 : f32 to vector<2x1xf32>
    %1672 = arith.addf %1671, %1670 : vector<2x1xf32>
    %1673 = math.log %1672 : vector<2x1xf32>
    %1674 = arith.addf %1667, %1673 : vector<2x1xf32>
    %1675 = arith.subf %1600, %1674 : vector<2x1xf32>
    %cst_740 = arith.constant 0.000000e+00 : f32
    %1676 = vector.broadcast %cst_740 : f32 to vector<2x1xf32>
    %1677 = arith.subf %1676, %1600 : vector<2x1xf32>
    %1678 = arith.subf %1677, %1674 : vector<2x1xf32>
    %1679 = arith.cmpf olt, %1657, %1666 : vector<2x1xf32>
    %1680 = arith.extui %1679 : vector<2x1xi1> to vector<2x1xi32>
    %1681 = arith.sitofp %1680 : vector<2x1xi32> to vector<2x1xf32>
    %1682 = arith.mulf %1681, %1675 : vector<2x1xf32>
    %cst_741 = arith.constant 1.000000e+00 : f32
    %1683 = vector.broadcast %cst_741 : f32 to vector<2x1xf32>
    %1684 = arith.subf %1683, %1681 : vector<2x1xf32>
    %1685 = arith.mulf %1684, %1678 : vector<2x1xf32>
    %1686 = arith.addf %1682, %1685 : vector<2x1xf32>
    %cst_742 = arith.constant 1.000000e+00 : f32
    %1687 = vector.broadcast %cst_742 : f32 to vector<2x1xf32>
    %1688 = arith.subf %1687, %1666 : vector<2x1xf32>
    %1689 = arith.mulf %1688, %1678 : vector<2x1xf32>
    %1690 = arith.mulf %1666, %1675 : vector<2x1xf32>
    %1691 = arith.addf %1689, %1690 : vector<2x1xf32>
    %cst_743 = arith.constant 0.000000e+00 : f32
    %1692 = vector.broadcast %cst_743 : f32 to vector<2x1xf32>
    %1693 = arith.subf %1692, %1691 : vector<2x1xf32>
    %1694 = vector.extract_strided_slice %1468 {offsets = [0, 0], sizes = [1, 1], strides = [1, 1]} : vector<2x1xf32> to vector<1x1xf32>
    %1695 = vector.extract_strided_slice %1468 {offsets = [1, 0], sizes = [1, 1], strides = [1, 1]} : vector<2x1xf32> to vector<1x1xf32>
    %1696 = arith.addf %1694, %1695 : vector<1x1xf32>
    %1697 = arith.addf %1581, %1600 : vector<2x1xf32>
    %cst_744 = arith.constant 2.000000e+00 : f32
    %1698 = vector.broadcast %cst_744 : f32 to vector<2x1xf32>
    %1699 = arith.mulf %1698, %1588 : vector<2x1xf32>
    %1700 = arith.subf %1697, %1699 : vector<2x1xf32>
    %1701 = vector.extract_strided_slice %1700 {offsets = [0, 0], sizes = [1, 1], strides = [1, 1]} : vector<2x1xf32> to vector<1x1xf32>
    %1702 = vector.extract_strided_slice %1700 {offsets = [1, 0], sizes = [1, 1], strides = [1, 1]} : vector<2x1xf32> to vector<1x1xf32>
    %1703 = arith.addf %1701, %1702 : vector<1x1xf32>
    %1704 = arith.addf %1696, %1703 : vector<1x1xf32>
    %1705 = arith.addf %1649, %1686 : vector<2x1xf32>
    %1706 = vector.extract_strided_slice %1705 {offsets = [0, 0], sizes = [1, 1], strides = [1, 1]} : vector<2x1xf32> to vector<1x1xf32>
    %1707 = vector.extract_strided_slice %1705 {offsets = [1, 0], sizes = [1, 1], strides = [1, 1]} : vector<2x1xf32> to vector<1x1xf32>
    %1708 = arith.addf %1706, %1707 : vector<1x1xf32>
    %1709 = arith.addf %1704, %1708 : vector<1x1xf32>
    %1710 = arith.addf %1656, %1693 : vector<2x1xf32>
    %1711 = vector.extract_strided_slice %1710 {offsets = [0, 0], sizes = [1, 1], strides = [1, 1]} : vector<2x1xf32> to vector<1x1xf32>
    %1712 = vector.extract_strided_slice %1710 {offsets = [1, 0], sizes = [1, 1], strides = [1, 1]} : vector<2x1xf32> to vector<1x1xf32>
    %1713 = arith.addf %1711, %1712 : vector<1x1xf32>
    %c0_745 = arith.constant 0 : index
    %c0_746 = arith.constant 0 : index
    %1714 = vector.load %arg12[%c0_745, %c0_746] : memref<1x2xf32, #tpu.memory_space<vmem>>, vector<1x2xf32>
    %1715 = tpu.concatenate %1709, %1713 in 1 : vector<1x1xf32>, vector<1x1xf32> -> vector<1x2xf32>
    %1716 = vector.broadcast %1332 : vector<1x1xf32> to vector<1x2xf32>
    %1717 = arith.mulf %1716, %1715 : vector<1x2xf32>
    %1718 = arith.addf %1714, %1717 : vector<1x2xf32>
    %c0_747 = arith.constant 0 : index
    %c0_748 = arith.constant 0 : index
    %1719 = vector.load %arg12[%c0_747, %c0_748] : memref<1x2xf32, #tpu.memory_space<vmem>>, vector<1x2xf32>
    tpu.vector_store %arg12[%c0_747, %c0_748], %1718 {strides = array<i32>} : memref<1x2xf32, #tpu.memory_space<vmem>>, vector<1x2xf32>,
    %cst_749 = arith.constant 0.000000e+00 : f32
    %1720 = vector.broadcast %cst_749 : f32 to vector<2x1xf32>
    %1721 = vector.broadcast %1332 : vector<1x1xf32> to vector<2x1xf32>
    %1722 = arith.addf %1721, %1720 : vector<2x1xf32>
    %cst_750 = arith.constant 0.000000e+00 : f32
    %1723 = vector.broadcast %cst_750 : f32 to vector<2x2xf32>
    %1724 = tpu.concatenate %1467, %1594, %1606, %1644, %1681, %1722, %1723 in 1 : vector<2x1xf32>, vector<2x1xf32>, vector<2x1xf32>, vector<2x1xf32>, vector<2x1xf32>, vector<2x1xf32>, vector<2x2xf32> -> vector<2x8xf32>
    %c3_751 = arith.constant 3 : index
    %c0_752 = arith.constant 0 : index
    %c0_753 = arith.constant 0 : index
    %1725 = vector.load %arg11[%c3_751, %c0_752, %c0_753] : memref<4x2x8xf32, #tpu.memory_space<vmem>>, vector<1x2x8xf32>
    %1726 = vector.shape_cast %1725 : vector<1x2x8xf32> to vector<2x8xf32>
    %1727 = vector.shape_cast %1724 : vector<2x8xf32> to vector<1x2x8xf32>
    tpu.vector_store %arg11[%c3_751, %c0_752, %c0_753], %1727 {strides = array<i32>} : memref<4x2x8xf32, #tpu.memory_space<vmem>>, vector<1x2x8xf32>,
    %c0_754 = arith.constant 0 : index
    %c0_755 = arith.constant 0 : index
    %c0_756 = arith.constant 0 : index
    %1728 = vector.load %arg13[%c0_754, %c0_755, %c0_756] : memref<2x12x32xf32, #tpu.memory_space<vmem>>, vector<2x12x32xf32>
    %1729 = vector.shape_cast %1615 : vector<2x12xf32> to vector<2x12x1xf32>
    %1730 = vector.broadcast %1729 : vector<2x12x1xf32> to vector<2x12x32xf32>
    %1731 = arith.mulf %1730, %1728 : vector<2x12x32xf32>
    %cst_757 = arith.constant dense<0.000000e+00> : vector<2x32xf32>
    %1732 = vector.multi_reduction <add>, %1731, %cst_757 [1] : vector<2x12x32xf32> to vector<2x32xf32>
    %cst_758 = arith.constant dense<0.000000e+00> : vector<2xf32>
    %1733 = vector.multi_reduction <add>, %1615, %cst_758 [1] : vector<2x12xf32> to vector<2xf32>
    %1734 = vector.shape_cast %1733 : vector<2xf32> to vector<2x1xf32>
    %cst_759 = arith.constant 1.000000e+00 : f32
    %1735 = vector.broadcast %cst_759 : f32 to vector<2x1xf32>
    %1736 = arith.addf %1735, %1734 : vector<2x1xf32>
    %c0_760 = arith.constant 0 : index
    %c0_761 = arith.constant 0 : index
    %1737 = vector.load %arg18[%c0_760, %c0_761] : memref<2x32xf32, #tpu.memory_space<vmem>>, vector<2x32xf32>
    %1738 = vector.broadcast %1736 : vector<2x1xf32> to vector<2x32xf32>
    %1739 = arith.divf %1732, %1738 : vector<2x32xf32>
    %1740 = arith.subf %1739, %1737 : vector<2x32xf32>
    %1741 = vector.broadcast %1332 : vector<1x1xf32> to vector<2x32xf32>
    %1742 = arith.mulf %1741, %1740 : vector<2x32xf32>
    %1743 = arith.addf %1737, %1742 : vector<2x32xf32>
    %c0_762 = arith.constant 0 : index
    %c0_763 = arith.constant 0 : index
    %1744 = vector.load %arg18[%c0_762, %c0_763] : memref<2x32xf32, #tpu.memory_space<vmem>>, vector<2x32xf32>
    tpu.vector_store %arg18[%c0_762, %c0_763], %1743 {strides = array<i32>} : memref<2x32xf32, #tpu.memory_space<vmem>>, vector<2x32xf32>,
    %1745 = vector.shape_cast %1554 : vector<2x32xf32> to vector<2x1x32xf32>
    %c0_764 = arith.constant 0 : index
    %c11 = arith.constant 11 : index
    %c0_765 = arith.constant 0 : index
    %1746 = vector.load %arg13[%c0_764, %c11, %c0_765] : memref<2x12x32xf32, #tpu.memory_space<vmem>>, vector<2x1x32xf32>
    tpu.vector_store %arg13[%c0_764, %c11, %c0_765], %1745 {strides = array<i32>} : memref<2x12x32xf32, #tpu.memory_space<vmem>>, vector<2x1x32xf32>,
    %1747 = vector.shape_cast %1554 : vector<2x32xf32> to vector<2x1x32xf32>
    %c0_766 = arith.constant 0 : index
    %c11_767 = arith.constant 11 : index
    %c0_768 = arith.constant 0 : index
    %1748 = vector.load %arg14[%c0_766, %c11_767, %c0_768] : memref<2x12x32xf32, #tpu.memory_space<vmem>>, vector<2x1x32xf32>
    tpu.vector_store %arg14[%c0_766, %c11_767, %c0_768], %1747 {strides = array<i32>} : memref<2x12x32xf32, #tpu.memory_space<vmem>>, vector<2x1x32xf32>,
    %cst_769 = arith.constant 1.100000e+01 : f32
    %1749 = vector.broadcast %cst_769 : f32 to vector<2x12xf32>
    %1750 = arith.cmpf olt, %24, %1749 : vector<2x12xf32>
    %cst_770 = arith.constant 1.000000e+00 : f32
    %1751 = vector.broadcast %cst_770 : f32 to vector<2x12xf32>
    %1752 = arith.select %1750, %1618, %1751 : vector<2x12xi1>, vector<2x12xf32>
    %cst_771 = arith.constant dense<0x7F800000> : vector<2xf32>
    %1753 = vector.multi_reduction <minimumf>, %1752, %cst_771 [1] : vector<2x12xf32> to vector<2xf32>
    %1754 = vector.shape_cast %1753 : vector<2xf32> to vector<2x1xf32>
    %1755 = vector.extract_strided_slice %1754 {offsets = [0, 0], sizes = [1, 1], strides = [1, 1]} : vector<2x1xf32> to vector<1x1xf32>
    %1756 = vector.extract_strided_slice %1754 {offsets = [1, 0], sizes = [1, 1], strides = [1, 1]} : vector<2x1xf32> to vector<1x1xf32>
    %1757 = arith.minimumf %1755, %1756 : vector<1x1xf32>
    %cst_772 = arith.constant 0.000000e+00 : f32
    %1758 = vector.broadcast %cst_772 : f32 to vector<1x1xf32>
    %1759 = arith.cmpf ogt, %1757, %1758 : vector<1x1xf32>
    %1760 = arith.extui %1759 : vector<1x1xi1> to vector<1x1xi32>
    %1761 = arith.sitofp %1760 : vector<1x1xi32> to vector<1x1xf32>
    %c0_773 = arith.constant 0 : index
    %c0_774 = arith.constant 0 : index
    %1762 = vector.load %arg19[%c0_773, %c0_774] : memref<1x1xf32, #tpu.memory_space<vmem>>, vector<1x1xf32>
    %1763 = arith.maximumf %1762, %1761 : vector<1x1xf32>
    %c0_775 = arith.constant 0 : index
    %c0_776 = arith.constant 0 : index
    %1764 = vector.load %arg19[%c0_775, %c0_776] : memref<1x1xf32, #tpu.memory_space<vmem>>, vector<1x1xf32>
    tpu.vector_store %arg19[%c0_775, %c0_776], %1763 {strides = array<i32>} : memref<1x1xf32, #tpu.memory_space<vmem>>, vector<1x1xf32>,
    return
  }
  func.func @transform_0(%arg0: i32) -> (i32, i32, i32) {
    %c0_i32 = arith.constant 0 : i32
    %c0_i32_0 = arith.constant 0 : i32
    %c0_i32_1 = arith.constant 0 : i32
    %c0_i32_2 = arith.constant 0 : i32
    return %c0_i32, %c0_i32_0, %c0_i32_1 : i32, i32, i32
  }
  func.func @transform_1(%arg0: i32) -> (i32, i32, i32) {
    %c0_i32 = arith.constant 0 : i32
    %c0_i32_0 = arith.constant 0 : i32
    %c0_i32_1 = arith.constant 0 : i32
    %c0_i32_2 = arith.constant 0 : i32
    return %c0_i32, %c0_i32_0, %c0_i32_1 : i32, i32, i32
  }
  func.func @transform_2(%arg0: i32) -> (i32, i32) {
    %c0_i32 = arith.constant 0 : i32
    %c0_i32_0 = arith.constant 0 : i32
    %c0_i32_1 = arith.constant 0 : i32
    return %c0_i32, %c0_i32_0 : i32, i32
  }
  func.func @transform_3(%arg0: i32) -> (i32, i32) {
    %c0_i32 = arith.constant 0 : i32
    %c0_i32_0 = arith.constant 0 : i32
    %c0_i32_1 = arith.constant 0 : i32
    return %c0_i32, %c0_i32_0 : i32, i32
  }
  func.func @transform_4(%arg0: i32) -> (i32, i32) {
    %c0_i32 = arith.constant 0 : i32
    %c0_i32_0 = arith.constant 0 : i32
    %c0_i32_1 = arith.constant 0 : i32
    return %c0_i32, %c0_i32_0 : i32, i32
  }
  func.func @transform_5(%arg0: i32) -> (i32, i32) {
    %c0_i32 = arith.constant 0 : i32
    %c0_i32_0 = arith.constant 0 : i32
    %c0_i32_1 = arith.constant 0 : i32
    return %c0_i32, %c0_i32_0 : i32, i32
  }
  func.func @transform_6(%arg0: i32) -> (i32, i32, i32) {
    %c0_i32 = arith.constant 0 : i32
    %c0_i32_0 = arith.constant 0 : i32
    %c0_i32_1 = arith.constant 0 : i32
    %c0_i32_2 = arith.constant 0 : i32
    return %c0_i32, %c0_i32_0, %c0_i32_1 : i32, i32, i32
  }
  func.func @transform_7(%arg0: i32) -> (i32, i32, i32) {
    %c0_i32 = arith.constant 0 : i32
    %c0_i32_0 = arith.constant 0 : i32
    %c0_i32_1 = arith.constant 0 : i32
    %c0_i32_2 = arith.constant 0 : i32
    return %c0_i32, %c0_i32_0, %c0_i32_1 : i32, i32, i32
  }
  func.func @transform_8(%arg0: i32) -> (i32, i32, i32) {
    %c0_i32 = arith.constant 0 : i32
    %c0_i32_0 = arith.constant 0 : i32
    %c0_i32_1 = arith.constant 0 : i32
    %c0_i32_2 = arith.constant 0 : i32
    return %c0_i32, %c0_i32_0, %c0_i32_1 : i32, i32, i32
  }
  func.func @transform_9(%arg0: i32) -> (i32, i32, i32) {
    %c0_i32 = arith.constant 0 : i32
    %c0_i32_0 = arith.constant 0 : i32
    %c0_i32_1 = arith.constant 0 : i32
    %c0_i32_2 = arith.constant 0 : i32
    return %c0_i32, %c0_i32_0, %c0_i32_1 : i32, i32, i32
  }
  func.func @transform_10(%arg0: i32) -> (i32, i32, i32) {
    %c0_i32 = arith.constant 0 : i32
    %c0_i32_0 = arith.constant 0 : i32
    %c0_i32_1 = arith.constant 0 : i32
    %c0_i32_2 = arith.constant 0 : i32
    return %c0_i32, %c0_i32_0, %c0_i32_1 : i32, i32, i32
  }
  func.func @transform_11(%arg0: i32) -> (i32, i32) {
    %c0_i32 = arith.constant 0 : i32
    %c0_i32_0 = arith.constant 0 : i32
    %c0_i32_1 = arith.constant 0 : i32
    return %c0_i32, %c0_i32_0 : i32, i32
  }
}

</mosaic_0001>

<bundles_post_ra>
// kernel: tpu_custom_call.1
= control target key start
LH: loop header
LB: loop body
LE: loop exit
PB: predicated region body
PF: predicated region fallthrough
CT: control target
= control target key end

     0   :  { %17 = vsyncpa [#allocation10], 0  ;;  %s6270_s0 = inlined_call_operand.hbm [shape: f32[2,8,32], index: 0, kind: input, shape index: {}]   ;;  %s6271_s1 = inlined_call_operand.hbm [shape: f32[2,8,32], index: 1, kind: input, shape index: {}]   ;;  %s6272_s2 = inlined_call_operand.vmem [shape: f32[1,32], index: 2, kind: input, shape index: {}]   ;;  %s6273_s3 = inlined_call_operand.vmem [shape: f32[2,32], index: 3, kind: input, shape index: {}]   ;;  %s6274_s4 = inlined_call_operand.vmem [shape: f32[32,2], index: 4, kind: input, shape index: {}]   ;;  %s6275_s5 = inlined_call_operand.vmem [shape: f32[32,32], index: 5, kind: input, shape index: {}]   ;;  %s6276_s6 = inlined_call_operand.vmem [shape: f32[1,1,32], index: 6, kind: input, shape index: {}]   ;;  %s6277_s7 = inlined_call_operand.hbm [shape: f32[2,64,128], index: 7, kind: input, shape index: {}]   ;;  %s6278_s8 = inlined_call_operand.vmem [shape: f32[2,1,128], index: 8, kind: input, shape index: {}]   ;;  %s6279_s9 = inlined_call_operand.vmem [shape: f32[4,2,2], index: 9, kind: input, shape index: {}]   ;;  %s6280_s10 = inlined_call_operand.hbm [shape: f32[4,2,8], index: 10, kind: output, shape index: {0}]   ;;  %s6281_s11 = inlined_call_operand.hbm [shape: f32[1,2], index: 11, kind: output, shape index: {1}]  }
   0x1   :  { %18 = vsyncpa [#allocation13], 0 }
   0x2   :  { %19 = vsyncpa [#allocation11], 0 }
   0x3   :  { %20 = vsyncpa [#allocation17], 0  ;;  %s38_s19 = sshll.u32 %s6271_s1, 4  ;;  %s4353_s20 = smov [#allocation12]   ;;  %s39_s19 = int_to_ptr.hbm [resolvable:$true] %s38_s19 }
   0x4   :  { %s40_s21 = sshll.u32 %s4353_s20, 4  ;;  %s25_s24 = sshll.u32 %s6270_s0, 4  ;;  %s41_s21 = int_to_ptr.vmem [resolvable:$true] %s40_s21  ;;  %s26_s24 = int_to_ptr.hbm [resolvable:$true] %s25_s24 }
   0x5   :  { %s4354_s25 = smov 128   ;;  %s4355_s26 = smov 8  }
   0x6   :  { %46 = dma.hbm_to_vmem [thread:$0]  %s39_s19, 256, %s41_s21, [#allocation13], %s4354_s25, %s4354_s25, %s4355_s26  }
   0x7   :  { %s4356_s27 = smov [#allocation9]   ;;  %s61_s12 = sshll.u32 %s6277_s7, 4  ;;  %s62_s12 = int_to_ptr.hbm [resolvable:$true] %s61_s12 }
   0x8   :  { %s27_s28 = sshll.u32 %s4356_s27, 4  ;;  %s4357_s1 = smov [#allocation14]   ;;  %s28_s28 = int_to_ptr.vmem [resolvable:$true] %s27_s28 }
   0x9   :  { %33 = dma.hbm_to_vmem [thread:$0]  %s26_s24, 256, %s28_s28, [#allocation10], %s4354_s25, %s4354_s25, %s4355_s26  }
   0xa   :  { %s63_s13 = sshll.u32 %s4357_s1, 4  ;;  %s64_s13 = int_to_ptr.vmem [resolvable:$true] %s63_s13 }
   0xb   :  { %69 = dma.hbm_to_vmem [thread:$0]  %s62_s12, 2048, %s64_s13, [#allocation13], %s4354_s25, %s4354_s25, %s4355_s26  }
   0xc   :  { %4345 = dma.done.wait [#allocation10], 256  }
   0xd   :  { %4346 = vsyncadd [#allocation10], 4294967040 }
   0xe   :  { %4347 = dma.done.wait [#allocation13], 2304  }
   0xf   :  { %4348 = vsyncadd [#allocation13], 4294964992  ;;  %vm6344_vm0 = vcmask 254976   ;;  %v6287_v0 = vmov 0.0   ;;  %v4448_v1 = vld [vmem:[#allocation14 + $0x38] sm:$0xff]  ;;  %v4450_v2 = vld [vmem:[#allocation14 + $0x30] sm:$0xff] }
  0x10   :  { %91 = vst.msk [vmem:[#allocation4] sm:$0x3] %vm6344_vm0, %v6287_v0  ;;  %159 = vmatpush.msra.mxu0 %v4448_v1  ;;  %417 = vmatpush.msra.mxu3 %v4448_v1  ;;  %s4359_s0 = smov 32   ;;  %v140_v4 = vld [vmem:[#allocation14 + $0x28] sm:$0xff]  ;;  %v139_v5 = vld [vmem:[#allocation14 + $0x20] sm:$0xff]  ;;  %v138_v6 = vld [vmem:[#allocation14 + $0x18] sm:$0xff] }
  0x11   :  { %92 = vst.msk [vmem:[#allocation4 + $0x2] sm:$0x3] %vm6344_vm0, %v6287_v0  ;;  %v137_v7 = vld [vmem:[#allocation14 + $0x10] sm:$0xff]  ;;  %v136_v8 = vld [vmem:[#allocation14 + $0x8] sm:$0xff]  ;;  %v135_v10 = vld [vmem:[#allocation14] sm:$0xff]  ;;  %vm103_vm1 = vcmask 261120  }
  0x12   :  { %93 = vst.msk [vmem:[#allocation5] sm:$0x3] %vm6344_vm0, %v6287_v0  ;;  %160 = vmatpush.msra.mxu0 %v4450_v2  ;;  %418 = vmatpush.msra.mxu3 %v4450_v2  ;;  %v3887_v9 = vld [vmem:[%s6272_s2] ss:$0 sm:$0xff]  ;;  %vm147_vm2 = vcmask 523264   ;;  %s4360_s16 = smov 64  }
  0x13   :  { %94 = vst.msk [vmem:[#allocation5 + $0x2] sm:$0x3] %vm6344_vm0, %v6287_v0  ;;  %v3888_v15 = vld [vmem:[%s6278_s8] ss:$0 sm:$0xff]  ;;  %v243_v31 = vld [vmem:[#allocation14 + $0x78] sm:$0xff]  ;;  %v241_v33 = vld [vmem:[#allocation14 + $0x68] sm:$0xff] }
  0x14   :  { %161 = vmatpush.msra.mxu0 %v140_v4  ;;  %419 = vmatpush.msra.mxu3 %v140_v4  ;;  %102 = vst.msk [vmem:[#allocation7] sm:$0x3] %vm6344_vm0, %v3887_v9  ;;  %v242_v32 = vld [vmem:[#allocation14 + $0x70] sm:$0xff]  ;;  %v240_v34 = vld [vmem:[#allocation14 + $0x60] sm:$0xff]  ;;  %v239_v35 = vld [vmem:[#allocation14 + $0x58] sm:$0xff]  ;;  %s4361_s27 = smov 1  }
  0x15   :  { %104 = vst.msk [vmem:[#allocation2] sm:$0xff] %vm103_vm1, %v6287_v0  ;;  %260 = vmatpush.msra.mxu1 %v243_v31  ;;  %v238_v36 = vld [vmem:[#allocation14 + $0x50] sm:$0xff]  ;;  %v237_v37 = vld [vmem:[#allocation14 + $0x48] sm:$0xff]  ;;  %v236_v40 = vld [vmem:[#allocation14 + $0x40] sm:$0xff]  ;;  %vm95_vm4 = vcmask 91136   ;;  %vm105_vm5 = vcmask 257024  }
  0x16   :  { %162 = vmatpush.msra.mxu0 %v139_v5  ;;  %420 = vmatpush.msra.mxu3 %v139_v5  ;;  %107 = vst.msk [vmem:[#allocation2 + $0x10] sm:$0xff] %vm103_vm1, %v6287_v0  ;;  %v3889_v45 = vld [vmem:[%s6278_s8 + $0x1] ss:$0 sm:$0xff]  ;;  %v320_v60 = vld [vmem:[%s6274_s4 + $0x18] sm:$0xff]  ;;  %v319_v61 = vld [vmem:[%s6274_s4 + $0x10] sm:$0xff]  ;;  %vm6345_vm8 = vcmask 0  }
  0x17   :  { %v4452_v3 = vld [vmem:[#allocation4] sm:$0x3]  ;;  %109 = vst.msk [vmem:[#allocation3] sm:$0xff] %vm103_vm1, %v6287_v0  ;;  %261 = vmatpush.msra.mxu1 %v242_v32  ;;  %338 = vmatpush.msra.mxu2 %v320_v60  ;;  %v318_v62 = vld [vmem:[%s6274_s4 + $0x8] sm:$0xff]  ;;  %vm650_vm9 = vcmask 130112   ;;  %vm655_vm10 = vcmask 1041409  }
  0x18   :  { %131 = vrot.lane.b32.xlu0 %v4452_v3, %s4359_s0  ;;  %163 = vmatpush.msra.mxu0 %v138_v6  ;;  %111 = vst.msk [vmem:[#allocation3 + $0x10] sm:$0xff] %vm103_vm1, %v6287_v0  ;;  %v4480_v25 = vld [vmem:[#allocation4 + $0x2] sm:$0x3]  ;;  %s4364_s28 = smov 96   ;;  %s4366_s29 = smov 3  }
  0x19   :  { %421 = vmatpush.msra.mxu3 %v138_v6  ;;  %v129_v11 = vld [vmem:[#allocation5] sm:$0x3]  ;;  %262 = vmatpush.msra.mxu1 %v241_v33  ;;  %96 = vst.msk [vmem:[#allocation6] sm:$0x3] %vm95_vm4, %v6287_v0  ;;  %s3717_s21 = sshll.u32 %s6281_s11, 4  ;;  %s3703_s23 = sshll.u32 %s6280_s10, 4  ;;  %s3718_s21 = int_to_ptr.hbm [resolvable:$true] %s3717_s21  ;;  %s3704_s23 = int_to_ptr.hbm [resolvable:$true] %s3703_s23 }
  0x1a   :  { %164 = vmatpush.msra.mxu0 %v137_v7  ;;  %177 = vrot.lane.b32.xlu1 %v129_v11, %s4359_s0  ;;  %v225_v41 = vld [vmem:[#allocation5 + $0x2] sm:$0x3]  ;;  %v378_v11 = vld [vmem:[%s6273_s3] sm:$0x1]  ;;  %110 = vst.msk [vmem:[#allocation3 + $0x8] sm:$0xf] %vm105_vm5, %v6287_v0 }
  0x1b   :  { %422 = vmatpush.msra.mxu3 %v137_v7  ;;  %v127_v12 = vld [vmem:[#allocation7] sm:$0x3]  ;;  %263 = vmatpush.msra.mxu1 %v240_v34  ;;  %v317_v63 = vld [vmem:[%s6274_s4] sm:$0xff]  ;;  %112 = vst.msk [vmem:[#allocation3 + $0x18] sm:$0xf] %vm105_vm5, %v6287_v0  ;;  %s4370_s10 = smov 2  }
  0x1c   :  { %165 = vmatpush.msra.mxu0 %v136_v8  ;;  %339 = vmatpush.msra.mxu2 %v319_v61  ;;  %106 = vst.msk [vmem:[#allocation2 + $0x8] sm:$0xf] %vm105_vm5, %v6287_v0 }
  0x1d   :  { %423 = vmatpush.msra.mxu3 %v136_v8  ;;  %264 = vmatpush.msra.mxu1 %v239_v35  ;;  %v6283_v8 = vmov 1   ;;  %108 = vst.msk [vmem:[#allocation2 + $0x18] sm:$0xf] %vm105_vm5, %v6287_v0 }
  0x1e   :  { %166 = vmatpush.msra.mxu0 %v135_v10  ;;  %340 = vmatpush.msra.mxu2 %v318_v62  ;;  %89 = vst.msk [vmem:[#allocation8] sm:$0x1] %vm6345_vm8, %v6287_v0 }
  0x1f   :  { %424 = vmatpush.msra.mxu3 %v135_v10  ;;  %265 = vmatpush.msra.mxu1 %v238_v36 }
  0x20   :  { %1249 = vmatpush.msrb.mxu0 %v320_v60  ;;  %341 = vmatpush.msra.mxu2 %v317_v63  ;;  %v519_v60 = vld [vmem:[%s6275_s5 + $0x18] sm:$0xff] }
  0x21   :  { %266 = vmatpush.msra.mxu1 %v237_v37  ;;  %3810 = vset.pattern.permute.xlu1 %v6283_v8 }
  0x22   :  { %1250 = vmatpush.msrb.mxu0 %v319_v61  ;;  %482 = vmatpush.msrb.mxu2 %v243_v31  ;;  %v518_v61 = vld [vmem:[%s6275_s5 + $0x10] sm:$0xff] }
  0x23   :  { %267 = vmatpush.msra.mxu1 %v236_v40  ;;  %537 = vmatpush.msrb.mxu3 %v519_v60 }
  0x24   :  { %1251 = vmatpush.msrb.mxu0 %v318_v62  ;;  %483 = vmatpush.msrb.mxu2 %v242_v32  ;;  %v517_v62 = vld [vmem:[%s6275_s5 + $0x8] sm:$0xff] }
  0x25   :  { %1074 = vmatpush.msrb.mxu1 %v4448_v1  ;;  %538 = vmatpush.msrb.mxu3 %v518_v61 }
  0x26   :  { %1252 = vmatpush.msrb.mxu0 %v317_v63  ;;  %484 = vmatpush.msrb.mxu2 %v241_v33  ;;  %v516_v63 = vld [vmem:[%s6275_s5] sm:$0xff] }
  0x27   :  { %1075 = vmatpush.msrb.mxu1 %v4450_v2  ;;  %539 = vmatpush.msrb.mxu3 %v517_v62 }
  0x28   :  { %485 = vmatpush.msrb.mxu2 %v240_v34 }
  0x29   :  { %540 = vmatpush.msrb.mxu3 %v516_v63 }
  0x2a   :  { %486 = vmatpush.msrb.mxu2 %v239_v35 }
  0x2c   :  { %487 = vmatpush.msrb.mxu2 %v238_v36 }
  0x2e   :  { %488 = vmatpush.msrb.mxu2 %v237_v37 }
  0x30   :  { %489 = vmatpush.msrb.mxu2 %v236_v40 }
  0x8a   :  { %v132_v13 = vpop.permute.xlu0 %131 }
  0x8b   :  { %v134_v14 = vsel %vm103_vm1, %v127_v12, %v132_v13  ;;  %v379_v12 = vld [vmem:[%s6273_s3 + $0x1] sm:$0x1] }
  0x8c   :  { %3733 = vmatmul.msk.f32.vlgmr.msra.gmra.mxu0 %vm147_vm2, %v134_v14  ;;  %v4484_v26 = vpop.permute.xlu1 %177  ;;  %v380_v13 = vsub.f32 %v379_v12, %v378_v11  ;;  %v118_v12 = vld [vmem:[#allocation12 + $0x8] sm:$0xff] }
  0x8d   :  { %120 = vst.msk [vmem:[#allocation3 + $0x10] sm:$0xff] %vm103_vm1, %v118_v12 }
  0x8e   :  { %v386_v14 = vperm.slane %v380_v13, 0 }
 0x109   :  { %v168_v16 = vpop.f32.mrf.mxu0 }
 0x10a   :  { %v169_v17 = vadd.f32 %v3888_v15, %v168_v16  ;;  %v3890_v15 = vld [vmem:[%s6273_s3] ss:$0 sm:$0xff] }
 0x10c   :  { %3912 = vtanh.f32 %v169_v17  ;;  %v171_v19 = vmul.f32 0.5, %v169_v17 }
 0x10e   :  { %3914 = vtanh.f32 %v171_v19 }
 0x112   :  { %v3913_v18 = vpop.eup %3912 }
 0x113   :  { %182 = vrot.lane.b32.xlu0 %v3913_v18, %s4360_s16 }
 0x114   :  { %v3915_v20 = vpop.eup %3914 }
 0x115   :  { %v173_v21 = vadd.f32 1.0, %v3915_v20 }
 0x117   :  { %v174_v22 = vmul.f32 0.5, %v173_v21  ;;  %v3891_v21 = vld [vmem:[%s6278_s8] ss:$0 sm:$0xff] }
 0x119   :  { %v180_v27 = vmul.f32 %v4484_v26, %v174_v22 }
 0x11b   :  { %231 = vrot.lane.b32.xlu0 %v4480_v25, %s4359_s0 }
 0x185   :  { %v183_v23 = vpop.permute.xlu0 %182 }
 0x186   :  { %v185_v24 = vmul.f32 %v183_v23, %v174_v22 }
 0x188   :  { %187 = vrot.lane.b32.xlu1 %v185_v24, %s4359_s0 }
 0x18d   :  { %v232_v42 = vpop.permute.xlu0 %231 }
 0x1fa   :  { %v188_v28 = vpop.permute.xlu1 %187 }
 0x1fb   :  { %v4487_v29 = vadd.f32 %v188_v28, %v180_v27 }
 0x1fd   :  { %3916 = vtanh.f32 %v4487_v29 }
 0x203   :  { %v3917_v30 = vpop.eup %3916 }
 0x204   :  { %193 = vrot.lane.b32.xlu2 %v3917_v30, %s4360_s16 }
 0x25e   :  { %v194_v38 = vpop.permute.xlu2 %193 }
 0x25f   :  { %v4491_v39 = vmul.f32 %v194_v38, %v174_v22 }
 0x261   :  { %227 = vrot.lane.b32.xlu2 %v4491_v39, %s4359_s0 }
 0x269   :  { %278 = vrot.lane.b32.xlu2 %v225_v41, %s4359_s0 }
 0x2bb   :  { %v228_v43 = vpop.permute.xlu2 %227 }
 0x2bc   :  { %v234_v44 = vsel %vm103_vm1, %v228_v43, %v232_v42 }
 0x2bd   :  { %3735 = vmatmul.msk.f32.vlgmr.msra.gmra.mxu1 %vm147_vm2, %v234_v44  ;;  %v3892_v44 = vld [vmem:[%s6278_s8 + $0x1] ss:$0 sm:$0xff] }
 0x2c3   :  { %v4505_v55 = vpop.permute.xlu2 %278 }
 0x33a   :  { %v269_v46 = vpop.f32.mrf.mxu1 }
 0x33b   :  { %v270_v47 = vadd.f32 %v3889_v45, %v269_v46 }
 0x33d   :  { %3918 = vtanh.f32 %v270_v47  ;;  %v272_v49 = vmul.f32 0.5, %v270_v47 }
 0x33f   :  { %3920 = vtanh.f32 %v272_v49 }
 0x343   :  { %v3919_v48 = vpop.eup %3918 }
 0x344   :  { %283 = vrot.lane.b32.xlu1 %v3919_v48, %s4360_s16 }
 0x345   :  { %v3921_v50 = vpop.eup %3920 }
 0x346   :  { %v274_v51 = vadd.f32 1.0, %v3921_v50 }
 0x348   :  { %v275_v52 = vmul.f32 0.5, %v274_v51 }
 0x34a   :  { %v281_v56 = vmul.f32 %v4505_v55, %v275_v52 }
 0x3b6   :  { %v284_v53 = vpop.permute.xlu1 %283 }
 0x3b7   :  { %v286_v54 = vmul.f32 %v284_v53, %v275_v52 }
 0x3b9   :  { %288 = vrot.lane.b32.xlu0 %v286_v54, %s4359_s0 }
 0x42b   :  { %v289_v57 = vpop.permute.xlu0 %288 }
 0x42c   :  { %v4508_v58 = vadd.f32 %v289_v57, %v281_v56 }
 0x42e   :  { %3922 = vtanh.f32 %v4508_v58 }
 0x434   :  { %v3923_v59 = vpop.eup %3922 }
 0x435   :  { %294 = vrot.lane.b32.xlu1 %v3923_v59, %s4360_s16 }
 0x4a7   :  { %v295_v1 = vpop.permute.xlu1 %294 }
 0x4a8   :  { %v4524_v2 = vmul.f32 %v295_v1, %v275_v52 }
 0x4aa   :  { %322 = vrot.lane.b32.xlu2 %v4524_v2, %s4359_s0 }
 0x4b2   :  { %390 = vrot.lane.b32.xlu2 %v4491_v39, %s4360_s16 }
 0x504   :  { %v323_v4 = vpop.permute.xlu2 %322 }
 0x505   :  { %3736 = vmatmul.msk.f32.vlgmr.msra.gmra.mxu2 %vm103_vm1, %v323_v4 }
 0x50c   :  { %v391_v19 = vpop.permute.xlu2 %390 }
 0x588   :  { %v343_v5 = vpop.f32.mrf.mxu2 }
 0x589   :  { %3924 = vtanh.f32 %v343_v5  ;;  %v121_v5 = vlaneseq }
 0x58b   :  { %v4591_v11 = vshrl.u32 %v121_v5, 7 }
 0x58d   :  { %v4598_v13 = vadd.s32 8, %v4591_v11  ;;  %3811 = vset.pattern.permute.xlu0 %v4591_v11  ;;  %3813 = vset.pattern.permute.xlu2 %v4591_v11 }
 0x58f   :  { %v3925_v6 = vpop.eup %3924 }
 0x590   :  { %v4531_v7 = vmul.f32 2.5, %v3925_v6  ;;  %v117_v6 = vld [vmem:[#allocation12] sm:$0xff] }
 0x591   :  { %119 = vst.msk [vmem:[#allocation3] sm:$0xff] %vm103_vm1, %v117_v6 }
 0x592   :  { %371 = vrot.lane.b32.xlu0 %v4531_v7, %s4361_s27 }
 0x604   :  { %v372_v9 = vpop.permute.xlu0 %371 }
 0x605   :  { %vm374_vm3 = vcmp.gt.f32.partialorder %v4531_v7, %v372_v9  ;;  %v4589_v9 = vand.u32 127, %v121_v5 }
 0x606   :  { %v4538_v10 = vsel %vm374_vm3, 1.0, %v6287_v0 }
 0x607   :  { %383 = vperm.xlu1 %3810, %v4538_v10  }
 0x60f   :  { %3812 = vset.pattern.permute.xlu1 %v4598_v13 }
 0x679   :  { %v384_v16 = vpop.permute.xlu1 %383 }
 0x67a   :  { %v387_v17 = vmul.f32 %v386_v14, %v384_v16  ;;  %v4601_v14 = vcvt.s32.f32 %v4589_v9 }
 0x67c   :  { %v389_v18 = vadd.f32 %v3890_v15, %v387_v17  ;;  %v4612_v15 = vld [vmem:[#allocation6] sm:$0x3]  ;;  %vm592_vm6 = vcmp.lt.f32.partialorder %v4601_v14, 8.0 }
 0x67d   :  { %vm593_vm7 = vcmp.gt.f32.partialorder %v4612_v15, 0.0 }
 0x67e   :  { %v393_v20 = vsel %vm103_vm1, %v389_v18, %v391_v19  ;;  %v594_v16 = vsel %vm593_vm7, -100.0, %v6287_v0 }
 0x67f   :  { %3738 = vmatmul.msk.f32.vlgmr.msra.gmra.mxu3 %vm147_vm2, %v393_v20  ;;  %v595_v17 = vsel %vm592_vm6, %v594_v16, -1e+30 }
 0x680   :  { %v597_v18 = vperm.slane %v595_v17, 0 }
 0x702   :  { %v426_v22 = vpop.f32.mrf.mxu3 }
 0x703   :  { %v427_v23 = vadd.f32 %v3891_v21, %v426_v22  ;;  %v545_v21 = vld [vmem:[#allocation3] sm:$0xff]  ;;  %v546_v22 = vld [vmem:[#allocation3 + $0x8] sm:$0xf] }
 0x705   :  { %3926 = vtanh.f32 %v427_v23  ;;  %v429_v27 = vmul.f32 0.5, %v427_v23 }
 0x707   :  { %3928 = vtanh.f32 %v429_v27  ;;  %v547_v27 = vld [vmem:[#allocation3 + $0x10] sm:$0xff] }
 0x70b   :  { %v3927_v24 = vpop.eup %3926 }
 0x70c   :  { %436 = vrot.lane.b32.xlu0 %v3927_v24, %s4360_s16 }
 0x70d   :  { %v3929_v28 = vpop.eup %3928 }
 0x70e   :  { %v431_v30 = vadd.f32 1.0, %v3929_v28 }
 0x710   :  { %v432_v31 = vmul.f32 0.5, %v431_v30 }
 0x712   :  { %v434_v34 = vmul.f32 %v432_v31, %v4487_v29 }
 0x77e   :  { %v437_v32 = vpop.permute.xlu0 %436 }
 0x77f   :  { %v439_v33 = vmul.f32 %v437_v32, %v432_v31  ;;  %v548_v32 = vld [vmem:[#allocation3 + $0x18] sm:$0xf] }
 0x781   :  { %441 = vrot.lane.b32.xlu1 %v439_v33, %s4359_s0 }
 0x789   :  { %455 = vrot.lane.b32.xlu1 %v4524_v2, %s4360_s16 }
 0x7f3   :  { %v442_v35 = vpop.permute.xlu1 %441 }
 0x7f4   :  { %v444_v36 = vadd.f32 %v442_v35, %v434_v34  ;;  %v3893_v35 = vld [vmem:[%s6276_s6] ss:$0 sm:$0xff] }
 0x7f6   :  { %3930 = vtanh.f32 %v444_v36 }
 0x7fb   :  { %v456_v41 = vpop.permute.xlu1 %455 }
 0x7fc   :  { %v3931_v37 = vpop.eup %3930 }
 0x7fd   :  { %447 = vrot.lane.b32.xlu2 %v3931_v37, %s4360_s16 }
 0x857   :  { %v448_v38 = vpop.permute.xlu2 %447 }
 0x858   :  { %v450_v40 = vmul.f32 %v448_v38, %v432_v31 }
 0x85a   :  { %452 = vrot.lane.b32.xlu0 %v450_v40, %s4359_s0 }
 0x8cc   :  { %v453_v42 = vpop.permute.xlu0 %452 }
 0x8cd   :  { %v458_v43 = vsel %vm103_vm1, %v453_v42, %v456_v41 }
 0x8ce   :  { %3740 = vmatmul.msk.f32.vlgmr.msrb.gmra.mxu2 %vm147_vm2, %v458_v43 }
 0x951   :  { %v491_v45 = vpop.f32.mrf.mxu2 }
 0x952   :  { %v492_v46 = vadd.f32 %v3892_v44, %v491_v45 }
 0x954   :  { %3932 = vtanh.f32 %v492_v46  ;;  %v494_v48 = vmul.f32 0.5, %v492_v46 }
 0x956   :  { %3934 = vtanh.f32 %v494_v48 }
 0x95a   :  { %v3933_v47 = vpop.eup %3932 }
 0x95b   :  { %501 = vrot.lane.b32.xlu2 %v3933_v47, %s4360_s16 }
 0x95c   :  { %v3935_v49 = vpop.eup %3934 }
 0x95d   :  { %v496_v50 = vadd.f32 1.0, %v3935_v49  ;;  %v610_v49 = vperm.slane %v595_v17, 1 }
 0x95f   :  { %v497_v51 = vmul.f32 0.5, %v496_v50  ;;  %v6285_v50 = vmov 0  }
 0x961   :  { %v499_v54 = vmul.f32 %v497_v51, %v4508_v58 }
 0x9b5   :  { %v502_v52 = vpop.permute.xlu2 %501 }
 0x9b6   :  { %v504_v53 = vmul.f32 %v502_v52, %v497_v51 }
 0x9b8   :  { %506 = vrot.lane.b32.xlu0 %v504_v53, %s4359_s0 }
 0xa2a   :  { %v507_v56 = vpop.permute.xlu0 %506 }
 0xa2b   :  { %v509_v57 = vadd.f32 %v507_v56, %v499_v54 }
 0xa2d   :  { %3936 = vtanh.f32 %v509_v57 }
 0xa33   :  { %v3937_v59 = vpop.eup %3936 }
 0xa34   :  { %512 = vrot.lane.b32.xlu1 %v3937_v59, %s4360_s16 }
 0xa3c   :  { %608 = vperm.xlu1 %3812, %v597_v18  }
 0xaa6   :  { %v513_v1 = vpop.permute.xlu1 %512 }
 0xaa7   :  { %v4583_v4 = vmul.f32 %v513_v1, %v497_v51 }
 0xaa9   :  { %521 = vrot.lane.b32.xlu2 %v4583_v4, %s4359_s0 }
 0xaae   :  { %v609_v51 = vpop.permute.xlu1 %608 }
 0xb03   :  { %v522_v19 = vpop.permute.xlu2 %521 }
 0xb04   :  { %3741 = vmatmul.msk.f32.vlgmr.msrb.gmra.mxu3 %vm103_vm1, %v522_v19 }
 0xb87   :  { %v542_v20 = vpop.f32.mrf.mxu3 }
 0xb88   :  { %v550_v23 = vrot.slane %v542_v20, 1  ;;  %v551_v24 = vperm.slane %v542_v20, 0 }
 0xb8a   :  { %v552_v28 = vperm.slane %v550_v23, 0  ;;  %v555_v30 = vadd.f32 %v551_v24, %v545_v21  ;;  %v556_v31 = vadd.f32 %v551_v24, %v546_v22  ;;  %v4648_v22 = vadd.s32 4294967288, %v4589_v9 }
 0xb8c   :  { %v557_v33 = vadd.f32 %v552_v28, %v547_v27  ;;  %3938 = vtanh.f32 %v555_v30  ;;  %v558_v34 = vadd.f32 %v552_v28, %v548_v32 }
 0xb8d   :  { %3940 = vtanh.f32 %v556_v31 }
 0xb8e   :  { %3942 = vtanh.f32 %v557_v33 }
 0xb8f   :  { %3944 = vtanh.f32 %v558_v34 }
 0xb92   :  { %v3939_v36 = vpop.eup %3938 }
 0xb93   :  { %v3941_v37 = vpop.eup %3940  ;;  %v567_v38 = vmul.f32 %v3939_v36, %v3893_v35 }
 0xb94   :  { %v3943_v40 = vpop.eup %3942  ;;  %v568_v41 = vmul.f32 %v3941_v37, %v3893_v35  ;;  %v4663_v37 = vld [vmem:[#allocation8] sm:$0x1] }
 0xb95   :  { %v571_v42 = vsel %vm103_vm1, %v567_v38, 0.0  ;;  %v569_v43 = vmul.f32 %v3943_v40, %v3893_v35  ;;  %v3945_v46 = vpop.eup %3944  ;;  %v6282_v38 = vsub.f32 1.0, %v4663_v37 }
 0xb96   :  { %v574_v44 = vsel %vm105_vm5, %v568_v41, 0.0  ;;  %572 = vadd.xlane.f32.xlu0 %v571_v42  ;;  %v570_v47 = vmul.f32 %v3945_v46, %v3893_v35 }
 0xb97   :  { %575 = vadd.xlane.f32.xlu1 %v574_v44  ;;  %v577_v45 = vsel %vm103_vm1, %v569_v43, 0.0  ;;  %v4670_v40 = vperm.slane %v6282_v38, 0 }
 0xb98   :  { %578 = vadd.xlane.f32.xlu2 %v577_v45  ;;  %v580_v48 = vsel %vm105_vm5, %v570_v47, 0.0 }
 0xba0   :  { %581 = vadd.xlane.f32.xlu2 %v580_v48 }
 0xbaa   :  { %602 = vperm.xlu0 %3811, %v597_v18  }
 0xbb0   :  { %621 = vperm.xlu1 %3812, %v610_v49  }
 0xbb2   :  { %3816 = vset.pattern.permute.xlu0 %v6285_v50 }
 0xbb8   :  { %615 = vperm.xlu2 %3813, %v610_v49   ;;  %3815 = vset.pattern.permute.xlu1 %v6285_v50 }
 0xbc0   :  { %3814 = vset.pattern.permute.xlu2 %v6285_v50 }
 0xc09   :  { %v573_v54 = vpop.xlane.xlu0 %572 }
 0xc0a   :  { %v576_v52 = vpop.xlane.xlu1 %575 }
 0xc0b   :  { %3946 = vtanh.f32 %v576_v52  ;;  %v579_v53 = vpop.xlane.xlu2 %578 }
 0xc0c   :  { %3948 = vtanh.f32 %v573_v54 }
 0xc11   :  { %v3947_v56 = vpop.eup %3946 }
 0xc12   :  { %v588_v57 = vmul.f32 2.5, %v3947_v56  ;;  %v3949_v61 = vpop.eup %3948 }
 0xc13   :  { %v582_v60 = vpop.xlane.xlu2 %581  ;;  %v587_v62 = vmul.f32 2.5, %v3949_v61 }
 0xc14   :  { %v4630_v59 = vadd.f32 %v609_v51, %v588_v57  ;;  %3950 = vtanh.f32 %v582_v60 }
 0xc15   :  { %3952 = vtanh.f32 %v579_v53 }
 0xc16   :  { %639 = vperm.xlu1 %3815, %v4630_v59  }
 0xc1a   :  { %v3951_v5 = vpop.eup %3950 }
 0xc1b   :  { %v3953_v6 = vpop.eup %3952  ;;  %v590_v12 = vmul.f32 2.5, %v3951_v5  ;;  %v616_v16 = vpop.permute.xlu2 %615  ;;  %v126_v5 = vld [vmem:[%s6279_s9] sm:$0x3] }
 0xc1c   :  { %v603_v63 = vpop.permute.xlu0 %602  ;;  %v589_v18 = vmul.f32 2.5, %v3953_v6 }
 0xc1d   :  { %v4633_v1 = vadd.f32 %v603_v63, %v587_v62 }
 0xc1e   :  { %v4638_v20 = vadd.f32 %v616_v16, %v589_v18 }
 0xc1f   :  { %636 = vperm.xlu2 %3814, %v4633_v1  }
 0xc20   :  { %6347 = vst [vmem:[#allocation22_spill] sm:$0xff] %v4638_v20 }
 0xc22   :  { %v622_v17 = vpop.permute.xlu1 %621 }
 0xc23   :  { %v4636_v19 = vadd.f32 %v622_v17, %v590_v12 }
 0xc25   :  { %645 = vperm.xlu0 %3816, %v4636_v19  }
 0xc27   :  { %642 = vperm.xlu2 %3814, %v4638_v20  }
 0xc2f   :  { %3817 = vset.pattern.permute.xlu2 %v4591_v11 }
 0xc37   :  { %717 = vperm.xlu2 %3817, %v4601_v14  }
 0xc3f   :  { %3818 = vset.pattern.permute.xlu2 %v4598_v13 }
 0xc47   :  { %723 = vperm.xlu2 %3818, %v4601_v14  }
 0xc4f   :  { %3819 = vset.pattern.permute.xlu2 %v6285_v50 }
 0xc79   :  { %v637_v21 = vpop.permute.xlu2 %636 }
 0xc7a   :  { %v647_v30 = vperm.slane %v637_v21, %v4589_v9 }
 0xc81   :  { %v643_v24 = vpop.permute.xlu2 %642 }
 0xc82   :  { %v652_v31 = vperm.slane %v643_v24, %v4589_v9 }
 0xc88   :  { %v640_v23 = vpop.permute.xlu1 %639 }
 0xc89   :  { %v649_v27 = vperm.slane %v640_v23, %v4648_v22 }
 0xc8b   :  { %v651_v33 = vsel %vm650_vm9, %v649_v27, %v647_v30 }
 0xc91   :  { %v4674_v41 = vpop.permute.xlu2 %717 }
 0xc92   :  { %6348 = vst [vmem:[#allocation23_spill] sm:$0xff] %v4674_v41 }
 0xc97   :  { %v646_v28 = vpop.permute.xlu0 %645 }
 0xc98   :  { %v653_v32 = vperm.slane %v646_v28, %v4648_v22 }
 0xc9a   :  { %v654_v34 = vsel %vm650_vm9, %v653_v32, %v652_v31 }
 0xc9b   :  { %v4659_v35 = vsel %vm655_vm10, %v654_v34, %v651_v33 }
 0xc9c   :  { %v658_v36 = vsel %vm95_vm4, %v4659_v35, -inf }
 0xc9d   :  { %659 = vmax.xlane.f32.xlu1 %v658_v36 }
 0xca1   :  { %v4678_v43 = vpop.permute.xlu2 %723 }
 0xca2   :  { %6350 = vst [vmem:[#allocation25_spill] sm:$0xff] %v4678_v43 }
 0xcb6   :  { %197 = vrot.lane.b32.xlu1 %v4452_v3, %s4364_s28 }
 0xcbe   :  { %204 = vperm.xlu1 %3815, %v4670_v40  }
 0xcc6   :  { %3821 = vset.pattern.permute.xlu1 %v4598_v13 }
 0xd10   :  { %v4676_v42 = vpop.xlane.xlu1 %659 }
 0xd11   :  { %6349 = vst [vmem:[#allocation24_spill] sm:$0xff] %v4676_v42  ;;  %v4681_v44 = vperm.slane %v4676_v42, 0  ;;  %v777_v45 = vmul.f32 2.0, %v4676_v42  ;;  %v782_v46 = vand.u32 2147483647, %v4676_v42  ;;  %v4692_v49 = vperm.slane %v4676_v42, 1 }
 0xd12   :  { %v791_v21 = vsub.f32 0.0, %v4676_v42 }
 0xd13   :  { %vm709_vm11 = vcmp.eq.f32.partialorder %v4630_v59, %v4681_v44  ;;  %vm708_vm12 = vcmp.eq.f32.partialorder %v4633_v1, %v4681_v44  ;;  %v778_v51 = vmul.f32 0.5, %v777_v45  ;;  %v783_v52 = vmul.f32 -2.0, %v782_v46 }
 0xd14   :  { %v728_v47 = vsel %vm709_vm11, %v4678_v43, 1e+09  ;;  %v727_v48 = vsel %vm708_vm12, %v4674_v41, 1e+09  ;;  %vm711_vm13 = vcmp.eq.f32.partialorder %v4636_v19, %v4692_v49  ;;  %vm710_vm14 = vcmp.eq.f32.partialorder %v4638_v20, %v4692_v49 }
 0xd15   :  { %739 = vperm.xlu2 %3819, %v728_v47   ;;  %736 = vperm.xlu0 %3816, %v727_v48   ;;  %v784_v53 = vmul.f32 1.442695, %v783_v52  ;;  %3954 = vtanh.f32 %v778_v51  ;;  %v730_v54 = vsel %vm711_vm13, %v4678_v43, 1e+09  ;;  %v729_v56 = vsel %vm710_vm14, %v4674_v41, 1e+09 }
 0xd17   :  { %3956 = vpow2.f32 %v784_v53 }
 0xd1b   :  { %v3955_v57 = vpop.eup %3954 }
 0xd1c   :  { %v780_v61 = vadd.f32 1.0, %v3955_v57 }
 0xd1d   :  { %745 = vperm.xlu2 %3819, %v730_v54   ;;  %742 = vperm.xlu0 %3816, %v729_v56   ;;  %v3957_v60 = vpop.eup %3956 }
 0xd1e   :  { %v786_v62 = vadd.f32 1.0, %v3957_v60  ;;  %v4702_v63 = vmul.f32 0.5, %v780_v61 }
 0xd20   :  { %3958 = vlog2.f32 %v786_v62  ;;  %vm793_vm15 = vcmp.lt.f32.partialorder %v126_v5, %v4702_v63 }
 0xd21   :  { %v4709_v17 = vsel %vm793_vm15, 1.0, %v6287_v0 }
 0xd22   :  { %v797_v30 = vsub.f32 1.0, %v4709_v17 }
 0xd25   :  { %3820 = vset.pattern.permute.xlu0 %v4591_v11  ;;  %3822 = vset.pattern.permute.xlu2 %v4591_v11 }
 0xd26   :  { %v3959_v12 = vpop.eup %3958 }
 0xd27   :  { %v788_v16 = vmul.f32 0.6931472, %v3959_v12 }
 0xd28   :  { %v198_v6 = vpop.permute.xlu1 %197 }
 0xd29   :  { %v789_v18 = vadd.f32 %v788_v16, %v782_v46  ;;  %v200_v23 = vsub.f32 %v4491_v39, %v198_v6 }
 0xd2b   :  { %v790_v27 = vsub.f32 %v4676_v42, %v789_v18  ;;  %v792_v28 = vsub.f32 %v791_v21, %v789_v18 }
 0xd2d   :  { %v796_v32 = vmul.f32 %v4709_v17, %v790_v27  ;;  %v798_v33 = vmul.f32 %v797_v30, %v792_v28 }
 0xd2f   :  { %v4720_v34 = vadd.f32 %v798_v33, %v796_v32 }
 0xd30   :  { %v4713_v24 = vpop.permute.xlu1 %204 }
 0xd31   :  { %v207_v31 = vmul.f32 %v4713_v24, %v200_v23 }
 0xd33   :  { %209 = vrot.lane.b32.xlu1 %v207_v31, %s4359_s0 }
 0xd6f   :  { %v740_v36 = vpop.permute.xlu2 %739 }
 0xd70   :  { %v748_v48 = vperm.slane %v740_v36, %v4648_v22 }
 0xd77   :  { %v746_v46 = vpop.permute.xlu2 %745 }
 0xd78   :  { %v751_v51 = vperm.slane %v746_v46, %v4648_v22 }
 0xd87   :  { %v737_v45 = vpop.permute.xlu0 %736 }
 0xd88   :  { %v747_v39 = vperm.slane %v737_v45, %v4589_v9 }
 0xd8a   :  { %v749_v53 = vsel %vm650_vm9, %v748_v48, %v747_v39 }
 0xd8f   :  { %v743_v47 = vpop.permute.xlu0 %742 }
 0xd90   :  { %v750_v52 = vperm.slane %v743_v47, %v4589_v9  ;;  %v800_v47 = vsub.f32 1.0, %v4702_v63 }
 0xd92   :  { %v752_v54 = vsel %vm650_vm9, %v751_v51, %v750_v52  ;;  %v801_v52 = vmul.f32 %v800_v47, %v792_v28 }
 0xd93   :  { %v753_v56 = vsel %vm655_vm10, %v752_v54, %v749_v53  ;;  %v802_v53 = vmul.f32 %v790_v27, %v4702_v63 }
 0xd94   :  { %v755_v57 = vsel %vm95_vm4, %v753_v56, inf }
 0xd95   :  { %756 = vmin.xlane.f32.xlu0 %v755_v57 }
 0xda5   :  { %v210_v60 = vpop.permute.xlu1 %209 }
 0xda6   :  { %v212_v61 = vadd.f32 %v210_v60, %v4452_v3 }
 0xda8   :  { %213 = vst.msk [vmem:[#allocation4] sm:$0x3] %vm6344_vm0, %v212_v61 }
 0xe08   :  { %v4732_v62 = vpop.xlane.xlu0 %756 }
 0xe09   :  { %6351 = vst [vmem:[#allocation26_spill] sm:$0xff] %v4732_v62  ;;  %vm758_vm3 = vcmp.eq.f32.partialorder %v4601_v14, %v4732_v62 }
 0xe0a   :  { %v759_v5 = vsel %vm758_vm3, -3e+38, %v4659_v35  ;;  %v3742_v63 = vsel %vm758_vm3, 1.0, %v6287_v0 }
 0xe0b   :  { %v760_v6 = vsel %vm95_vm4, %v759_v5, -inf }
 0xe0c   :  { %761 = vmax.xlane.f32.xlu2 %v760_v6 }
 0xe7f   :  { %v4741_v12 = vpop.xlane.xlu2 %761 }
 0xe80   :  { %6352 = vst [vmem:[#allocation27_spill] sm:$0xff] %v4741_v12  ;;  %vm763_vm7 = vcmp.eq.f32.partialorder %v759_v5, %v4741_v12  ;;  %v810_v3 = vand.u32 2147483647, %v4741_v12  ;;  %v805_v16 = vmul.f32 2.0, %v4741_v12  ;;  %v819_v51 = vsub.f32 0.0, %v4741_v12 }
 0xe81   :  { %v764_v18 = vsel %vm763_vm7, %v4601_v14, 1e+09  ;;  %v803_v5 = vadd.f32 %v802_v53, %v801_v52 }
 0xe82   :  { %v765_v21 = vsel %vm95_vm4, %v764_v18, inf  ;;  %v811_v23 = vmul.f32 -2.0, %v810_v3  ;;  %v806_v31 = vmul.f32 0.5, %v805_v16 }
 0xe83   :  { %766 = vmin.xlane.f32.xlu0 %v765_v21 }
 0xe84   :  { %v812_v30 = vmul.f32 1.442695, %v811_v23 }
 0xe86   :  { %3960 = vpow2.f32 %v812_v30 }
 0xe87   :  { %3962 = vtanh.f32 %v806_v31 }
 0xe8c   :  { %v3961_v35 = vpop.eup %3960 }
 0xe8d   :  { %v814_v32 = vadd.f32 1.0, %v3961_v35  ;;  %v3963_v33 = vpop.eup %3962 }
 0xe8e   :  { %v808_v36 = vadd.f32 1.0, %v3963_v33  ;;  %v4781_v33 = vld [vmem:[#allocation4] sm:$0x3] }
 0xe8f   :  { %3964 = vlog2.f32 %v814_v32 }
 0xe90   :  { %v4748_v46 = vmul.f32 0.5, %v808_v36  ;;  %v214_v36 = vsub.f32 %v4487_v29, %v4484_v26 }
 0xe92   :  { %v828_v57 = vsub.f32 1.0, %v4748_v46 }
 0xe95   :  { %v3965_v45 = vpop.eup %3964 }
 0xe96   :  { %v816_v39 = vmul.f32 0.6931472, %v3965_v45  ;;  %v114_v45 = vld [vmem:[#allocation9 + $0x8] sm:$0xff] }
 0xe97   :  { %116 = vst.msk [vmem:[#allocation2 + $0x10] sm:$0xff] %vm103_vm1, %v114_v45 }
 0xe98   :  { %v817_v48 = vadd.f32 %v816_v39, %v810_v3  ;;  %v804_v3 = vsub.f32 0.0, %v803_v5  ;;  %v113_v39 = vld [vmem:[#allocation9] sm:$0xff] }
 0xe99   :  { %115 = vst.msk [vmem:[#allocation2] sm:$0xff] %vm103_vm1, %v113_v39 }
 0xe9a   :  { %v4754_v54 = vsub.f32 %v4741_v12, %v817_v48  ;;  %v4756_v56 = vsub.f32 %v819_v51, %v817_v48  ;;  %v908_v48 = vld [vmem:[#allocation2 + $0x18] sm:$0xf] }
 0xe9c   :  { %v829_v60 = vmul.f32 %v828_v57, %v4756_v56  ;;  %v830_v61 = vmul.f32 %v4754_v54, %v4748_v46 }
 0xe9e   :  { %v831_v6 = vadd.f32 %v830_v61, %v829_v60  ;;  %v907_v47 = vld [vmem:[#allocation2 + $0x10] sm:$0xff] }
 0xe9f   :  { %v4798_v61 = vld [vmem:[#allocation14 + $0x28] sm:$0xff] }
 0xea0   :  { %v832_v16 = vsub.f32 0.0, %v831_v6  ;;  %1076 = vmatpush.msrb.mxu1 %v4798_v61  ;;  %v4802_v6 = vld [vmem:[#allocation14 + $0x20] sm:$0xff] }
 0xea2   :  { %v4762_v18 = vadd.f32 %v832_v16, %v804_v3  ;;  %v905_v16 = vld [vmem:[#allocation2] sm:$0xff]  ;;  %1077 = vmatpush.msrb.mxu1 %v4802_v6 }
 0xef6   :  { %v4764_v28 = vpop.xlane.xlu0 %766 }
 0xef7   :  { %6353 = vst [vmem:[#allocation28_spill] sm:$0xff] %v4764_v28  ;;  %vm770_vm11 = vcmp.eq.f32.partialorder %v4601_v14, %v4764_v28 }
 0xef8   :  { %v3743_v27 = vsel %vm770_vm11, 1.0, %v6287_v0 }
 0xef9   :  { %v773_v21 = vadd.f32 %v3743_v27, %v3742_v63  ;;  %v906_v63 = vld [vmem:[#allocation2 + $0x8] sm:$0xf] }
 0xefa   :  { %v4805_v27 = vld [vmem:[#allocation14 + $0x18] sm:$0xff] }
 0xefb   :  { %v774_v23 = vmul.f32 %v773_v21, %v4713_v24  ;;  %v957_v30 = vsel %vm95_vm4, %v773_v21, 0.0  ;;  %v922_v31 = vperm.slane %v773_v21, 1  ;;  %v909_v32 = vperm.slane %v773_v21, 0  ;;  %1078 = vmatpush.msrb.mxu1 %v4805_v27 }
 0xefc   :  { %958 = vadd.xlane.f32.xlu2 %v957_v30 }
 0xefd   :  { %v4776_v35 = vadd.f32 %v774_v23, %v4612_v15  ;;  %927 = vperm.xlu0 %3820, %v922_v31   ;;  %933 = vperm.xlu1 %3821, %v922_v31   ;;  %v215_v15 = vmul.f32 %v214_v36, %v4713_v24  ;;  %v4808_v36 = vld [vmem:[#allocation14 + $0x10] sm:$0xff] }
 0xefe   :  { %1079 = vmatpush.msrb.mxu1 %v4808_v36 }
 0xeff   :  { %776 = vst.msk [vmem:[#allocation6] sm:$0x3] %vm95_vm4, %v4776_v35 }
 0xf05   :  { %920 = vperm.xlu1 %3821, %v909_v32   ;;  %3823 = vset.pattern.permute.xlu0 %v6283_v8 }
 0xf0d   :  { %1047 = vrot.lane.b32.xlu1 %v4781_v33, %s4359_s0 }
 0xf14   :  { %914 = vperm.xlu2 %3822, %v909_v32  }
 0xf15   :  { %217 = vrot.lane.b32.xlu1 %v215_v15, %s4364_s28 }
 0xf1d   :  { %298 = vrot.lane.b32.xlu1 %v4480_v25, %s4364_s28 }
 0xf6f   :  { %v959_v51 = vpop.xlane.xlu2 %958  ;;  %v928_v52 = vpop.permute.xlu0 %927 }
 0xf70   :  { %v4793_v53 = vadd.f32 1.0, %v959_v51  ;;  %v937_v26 = vmul.f32 %v928_v52, %v907_v47  ;;  %v934_v29 = vpop.permute.xlu1 %933  ;;  %v4813_v51 = vld [vmem:[#allocation14 + $0x8] sm:$0xff] }
 0xf71   :  { %v938_v57 = vmul.f32 %v934_v29, %v908_v48  ;;  %1080 = vmatpush.msrb.mxu1 %v4813_v51 }
 0xf72   :  { %v963_v60 = vrot.slane %v4793_v53, 1  ;;  %3966 = vrcp.f32 %v4793_v53  ;;  %v948_v25 = vsel %vm103_vm1, %v937_v26, 0.0  ;;  %vm971_vm7 = vweird.f32 %v4793_v53 }
 0xf73   :  { %v949_v5 = vsel %vm105_vm5, %v938_v57, 0.0 }
 0xf74   :  { %3968 = vrcp.f32 %v963_v60  ;;  %v950_v3 = vadd.f32 %v949_v5, %v948_v25  ;;  %v4817_v25 = vld [vmem:[#allocation14] sm:$0xff]  ;;  %vm986_vm13 = vweird.f32 %v963_v60 }
 0xf75   :  { %1081 = vmatpush.msrb.mxu1 %v4817_v25 }
 0xf76   :  { %v951_v21 = vrot.slane %v950_v3, 4 }
 0xf77   :  { %v915_v23 = vpop.permute.xlu2 %914 }
 0xf78   :  { %v3967_v30 = vpop.eup %3966  ;;  %v935_v31 = vmul.f32 %v915_v23, %v905_v16  ;;  %v921_v32 = vpop.permute.xlu1 %920  ;;  %v952_v45 = vadd.f32 %v951_v21, %v950_v3  ;;  %v992_v21 = vand.u32 2147483648, %v963_v60 }
 0xf79   :  { %v967_v15 = vmul.f32 %v3967_v30, %v4793_v53  ;;  %v936_v39 = vmul.f32 %v921_v32, %v906_v63  ;;  %v990_v63 = vand.u32 2147483647, %v963_v60  ;;  %vm972_vm3 = vweird.f32 %v3967_v30 }
 0xf7a   :  { %v3969_v47 = vpop.eup %3968  ;;  %v939_v48 = vsel %vm103_vm1, %v935_v31, 0.0  ;;  %v953_v29 = vrot.slane %v952_v45, 2  ;;  %v961_v31 = vld [vmem:[#allocation7] sm:$0x3]  ;;  %vm973_vm11 = vmor %vm971_vm7, %vm972_vm3  ;;  %vm1503_vm3 = vcmp.lt.f32.partialorder %v4601_v14, 9.0 }
 0xf7b   :  { %v968_v52 = vsub.f32 1.0, %v967_v15  ;;  %v982_v26 = vmul.f32 %v3969_v47, %v963_v60  ;;  %v940_v57 = vsel %vm105_vm5, %v936_v39, 0.0  ;;  %vm987_vm12 = vweird.f32 %v3969_v47 }
 0xf7c   :  { %v954_v16 = vadd.f32 %v953_v29, %v952_v45  ;;  %v941_v3 = vadd.f32 %v940_v57, %v939_v48  ;;  %vm988_vm14 = vmor %vm986_vm13, %vm987_vm12  ;;  %vm991_vm15 = vcmp.eq.f32.partialorder %v990_v63, 8.507059e+37  ;;  %v993_v39 = vor.u32 1.1754944e-38, %v992_v21 }
 0xf7d   :  { %v983_v5 = vsub.f32 1.0, %v982_v26  ;;  %v969_v23 = vmul.f32 %v3967_v30, %v968_v52  ;;  %v997_v26 = vrot.slane %v961_v31, 1  ;;  %v977_v52 = vand.u32 2147483648, %v4793_v53 }
 0xf7e   :  { %v955_v15 = vrot.slane %v954_v16, 1  ;;  %v942_v38 = vrot.slane %v941_v3, 4 }
 0xf7f   :  { %v984_v32 = vmul.f32 %v3969_v47, %v983_v5  ;;  %v970_v29 = vadd.f32 %v3967_v30, %v969_v23  ;;  %v975_v5 = vand.u32 2147483647, %v4793_v53  ;;  %v978_v63 = vor.u32 1.1754944e-38, %v977_v52 }
 0xf80   :  { %v1048_v8 = vpop.permute.xlu1 %1047  ;;  %v943_v0 = vadd.f32 %v942_v38, %v941_v3  ;;  %v956_v48 = vadd.f32 %v955_v15, %v954_v16 }
 0xf81   :  { %v985_v50 = vadd.f32 %v3969_v47, %v984_v32  ;;  %v974_v60 = vsel %vm973_vm11, %v3967_v30, %v970_v29  ;;  %vm976_vm12 = vcmp.eq.f32.partialorder %v975_v5, 8.507059e+37  ;;  %v4209_v5 = vld [vmem:[#allocation4 + $0x2] sm:$0x3] }
 0xf82   :  { %v944_v57 = vrot.slane %v943_v0, 2  ;;  %v979_v23 = vsel %vm976_vm12, %v978_v63, %v974_v60 }
 0xf83   :  { %v989_v45 = vsel %vm988_vm14, %v3969_v47, %v985_v50  ;;  %v4208_v47 = vld [vmem:[#allocation5] sm:$0x3]  ;;  %vm6343_vm14 = vcmask 253952  }
 0xf84   :  { %v994_v12 = vsel %vm991_vm15, %v993_v39, %v989_v45  ;;  %v945_v32 = vadd.f32 %v944_v57, %v943_v0 }
 0xf85   :  { %v995_v42 = vmul.f32 %v994_v12, %v956_v48 }
 0xf86   :  { %v946_v3 = vrot.slane %v945_v32, 1 }
 0xf87   :  { %v1001_v38 = vsub.f32 %v995_v42, %v997_v26 }
 0xf88   :  { %v218_v21 = vpop.permute.xlu1 %217  ;;  %v947_v50 = vadd.f32 %v946_v3, %v945_v32 }
 0xf89   :  { %v220_v16 = vadd.f32 %v4208_v47, %v218_v21  ;;  %v1003_v15 = vmul.f32 %v1001_v38, %v4713_v24 }
 0xf8a   :  { %v980_v39 = vmul.f32 %v979_v23, %v947_v50 }
 0xf8b   :  { %221 = vst.msk [vmem:[#allocation5] sm:$0x3] %vm6344_vm0, %v220_v16  ;;  %v1006_v45 = vrot.slane %v1003_v15, 7 }
 0xf8c   :  { %v1000_v12 = vsub.f32 %v980_v39, %v961_v31 }
 0xf8e   :  { %v1002_v0 = vmul.f32 %v1000_v12, %v4713_v24 }
 0xf90   :  { %v299_v53 = vpop.permute.xlu1 %298  ;;  %v1007_v42 = vsel %vm655_vm10, %v1006_v45, %v1002_v0 }
 0xf91   :  { %v301_v30 = vsub.f32 %v4524_v2, %v299_v53  ;;  %v1009_v26 = vadd.f32 %v1007_v42, %v961_v31  ;;  %v3894_v2 = vld [vmem:[%s6278_s8] ss:$0 sm:$0xff]  ;;  %v309_v53 = vsub.f32 %v4508_v58, %v4505_v55  ;;  %v4872_v55 = vld [vmem:[#allocation14 + $0x58] sm:$0xff] }
 0xf92   :  { %v4842_v3 = vld [vmem:[#allocation5] sm:$0x3] }
 0xf93   :  { %v302_v48 = vmul.f32 %v301_v30, %v4713_v24  ;;  %1010 = vst.msk [vmem:[#allocation7] sm:$0x3] %vm6344_vm0, %v1009_v26  ;;  %v310_v42 = vmul.f32 %v309_v53, %v4713_v24  ;;  %v4858_v30 = vld [vmem:[#allocation14 + $0x78] sm:$0xff]  ;;  %v4860_v26 = vld [vmem:[#allocation14 + $0x70] sm:$0xff]  ;;  %v4880_v24 = vld [vmem:[#allocation14 + $0x48] sm:$0xff] }
 0xf94   :  { %1171 = vmatpush.msra.mxu3 %v4858_v30  ;;  %1393 = vmatpush.msra.mxu0 %v4858_v30  ;;  %v4876_v58 = vld [vmem:[#allocation14 + $0x50] sm:$0xff] }
 0xf95   :  { %304 = vrot.lane.b32.xlu1 %v302_v48, %s4359_s0  ;;  %v4864_v48 = vld [vmem:[#allocation14 + $0x68] sm:$0xff] }
 0xf96   :  { %1172 = vmatpush.msra.mxu3 %v4860_v26  ;;  %1394 = vmatpush.msra.mxu0 %v4860_v26 }
 0xf98   :  { %1173 = vmatpush.msra.mxu3 %v4864_v48  ;;  %1395 = vmatpush.msra.mxu0 %v4864_v48 }
 0xf9a   :  { %v1043_v29 = vld [vmem:[#allocation7] sm:$0x3] }
 0xf9b   :  { %v1050_v57 = vsel %vm103_vm1, %v1043_v29, %v1048_v8  ;;  %v4868_v29 = vld [vmem:[#allocation14 + $0x60] sm:$0xff] }
 0xf9c   :  { %3748 = vmatmul.msk.f32.vlgmr.msrb.gmra.mxu1 %vm147_vm2, %v1050_v57  ;;  %1174 = vmatpush.msra.mxu3 %v4868_v29 }
 0xf9d   :  { %1396 = vmatpush.msra.mxu0 %v4868_v29 }
 0xf9e   :  { %1175 = vmatpush.msra.mxu3 %v4872_v55 }
 0xf9f   :  { %1397 = vmatpush.msra.mxu0 %v4872_v55 }
 0xfa0   :  { %1176 = vmatpush.msra.mxu3 %v4876_v58 }
 0xfa1   :  { %1398 = vmatpush.msra.mxu0 %v4876_v58 }
 0xfa2   :  { %1177 = vmatpush.msra.mxu3 %v4880_v24 }
 0xfa3   :  { %1399 = vmatpush.msra.mxu0 %v4880_v24 }
0x1007   :  { %v305_v52 = vpop.permute.xlu1 %304 }
0x1008   :  { %v307_v32 = vadd.f32 %v4209_v5, %v305_v52 }
0x100a   :  { %308 = vst.msk [vmem:[#allocation4 + $0x2] sm:$0x3] %vm6344_vm0, %v307_v32  ;;  %v4210_v32 = vld [vmem:[#allocation5 + $0x2] sm:$0x3] }
0x1011   :  { %v4834_v38 = vld [vmem:[#allocation4 + $0x2] sm:$0x3] }
0x1012   :  { %1144 = vrot.lane.b32.xlu1 %v4834_v38, %s4359_s0 }
0x1019   :  { %v1083_v31 = vpop.f32.mrf.mxu1 }
0x101a   :  { %v1084_v60 = vadd.f32 %v3894_v2, %v1083_v31 }
0x101c   :  { %3970 = vtanh.f32 %v1084_v60  ;;  %v1086_v63 = vmul.f32 0.5, %v1084_v60  ;;  %v4895_v60 = vld [vmem:[#allocation14 + $0x40] sm:$0xff] }
0x101d   :  { %1178 = vmatpush.msra.mxu3 %v4895_v60  ;;  %1400 = vmatpush.msra.mxu0 %v4895_v60 }
0x101e   :  { %3972 = vtanh.f32 %v1086_v63 }
0x1022   :  { %v3971_v8 = vpop.eup %3970 }
0x1023   :  { %1097 = vrot.lane.b32.xlu2 %v3971_v8, %s4360_s16 }
0x1024   :  { %v3973_v21 = vpop.eup %3972 }
0x1025   :  { %v1088_v50 = vadd.f32 1.0, %v3973_v21 }
0x1027   :  { %v1089_v47 = vmul.f32 0.5, %v1088_v50  ;;  %v3895_v50 = vld [vmem:[%s6278_s8 + $0x1] ss:$0 sm:$0xff] }
0x102b   :  { %1092 = vrot.lane.b32.xlu2 %v4842_v3, %s4359_s0 }
0x107d   :  { %v1098_v16 = vpop.permute.xlu2 %1097 }
0x107e   :  { %v1100_v23 = vmul.f32 %v1098_v16, %v1089_v47 }
0x1080   :  { %1102 = vrot.lane.b32.xlu0 %v1100_v23, %s4359_s0 }
0x1084   :  { %v1145_v8 = vpop.permute.xlu1 %1144 }
0x1085   :  { %v4847_v15 = vpop.permute.xlu2 %1092 }
0x1086   :  { %v1095_v39 = vmul.f32 %v4847_v15, %v1089_v47 }
0x10f2   :  { %v1103_v12 = vpop.permute.xlu0 %1102 }
0x10f3   :  { %v4850_v45 = vadd.f32 %v1103_v12, %v1095_v39 }
0x10f5   :  { %3974 = vtanh.f32 %v4850_v45 }
0x10fb   :  { %v3975_v0 = vpop.eup %3974 }
0x10fc   :  { %1108 = vrot.lane.b32.xlu2 %v3975_v0, %s4360_s16 }
0x1104   :  { %312 = vrot.lane.b32.xlu2 %v310_v42, %s4364_s28 }
0x1156   :  { %v1109_v57 = vpop.permute.xlu2 %1108 }
0x1157   :  { %v4886_v52 = vmul.f32 %v1109_v57, %v1089_v47 }
0x1159   :  { %1140 = vrot.lane.b32.xlu0 %v4886_v52, %s4359_s0 }
0x115e   :  { %v313_v5 = vpop.permute.xlu2 %312 }
0x115f   :  { %v315_v2 = vadd.f32 %v4210_v32, %v313_v5 }
0x1161   :  { %316 = vst.msk [vmem:[#allocation5 + $0x2] sm:$0x3] %vm6344_vm0, %v315_v2 }
0x1168   :  { %v4891_v31 = vld [vmem:[#allocation5 + $0x2] sm:$0x3] }
0x1169   :  { %1189 = vrot.lane.b32.xlu1 %v4891_v31, %s4359_s0 }
0x11cb   :  { %v1141_v63 = vpop.permute.xlu0 %1140 }
0x11cc   :  { %v1147_v21 = vsel %vm103_vm1, %v1141_v63, %v1145_v8 }
0x11cd   :  { %3750 = vmatmul.msk.f32.vlgmr.msra.gmra.mxu3 %vm147_vm2, %v1147_v21 }
0x11db   :  { %v4906_v5 = vpop.permute.xlu1 %1189 }
0x1250   :  { %v1180_v47 = vpop.f32.mrf.mxu3 }
0x1251   :  { %v1181_v16 = vadd.f32 %v3895_v50, %v1180_v47 }
0x1253   :  { %3976 = vtanh.f32 %v1181_v16  ;;  %v1183_v39 = vmul.f32 0.5, %v1181_v16 }
0x1255   :  { %3978 = vtanh.f32 %v1183_v39 }
0x1259   :  { %v3977_v23 = vpop.eup %3976 }
0x125a   :  { %1194 = vrot.lane.b32.xlu0 %v3977_v23, %s4360_s16 }
0x125b   :  { %v3979_v12 = vpop.eup %3978 }
0x125c   :  { %v1185_v0 = vadd.f32 1.0, %v3979_v12  ;;  %v1312_v12 = vld [vmem:[#allocation14 + $0x38] sm:$0xff] }
0x125d   :  { %1328 = vmatpush.msra.mxu2 %v1312_v12  ;;  %1960 = vmatpush.msrb.mxu3 %v1312_v12 }
0x125e   :  { %v1186_v53 = vmul.f32 0.5, %v1185_v0  ;;  %v1311_v0 = vld [vmem:[#allocation14 + $0x30] sm:$0xff] }
0x125f   :  { %1329 = vmatpush.msra.mxu2 %v1311_v0  ;;  %1961 = vmatpush.msrb.mxu3 %v1311_v0 }
0x1260   :  { %v1192_v32 = vmul.f32 %v4906_v5, %v1186_v53 }
0x1261   :  { %1330 = vmatpush.msra.mxu2 %v4798_v61  ;;  %1962 = vmatpush.msrb.mxu3 %v4798_v61 }
0x1263   :  { %1331 = vmatpush.msra.mxu2 %v4802_v6  ;;  %1963 = vmatpush.msrb.mxu3 %v4802_v6  ;;  %v6354_v6 = vmov 0.0  }
0x1265   :  { %1332 = vmatpush.msra.mxu2 %v4805_v27  ;;  %1964 = vmatpush.msrb.mxu3 %v4805_v27  ;;  %v1289_v27 = vld [vmem:[%s6273_s3] sm:$0x1] }
0x1267   :  { %1333 = vmatpush.msra.mxu2 %v4808_v36  ;;  %1965 = vmatpush.msrb.mxu3 %v4808_v36  ;;  %v1290_v36 = vld [vmem:[%s6273_s3 + $0x1] sm:$0x1] }
0x1269   :  { %1334 = vmatpush.msra.mxu2 %v4813_v51  ;;  %1966 = vmatpush.msrb.mxu3 %v4813_v51  ;;  %v1291_v51 = vsub.f32 %v1290_v36, %v1289_v27 }
0x126b   :  { %1335 = vmatpush.msra.mxu2 %v4817_v25  ;;  %1967 = vmatpush.msrb.mxu3 %v4817_v25  ;;  %v1297_v25 = vperm.slane %v1291_v51, 0 }
0x12cc   :  { %v1195_v42 = vpop.permute.xlu0 %1194 }
0x12cd   :  { %v1197_v57 = vmul.f32 %v1195_v42, %v1186_v53  ;;  %v3896_v42 = vld [vmem:[%s6273_s3] ss:$0 sm:$0xff] }
0x12cf   :  { %1199 = vrot.lane.b32.xlu2 %v1197_v57, %s4359_s0 }
0x1329   :  { %v1200_v2 = vpop.permute.xlu2 %1199 }
0x132a   :  { %v4909_v8 = vadd.f32 %v1200_v2, %v1192_v32 }
0x132c   :  { %3980 = vtanh.f32 %v4909_v8 }
0x1332   :  { %v3981_v63 = vpop.eup %3980 }
0x1333   :  { %1205 = vrot.lane.b32.xlu0 %v3981_v63, %s4360_s16 }
0x13a5   :  { %v1206_v21 = vpop.permute.xlu0 %1205 }
0x13a6   :  { %v4913_v50 = vmul.f32 %v1206_v21, %v1186_v53 }
0x13a8   :  { %1233 = vrot.lane.b32.xlu1 %v4913_v50, %s4359_s0 }
0x13b0   :  { %1301 = vrot.lane.b32.xlu1 %v4886_v52, %s4360_s16 }
0x141a   :  { %v1234_v47 = vpop.permute.xlu1 %1233 }
0x141b   :  { %3751 = vmatmul.msk.f32.vlgmr.msrb.gmra.mxu0 %vm103_vm1, %v1234_v47  ;;  %v3897_v47 = vld [vmem:[%s6278_s8] ss:$0 sm:$0xff] }
0x141c   :  { %2214 = vmatpush.msrb.mxu0 %v1312_v12 }
0x141e   :  { %2215 = vmatpush.msrb.mxu0 %v1311_v0 }
0x1422   :  { %v1302_v63 = vpop.permute.xlu1 %1301 }
0x1498   :  { %v1254_v16 = vpop.f32.mrf.mxu0 }
0x1499   :  { %3982 = vtanh.f32 %v1254_v16 }
0x149f   :  { %v3983_v23 = vpop.eup %3982 }
0x14a0   :  { %v4920_v39 = vmul.f32 2.5, %v3983_v23 }
0x14a2   :  { %1282 = vrot.lane.b32.xlu2 %v4920_v39, %s4361_s27 }
0x14fc   :  { %v1283_v61 = vpop.permute.xlu2 %1282 }
0x14fd   :  { %vm1285_vm13 = vcmp.gt.f32.partialorder %v4920_v39, %v1283_v61 }
0x14fe   :  { %v4938_v53 = vsel %vm1285_vm13, 1.0, %v6354_v6 }
0x14ff   :  { %1294 = vperm.xlu0 %3823, %v4938_v53  }
0x1507   :  { %3824 = vset.pattern.permute.xlu0 %v4591_v11 }
0x1571   :  { %v1295_v57 = vpop.permute.xlu0 %1294 }
0x1572   :  { %v1298_v32 = vmul.f32 %v1297_v25, %v1295_v57 }
0x1574   :  { %v1300_v2 = vadd.f32 %v3896_v42, %v1298_v32 }
0x1576   :  { %v1304_v21 = vsel %vm103_vm1, %v1300_v2, %v1302_v63 }
0x1577   :  { %3753 = vmatmul.msk.f32.vlgmr.msra.gmra.mxu2 %vm147_vm2, %v1304_v21 }
0x15fa   :  { %v1337_v16 = vpop.f32.mrf.mxu2 }
0x15fb   :  { %v1338_v23 = vadd.f32 %v3897_v47, %v1337_v16 }
0x15fd   :  { %3984 = vtanh.f32 %v1338_v23  ;;  %v1340_v0 = vmul.f32 0.5, %v1338_v23 }
0x15ff   :  { %3986 = vtanh.f32 %v1340_v0 }
0x1603   :  { %v3985_v12 = vpop.eup %3984 }
0x1604   :  { %1347 = vrot.lane.b32.xlu2 %v3985_v12, %s4360_s16  ;;  %v3898_v12 = vld [vmem:[%s6278_s8 + $0x1] ss:$0 sm:$0xff] }
0x1605   :  { %v3987_v61 = vpop.eup %3986 }
0x1606   :  { %v1342_v27 = vadd.f32 1.0, %v3987_v61 }
0x1608   :  { %v1343_v36 = vmul.f32 0.5, %v1342_v27 }
0x160a   :  { %v1345_v42 = vmul.f32 %v1343_v36, %v4850_v45 }
0x165e   :  { %v1348_v51 = vpop.permute.xlu2 %1347 }
0x165f   :  { %v1350_v25 = vmul.f32 %v1348_v51, %v1343_v36 }
0x1661   :  { %1352 = vrot.lane.b32.xlu1 %v1350_v25, %s4359_s0 }
0x1669   :  { %1366 = vrot.lane.b32.xlu1 %v4913_v50, %s4360_s16 }
0x16d3   :  { %v1353_v57 = vpop.permute.xlu1 %1352 }
0x16d4   :  { %v1355_v32 = vadd.f32 %v1353_v57, %v1345_v42 }
0x16d6   :  { %3988 = vtanh.f32 %v1355_v32 }
0x16db   :  { %v1367_v47 = vpop.permute.xlu1 %1366 }
0x16dc   :  { %v3989_v2 = vpop.eup %3988 }
0x16dd   :  { %1358 = vrot.lane.b32.xlu2 %v3989_v2, %s4360_s16  ;;  %v1012_v2 = vperm.slane %v4583_v4, 0 }
0x1737   :  { %v1359_v63 = vpop.permute.xlu2 %1358 }
0x1738   :  { %v1361_v21 = vmul.f32 %v1359_v63, %v1343_v36 }
0x173a   :  { %1363 = vrot.lane.b32.xlu0 %v1361_v21, %s4359_s0 }
0x17ac   :  { %v1364_v16 = vpop.permute.xlu0 %1363 }
0x17ad   :  { %v1369_v23 = vsel %vm103_vm1, %v1364_v16, %v1367_v47 }
0x17ae   :  { %3755 = vmatmul.msk.f32.vlgmr.msra.gmra.mxu0 %vm147_vm2, %v1369_v23 }
0x182b   :  { %v1402_v0 = vpop.f32.mrf.mxu0 }
0x182c   :  { %v1403_v61 = vadd.f32 %v3898_v12, %v1402_v0  ;;  %v1011_v12 = vrot.slane %v4583_v4, 1  ;;  %v4977_v0 = vld [vmem:[#allocation6] sm:$0x3]  ;;  %v1430_v4 = vld [vmem:[%s6275_s5 + $0x18] sm:$0xff] }
0x182d   :  { %vm1504_vm15 = vcmp.gt.f32.partialorder %v4977_v0, 0.0  ;;  %1448 = vmatpush.msra.mxu1 %v1430_v4  ;;  %2334 = vmatpush.msra.mxu3 %v1430_v4 }
0x182e   :  { %3990 = vtanh.f32 %v1403_v61  ;;  %v1405_v51 = vmul.f32 0.5, %v1403_v61  ;;  %v1013_v61 = vperm.slane %v1011_v12, 0 }
0x1830   :  { %3992 = vtanh.f32 %v1405_v51 }
0x1834   :  { %v3991_v27 = vpop.eup %3990 }
0x1835   :  { %1412 = vrot.lane.b32.xlu2 %v3991_v27, %s4360_s16  ;;  %v1505_v27 = vsel %vm1504_vm15, -100.0, %v6354_v6 }
0x1836   :  { %v3993_v36 = vpop.eup %3992  ;;  %v4985_v51 = vsel %vm1503_vm3, %v1505_v27, -1e+30 }
0x1837   :  { %v1407_v25 = vadd.f32 1.0, %v3993_v36  ;;  %v1508_v36 = vperm.slane %v4985_v51, 0 }
0x1839   :  { %v1408_v42 = vmul.f32 0.5, %v1407_v25  ;;  %v1429_v25 = vld [vmem:[%s6275_s5 + $0x10] sm:$0xff] }
0x183a   :  { %1449 = vmatpush.msra.mxu1 %v1429_v25  ;;  %2335 = vmatpush.msra.mxu3 %v1429_v25 }
0x183b   :  { %v1410_v63 = vmul.f32 %v1408_v42, %v4909_v8 }
0x188f   :  { %v1413_v57 = vpop.permute.xlu2 %1412 }
0x1890   :  { %v1415_v32 = vmul.f32 %v1413_v57, %v1408_v42  ;;  %v1428_v57 = vld [vmem:[%s6275_s5 + $0x8] sm:$0xff] }
0x1891   :  { %1450 = vmatpush.msra.mxu1 %v1428_v57  ;;  %2336 = vmatpush.msra.mxu3 %v1428_v57 }
0x1892   :  { %1417 = vrot.lane.b32.xlu0 %v1415_v32, %s4359_s0  ;;  %v1427_v32 = vld [vmem:[%s6275_s5] sm:$0xff] }
0x1893   :  { %1451 = vmatpush.msra.mxu1 %v1427_v32  ;;  %2337 = vmatpush.msra.mxu3 %v1427_v32 }
0x1895   :  { %2057 = vmatpush.msrb.mxu1 %v4858_v30 }
0x1897   :  { %2058 = vmatpush.msrb.mxu1 %v4860_v26 }
0x1899   :  { %2059 = vmatpush.msrb.mxu1 %v4864_v48 }
0x189a   :  { %1014 = vrot.lane.b32.xlu0 %v1012_v2, %s4359_s0 }
0x189b   :  { %2060 = vmatpush.msrb.mxu1 %v4868_v29 }
0x189d   :  { %2061 = vmatpush.msrb.mxu1 %v4872_v55 }
0x189f   :  { %2062 = vmatpush.msrb.mxu1 %v4876_v58 }
0x18a1   :  { %2063 = vmatpush.msrb.mxu1 %v4880_v24  ;;  %v4212_v24 = vld [vmem:[#allocation3 + $0x10] sm:$0xff] }
0x18a3   :  { %2064 = vmatpush.msrb.mxu1 %v4895_v60 }
0x1904   :  { %v1418_v21 = vpop.permute.xlu0 %1417 }
0x1905   :  { %v1420_v47 = vadd.f32 %v1418_v21, %v1410_v63  ;;  %v4211_v21 = vld [vmem:[#allocation3] sm:$0xff] }
0x1907   :  { %3994 = vtanh.f32 %v1420_v47 }
0x190c   :  { %v1015_v16 = vpop.permute.xlu0 %1014 }
0x190d   :  { %v3995_v23 = vpop.eup %3994  ;;  %1021 = vst.msk [vmem:[#allocation2 + $0x8] sm:$0x1] %vm6343_vm14, %v1015_v16 }
0x190e   :  { %1023 = vst.msk [vmem:[#allocation3 + $0x8] sm:$0x1] %vm6343_vm14, %v1015_v16  ;;  %1423 = vrot.lane.b32.xlu1 %v3995_v23, %s4360_s16 }
0x1916   :  { %1016 = vrot.lane.b32.xlu1 %v1013_v61, %s4359_s0  ;;  %v3899_v61 = vld [vmem:[%s6276_s6] ss:$0 sm:$0xff] }
0x191e   :  { %1519 = vperm.xlu1 %3821, %v1508_v36  }
0x1980   :  { %v1424_v2 = vpop.permute.xlu1 %1423 }
0x1981   :  { %v5005_v63 = vmul.f32 %v1424_v2, %v1408_v42  ;;  %v1457_v42 = vld [vmem:[#allocation3 + $0x8] sm:$0xf] }
0x1983   :  { %1432 = vrot.lane.b32.xlu2 %v5005_v63, %s4359_s0 }
0x1988   :  { %v1017_v30 = vpop.permute.xlu1 %1016 }
0x1989   :  { %1022 = vst.msk [vmem:[#allocation2 + $0x18] sm:$0x1] %vm6343_vm14, %v1017_v30 }
0x198a   :  { %1024 = vst.msk [vmem:[#allocation3 + $0x18] sm:$0x1] %vm6343_vm14, %v1017_v30 }
0x1991   :  { %v1459_v23 = vld [vmem:[#allocation3 + $0x18] sm:$0xf] }
0x19dd   :  { %v1433_v26 = vpop.permute.xlu2 %1432 }
0x19de   :  { %3756 = vmatmul.msk.f32.vlgmr.msra.gmra.mxu1 %vm103_vm1, %v1433_v26 }
0x1a5b   :  { %v1453_v48 = vpop.f32.mrf.mxu1 }
0x1a5c   :  { %v1461_v29 = vrot.slane %v1453_v48, 1  ;;  %v1462_v55 = vperm.slane %v1453_v48, 0 }
0x1a5e   :  { %v1463_v58 = vperm.slane %v1461_v29, 0  ;;  %v1466_v47 = vadd.f32 %v4211_v21, %v1462_v55  ;;  %v1467_v16 = vadd.f32 %v1462_v55, %v1457_v42  ;;  %v6355_v21 = vmov 0  }
0x1a60   :  { %v1468_v12 = vadd.f32 %v4212_v24, %v1463_v58  ;;  %v1469_v60 = vadd.f32 %v1463_v58, %v1459_v23  ;;  %3996 = vtanh.f32 %v1466_v47  ;;  %v1521_v58 = vperm.slane %v4985_v51, 1  ;;  %v1520_v23 = vpop.permute.xlu1 %1519 }
0x1a61   :  { %3998 = vtanh.f32 %v1467_v16 }
0x1a62   :  { %4000 = vtanh.f32 %v1468_v12 }
0x1a63   :  { %4002 = vtanh.f32 %v1469_v60 }
0x1a66   :  { %v3997_v27 = vpop.eup %3996 }
0x1a67   :  { %v3999_v4 = vpop.eup %3998  ;;  %v1478_v25 = vmul.f32 %v3997_v27, %v3899_v61 }
0x1a68   :  { %v4001_v57 = vpop.eup %4000  ;;  %v1479_v32 = vmul.f32 %v3999_v4, %v3899_v61 }
0x1a69   :  { %v1482_v2 = vsel %vm103_vm1, %v1478_v25, 0.0  ;;  %v1480_v30 = vmul.f32 %v4001_v57, %v3899_v61  ;;  %v4003_v26 = vpop.eup %4002 }
0x1a6a   :  { %v1485_v48 = vsel %vm105_vm5, %v1479_v32, 0.0  ;;  %1483 = vadd.xlane.f32.xlu2 %v1482_v2  ;;  %v1481_v55 = vmul.f32 %v4003_v26, %v3899_v61 }
0x1a6b   :  { %1486 = vadd.xlane.f32.xlu0 %v1485_v48  ;;  %v1488_v29 = vsel %vm103_vm1, %v1480_v30, 0.0 }
0x1a6c   :  { %1489 = vadd.xlane.f32.xlu1 %v1488_v29  ;;  %v1491_v42 = vsel %vm105_vm5, %v1481_v55, 0.0 }
0x1a72   :  { %1492 = vadd.xlane.f32.xlu2 %v1491_v42 }
0x1a7f   :  { %1513 = vperm.xlu0 %3824, %v1508_v36  }
0x1a85   :  { %1532 = vperm.xlu1 %3821, %v1521_v58  }
0x1a87   :  { %3827 = vset.pattern.permute.xlu0 %v6355_v21 }
0x1a8a   :  { %1526 = vperm.xlu2 %3822, %v1521_v58  }
0x1a8d   :  { %3826 = vset.pattern.permute.xlu1 %v6355_v21 }
0x1a92   :  { %3825 = vset.pattern.permute.xlu2 %v6355_v21 }
0x1add   :  { %v1484_v16 = vpop.xlane.xlu2 %1483 }
0x1ade   :  { %v1487_v47 = vpop.xlane.xlu0 %1486 }
0x1adf   :  { %4004 = vtanh.f32 %v1487_v47  ;;  %v1490_v51 = vpop.xlane.xlu1 %1489 }
0x1ae0   :  { %4006 = vtanh.f32 %v1484_v16 }
0x1ae5   :  { %v4005_v24 = vpop.eup %4004  ;;  %v1493_v36 = vpop.xlane.xlu2 %1492 }
0x1ae6   :  { %v1499_v12 = vmul.f32 2.5, %v4005_v24  ;;  %v4007_v61 = vpop.eup %4006  ;;  %4008 = vtanh.f32 %v1493_v36 }
0x1ae7   :  { %4010 = vtanh.f32 %v1490_v51  ;;  %v1498_v27 = vmul.f32 2.5, %v4007_v61 }
0x1ae8   :  { %v5026_v60 = vadd.f32 %v1520_v23, %v1499_v12 }
0x1aea   :  { %6356 = vst [vmem:[#allocation29_spill] sm:$0xff] %v5026_v60  ;;  %1550 = vperm.xlu1 %3826, %v5026_v60  }
0x1aec   :  { %v4009_v57 = vpop.eup %4008 }
0x1aed   :  { %v4011_v32 = vpop.eup %4010  ;;  %v1501_v2 = vmul.f32 2.5, %v4009_v57  ;;  %v1527_v30 = vpop.permute.xlu2 %1526 }
0x1aee   :  { %v1500_v48 = vmul.f32 2.5, %v4011_v32 }
0x1af0   :  { %v5035_v55 = vadd.f32 %v1527_v30, %v1500_v48 }
0x1af1   :  { %v1514_v4 = vpop.permute.xlu0 %1513 }
0x1af2   :  { %v5029_v25 = vadd.f32 %v1514_v4, %v1498_v27  ;;  %3829 = vset.pattern.permute.xlu1 %v4598_v13  ;;  %6359 = vst [vmem:[#allocation32_spill] sm:$0xff] %v5035_v55 }
0x1af4   :  { %6357 = vst [vmem:[#allocation30_spill] sm:$0xff] %v5029_v25  ;;  %1547 = vperm.xlu2 %3825, %v5029_v25  }
0x1af7   :  { %v1533_v26 = vpop.permute.xlu1 %1532 }
0x1af8   :  { %v5033_v29 = vadd.f32 %v1533_v26, %v1501_v2 }
0x1afa   :  { %6358 = vst [vmem:[#allocation31_spill] sm:$0xff] %v5033_v29  ;;  %1556 = vperm.xlu0 %3827, %v5033_v29  }
0x1afc   :  { %1553 = vperm.xlu2 %3825, %v5035_v55  }
0x1b4e   :  { %v1548_v42 = vpop.permute.xlu2 %1547 }
0x1b4f   :  { %v1558_v24 = vperm.slane %v1548_v42, %v4589_v9 }
0x1b56   :  { %v1554_v47 = vpop.permute.xlu2 %1553 }
0x1b57   :  { %v1561_v12 = vperm.slane %v1554_v47, %v4589_v9 }
0x1b5c   :  { %v1551_v58 = vpop.permute.xlu1 %1550 }
0x1b5d   :  { %v1559_v16 = vperm.slane %v1551_v58, %v4648_v22 }
0x1b5f   :  { %v1560_v51 = vsel %vm650_vm9, %v1559_v16, %v1558_v24 }
0x1b6c   :  { %v1557_v23 = vpop.permute.xlu0 %1556 }
0x1b6d   :  { %v1562_v36 = vperm.slane %v1557_v23, %v4648_v22 }
0x1b6f   :  { %v1563_v61 = vsel %vm650_vm9, %v1562_v36, %v1561_v12 }
0x1b70   :  { %v5046_v27 = vsel %vm655_vm10, %v1563_v61, %v1560_v51 }
0x1b71   :  { %v1566_v4 = vsel %vm95_vm4, %v5046_v27, -inf }
0x1b72   :  { %1567 = vmax.xlane.f32.xlu1 %v1566_v4 }
0x1be5   :  { %v5050_v57 = vpop.xlane.xlu1 %1567 }
0x1be6   :  { %6360 = vst [vmem:[#allocation33_spill] sm:$0xff] %v5050_v57  ;;  %v5053_v32 = vperm.slane %v5050_v57, 1  ;;  %v5056_v2 = vperm.slane %v5050_v57, 0  ;;  %v1670_v30 = vmul.f32 2.0, %v5050_v57  ;;  %v1675_v26 = vand.u32 2147483647, %v5050_v57 }
0x1be8   :  { %6361 = vst [vmem:[#allocation34_spill] sm:$0xff] %v5053_v32  ;;  %vm1618_vm7 = vcmp.eq.f32.partialorder %v5035_v55, %v5053_v32  ;;  %vm1616_vm11 = vcmp.eq.f32.partialorder %v5029_v25, %v5056_v2  ;;  %v1671_v58 = vmul.f32 0.5, %v1670_v30  ;;  %v1676_v47 = vmul.f32 -2.0, %v1675_v26  ;;  %v3747_v30 = vld [vmem:[%s6279_s9 + $0x2] sm:$0x3] }
0x1be9   :  { %v1622_v48 = vsel %vm1618_vm7, %v4674_v41, 1e+09  ;;  %v1620_v42 = vsel %vm1616_vm11, %v4674_v41, 1e+09  ;;  %vm1617_vm12 = vcmp.eq.f32.partialorder %v5026_v60, %v5056_v2  ;;  %vm1619_vm13 = vcmp.eq.f32.partialorder %v5033_v29, %v5053_v32 }
0x1bea   :  { %1635 = vperm.xlu0 %3827, %v1622_v48   ;;  %1629 = vperm.xlu2 %3825, %v1620_v42   ;;  %v1677_v16 = vmul.f32 1.442695, %v1676_v47  ;;  %4012 = vtanh.f32 %v1671_v58  ;;  %v1621_v23 = vsel %vm1617_vm12, %v4678_v43, 1e+09  ;;  %v1623_v61 = vsel %vm1619_vm13, %v4678_v43, 1e+09 }
0x1bec   :  { %4014 = vpow2.f32 %v1677_v16  ;;  %v1684_v16 = vsub.f32 0.0, %v5050_v57 }
0x1bf0   :  { %v4013_v24 = vpop.eup %4012 }
0x1bf1   :  { %v1673_v36 = vadd.f32 1.0, %v4013_v24 }
0x1bf2   :  { %1632 = vperm.xlu2 %3825, %v1621_v23   ;;  %v4015_v12 = vpop.eup %4014 }
0x1bf3   :  { %v1679_v51 = vadd.f32 1.0, %v4015_v12  ;;  %v5072_v4 = vmul.f32 0.5, %v1673_v36 }
0x1bf5   :  { %4016 = vlog2.f32 %v1679_v51  ;;  %6362 = vst [vmem:[#allocation35_spill] sm:$0xff] %v5072_v4  ;;  %vm1686_vm15 = vcmp.lt.f32.partialorder %v3747_v30, %v5072_v4 }
0x1bf6   :  { %v5080_v58 = vsel %vm1686_vm15, 1.0, %v6354_v6 }
0x1bf7   :  { %6363 = vst [vmem:[#allocation36_spill] sm:$0xff] %v5080_v58  ;;  %v1690_v23 = vsub.f32 1.0, %v5080_v58 }
0x1bfa   :  { %1638 = vperm.xlu2 %3825, %v1623_v61  }
0x1bfb   :  { %v4017_v48 = vpop.eup %4016 }
0x1bfc   :  { %v1681_v42 = vmul.f32 0.6931472, %v4017_v48 }
0x1bfe   :  { %v1682_v47 = vadd.f32 %v1681_v42, %v1675_v26  ;;  %v1025_v26 = vsel %vm592_vm6, %v4776_v35, 1.0 }
0x1bff   :  { %v1026_v30 = vsel %vm95_vm4, %v1025_v26, inf }
0x1c00   :  { %v5085_v24 = vsub.f32 %v5050_v57, %v1682_v47  ;;  %v5087_v12 = vsub.f32 %v1684_v16, %v1682_v47 }
0x1c02   :  { %3830 = vset.pattern.permute.xlu2 %v4591_v11  ;;  %6364 = vst [vmem:[#allocation37_spill] sm:$0xff] %v5085_v24  ;;  %v1689_v36 = vmul.f32 %v5080_v58, %v5085_v24  ;;  %v1691_v51 = vmul.f32 %v1690_v23, %v5087_v12 }
0x1c03   :  { %6365 = vst [vmem:[#allocation38_spill] sm:$0xff] %v5087_v12 }
0x1c04   :  { %v5092_v61 = vadd.f32 %v1691_v51, %v1689_v36 }
0x1c06   :  { %6366 = vst [vmem:[#allocation39_spill] sm:$0xff] %v5092_v61 }
0x1c23   :  { %1027 = vmin.xlane.f32.xlu2 %v1026_v30 }
0x1c44   :  { %v1630_v48 = vpop.permute.xlu2 %1629 }
0x1c45   :  { %v1640_v4 = vperm.slane %v1630_v48, %v4589_v9 }
0x1c4c   :  { %v1633_v42 = vpop.permute.xlu2 %1632 }
0x1c4d   :  { %v1641_v47 = vperm.slane %v1633_v42, %v4648_v22  ;;  %v1036_v42 = vld [vmem:[#allocation8] sm:$0x1] }
0x1c4f   :  { %v1642_v36 = vsel %vm650_vm9, %v1641_v47, %v1640_v4 }
0x1c54   :  { %v1639_v57 = vpop.permute.xlu2 %1638 }
0x1c55   :  { %v1644_v58 = vperm.slane %v1639_v57, %v4648_v22 }
0x1c5c   :  { %v1636_v16 = vpop.permute.xlu0 %1635 }
0x1c5d   :  { %v1643_v23 = vperm.slane %v1636_v16, %v4589_v9 }
0x1c5f   :  { %v1645_v51 = vsel %vm650_vm9, %v1644_v58, %v1643_v23 }
0x1c60   :  { %v1646_v35 = vsel %vm655_vm10, %v1645_v51, %v1642_v36 }
0x1c61   :  { %v1648_v26 = vsel %vm95_vm4, %v1646_v35, inf }
0x1c62   :  { %1649 = vmin.xlane.f32.xlu0 %v1648_v26 }
0x1c96   :  { %v1028_v30 = vpop.xlane.xlu2 %1027 }
0x1c97   :  { %v1030_v24 = vrot.slane %v1028_v30, 1 }
0x1c99   :  { %v1032_v12 = vmin.f32 %v1028_v30, %v1030_v24 }
0x1c9b   :  { %vm1033_vm6 = vcmp.gt.f32.partialorder %v1032_v12, 0.0 }
0x1c9c   :  { %v3746_v48 = vsel %vm1033_vm6, 1.0, %v6354_v6 }
0x1c9d   :  { %v1037_v55 = vmax.f32 %v1036_v42, %v3746_v48 }
0x1c9f   :  { %1038 = vst.msk [vmem:[#allocation8] sm:$0x1] %vm6345_vm8, %v1037_v55 }
0x1ca6   :  { %v5108_v57 = vld [vmem:[#allocation8] sm:$0x1] }
0x1ca7   :  { %6367 = vst [vmem:[#allocation40_spill] sm:$0xff] %v5108_v57  ;;  %v6300_v4 = vsub.f32 1.0, %v5108_v57 }
0x1ca9   :  { %v5113_v58 = vperm.slane %v6300_v4, 0 }
0x1cab   :  { %6368 = vst [vmem:[#allocation41_spill] sm:$0xff] %v5113_v58  ;;  %1119 = vperm.xlu0 %3827, %v5113_v58  }
0x1cb3   :  { %3828 = vset.pattern.permute.xlu0 %v4591_v11 }
0x1cd5   :  { %v5117_v24 = vpop.xlane.xlu0 %1649 }
0x1cd6   :  { %6369 = vst [vmem:[#allocation42_spill] sm:$0xff] %v5117_v24  ;;  %vm1651_vm7 = vcmp.eq.f32.partialorder %v4601_v14, %v5117_v24 }
0x1cd7   :  { %v1652_v55 = vsel %vm1651_vm7, -3e+38, %v5046_v27 }
0x1cd8   :  { %v1653_v12 = vsel %vm95_vm4, %v1652_v55, -inf }
0x1cd9   :  { %1654 = vmax.xlane.f32.xlu1 %v1653_v12 }
0x1cf2   :  { %1112 = vrot.lane.b32.xlu1 %v4781_v33, %s4364_s28 }
0x1d4c   :  { %v5128_v47 = vpop.xlane.xlu1 %1654 }
0x1d4d   :  { %6370 = vst [vmem:[#allocation43_spill] sm:$0xff] %v5128_v47  ;;  %vm1656_vm11 = vcmp.eq.f32.partialorder %v1652_v55, %v5128_v47  ;;  %v1703_v16 = vand.u32 2147483647, %v5128_v47  ;;  %v1698_v23 = vmul.f32 2.0, %v5128_v47 }
0x1d4e   :  { %v1657_v36 = vsel %vm1656_vm11, %v4601_v14, 1e+09 }
0x1d4f   :  { %v1658_v51 = vsel %vm95_vm4, %v1657_v36, inf  ;;  %v1704_v35 = vmul.f32 -2.0, %v1703_v16  ;;  %v1699_v26 = vmul.f32 0.5, %v1698_v23  ;;  %v1712_v36 = vsub.f32 0.0, %v5128_v47 }
0x1d50   :  { %1659 = vmin.xlane.f32.xlu2 %v1658_v51  ;;  %v5139_v51 = vpop.permute.xlu0 %1119 }
0x1d51   :  { %v1705_v27 = vmul.f32 1.442695, %v1704_v35 }
0x1d53   :  { %4018 = vpow2.f32 %v1705_v27 }
0x1d54   :  { %4020 = vtanh.f32 %v1699_v26 }
0x1d59   :  { %v4019_v30 = vpop.eup %4018 }
0x1d5a   :  { %v1707_v33 = vadd.f32 1.0, %v4019_v30  ;;  %v4021_v42 = vpop.eup %4020 }
0x1d5b   :  { %v1701_v48 = vadd.f32 1.0, %v4021_v42 }
0x1d5c   :  { %4022 = vlog2.f32 %v1707_v33 }
0x1d5d   :  { %v5135_v12 = vmul.f32 0.5, %v1701_v48 }
0x1d5f   :  { %6371 = vst [vmem:[#allocation44_spill] sm:$0xff] %v5135_v12  ;;  %v1721_v26 = vsub.f32 1.0, %v5135_v12 }
0x1d62   :  { %v4023_v55 = vpop.eup %4022 }
0x1d63   :  { %v1709_v4 = vmul.f32 0.6931472, %v4023_v55 }
0x1d64   :  { %v1113_v61 = vpop.permute.xlu1 %1112 }
0x1d65   :  { %v1115_v60 = vsub.f32 %v4886_v52, %v1113_v61  ;;  %v1710_v28 = vadd.f32 %v1709_v4, %v1703_v16 }
0x1d67   :  { %v1122_v23 = vmul.f32 %v5139_v51, %v1115_v60  ;;  %v5143_v35 = vsub.f32 %v5128_v47, %v1710_v28  ;;  %v5145_v27 = vsub.f32 %v1712_v36, %v1710_v28  ;;  %v3757_v28 = vsel %vm1651_vm7, 1.0, %v6354_v6  ;;  %v1793_v47 = vld [vmem:[#allocation2 + $0x8] sm:$0xf] }
0x1d69   :  { %6372 = vst [vmem:[#allocation45_spill] sm:$0xff] %v5143_v35  ;;  %1124 = vrot.lane.b32.xlu1 %v1122_v23, %s4359_s0  ;;  %v1722_v30 = vmul.f32 %v1721_v26, %v5145_v27  ;;  %v1723_v52 = vmul.f32 %v5143_v35, %v5135_v12  ;;  %v6376_v23 = vmov 1   ;;  %v1129_v26 = vsub.f32 %v4850_v45, %v4847_v15  ;;  %v1795_v45 = vld [vmem:[#allocation2 + $0x18] sm:$0xf] }
0x1d6a   :  { %6373 = vst [vmem:[#allocation46_spill] sm:$0xff] %v5145_v27 }
0x1d6b   :  { %v5152_v61 = vadd.f32 %v1723_v52, %v1722_v30  ;;  %v1130_v30 = vmul.f32 %v1129_v26, %v5139_v51  ;;  %v4214_v26 = vld [vmem:[#allocation2 + $0x10] sm:$0xff] }
0x1d6d   :  { %6374 = vst [vmem:[#allocation47_spill] sm:$0xff] %v5152_v61 }
0x1dc3   :  { %v5154_v4 = vpop.xlane.xlu2 %1659 }
0x1dc4   :  { %6375 = vst [vmem:[#allocation48_spill] sm:$0xff] %v5154_v4  ;;  %vm1663_vm12 = vcmp.eq.f32.partialorder %v4601_v14, %v5154_v4 }
0x1dc5   :  { %v3758_v60 = vsel %vm1663_vm12, 1.0, %v6354_v6 }
0x1dc6   :  { %v1666_v16 = vadd.f32 %v3758_v60, %v3757_v28 }
0x1dc8   :  { %v1667_v33 = vmul.f32 %v1666_v16, %v5139_v51  ;;  %v1844_v42 = vsel %vm95_vm4, %v1666_v16, 0.0  ;;  %v1809_v48 = vperm.slane %v1666_v16, 1  ;;  %v1796_v36 = vperm.slane %v1666_v16, 0 }
0x1dc9   :  { %1845 = vadd.xlane.f32.xlu2 %v1844_v42 }
0x1dca   :  { %v5166_v55 = vadd.f32 %v1667_v33, %v4977_v0  ;;  %1820 = vperm.xlu1 %3829, %v1809_v48   ;;  %1814 = vperm.xlu0 %3828, %v1809_v48   ;;  %v4213_v0 = vld [vmem:[#allocation4] sm:$0x3] }
0x1dcc   :  { %1669 = vst.msk [vmem:[#allocation6] sm:$0x3] %vm95_vm4, %v5166_v55 }
0x1dd2   :  { %1807 = vperm.xlu1 %3829, %v1796_v36   ;;  %3831 = vset.pattern.permute.xlu0 %v6376_v23 }
0x1dda   :  { %1132 = vrot.lane.b32.xlu1 %v1130_v30, %s4364_s28 }
0x1ddb   :  { %v1125_v52 = vpop.permute.xlu1 %1124  ;;  %3833 = vset.pattern.permute.xlu1 %v4591_v11 }
0x1ddc   :  { %v1127_v28 = vadd.f32 %v4213_v0, %v1125_v52 }
0x1dde   :  { %1128 = vst.msk [vmem:[#allocation4] sm:$0x3] %vm6344_vm0, %v1127_v28 }
0x1de1   :  { %1801 = vperm.xlu2 %3830, %v1796_v36  }
0x1de2   :  { %1209 = vrot.lane.b32.xlu1 %v4834_v38, %s4364_s28 }
0x1de5   :  { %v5179_v60 = vld [vmem:[#allocation4] sm:$0x3] }
0x1de6   :  { %1933 = vrot.lane.b32.xlu0 %v5179_v60, %s4359_s0 }
0x1e3c   :  { %v1846_v15 = vpop.xlane.xlu2 %1845  ;;  %v1821_v16 = vpop.permute.xlu1 %1820 }
0x1e3d   :  { %v5183_v33 = vadd.f32 1.0, %v1846_v15  ;;  %v1825_v42 = vmul.f32 %v1821_v16, %v1795_v45  ;;  %v1815_v48 = vpop.permute.xlu0 %1814  ;;  %v4215_v45 = vld [vmem:[#allocation2] sm:$0xff] }
0x1e3e   :  { %v1824_v30 = vmul.f32 %v4214_v26, %v1815_v48 }
0x1e3f   :  { %v1850_v52 = vrot.slane %v5183_v33, 1  ;;  %4024 = vrcp.f32 %v5183_v33  ;;  %v1836_v38 = vsel %vm105_vm5, %v1825_v42, 0.0  ;;  %vm1858_vm12 = vweird.f32 %v5183_v33 }
0x1e40   :  { %v1835_v36 = vsel %vm103_vm1, %v1824_v30, 0.0 }
0x1e41   :  { %4026 = vrcp.f32 %v1850_v52  ;;  %v1837_v0 = vadd.f32 %v1836_v38, %v1835_v36  ;;  %v1879_v12 = vand.u32 2147483648, %v1850_v52  ;;  %vm1873_vm15 = vweird.f32 %v1850_v52 }
0x1e43   :  { %v1838_v28 = vrot.slane %v1837_v0, 4 }
0x1e44   :  { %v1808_v4 = vpop.permute.xlu1 %1807  ;;  %v1802_v24 = vpop.permute.xlu2 %1801 }
0x1e45   :  { %v4025_v15 = vpop.eup %4024  ;;  %v1823_v61 = vmul.f32 %v1808_v4, %v1793_v47  ;;  %v1822_v16 = vmul.f32 %v4215_v45, %v1802_v24  ;;  %v1839_v26 = vadd.f32 %v1838_v28, %v1837_v0  ;;  %v1877_v24 = vand.u32 2147483647, %v1850_v52 }
0x1e46   :  { %v1854_v48 = vmul.f32 %v4025_v15, %v5183_v33  ;;  %vm1859_vm7 = vweird.f32 %v4025_v15 }
0x1e47   :  { %v4027_v62 = vpop.eup %4026  ;;  %v1827_v58 = vsel %vm105_vm5, %v1823_v61, 0.0  ;;  %v1826_v42 = vsel %vm103_vm1, %v1822_v16, 0.0  ;;  %v1840_v57 = vrot.slane %v1839_v26, 2  ;;  %v1848_v16 = vld [vmem:[#allocation7] sm:$0x3]  ;;  %vm1878_vm11 = vcmp.eq.f32.partialorder %v1877_v24, 8.507059e+37 }
0x1e48   :  { %v1855_v20 = vsub.f32 1.0, %v1854_v48  ;;  %v1869_v30 = vmul.f32 %v4027_v62, %v1850_v52  ;;  %v1828_v38 = vadd.f32 %v1827_v58, %v1826_v42  ;;  %vm1874_vm13 = vweird.f32 %v4027_v62 }
0x1e49   :  { %v1841_v27 = vadd.f32 %v1840_v57, %v1839_v26  ;;  %vm1875_vm6 = vmor %vm1873_vm15, %vm1874_vm13  ;;  %v1880_v48 = vor.u32 1.1754944e-38, %v1879_v12  ;;  %v1864_v26 = vand.u32 2147483648, %v5183_v33  ;;  %v1884_v52 = vrot.slane %v1848_v16, 1 }
0x1e4a   :  { %v1870_v36 = vsub.f32 1.0, %v1869_v30  ;;  %v1856_v35 = vmul.f32 %v4025_v15, %v1855_v20  ;;  %v1829_v29 = vrot.slane %v1828_v38, 4  ;;  %vm1860_vm13 = vmor %vm1858_vm12, %vm1859_vm7 }
0x1e4b   :  { %v1842_v4 = vrot.slane %v1841_v27, 1 }
0x1e4c   :  { %v1871_v47 = vmul.f32 %v4027_v62, %v1870_v36  ;;  %v1133_v45 = vpop.permute.xlu1 %1132  ;;  %v1830_v0 = vadd.f32 %v1829_v29, %v1828_v38  ;;  %v1857_v32 = vadd.f32 %v4025_v15, %v1856_v35  ;;  %v1865_v36 = vor.u32 1.1754944e-38, %v1864_v26  ;;  %v4216_v26 = vld [vmem:[#allocation4 + $0x2] sm:$0x3] }
0x1e4d   :  { %v1135_v28 = vadd.f32 %v1133_v45, %v4842_v3  ;;  %v1843_v57 = vadd.f32 %v1842_v4, %v1841_v27  ;;  %v1862_v3 = vand.u32 2147483647, %v5183_v33 }
0x1e4e   :  { %v1872_v61 = vadd.f32 %v4027_v62, %v1871_v47  ;;  %v1831_v58 = vrot.slane %v1830_v0, 2  ;;  %v1861_v12 = vsel %vm1860_vm13, %v4025_v15, %v1857_v32 }
0x1e4f   :  { %1136 = vst.msk [vmem:[#allocation5] sm:$0x3] %vm6344_vm0, %v1135_v28  ;;  %vm1863_vm15 = vcmp.eq.f32.partialorder %v1862_v3, 8.507059e+37 }
0x1e50   :  { %v1876_v20 = vsel %vm1875_vm6, %v4027_v62, %v1872_v61  ;;  %v1832_v29 = vadd.f32 %v1831_v58, %v1830_v0  ;;  %v1866_v24 = vsel %vm1863_vm15, %v1865_v36, %v1861_v12 }
0x1e51   :  { %v1881_v42 = vsel %vm1878_vm11, %v1880_v48, %v1876_v20  ;;  %vm2389_vm11 = vcmp.lt.f32.partialorder %v4601_v14, 10.0 }
0x1e52   :  { %v1882_v30 = vmul.f32 %v1881_v42, %v1843_v57  ;;  %v1833_v35 = vrot.slane %v1832_v29, 1 }
0x1e54   :  { %v1888_v38 = vsub.f32 %v1882_v30, %v1884_v52  ;;  %v1210_v47 = vpop.permute.xlu1 %1209  ;;  %v1834_v62 = vadd.f32 %v1833_v35, %v1832_v29 }
0x1e55   :  { %v1212_v27 = vsub.f32 %v4913_v50, %v1210_v47 }
0x1e56   :  { %v5198_v4 = vld [vmem:[#allocation5] sm:$0x3]  ;;  %v1890_v45 = vmul.f32 %v1888_v38, %v5139_v51  ;;  %v1867_v28 = vmul.f32 %v1866_v24, %v1834_v62 }
0x1e57   :  { %v1213_v33 = vmul.f32 %v1212_v27, %v5139_v51  ;;  %1978 = vrot.lane.b32.xlu2 %v5198_v4, %s4359_s0 }
0x1e58   :  { %v1887_v32 = vsub.f32 %v1867_v28, %v1848_v16  ;;  %v1893_v15 = vrot.slane %v1890_v45, 7  ;;  %v1934_v48 = vpop.permute.xlu0 %1933 }
0x1e59   :  { %1215 = vrot.lane.b32.xlu1 %v1213_v33, %s4359_s0 }
0x1e5a   :  { %v1889_v0 = vmul.f32 %v1887_v32, %v5139_v51  ;;  %v1220_v32 = vsub.f32 %v4909_v8, %v4906_v5 }
0x1e5c   :  { %v1894_v61 = vsel %vm655_vm10, %v1893_v15, %v1889_v0  ;;  %v1221_v15 = vmul.f32 %v1220_v32, %v5139_v51  ;;  %v3901_v51 = vld [vmem:[%s6278_s8 + $0x1] ss:$0 sm:$0xff] }
0x1e5d   :  { %v1896_v50 = vadd.f32 %v1894_v61, %v1848_v16  ;;  %v3900_v16 = vld [vmem:[%s6278_s8] ss:$0 sm:$0xff] }
0x1e5e   :  { %v2114_v32 = vld [vmem:[%s6274_s4] sm:$0xff] }
0x1e5f   :  { %1897 = vst.msk [vmem:[#allocation7] sm:$0x3] %vm6344_vm0, %v1896_v50 }
0x1e66   :  { %v1929_v58 = vld [vmem:[#allocation7] sm:$0x3] }
0x1e67   :  { %v1936_v20 = vsel %vm103_vm1, %v1929_v58, %v1934_v48 }
0x1e68   :  { %3763 = vmatmul.msk.f32.vlgmr.msrb.gmra.mxu3 %vm147_vm2, %v1936_v20 }
0x1eb1   :  { %v5220_v27 = vpop.permute.xlu2 %1978 }
0x1ecb   :  { %v1216_v57 = vpop.permute.xlu1 %1215 }
0x1ecc   :  { %v1218_v42 = vadd.f32 %v4216_v26, %v1216_v57 }
0x1ece   :  { %1219 = vst.msk [vmem:[#allocation4 + $0x2] sm:$0x3] %vm6344_vm0, %v1218_v42 }
0x1ed5   :  { %v5211_v3 = vld [vmem:[#allocation4 + $0x2] sm:$0x3] }
0x1ed6   :  { %2030 = vrot.lane.b32.xlu1 %v5211_v3, %s4359_s0 }
0x1eeb   :  { %v1969_v29 = vpop.f32.mrf.mxu3 }
0x1eec   :  { %v1970_v52 = vadd.f32 %v3900_v16, %v1969_v29 }
0x1eee   :  { %4028 = vtanh.f32 %v1970_v52  ;;  %v1972_v12 = vmul.f32 0.5, %v1970_v52 }
0x1ef0   :  { %4030 = vtanh.f32 %v1972_v12 }
0x1ef4   :  { %v4029_v30 = vpop.eup %4028 }
0x1ef5   :  { %1983 = vrot.lane.b32.xlu0 %v4029_v30, %s4360_s16 }
0x1ef6   :  { %v4031_v35 = vpop.eup %4030 }
0x1ef7   :  { %v1974_v38 = vadd.f32 1.0, %v4031_v35 }
0x1ef9   :  { %v1975_v36 = vmul.f32 0.5, %v1974_v38 }
0x1efb   :  { %v1981_v24 = vmul.f32 %v5220_v27, %v1975_v36 }
0x1f48   :  { %v2031_v20 = vpop.permute.xlu1 %2030 }
0x1f67   :  { %v1984_v47 = vpop.permute.xlu0 %1983 }
0x1f68   :  { %v1986_v62 = vmul.f32 %v1984_v47, %v1975_v36 }
0x1f6a   :  { %1988 = vrot.lane.b32.xlu0 %v1986_v62, %s4359_s0 }
0x1fdc   :  { %v1989_v45 = vpop.permute.xlu0 %1988 }
0x1fdd   :  { %v5223_v28 = vadd.f32 %v1989_v45, %v1981_v24  ;;  %v2117_v24 = vld [vmem:[%s6274_s4 + $0x18] sm:$0xff]  ;;  %v2116_v45 = vld [vmem:[%s6274_s4 + $0x10] sm:$0xff] }
0x1fde   :  { %2135 = vmatpush.msrb.mxu2 %v2117_v24 }
0x1fdf   :  { %4032 = vtanh.f32 %v5223_v28 }
0x1fe0   :  { %2136 = vmatpush.msrb.mxu2 %v2116_v45 }
0x1fe5   :  { %v4033_v33 = vpop.eup %4032 }
0x1fe6   :  { %1994 = vrot.lane.b32.xlu2 %v4033_v33, %s4360_s16  ;;  %v2115_v33 = vld [vmem:[%s6274_s4 + $0x8] sm:$0xff] }
0x1fe7   :  { %2137 = vmatpush.msrb.mxu2 %v2115_v33 }
0x1fe9   :  { %2138 = vmatpush.msrb.mxu2 %v2114_v32  ;;  %v3903_v32 = vld [vmem:[%s6278_s8] ss:$0 sm:$0xff] }
0x1fee   :  { %1223 = vrot.lane.b32.xlu2 %v1221_v15, %s4364_s28 }
0x2040   :  { %v1995_v0 = vpop.permute.xlu2 %1994 }
0x2041   :  { %v5231_v61 = vmul.f32 %v1995_v0, %v1975_v36 }
0x2043   :  { %2026 = vrot.lane.b32.xlu0 %v5231_v61, %s4359_s0 }
0x2048   :  { %v1224_v50 = vpop.permute.xlu2 %1223 }
0x2049   :  { %v1226_v48 = vadd.f32 %v1224_v50, %v4891_v31 }
0x204b   :  { %1227 = vst.msk [vmem:[#allocation5 + $0x2] sm:$0x3] %vm6344_vm0, %v1226_v48 }
0x2052   :  { %v2024_v58 = vld [vmem:[#allocation5 + $0x2] sm:$0x3] }
0x2053   :  { %2075 = vrot.lane.b32.xlu1 %v2024_v58, %s4359_s0 }
0x20b5   :  { %v2027_v5 = vpop.permute.xlu0 %2026 }
0x20b6   :  { %v2033_v8 = vsel %vm103_vm1, %v2027_v5, %v2031_v20  ;;  %v5275_v5 = vld [vmem:[#allocation14 + $0x28] sm:$0xff] }
0x20b7   :  { %3765 = vmatmul.msk.f32.vlgmr.msrb.gmra.mxu1 %vm147_vm2, %v2033_v8  ;;  %v5277_v8 = vld [vmem:[#allocation14 + $0x20] sm:$0xff]  ;;  %2216 = vmatpush.msrb.mxu0 %v5275_v5 }
0x20b9   :  { %2217 = vmatpush.msrb.mxu0 %v5277_v8 }
0x20c5   :  { %v5245_v35 = vpop.permute.xlu1 %2075 }
0x2134   :  { %v2066_v57 = vpop.f32.mrf.mxu1 }
0x2135   :  { %v2067_v26 = vadd.f32 %v3901_v51, %v2066_v57  ;;  %v5280_v51 = vld [vmem:[#allocation14 + $0x18] sm:$0xff] }
0x2136   :  { %2218 = vmatpush.msrb.mxu0 %v5280_v51 }
0x2137   :  { %4034 = vtanh.f32 %v2067_v26  ;;  %v2069_v31 = vmul.f32 0.5, %v2067_v26 }
0x2139   :  { %4036 = vtanh.f32 %v2069_v31  ;;  %v5293_v31 = vld [vmem:[#allocation14 + $0x8] sm:$0xff] }
0x213d   :  { %v4035_v42 = vpop.eup %4034 }
0x213e   :  { %2080 = vrot.lane.b32.xlu0 %v4035_v42, %s4360_s16  ;;  %v5290_v42 = vld [vmem:[#allocation14 + $0x10] sm:$0xff] }
0x213f   :  { %v4037_v16 = vpop.eup %4036  ;;  %2219 = vmatpush.msrb.mxu0 %v5290_v42 }
0x2140   :  { %v2071_v29 = vadd.f32 1.0, %v4037_v16  ;;  %v5295_v16 = vld [vmem:[#allocation14] sm:$0xff] }
0x2141   :  { %2220 = vmatpush.msrb.mxu0 %v5293_v31 }
0x2142   :  { %v2072_v52 = vmul.f32 0.5, %v2071_v29  ;;  %v2175_v29 = vld [vmem:[%s6273_s3] sm:$0x1] }
0x2143   :  { %2221 = vmatpush.msrb.mxu0 %v5295_v16 }
0x2144   :  { %v2078_v38 = vmul.f32 %v5245_v35, %v2072_v52 }
0x21b0   :  { %v2081_v30 = vpop.permute.xlu0 %2080 }
0x21b1   :  { %v2083_v12 = vmul.f32 %v2081_v30, %v2072_v52 }
0x21b3   :  { %2085 = vrot.lane.b32.xlu2 %v2083_v12, %s4359_s0 }
0x220d   :  { %v2086_v36 = vpop.permute.xlu2 %2085 }
0x220e   :  { %v5248_v47 = vadd.f32 %v2086_v36, %v2078_v38  ;;  %v3902_v38 = vld [vmem:[%s6273_s3] ss:$0 sm:$0xff] }
0x2210   :  { %4038 = vtanh.f32 %v5248_v47 }
0x2216   :  { %v4039_v62 = vpop.eup %4038 }
0x2217   :  { %2091 = vrot.lane.b32.xlu0 %v4039_v62, %s4360_s16 }
0x2289   :  { %v2092_v15 = vpop.permute.xlu0 %2091 }
0x228a   :  { %v5264_v0 = vmul.f32 %v2092_v15, %v2072_v52  ;;  %v2176_v52 = vld [vmem:[%s6273_s3 + $0x1] sm:$0x1] }
0x228b   :  { %v2177_v30 = vsub.f32 %v2176_v52, %v2175_v29 }
0x228c   :  { %2119 = vrot.lane.b32.xlu1 %v5264_v0, %s4359_s0 }
0x228d   :  { %v2183_v12 = vperm.slane %v2177_v30, 0 }
0x2294   :  { %2187 = vrot.lane.b32.xlu1 %v5231_v61, %s4360_s16 }
0x22fe   :  { %v2120_v50 = vpop.permute.xlu1 %2119 }
0x22ff   :  { %3766 = vmatmul.msk.f32.vlgmr.msrb.gmra.mxu2 %vm103_vm1, %v2120_v50 }
0x2306   :  { %v2188_v45 = vpop.permute.xlu1 %2187 }
0x2382   :  { %v2140_v48 = vpop.f32.mrf.mxu2 }
0x2383   :  { %4040 = vtanh.f32 %v2140_v48 }
0x2389   :  { %v4041_v58 = vpop.eup %4040 }
0x238a   :  { %v5271_v20 = vmul.f32 2.5, %v4041_v58 }
0x238c   :  { %6377 = vst [vmem:[#allocation49_spill] sm:$0xff] %v5271_v20  ;;  %2168 = vrot.lane.b32.xlu2 %v5271_v20, %s4361_s27 }
0x23e6   :  { %v2169_v57 = vpop.permute.xlu2 %2168 }
0x23e7   :  { %vm2171_vm6 = vcmp.gt.f32.partialorder %v5271_v20, %v2169_v57 }
0x23e8   :  { %v5286_v26 = vsel %vm2171_vm6, 1.0, %v6354_v6 }
0x23e9   :  { %6378 = vst [vmem:[#allocation50_spill] sm:$0xff] %v5286_v26  ;;  %2180 = vperm.xlu0 %3831, %v5286_v26  }
0x23f1   :  { %3832 = vset.pattern.permute.xlu0 %v4598_v13 }
0x245b   :  { %v2181_v36 = vpop.permute.xlu0 %2180 }
0x245c   :  { %v2184_v62 = vmul.f32 %v2183_v12, %v2181_v36 }
0x245e   :  { %v2186_v24 = vadd.f32 %v3902_v38, %v2184_v62 }
0x2460   :  { %v2190_v33 = vsel %vm103_vm1, %v2186_v24, %v2188_v45  ;;  %v2263_v45 = vld [vmem:[#allocation14 + $0x78] sm:$0xff] }
0x2461   :  { %3768 = vmatmul.msk.f32.vlgmr.msrb.gmra.mxu0 %vm147_vm2, %v2190_v33  ;;  %v2262_v33 = vld [vmem:[#allocation14 + $0x70] sm:$0xff]  ;;  %2279 = vmatpush.msra.mxu2 %v2263_v45 }
0x2462   :  { %2943 = vmatpush.msrb.mxu3 %v2263_v45 }
0x2463   :  { %2280 = vmatpush.msra.mxu2 %v2262_v33 }
0x2464   :  { %2944 = vmatpush.msrb.mxu3 %v2262_v33 }
0x24de   :  { %v2223_v15 = vpop.f32.mrf.mxu0 }
0x24df   :  { %v2224_v50 = vadd.f32 %v3903_v32, %v2223_v15  ;;  %v2261_v32 = vld [vmem:[#allocation14 + $0x68] sm:$0xff]  ;;  %v2260_v15 = vld [vmem:[#allocation14 + $0x60] sm:$0xff] }
0x24e0   :  { %2281 = vmatpush.msra.mxu2 %v2261_v32  ;;  %2945 = vmatpush.msrb.mxu3 %v2261_v32 }
0x24e1   :  { %4042 = vtanh.f32 %v2224_v50  ;;  %v2226_v58 = vmul.f32 0.5, %v2224_v50  ;;  %v2259_v50 = vld [vmem:[#allocation14 + $0x58] sm:$0xff] }
0x24e2   :  { %2282 = vmatpush.msra.mxu2 %v2260_v15  ;;  %2946 = vmatpush.msrb.mxu3 %v2260_v15 }
0x24e3   :  { %4044 = vtanh.f32 %v2226_v58  ;;  %v2257_v58 = vld [vmem:[#allocation14 + $0x48] sm:$0xff] }
0x24e4   :  { %2283 = vmatpush.msra.mxu2 %v2259_v50  ;;  %2947 = vmatpush.msrb.mxu3 %v2259_v50 }
0x24e7   :  { %v4043_v48 = vpop.eup %4042 }
0x24e8   :  { %2233 = vrot.lane.b32.xlu2 %v4043_v48, %s4360_s16  ;;  %v2258_v48 = vld [vmem:[#allocation14 + $0x50] sm:$0xff] }
0x24e9   :  { %v4045_v57 = vpop.eup %4044  ;;  %2284 = vmatpush.msra.mxu2 %v2258_v48  ;;  %2948 = vmatpush.msrb.mxu3 %v2258_v48 }
0x24ea   :  { %v2228_v29 = vadd.f32 1.0, %v4045_v57 }
0x24eb   :  { %2285 = vmatpush.msra.mxu2 %v2257_v58  ;;  %2949 = vmatpush.msrb.mxu3 %v2257_v58 }
0x24ec   :  { %v2229_v52 = vmul.f32 0.5, %v2228_v29 }
0x24ee   :  { %v2231_v38 = vmul.f32 %v2229_v52, %v5223_v28 }
0x2542   :  { %v2234_v30 = vpop.permute.xlu2 %2233 }
0x2543   :  { %v2236_v12 = vmul.f32 %v2234_v30, %v2229_v52  ;;  %v2256_v30 = vld [vmem:[#allocation14 + $0x40] sm:$0xff] }
0x2544   :  { %2286 = vmatpush.msra.mxu2 %v2256_v30  ;;  %2950 = vmatpush.msrb.mxu3 %v2256_v30 }
0x2545   :  { %2238 = vrot.lane.b32.xlu1 %v2236_v12, %s4359_s0 }
0x254d   :  { %2252 = vrot.lane.b32.xlu1 %v5264_v0, %s4360_s16 }
0x25b7   :  { %v2239_v36 = vpop.permute.xlu1 %2238 }
0x25b8   :  { %v2241_v62 = vadd.f32 %v2239_v36, %v2231_v38 }
0x25ba   :  { %4046 = vtanh.f32 %v2241_v62  ;;  %v3904_v62 = vld [vmem:[%s6278_s8 + $0x1] ss:$0 sm:$0xff] }
0x25bf   :  { %v2253_v12 = vpop.permute.xlu1 %2252 }
0x25c0   :  { %v4047_v24 = vpop.eup %4046 }
0x25c1   :  { %2244 = vrot.lane.b32.xlu2 %v4047_v24, %s4360_s16 }
0x261b   :  { %v2245_v57 = vpop.permute.xlu2 %2244 }
0x261c   :  { %v2247_v29 = vmul.f32 %v2245_v57, %v2229_v52  ;;  %v1899_v57 = vperm.slane %v5005_v63, 0 }
0x261e   :  { %2249 = vrot.lane.b32.xlu0 %v2247_v29, %s4359_s0 }
0x2690   :  { %v2250_v38 = vpop.permute.xlu0 %2249 }
0x2691   :  { %v2255_v36 = vsel %vm103_vm1, %v2250_v38, %v2253_v12 }
0x2692   :  { %3770 = vmatmul.msk.f32.vlgmr.msra.gmra.mxu2 %vm147_vm2, %v2255_v36 }
0x2715   :  { %v2288_v24 = vpop.f32.mrf.mxu2 }
0x2716   :  { %v2289_v45 = vadd.f32 %v3904_v62, %v2288_v24  ;;  %v1898_v62 = vrot.slane %v5005_v63, 1 }
0x2718   :  { %4048 = vtanh.f32 %v2289_v45  ;;  %v2291_v52 = vmul.f32 0.5, %v2289_v45  ;;  %v1900_v24 = vperm.slane %v1898_v62, 0  ;;  %v5335_v45 = vld [vmem:[#allocation6] sm:$0x3] }
0x2719   :  { %vm2390_vm7 = vcmp.gt.f32.partialorder %v5335_v45, 0.0 }
0x271a   :  { %4050 = vtanh.f32 %v2291_v52 }
0x271e   :  { %v4049_v33 = vpop.eup %4048 }
0x271f   :  { %2298 = vrot.lane.b32.xlu2 %v4049_v33, %s4360_s16 }
0x2720   :  { %v4051_v32 = vpop.eup %4050 }
0x2721   :  { %v2293_v15 = vadd.f32 1.0, %v4051_v32  ;;  %v2391_v32 = vsel %vm2390_vm7, -100.0, %v6354_v6 }
0x2722   :  { %v2392_v63 = vsel %vm2389_vm11, %v2391_v32, -1e+30 }
0x2723   :  { %v2294_v50 = vmul.f32 0.5, %v2293_v15 }
0x2725   :  { %v2296_v29 = vmul.f32 %v2294_v50, %v5248_v47 }
0x2779   :  { %v2299_v48 = vpop.permute.xlu2 %2298 }
0x277a   :  { %v2301_v58 = vmul.f32 %v2299_v48, %v2294_v50  ;;  %v2394_v48 = vperm.slane %v2392_v63, 0 }
0x277c   :  { %2303 = vrot.lane.b32.xlu0 %v2301_v58, %s4359_s0 }
0x2784   :  { %1901 = vrot.lane.b32.xlu0 %v1899_v57, %s4359_s0  ;;  %v2342_v57 = vld [vmem:[#allocation3] sm:$0xff] }
0x27ee   :  { %v2304_v30 = vpop.permute.xlu0 %2303 }
0x27ef   :  { %v2306_v12 = vadd.f32 %v2304_v30, %v2296_v29 }
0x27f1   :  { %4052 = vtanh.f32 %v2306_v12 }
0x27f6   :  { %v1902_v38 = vpop.permute.xlu0 %1901 }
0x27f7   :  { %v4053_v36 = vpop.eup %4052  ;;  %1907 = vst.msk [vmem:[#allocation2 + $0x9] sm:$0x1] %vm6343_vm14, %v1902_v38 }
0x27f8   :  { %1909 = vst.msk [vmem:[#allocation3 + $0x9] sm:$0x1] %vm6343_vm14, %v1902_v38  ;;  %2309 = vrot.lane.b32.xlu1 %v4053_v36, %s4360_s16  ;;  %v2344_v38 = vld [vmem:[#allocation3 + $0x10] sm:$0xff] }
0x27ff   :  { %v2343_v12 = vld [vmem:[#allocation3 + $0x8] sm:$0xf] }
0x2800   :  { %1903 = vrot.lane.b32.xlu1 %v1900_v24, %s4359_s0 }
0x286a   :  { %v2310_v33 = vpop.permute.xlu1 %2309 }
0x286b   :  { %v5338_v52 = vmul.f32 %v2310_v33, %v2294_v50 }
0x286d   :  { %6379 = vst [vmem:[#allocation51_spill] sm:$0xff] %v5338_v52  ;;  %2318 = vrot.lane.b32.xlu2 %v5338_v52, %s4359_s0 }
0x2872   :  { %v1904_v15 = vpop.permute.xlu1 %1903 }
0x2873   :  { %1908 = vst.msk [vmem:[#allocation2 + $0x19] sm:$0x1] %vm6343_vm14, %v1904_v15 }
0x2874   :  { %1910 = vst.msk [vmem:[#allocation3 + $0x19] sm:$0x1] %vm6343_vm14, %v1904_v15  ;;  %v3905_v15 = vld [vmem:[%s6276_s6] ss:$0 sm:$0xff] }
0x2875   :  { %2399 = vperm.xlu2 %3830, %v2394_v48  }
0x287b   :  { %v2345_v33 = vld [vmem:[#allocation3 + $0x18] sm:$0xf] }
0x287d   :  { %3834 = vset.pattern.permute.xlu2 %v4598_v13 }
0x28c7   :  { %v2319_v50 = vpop.permute.xlu2 %2318 }
0x28c8   :  { %3771 = vmatmul.msk.f32.vlgmr.msra.gmra.mxu3 %vm103_vm1, %v2319_v50 }
0x294b   :  { %v2339_v58 = vpop.f32.mrf.mxu3 }
0x294c   :  { %v2347_v29 = vrot.slane %v2339_v58, 1  ;;  %v2348_v30 = vperm.slane %v2339_v58, 0 }
0x294e   :  { %v2349_v36 = vperm.slane %v2347_v29, 0  ;;  %v2352_v62 = vadd.f32 %v2348_v30, %v2342_v57  ;;  %v2353_v24 = vadd.f32 %v2348_v30, %v2343_v12 }
0x2950   :  { %v2354_v32 = vadd.f32 %v2349_v36, %v2344_v38  ;;  %v2355_v26 = vadd.f32 %v2349_v36, %v2345_v33  ;;  %4054 = vtanh.f32 %v2352_v62 }
0x2951   :  { %4056 = vtanh.f32 %v2353_v24 }
0x2952   :  { %4058 = vtanh.f32 %v2354_v32 }
0x2953   :  { %4060 = vtanh.f32 %v2355_v26  ;;  %v2407_v26 = vperm.slane %v2392_v63, 1 }
0x2956   :  { %v4055_v50 = vpop.eup %4054 }
0x2957   :  { %v4057_v20 = vpop.eup %4056  ;;  %v2364_v52 = vmul.f32 %v4055_v50, %v3905_v15 }
0x2958   :  { %v4059_v58 = vpop.eup %4058  ;;  %v2365_v25 = vmul.f32 %v4057_v20, %v3905_v15 }
0x2959   :  { %v2368_v29 = vsel %vm103_vm1, %v2364_v52, 0.0  ;;  %v2366_v57 = vmul.f32 %v4059_v58, %v3905_v15  ;;  %v4061_v30 = vpop.eup %4060 }
0x295a   :  { %v2371_v12 = vsel %vm105_vm5, %v2365_v25, 0.0  ;;  %2369 = vadd.xlane.f32.xlu2 %v2368_v29  ;;  %v2367_v36 = vmul.f32 %v4061_v30, %v3905_v15  ;;  %v2400_v25 = vpop.permute.xlu2 %2399 }
0x295b   :  { %2372 = vadd.xlane.f32.xlu0 %v2371_v12  ;;  %v2374_v38 = vsel %vm103_vm1, %v2366_v57, 0.0 }
0x295c   :  { %2375 = vadd.xlane.f32.xlu1 %v2374_v38  ;;  %v2377_v62 = vsel %vm105_vm5, %v2367_v36, 0.0 }
0x2962   :  { %2378 = vadd.xlane.f32.xlu2 %v2377_v62 }
0x296f   :  { %2405 = vperm.xlu0 %3832, %v2394_v48  }
0x2975   :  { %2412 = vperm.xlu1 %3833, %v2407_v26  }
0x2977   :  { %3837 = vset.pattern.permute.xlu0 %v4591_v11 }
0x297a   :  { %2418 = vperm.xlu2 %3834, %v2407_v26  }
0x297d   :  { %3835 = vset.pattern.permute.xlu1 %v6355_v21 }
0x2982   :  { %3836 = vset.pattern.permute.xlu2 %v6355_v21 }
0x29cd   :  { %v2370_v20 = vpop.xlane.xlu2 %2369 }
0x29ce   :  { %4062 = vtanh.f32 %v2370_v20  ;;  %v2373_v24 = vpop.xlane.xlu0 %2372 }
0x29cf   :  { %4064 = vtanh.f32 %v2373_v24  ;;  %v2376_v15 = vpop.xlane.xlu1 %2375 }
0x29d0   :  { %4066 = vtanh.f32 %v2376_v15 }
0x29d4   :  { %v4063_v52 = vpop.eup %4062 }
0x29d5   :  { %v2384_v33 = vmul.f32 2.5, %v4063_v52  ;;  %v2379_v63 = vpop.xlane.xlu2 %2378  ;;  %v4065_v48 = vpop.eup %4064 }
0x29d6   :  { %4068 = vtanh.f32 %v2379_v63  ;;  %v2385_v50 = vmul.f32 2.5, %v4065_v48  ;;  %v4067_v29 = vpop.eup %4066 }
0x29d7   :  { %v5360_v32 = vadd.f32 %v2400_v25, %v2384_v33  ;;  %v2386_v12 = vmul.f32 2.5, %v4067_v29 }
0x29d9   :  { %6380 = vst [vmem:[#allocation52_spill] sm:$0xff] %v5360_v32  ;;  %2433 = vperm.xlu1 %3835, %v5360_v32  }
0x29dc   :  { %v4069_v30 = vpop.eup %4068 }
0x29dd   :  { %v2387_v38 = vmul.f32 2.5, %v4069_v30  ;;  %v2419_v36 = vpop.permute.xlu2 %2418 }
0x29df   :  { %v5368_v25 = vadd.f32 %v2419_v36, %v2387_v38 }
0x29e1   :  { %v2406_v58 = vpop.permute.xlu0 %2405  ;;  %6382 = vst [vmem:[#allocation54_spill] sm:$0xff] %v5368_v25 }
0x29e2   :  { %v5363_v57 = vadd.f32 %v2406_v58, %v2385_v50 }
0x29e4   :  { %6381 = vst [vmem:[#allocation53_spill] sm:$0xff] %v5363_v57  ;;  %2436 = vperm.xlu2 %3836, %v5363_v57  }
0x29e7   :  { %v2413_v62 = vpop.permute.xlu1 %2412 }
0x29e8   :  { %v5366_v26 = vadd.f32 %v2413_v62, %v2386_v12 }
0x29ea   :  { %2439 = vperm.xlu1 %3835, %v5366_v26  }
0x29ec   :  { %2442 = vperm.xlu2 %3836, %v5368_v25  }
0x2a3e   :  { %v2437_v20 = vpop.permute.xlu2 %2436 }
0x2a3f   :  { %v2445_v63 = vperm.slane %v2437_v20, %v4648_v22 }
0x2a46   :  { %v2443_v24 = vpop.permute.xlu2 %2442 }
0x2a47   :  { %v2448_v48 = vperm.slane %v2443_v24, %v4648_v22 }
0x2a4b   :  { %v2434_v52 = vpop.permute.xlu1 %2433 }
0x2a4c   :  { %v2444_v33 = vperm.slane %v2434_v52, %v4589_v9 }
0x2a4e   :  { %v2446_v58 = vsel %vm650_vm9, %v2445_v63, %v2444_v33 }
0x2a5c   :  { %v2440_v15 = vpop.permute.xlu1 %2439 }
0x2a5d   :  { %v2447_v50 = vperm.slane %v2440_v15, %v4589_v9 }
0x2a5f   :  { %v2449_v29 = vsel %vm650_vm9, %v2448_v48, %v2447_v50 }
0x2a60   :  { %v5379_v30 = vsel %vm655_vm10, %v2449_v29, %v2446_v58 }
0x2a61   :  { %v2452_v12 = vsel %vm95_vm4, %v5379_v30, -inf }
0x2a62   :  { %2453 = vmax.xlane.f32.xlu0 %v2452_v12 }
0x2ad5   :  { %v5383_v38 = vpop.xlane.xlu0 %2453 }
0x2ad6   :  { %6383 = vst [vmem:[#allocation55_spill] sm:$0xff] %v5383_v38  ;;  %v2561_v36 = vand.u32 2147483647, %v5383_v38  ;;  %v5387_v62 = vperm.slane %v5383_v38, 0  ;;  %v2556_v52 = vmul.f32 2.0, %v5383_v38  ;;  %v5397_v63 = vperm.slane %v5383_v38, 1 }
0x2ad8   :  { %6384 = vst [vmem:[#allocation56_spill] sm:$0xff] %v5387_v62  ;;  %v2562_v20 = vmul.f32 -2.0, %v2561_v36  ;;  %vm2503_vm12 = vcmp.eq.f32.partialorder %v5363_v57, %v5387_v62  ;;  %vm2502_vm13 = vcmp.eq.f32.partialorder %v5360_v32, %v5387_v62  ;;  %v2557_v48 = vmul.f32 0.5, %v2556_v52  ;;  %v5408_v52 = vld [vmem:[%s6279_s9 + $0x4] sm:$0x3] }
0x2ad9   :  { %v2507_v24 = vsel %vm2503_vm12, %v4678_v43, 1e+09  ;;  %v2506_v15 = vsel %vm2502_vm13, %v4674_v41, 1e+09  ;;  %vm2505_vm15 = vcmp.eq.f32.partialorder %v5368_v25, %v5397_v63  ;;  %vm2504_vm6 = vcmp.eq.f32.partialorder %v5366_v26, %v5397_v63 }
0x2ada   :  { %v2563_v33 = vmul.f32 1.442695, %v2562_v20  ;;  %2518 = vperm.xlu2 %3836, %v2507_v24   ;;  %2515 = vperm.xlu1 %3835, %v2506_v15   ;;  %v2509_v50 = vsel %vm2505_vm15, %v4678_v43, 1e+09  ;;  %v2508_v29 = vsel %vm2504_vm6, %v4674_v41, 1e+09 }
0x2adc   :  { %4070 = vpow2.f32 %v2563_v33 }
0x2add   :  { %4072 = vtanh.f32 %v2557_v48 }
0x2ae2   :  { %v4071_v58 = vpop.eup %4070  ;;  %2524 = vperm.xlu2 %3836, %v2509_v50   ;;  %2521 = vperm.xlu1 %3835, %v2508_v29   ;;  %v2570_v29 = vsub.f32 0.0, %v5383_v38 }
0x2ae3   :  { %v2565_v12 = vadd.f32 1.0, %v4071_v58  ;;  %v4073_v20 = vpop.eup %4072 }
0x2ae4   :  { %v2559_v24 = vadd.f32 1.0, %v4073_v20 }
0x2ae5   :  { %4074 = vlog2.f32 %v2565_v12 }
0x2ae6   :  { %v5411_v33 = vmul.f32 0.5, %v2559_v24 }
0x2ae8   :  { %vm2572_vm7 = vcmp.lt.f32.partialorder %v5408_v52, %v5411_v33 }
0x2ae9   :  { %v5416_v50 = vsel %vm2572_vm7, 1.0, %v6354_v6 }
0x2aea   :  { %3838 = vset.pattern.permute.xlu2 %v4598_v13  ;;  %6385 = vst [vmem:[#allocation57_spill] sm:$0xff] %v5416_v50  ;;  %v2576_v43 = vsub.f32 1.0, %v5416_v50 }
0x2aeb   :  { %v4075_v15 = vpop.eup %4074 }
0x2aec   :  { %v2567_v48 = vmul.f32 0.6931472, %v4075_v15 }
0x2aee   :  { %v2568_v58 = vadd.f32 %v2567_v48, %v2561_v36  ;;  %v1911_v36 = vsel %vm1503_vm3, %v5166_v55, 1.0 }
0x2aef   :  { %v1912_v48 = vsel %vm95_vm4, %v1911_v36, inf }
0x2af0   :  { %v5420_v12 = vsub.f32 %v5383_v38, %v2568_v58  ;;  %v5422_v20 = vsub.f32 %v2570_v29, %v2568_v58 }
0x2af2   :  { %6386 = vst [vmem:[#allocation58_spill] sm:$0xff] %v5420_v12  ;;  %v2575_v24 = vmul.f32 %v5416_v50, %v5420_v12  ;;  %v2577_v15 = vmul.f32 %v2576_v43, %v5422_v20 }
0x2af4   :  { %v5428_v41 = vadd.f32 %v2577_v15, %v2575_v24 }
0x2af6   :  { %6387 = vst [vmem:[#allocation59_spill] sm:$0xff] %v5428_v41 }
0x2b0b   :  { %1913 = vmin.xlane.f32.xlu2 %v1912_v48 }
0x2b34   :  { %v2519_v38 = vpop.permute.xlu2 %2518 }
0x2b35   :  { %v2527_v57 = vperm.slane %v2519_v38, %v4648_v22 }
0x2b3c   :  { %v2525_v58 = vpop.permute.xlu2 %2524 }
0x2b3d   :  { %v2530_v50 = vperm.slane %v2525_v58, %v4648_v22 }
0x2b4c   :  { %v2516_v32 = vpop.permute.xlu1 %2515 }
0x2b4d   :  { %v2526_v29 = vperm.slane %v2516_v32, %v4589_v9  ;;  %v1922_v32 = vld [vmem:[#allocation8] sm:$0x1] }
0x2b4f   :  { %v2528_v24 = vsel %vm650_vm9, %v2527_v57, %v2526_v29 }
0x2b54   :  { %v2522_v25 = vpop.permute.xlu1 %2521 }
0x2b55   :  { %v2529_v43 = vperm.slane %v2522_v25, %v4589_v9 }
0x2b57   :  { %v2531_v15 = vsel %vm650_vm9, %v2530_v50, %v2529_v43 }
0x2b58   :  { %v2532_v55 = vsel %vm655_vm10, %v2531_v15, %v2528_v24 }
0x2b59   :  { %v2534_v36 = vsel %vm95_vm4, %v2532_v55, inf }
0x2b5a   :  { %2535 = vmin.xlane.f32.xlu1 %v2534_v36 }
0x2b7e   :  { %v1914_v48 = vpop.xlane.xlu2 %1913 }
0x2b7f   :  { %v1916_v41 = vrot.slane %v1914_v48, 1 }
0x2b81   :  { %v1918_v62 = vmin.f32 %v1914_v48, %v1916_v41 }
0x2b83   :  { %vm1919_vm3 = vcmp.gt.f32.partialorder %v1918_v62, 0.0 }
0x2b84   :  { %v3761_v38 = vsel %vm1919_vm3, 1.0, %v6354_v6 }
0x2b85   :  { %v1923_v12 = vmax.f32 %v1922_v32, %v3761_v38 }
0x2b87   :  { %1924 = vst.msk [vmem:[#allocation8] sm:$0x1] %vm6345_vm8, %v1923_v12  ;;  %vm3275_vm8 = vcmp.lt.f32.partialorder %v4601_v14, 11.0 }
0x2b8e   :  { %v5444_v25 = vld [vmem:[#allocation8] sm:$0x1] }
0x2b8f   :  { %6388 = vst [vmem:[#allocation60_spill] sm:$0xff] %v5444_v25  ;;  %v6335_v57 = vsub.f32 1.0, %v5444_v25 }
0x2b91   :  { %v5449_v50 = vperm.slane %v6335_v57, 0 }
0x2b93   :  { %6389 = vst [vmem:[#allocation61_spill] sm:$0xff] %v5449_v50  ;;  %2005 = vperm.xlu1 %3835, %v5449_v50  }
0x2b9b   :  { %3839 = vset.pattern.permute.xlu1 %v4591_v11 }
0x2bcd   :  { %v5453_v41 = vpop.xlane.xlu1 %2535 }
0x2bce   :  { %6390 = vst [vmem:[#allocation62_spill] sm:$0xff] %v5453_v41  ;;  %vm2537_vm12 = vcmp.eq.f32.partialorder %v4601_v14, %v5453_v41 }
0x2bcf   :  { %v2538_v62 = vsel %vm2537_vm12, -3e+38, %v5379_v30 }
0x2bd0   :  { %v2539_v12 = vsel %vm95_vm4, %v2538_v62, -inf }
0x2bd1   :  { %2540 = vmax.xlane.f32.xlu0 %v2539_v12 }
0x2be5   :  { %1998 = vrot.lane.b32.xlu0 %v5179_v60, %s4364_s28 }
0x2c05   :  { %v5474_v25 = vpop.permute.xlu1 %2005 }
0x2c44   :  { %v5464_v58 = vpop.xlane.xlu0 %2540 }
0x2c45   :  { %6391 = vst [vmem:[#allocation63_spill] sm:$0xff] %v5464_v58  ;;  %v2584_v29 = vmul.f32 2.0, %v5464_v58  ;;  %v2589_v43 = vand.u32 2147483647, %v5464_v58  ;;  %vm2542_vm13 = vcmp.eq.f32.partialorder %v2538_v62, %v5464_v58 }
0x2c46   :  { %v2543_v24 = vsel %vm2542_vm13, %v4601_v14, 1e+09 }
0x2c47   :  { %v2585_v15 = vmul.f32 0.5, %v2584_v29  ;;  %v2590_v55 = vmul.f32 -2.0, %v2589_v43  ;;  %v2544_v30 = vsel %vm95_vm4, %v2543_v24, inf }
0x2c48   :  { %2545 = vmin.xlane.f32.xlu2 %v2544_v30 }
0x2c49   :  { %4076 = vtanh.f32 %v2585_v15  ;;  %v2591_v36 = vmul.f32 1.442695, %v2590_v55 }
0x2c4b   :  { %4078 = vpow2.f32 %v2591_v36  ;;  %v2598_v36 = vsub.f32 0.0, %v5464_v58 }
0x2c4f   :  { %v4077_v48 = vpop.eup %4076 }
0x2c50   :  { %v2587_v38 = vadd.f32 1.0, %v4077_v48 }
0x2c51   :  { %v4079_v32 = vpop.eup %4078 }
0x2c52   :  { %v2593_v12 = vadd.f32 1.0, %v4079_v32  ;;  %v5471_v57 = vmul.f32 0.5, %v2587_v38 }
0x2c54   :  { %4080 = vlog2.f32 %v2593_v12  ;;  %vm2600_vm15 = vcmp.lt.f32.partialorder %v5408_v52, %v5471_v57 }
0x2c55   :  { %v5481_v55 = vsel %vm2600_vm15, 1.0, %v6354_v6 }
0x2c56   :  { %6392 = vst [vmem:[#allocation64_spill] sm:$0xff] %v5481_v55 }
0x2c57   :  { %v1999_v50 = vpop.permute.xlu0 %1998 }
0x2c58   :  { %v2001_v62 = vsub.f32 %v5231_v61, %v1999_v50  ;;  %v2604_v50 = vsub.f32 1.0, %v5481_v55 }
0x2c5a   :  { %v4081_v29 = vpop.eup %4080  ;;  %v2008_v24 = vmul.f32 %v5474_v25, %v2001_v62 }
0x2c5b   :  { %v2595_v15 = vmul.f32 0.6931472, %v4081_v29 }
0x2c5c   :  { %2010 = vrot.lane.b32.xlu0 %v2008_v24, %s4359_s0 }
0x2c5d   :  { %v2596_v30 = vadd.f32 %v2595_v15, %v2589_v43  ;;  %v3772_v43 = vsel %vm2537_vm12, 1.0, %v6354_v6 }
0x2c5f   :  { %v5485_v48 = vsub.f32 %v5464_v58, %v2596_v30  ;;  %v5487_v61 = vsub.f32 %v2598_v36, %v2596_v30  ;;  %v2678_v58 = vld [vmem:[#allocation2] sm:$0xff] }
0x2c61   :  { %v2603_v52 = vmul.f32 %v5481_v55, %v5485_v48  ;;  %v2605_v32 = vmul.f32 %v2604_v50, %v5487_v61  ;;  %v2679_v55 = vld [vmem:[#allocation2 + $0x8] sm:$0xf] }
0x2c63   :  { %v5493_v38 = vadd.f32 %v2605_v32, %v2603_v52 }
0x2c65   :  { %6393 = vst [vmem:[#allocation65_spill] sm:$0xff] %v5493_v38 }
0x2cbb   :  { %v5495_v12 = vpop.xlane.xlu2 %2545 }
0x2cbc   :  { %6394 = vst [vmem:[#allocation66_spill] sm:$0xff] %v5495_v12  ;;  %vm2549_vm6 = vcmp.eq.f32.partialorder %v4601_v14, %v5495_v12 }
0x2cbd   :  { %v3773_v62 = vsel %vm2549_vm6, 1.0, %v6354_v6 }
0x2cbe   :  { %v2552_v29 = vadd.f32 %v3773_v62, %v3772_v43  ;;  %v2015_v43 = vsub.f32 %v5223_v28, %v5220_v27  ;;  %v2680_v28 = vld [vmem:[#allocation2 + $0x10] sm:$0xff] }
0x2cc0   :  { %v2553_v24 = vmul.f32 %v2552_v29, %v5474_v25  ;;  %v2730_v15 = vsel %vm95_vm4, %v2552_v29, 0.0  ;;  %v2682_v30 = vperm.slane %v2552_v29, 0  ;;  %v2695_v36 = vperm.slane %v2552_v29, 1 }
0x2cc1   :  { %2731 = vadd.xlane.f32.xlu2 %v2730_v15  ;;  %v2016_v62 = vmul.f32 %v2015_v43, %v5474_v25  ;;  %v2830_v15 = vld [vmem:[#allocation14 + $0x38] sm:$0xff] }
0x2cc2   :  { %v5507_v50 = vadd.f32 %v2553_v24, %v5335_v45  ;;  %2687 = vperm.xlu1 %3839, %v2682_v30   ;;  %2700 = vperm.xlu0 %3837, %v2695_v36  }
0x2cc3   :  { %2846 = vmatpush.msra.mxu1 %v2830_v15  ;;  %3100 = vmatpush.msrb.mxu2 %v2830_v15 }
0x2cc4   :  { %6395 = vst [vmem:[#allocation67_spill] sm:$0xff] %v5507_v50 }
0x2cc5   :  { %2555 = vst.msk [vmem:[#allocation6] sm:$0x3] %vm95_vm4, %v5507_v50 }
0x2cca   :  { %3840 = vset.pattern.permute.xlu1 %v4598_v13  ;;  %3841 = vset.pattern.permute.xlu0 %v6376_v23 }
0x2cce   :  { %v2011_v52 = vpop.permute.xlu0 %2010 }
0x2ccf   :  { %v2013_v32 = vadd.f32 %v2011_v52, %v5179_v60 }
0x2cd1   :  { %2014 = vst.msk [vmem:[#allocation4] sm:$0x3] %vm6344_vm0, %v2013_v32  ;;  %v2829_v32 = vld [vmem:[#allocation14 + $0x30] sm:$0xff] }
0x2cd2   :  { %2693 = vperm.xlu1 %3840, %v2682_v30   ;;  %2847 = vmatpush.msra.mxu1 %v2829_v32 }
0x2cd3   :  { %3101 = vmatpush.msrb.mxu2 %v2829_v32 }
0x2cd4   :  { %2848 = vmatpush.msra.mxu1 %v5275_v5 }
0x2cd6   :  { %2849 = vmatpush.msra.mxu1 %v5277_v8 }
0x2cd8   :  { %v2816_v45 = vld [vmem:[#allocation4] sm:$0x3]  ;;  %2850 = vmatpush.msra.mxu1 %v5280_v51 }
0x2cd9   :  { %2706 = vperm.xlu2 %3838, %v2695_v36   ;;  %2819 = vrot.lane.b32.xlu0 %v2816_v45, %s4359_s0  ;;  %v2681_v36 = vld [vmem:[#allocation2 + $0x18] sm:$0xf] }
0x2cda   :  { %2018 = vrot.lane.b32.xlu1 %v2016_v62, %s4364_s28  ;;  %2851 = vmatpush.msra.mxu1 %v5290_v42 }
0x2cdb   :  { %3844 = vset.pattern.permute.xlu1 %v6355_v21 }
0x2cdc   :  { %2852 = vmatpush.msra.mxu1 %v5293_v31 }
0x2cde   :  { %2853 = vmatpush.msra.mxu1 %v5295_v16 }
0x2ce1   :  { %2095 = vrot.lane.b32.xlu2 %v5211_v3, %s4364_s28 }
0x2ce2   :  { %3843 = vset.pattern.permute.xlu2 %v6355_v21 }
0x2d34   :  { %v2732_v23 = vpop.xlane.xlu2 %2731  ;;  %v2701_v29 = vpop.permute.xlu0 %2700 }
0x2d35   :  { %v5524_v60 = vadd.f32 1.0, %v2732_v23  ;;  %v2710_v24 = vmul.f32 %v2701_v29, %v2680_v28  ;;  %v2688_v30 = vpop.permute.xlu1 %2687 }
0x2d37   :  { %v2736_v27 = vrot.slane %v5524_v60, 1  ;;  %4082 = vrcp.f32 %v5524_v60  ;;  %v2721_v62 = vsel %vm103_vm1, %v2710_v24, 0.0  ;;  %vm2744_vm6 = vweird.f32 %v5524_v60 }
0x2d39   :  { %4084 = vrcp.f32 %v2736_v27  ;;  %v2765_v8 = vand.u32 2147483648, %v2736_v27  ;;  %vm2759_vm3 = vweird.f32 %v2736_v27 }
0x2d3c   :  { %v2707_v52 = vpop.permute.xlu2 %2706 }
0x2d3d   :  { %v2711_v3 = vmul.f32 %v2707_v52, %v2681_v36  ;;  %v5528_v43 = vpop.eup %4082  ;;  %v2708_v52 = vmul.f32 %v2688_v30, %v2678_v58 }
0x2d3e   :  { %v2740_v29 = vmul.f32 %v5528_v43, %v5524_v60  ;;  %vm2745_vm15 = vweird.f32 %v5528_v43 }
0x2d3f   :  { %v4085_v45 = vpop.eup %4084  ;;  %v2722_v23 = vsel %vm105_vm5, %v2711_v3, 0.0 }
0x2d40   :  { %v2755_v12 = vmul.f32 %v4085_v45, %v2736_v27  ;;  %v2723_v28 = vadd.f32 %v2722_v23, %v2721_v62  ;;  %v2741_v23 = vsub.f32 1.0, %v2740_v29  ;;  %vm2760_vm7 = vweird.f32 %v4085_v45 }
0x2d41   :  { %vm2761_vm12 = vmor %vm2759_vm3, %vm2760_vm7 }
0x2d42   :  { %v2756_v15 = vsub.f32 1.0, %v2755_v12  ;;  %v2724_v36 = vrot.slane %v2723_v28, 4  ;;  %v2712_v12 = vsel %vm103_vm1, %v2708_v52, 0.0  ;;  %vm2746_vm7 = vmor %vm2744_vm6, %vm2745_vm15  ;;  %vm865_vm15 = vcmask 7168  }
0x2d43   :  { %vm893_vm6 = vcmask 15360  }
0x2d44   :  { %v2757_v41 = vmul.f32 %v4085_v45, %v2756_v15  ;;  %v2725_v32 = vadd.f32 %v2724_v36, %v2723_v28  ;;  %v2096_v50 = vpop.permute.xlu2 %2095  ;;  %v2694_v24 = vpop.permute.xlu1 %2693  ;;  %v2763_v28 = vand.u32 2147483647, %v2736_v27  ;;  %v2734_v27 = vld [vmem:[#allocation7] sm:$0x3] }
0x2d45   :  { %v2098_v3 = vsub.f32 %v5264_v0, %v2096_v50  ;;  %v2709_v62 = vmul.f32 %v2694_v24, %v2679_v55  ;;  %v2742_v0 = vmul.f32 %v5528_v43, %v2741_v23  ;;  %v2766_v50 = vor.u32 1.1754944e-38, %v2765_v8 }
0x2d46   :  { %v2758_v5 = vadd.f32 %v4085_v45, %v2757_v41  ;;  %v2726_v38 = vrot.slane %v2725_v32, 2  ;;  %vm2764_vm13 = vcmp.eq.f32.partialorder %v2763_v28, 8.507059e+37  ;;  %v2770_v16 = vrot.slane %v2734_v27, 1 }
0x2d47   :  { %v2099_v58 = vmul.f32 %v2098_v3, %v5474_v25  ;;  %v2713_v30 = vsel %vm105_vm5, %v2709_v62, 0.0  ;;  %v2743_v24 = vadd.f32 %v5528_v43, %v2742_v0  ;;  %v2748_v62 = vand.u32 2147483647, %v5524_v60 }
0x2d48   :  { %v2727_v15 = vadd.f32 %v2726_v38, %v2725_v32  ;;  %v2714_v51 = vadd.f32 %v2713_v30, %v2712_v12  ;;  %v2762_v41 = vsel %vm2761_vm12, %v4085_v45, %v2758_v5  ;;  %v2750_v45 = vand.u32 2147483648, %v5524_v60 }
0x2d49   :  { %2101 = vrot.lane.b32.xlu2 %v2099_v58, %s4359_s0  ;;  %v2767_v38 = vsel %vm2764_vm13, %v2766_v50, %v2762_v41  ;;  %vm2749_vm3 = vcmp.eq.f32.partialorder %v2748_v62, 8.507059e+37 }
0x2d4a   :  { %v2728_v42 = vrot.slane %v2727_v15, 1  ;;  %v2715_v55 = vrot.slane %v2714_v51, 4  ;;  %v2751_v8 = vor.u32 1.1754944e-38, %v2750_v45 }
0x2d4c   :  { %v2729_v29 = vadd.f32 %v2728_v42, %v2727_v15  ;;  %v2716_v36 = vadd.f32 %v2715_v55, %v2714_v51  ;;  %v2019_v52 = vpop.permute.xlu1 %2018 }
0x2d4d   :  { %v2021_v32 = vadd.f32 %v2019_v52, %v5198_v4  ;;  %v2747_v4 = vsel %vm2746_vm7, %v5528_v43, %v2743_v24  ;;  %v2820_v43 = vpop.permute.xlu0 %2819  ;;  %v4217_v52 = vld [vmem:[#allocation4 + $0x2] sm:$0x3]  ;;  %vm895_vm7 = vcmask 23552  }
0x2d4e   :  { %v2768_v31 = vmul.f32 %v2767_v38, %v2729_v29  ;;  %v2717_v3 = vrot.slane %v2716_v36, 2  ;;  %v2752_v30 = vsel %vm2749_vm3, %v2751_v8, %v2747_v4  ;;  %vm897_vm3 = vcmask 31744  }
0x2d4f   :  { %2022 = vst.msk [vmem:[#allocation5] sm:$0x3] %vm6344_vm0, %v2021_v32 }
0x2d50   :  { %v2718_v23 = vadd.f32 %v2717_v3, %v2716_v36  ;;  %v2774_v5 = vsub.f32 %v2768_v31, %v2770_v16 }
0x2d52   :  { %v2719_v12 = vrot.slane %v2718_v23, 1  ;;  %v2776_v28 = vmul.f32 %v2774_v5, %v5474_v25 }
0x2d54   :  { %v2720_v58 = vadd.f32 %v2719_v12, %v2718_v23  ;;  %v2779_v41 = vrot.slane %v2776_v28, 7 }
0x2d56   :  { %v2753_v15 = vmul.f32 %v2752_v30, %v2720_v58  ;;  %v2817_v51 = vld [vmem:[#allocation5] sm:$0x3] }
0x2d57   :  { %2864 = vrot.lane.b32.xlu1 %v2817_v51, %s4359_s0 }
0x2d58   :  { %v2773_v0 = vsub.f32 %v2753_v15, %v2734_v27  ;;  %v2106_v15 = vsub.f32 %v5248_v47, %v5245_v35 }
0x2d5a   :  { %v2775_v60 = vmul.f32 %v2773_v0, %v5474_v25  ;;  %v2107_v51 = vmul.f32 %v2106_v15, %v5474_v25  ;;  %v3907_v25 = vld [vmem:[%s6278_s8 + $0x1] ss:$0 sm:$0xff] }
0x2d5c   :  { %v2780_v42 = vsel %vm655_vm10, %v2779_v41, %v2775_v60 }
0x2d5d   :  { %v2782_v55 = vadd.f32 %v2780_v42, %v2734_v27  ;;  %v3906_v27 = vld [vmem:[%s6278_s8] ss:$0 sm:$0xff]  ;;  %v4218_v42 = vld [vmem:[#allocation5 + $0x2] sm:$0x3] }
0x2d5f   :  { %2783 = vst.msk [vmem:[#allocation7] sm:$0x3] %vm6344_vm0, %v2782_v55 }
0x2d66   :  { %v2815_v50 = vld [vmem:[#allocation7] sm:$0x3] }
0x2d67   :  { %v2822_v29 = vsel %vm103_vm1, %v2815_v50, %v2820_v43 }
0x2d68   :  { %3778 = vmatmul.msk.f32.vlgmr.msra.gmra.mxu1 %vm147_vm2, %v2822_v29 }
0x2da3   :  { %v2102_v36 = vpop.permute.xlu2 %2101 }
0x2da4   :  { %v2104_v38 = vadd.f32 %v4217_v52, %v2102_v36 }
0x2da6   :  { %2105 = vst.msk [vmem:[#allocation4 + $0x2] sm:$0x3] %vm6344_vm0, %v2104_v38 }
0x2dad   :  { %v2909_v32 = vld [vmem:[#allocation4 + $0x2] sm:$0x3] }
0x2dae   :  { %2916 = vrot.lane.b32.xlu2 %v2909_v32, %s4359_s0 }
0x2dc9   :  { %v5568_v12 = vpop.permute.xlu1 %2864 }
0x2de5   :  { %v2855_v31 = vpop.f32.mrf.mxu1 }
0x2de6   :  { %v2856_v24 = vadd.f32 %v3906_v27, %v2855_v31 }
0x2de8   :  { %4086 = vtanh.f32 %v2856_v24  ;;  %v2858_v45 = vmul.f32 0.5, %v2856_v24 }
0x2dea   :  { %4088 = vtanh.f32 %v2858_v45 }
0x2dee   :  { %v4087_v3 = vpop.eup %4086 }
0x2def   :  { %2869 = vrot.lane.b32.xlu0 %v4087_v3, %s4360_s16 }
0x2df0   :  { %v4089_v16 = vpop.eup %4088 }
0x2df1   :  { %v2860_v62 = vadd.f32 1.0, %v4089_v16 }
0x2df3   :  { %v2861_v23 = vmul.f32 0.5, %v2860_v62 }
0x2df5   :  { %v2867_v8 = vmul.f32 %v5568_v12, %v2861_v23 }
0x2e08   :  { %v2917_v50 = vpop.permute.xlu2 %2916 }
0x2e61   :  { %v2870_v5 = vpop.permute.xlu0 %2869 }
0x2e62   :  { %v2872_v4 = vmul.f32 %v2870_v5, %v2861_v23 }
0x2e64   :  { %2874 = vrot.lane.b32.xlu0 %v2872_v4, %s4359_s0  ;;  %v3003_v4 = vld [vmem:[%s6274_s4 + $0x18] sm:$0xff] }
0x2e65   :  { %3021 = vmatpush.msra.mxu0 %v3003_v4 }
0x2ed6   :  { %v2875_v58 = vpop.permute.xlu0 %2874 }
0x2ed7   :  { %v5571_v30 = vadd.f32 %v2875_v58, %v2867_v8  ;;  %v3002_v8 = vld [vmem:[%s6274_s4 + $0x10] sm:$0xff]  ;;  %v3001_v58 = vld [vmem:[%s6274_s4 + $0x8] sm:$0xff] }
0x2ed8   :  { %3022 = vmatpush.msra.mxu0 %v3002_v8  ;;  %v3909_v8 = vld [vmem:[%s6278_s8] ss:$0 sm:$0xff] }
0x2ed9   :  { %4090 = vtanh.f32 %v5571_v30 }
0x2eda   :  { %3023 = vmatpush.msra.mxu0 %v3001_v58 }
0x2edf   :  { %v4091_v28 = vpop.eup %4090 }
0x2ee0   :  { %2880 = vrot.lane.b32.xlu1 %v4091_v28, %s4360_s16  ;;  %v3000_v28 = vld [vmem:[%s6274_s4] sm:$0xff] }
0x2ee1   :  { %3024 = vmatpush.msra.mxu0 %v3000_v28 }
0x2ee8   :  { %2109 = vrot.lane.b32.xlu1 %v2107_v51, %s4364_s28 }
0x2f52   :  { %v2881_v0 = vpop.permute.xlu1 %2880 }
0x2f53   :  { %v5579_v41 = vmul.f32 %v2881_v0, %v2861_v23 }
0x2f55   :  { %2912 = vrot.lane.b32.xlu0 %v5579_v41, %s4359_s0 }
0x2f5a   :  { %v2110_v60 = vpop.permute.xlu1 %2109 }
0x2f5b   :  { %v2112_v55 = vadd.f32 %v4218_v42, %v2110_v60 }
0x2f5d   :  { %2113 = vst.msk [vmem:[#allocation5 + $0x2] sm:$0x3] %vm6344_vm0, %v2112_v55 }
0x2f64   :  { %v2910_v43 = vld [vmem:[#allocation5 + $0x2] sm:$0x3] }
0x2f65   :  { %2961 = vrot.lane.b32.xlu2 %v2910_v43, %s4359_s0  ;;  %v3082_v43 = vld [vmem:[#allocation14 + $0x28] sm:$0xff] }
0x2f66   :  { %3102 = vmatpush.msrb.mxu2 %v3082_v43 }
0x2fbf   :  { %v5592_v45 = vpop.permute.xlu2 %2961 }
0x2fc7   :  { %v2913_v35 = vpop.permute.xlu0 %2912 }
0x2fc8   :  { %v2919_v47 = vsel %vm103_vm1, %v2913_v35, %v2917_v50  ;;  %v3081_v50 = vld [vmem:[#allocation14 + $0x20] sm:$0xff]  ;;  %v3080_v35 = vld [vmem:[#allocation14 + $0x18] sm:$0xff] }
0x2fc9   :  { %3780 = vmatmul.msk.f32.vlgmr.msrb.gmra.mxu3 %vm147_vm2, %v2919_v47  ;;  %3103 = vmatpush.msrb.mxu2 %v3081_v50 }
0x2fcb   :  { %3104 = vmatpush.msrb.mxu2 %v3080_v35 }
0x304c   :  { %v2952_v29 = vpop.f32.mrf.mxu3 }
0x304d   :  { %v2953_v36 = vadd.f32 %v3907_v25, %v2952_v29  ;;  %v3079_v29 = vld [vmem:[#allocation14 + $0x10] sm:$0xff] }
0x304e   :  { %3105 = vmatpush.msrb.mxu2 %v3079_v29 }
0x304f   :  { %4092 = vtanh.f32 %v2953_v36  ;;  %v2955_v38 = vmul.f32 0.5, %v2953_v36  ;;  %v3078_v36 = vld [vmem:[#allocation14 + $0x8] sm:$0xff] }
0x3050   :  { %3106 = vmatpush.msrb.mxu2 %v3078_v36 }
0x3051   :  { %4094 = vtanh.f32 %v2955_v38  ;;  %v3061_v38 = vld [vmem:[%s6273_s3] sm:$0x1] }
0x3055   :  { %v4093_v52 = vpop.eup %4092 }
0x3056   :  { %2966 = vrot.lane.b32.xlu0 %v4093_v52, %s4360_s16  ;;  %v3077_v52 = vld [vmem:[#allocation14] sm:$0xff] }
0x3057   :  { %v4095_v32 = vpop.eup %4094  ;;  %3107 = vmatpush.msrb.mxu2 %v3077_v52 }
0x3058   :  { %v2957_v27 = vadd.f32 1.0, %v4095_v32  ;;  %v3062_v32 = vld [vmem:[%s6273_s3 + $0x1] sm:$0x1] }
0x305a   :  { %v2958_v31 = vmul.f32 0.5, %v2957_v27  ;;  %v3063_v27 = vsub.f32 %v3062_v32, %v3061_v38  ;;  %v3149_v38 = vld [vmem:[#allocation14 + $0x78] sm:$0xff]  ;;  %v3148_v32 = vld [vmem:[#allocation14 + $0x70] sm:$0xff] }
0x305b   :  { %3165 = vmatpush.msrb.mxu0 %v3149_v38 }
0x305c   :  { %v2964_v16 = vmul.f32 %v5592_v45, %v2958_v31 }
0x305d   :  { %3166 = vmatpush.msrb.mxu0 %v3148_v32  ;;  %v4219_v32 = vld [vmem:[%s6279_s9] sm:$0x3] }
0x30c8   :  { %v2967_v24 = vpop.permute.xlu0 %2966 }
0x30c9   :  { %v2969_v3 = vmul.f32 %v2967_v24, %v2958_v31  ;;  %v3908_v24 = vld [vmem:[%s6273_s3] ss:$0 sm:$0xff]  ;;  %s4369_s3 = smov [#allocation15]  }
0x30ca   :  { %s6238_s24 = sshll.u32 %s4369_s3, 4  ;;  %s3702_s24 = int_to_ptr.vmem [resolvable:$true] %s6238_s24 }
0x30cb   :  { %2971 = vrot.lane.b32.xlu1 %v2969_v3, %s4359_s0 }
0x313d   :  { %v2972_v62 = vpop.permute.xlu1 %2971 }
0x313e   :  { %v5595_v23 = vadd.f32 %v2972_v62, %v2964_v16 }
0x3140   :  { %4096 = vtanh.f32 %v5595_v23 }
0x3146   :  { %v4097_v5 = vpop.eup %4096 }
0x3147   :  { %2977 = vrot.lane.b32.xlu0 %v4097_v5, %s4360_s16 }
0x31b9   :  { %v2978_v15 = vpop.permute.xlu0 %2977 }
0x31ba   :  { %v5611_v51 = vmul.f32 %v2978_v15, %v2958_v31  ;;  %v3069_v31 = vperm.slane %v3063_v27, 0  ;;  %v3147_v27 = vld [vmem:[#allocation14 + $0x68] sm:$0xff] }
0x31bb   :  { %3167 = vmatpush.msrb.mxu0 %v3147_v27 }
0x31bc   :  { %3005 = vrot.lane.b32.xlu2 %v5611_v51, %s4359_s0 }
0x31c4   :  { %3073 = vrot.lane.b32.xlu2 %v5579_v41, %s4360_s16 }
0x3216   :  { %v3006_v0 = vpop.permute.xlu2 %3005 }
0x3217   :  { %3781 = vmatmul.msk.f32.vlgmr.msra.gmra.mxu0 %vm103_vm1, %v3006_v0 }
0x321e   :  { %v3074_v5 = vpop.permute.xlu2 %3073 }
0x3294   :  { %v3026_v60 = vpop.f32.mrf.mxu0 }
0x3295   :  { %4098 = vtanh.f32 %v3026_v60 }
0x329b   :  { %v4099_v42 = vpop.eup %4098 }
0x329c   :  { %v5618_v55 = vmul.f32 2.5, %v4099_v42 }
0x329e   :  { %3054 = vrot.lane.b32.xlu1 %v5618_v55, %s4361_s27 }
0x3310   :  { %v3055_v47 = vpop.permute.xlu1 %3054 }
0x3311   :  { %vm3057_vm12 = vcmp.gt.f32.partialorder %v5618_v55, %v3055_v47 }
0x3312   :  { %v5624_v25 = vsel %vm3057_vm12, 1.0, %v6354_v6  ;;  %vm899_vm12 = vcmask 39936  }
0x3313   :  { %3066 = vperm.xlu0 %3841, %v5624_v25  }
0x331b   :  { %3842 = vset.pattern.permute.xlu0 %v6355_v21 }
0x3385   :  { %v3067_v3 = vpop.permute.xlu0 %3066 }
0x3386   :  { %v3070_v16 = vmul.f32 %v3069_v31, %v3067_v3  ;;  %v3146_v31 = vld [vmem:[#allocation14 + $0x60] sm:$0xff]  ;;  %v3144_v3 = vld [vmem:[#allocation14 + $0x50] sm:$0xff] }
0x3387   :  { %3168 = vmatpush.msrb.mxu0 %v3146_v31 }
0x3388   :  { %v3072_v62 = vadd.f32 %v3908_v24, %v3070_v16  ;;  %v3145_v24 = vld [vmem:[#allocation14 + $0x58] sm:$0xff]  ;;  %v3143_v16 = vld [vmem:[#allocation14 + $0x48] sm:$0xff] }
0x3389   :  { %3169 = vmatpush.msrb.mxu0 %v3145_v24 }
0x338a   :  { %v3076_v4 = vsel %vm103_vm1, %v3072_v62, %v3074_v5 }
0x338b   :  { %3783 = vmatmul.msk.f32.vlgmr.msrb.gmra.mxu2 %vm147_vm2, %v3076_v4  ;;  %3170 = vmatpush.msrb.mxu0 %v3144_v3  ;;  %v3142_v4 = vld [vmem:[#allocation14 + $0x40] sm:$0xff] }
0x338d   :  { %3171 = vmatpush.msrb.mxu0 %v3143_v16 }
0x338f   :  { %3172 = vmatpush.msrb.mxu0 %v3142_v4 }
0x340e   :  { %v3109_v58 = vpop.f32.mrf.mxu2 }
0x340f   :  { %v3110_v28 = vadd.f32 %v3909_v8, %v3109_v58 }
0x3411   :  { %4100 = vtanh.f32 %v3110_v28  ;;  %v3112_v0 = vmul.f32 0.5, %v3110_v28 }
0x3413   :  { %4102 = vtanh.f32 %v3112_v0 }
0x3417   :  { %v4101_v15 = vpop.eup %4100 }
0x3418   :  { %3119 = vrot.lane.b32.xlu1 %v4101_v15, %s4360_s16  ;;  %v3910_v15 = vld [vmem:[%s6278_s8 + $0x1] ss:$0 sm:$0xff]  ;;  %s4365_s8 = smov 127  }
0x3419   :  { %v4103_v60 = vpop.eup %4102 }
0x341a   :  { %v3114_v42 = vadd.f32 1.0, %v4103_v60 }
0x341c   :  { %v3115_v43 = vmul.f32 0.5, %v3114_v42 }
0x341e   :  { %v3117_v47 = vmul.f32 %v3115_v43, %v5571_v30 }
0x348a   :  { %v3120_v50 = vpop.permute.xlu1 %3119 }
0x348b   :  { %v3122_v35 = vmul.f32 %v3120_v50, %v3115_v43 }
0x348d   :  { %3124 = vrot.lane.b32.xlu2 %v3122_v35, %s4359_s0 }
0x3495   :  { %3138 = vrot.lane.b32.xlu2 %v5611_v51, %s4360_s16 }
0x34e7   :  { %v3125_v29 = vpop.permute.xlu2 %3124 }
0x34e8   :  { %v3127_v36 = vadd.f32 %v3125_v29, %v3117_v47 }
0x34ea   :  { %4104 = vtanh.f32 %v3127_v36 }
0x34ef   :  { %v3139_v8 = vpop.permute.xlu2 %3138 }
0x34f0   :  { %v4105_v52 = vpop.eup %4104 }
0x34f1   :  { %3130 = vrot.lane.b32.xlu1 %v4105_v52, %s4360_s16  ;;  %v666_v52 = vsub.f32 %v4633_v1, %v4681_v44 }
0x34f3   :  { %v670_v38 = vmul.f32 1.442695, %v666_v52 }
0x3563   :  { %v3131_v62 = vpop.permute.xlu1 %3130 }
0x3564   :  { %v3133_v5 = vmul.f32 %v3131_v62, %v3115_v43  ;;  %v6396_v62 = vsub.f32 1.0, %v4663_v37  ;;  %v667_v37 = vsub.f32 %v4630_v59, %v4681_v44  ;;  %v857_v44 = vrot.slane %v4762_v18, 1 }
0x3566   :  { %3135 = vrot.lane.b32.xlu0 %v3133_v5, %s4359_s0 }
0x35d8   :  { %v3136_v58 = vpop.permute.xlu0 %3135 }
0x35d9   :  { %v3141_v28 = vsel %vm103_vm1, %v3136_v58, %v3139_v8 }
0x35da   :  { %3785 = vmatmul.msk.f32.vlgmr.msrb.gmra.mxu0 %vm147_vm2, %v3141_v28  ;;  %vm821_vm2 = vcmp.lt.f32.partialorder %v4219_v32, %v4748_v46 }
0x35db   :  { %v3745_v27 = vsel %vm821_vm2, 1.0, %v6354_v6  ;;  %vm901_vm2 = vcmask 48128  }
0x35dc   :  { %v825_v24 = vsub.f32 1.0, %v3745_v27  ;;  %v824_v3 = vmul.f32 %v3745_v27, %v4754_v54  ;;  %v3850_v5 = vpack.i.bf16 %v3745_v27, %v4709_v17  ;;  %v672_v17 = vmul.f32 1.442695, %v667_v37 }
0x35de   :  { %v826_v1 = vmul.f32 %v825_v24, %v4756_v56  ;;  %v6400_v24 = vld [vmem:[#allocation51_spill] sm:$0xff] }
0x35e0   :  { %v827_v16 = vadd.f32 %v826_v1, %v824_v3  ;;  %v2784_v3 = vrot.slane %v6400_v24, 1  ;;  %v4220_v1 = vld [vmem:[%s6279_s9 + $0x2] sm:$0x3] }
0x3657   :  { %v3174_v0 = vpop.f32.mrf.mxu0 }
0x3658   :  { %v3175_v60 = vadd.f32 %v3910_v15, %v3174_v0  ;;  %v669_v15 = vsub.f32 %v4636_v19, %v4692_v49  ;;  %v3845_v19 = vpack.i.bf16 %v4938_v53, %v4538_v10  ;;  %v6398_v10 = vld [vmem:[#allocation34_spill] sm:$0xff]  ;;  %v6399_v53 = vld [vmem:[#allocation31_spill] sm:$0xff] }
0x3659   :  { %v1577_v32 = vsub.f32 %v6399_v53, %v6398_v10 }
0x365a   :  { %4106 = vtanh.f32 %v3175_v60  ;;  %v3177_v43 = vmul.f32 0.5, %v3175_v60  ;;  %v676_v0 = vmul.f32 1.442695, %v669_v15 }
0x365b   :  { %v1584_v27 = vmul.f32 1.442695, %v1577_v32 }
0x365c   :  { %4108 = vtanh.f32 %v3177_v43 }
0x365d   :  { %4110 = vpow2.f32 %v670_v38 }
0x3660   :  { %v4107_v42 = vpop.eup %4106 }
0x3661   :  { %3184 = vrot.lane.b32.xlu1 %v4107_v42, %s4360_s16 }
0x3662   :  { %v4109_v50 = vpop.eup %4108 }
0x3663   :  { %v3179_v35 = vadd.f32 1.0, %v4109_v50  ;;  %v4111_v31 = vpop.eup %4110  ;;  %v859_v50 = vadd.f32 %v857_v44, %v4762_v18 }
0x3665   :  { %v5655_v47 = vmul.f32 0.5, %v3179_v35 }
0x3667   :  { %v3182_v46 = vmul.f32 %v5655_v47, %v5595_v23 }
0x36d3   :  { %v3185_v29 = vpop.permute.xlu1 %3184 }
0x36d4   :  { %v3187_v36 = vmul.f32 %v3185_v29, %v5655_v47 }
0x36d6   :  { %3189 = vrot.lane.b32.xlu0 %v3187_v36, %s4359_s0 }
0x36de   :  { %349 = vrot.lane.b32.xlu0 %v4531_v7, %s4365_s8 }
0x36e6   :  { %683 = vperm.xlu0 %3842, %v4111_v31  }
0x36ee   :  { %846 = vrot.lane.b32.xlu0 %v827_v16, %s4365_s8  ;;  %v6401_v16 = vld [vmem:[#allocation44_spill] sm:$0xff] }
0x36ef   :  { %vm1714_vm13 = vcmp.lt.f32.partialorder %v4220_v1, %v6401_v16  ;;  %v6408_v1 = vld [vmem:[#allocation26_spill] sm:$0xff] }
0x36f6   :  { %868 = vperm.xlu0 %3842, %v6396_v62   ;;  %v5721_v62 = vsel %vm1714_vm13, 1.0, %v6354_v6  ;;  %vm6346_vm13 = vcmask 58368  }
0x36fe   :  { %3851 = vrot.lane.b32.xlu0 %v3850_v5, %s4366_s29  ;;  %v2786_v5 = vperm.slane %v2784_v3, 0 }
0x3706   :  { %1260 = vrot.lane.b32.xlu0 %v4920_v39, %s4365_s8 }
0x3748   :  { %v3190_v54 = vpop.permute.xlu0 %3189 }
0x3749   :  { %v3192_v4 = vadd.f32 %v3190_v54, %v3182_v46  ;;  %v1718_v46 = vsub.f32 1.0, %v5721_v62  ;;  %v6402_v54 = vld [vmem:[#allocation45_spill] sm:$0xff] }
0x374b   :  { %4112 = vtanh.f32 %v3192_v4  ;;  %v1717_v4 = vmul.f32 %v5721_v62, %v6402_v54 }
0x374c   :  { %4114 = vpow2.f32 %v672_v17 }
0x374d   :  { %4116 = vpow2.f32 %v676_v0  ;;  %v6404_v0 = vld [vmem:[#allocation40_spill] sm:$0xff] }
0x3750   :  { %v350_v56 = vpop.permute.xlu0 %349 }
0x3751   :  { %v4113_v8 = vpop.eup %4112  ;;  %v5683_v58 = vmax.f32 %v4531_v7, %v350_v56  ;;  %v6403_v56 = vld [vmem:[#allocation46_spill] sm:$0xff] }
0x3752   :  { %3195 = vrot.lane.b32.xlu2 %v4113_v8, %s4360_s16  ;;  %v4115_v42 = vpop.eup %4114  ;;  %s4367_s16 = smov 5   ;;  %v1719_v8 = vmul.f32 %v1718_v46, %v6403_v56 }
0x3753   :  { %v4117_v59 = vpop.eup %4116 }
0x3754   :  { %v1720_v37 = vadd.f32 %v1719_v8, %v1717_v4 }
0x3758   :  { %v5685_v28 = vpop.permute.xlu0 %683 }
0x375a   :  { %357 = vrot.lane.b32.xlu2 %v5683_v58, %s4361_s27 }
0x3760   :  { %v847_v60 = vpop.permute.xlu0 %846 }
0x3761   :  { %v5692_v43 = vadd.f32 %v847_v60, %v4720_v34  ;;  %v6397_v34 = vld [vmem:[#allocation30_spill] sm:$0xff]  ;;  %v6405_v60 = vsub.f32 1.0, %v6404_v0 }
0x3762   :  { %686 = vperm.xlu2 %3843, %v4115_v42   ;;  %v1574_v36 = vsub.f32 %v6397_v34, %v5056_v2  ;;  %v6407_v34 = vld [vmem:[#allocation41_spill] sm:$0xff] }
0x3764   :  { %v1578_v18 = vmul.f32 1.442695, %v1574_v36 }
0x3766   :  { %4118 = vpow2.f32 %v1578_v18 }
0x3767   :  { %4120 = vpow2.f32 %v1584_v27 }
0x3768   :  { %v5696_v35 = vpop.permute.xlu0 %868 }
0x376a   :  { %692 = vperm.xlu2 %3843, %v4117_v59  }
0x376c   :  { %v4119_v31 = vpop.eup %4118 }
0x3770   :  { %v5702_v29 = vpop.permute.xlu0 %3851 }
0x3771   :  { %v3854_v4 = vunpack.i.h.bf16 %v5702_v29 }
0x3772   :  { %862 = vrot.lane.b32.xlu2 %v859_v50, %s4361_s27  ;;  %v6406_v50 = vld [vmem:[#allocation22_spill] sm:$0xff] }
0x3778   :  { %v1261_v52 = vpop.permute.xlu0 %1260 }
0x3779   :  { %v5709_v38 = vmax.f32 %v4920_v39, %v1261_v52  ;;  %v694_v52 = vperm.slane %v5685_v28, %v4589_v9  ;;  %v3853_v28 = vunpack.i.l.bf16 %v5702_v29 }
0x377a   :  { %3846 = vrot.lane.b32.xlu2 %v3845_v19, %s4365_s8  ;;  %v668_v19 = vsub.f32 %v6406_v50, %v4692_v49 }
0x377c   :  { %v674_v36 = vmul.f32 1.442695, %v668_v19 }
0x3782   :  { %889 = vrot.lane.b32.xlu2 %v4670_v40, %s4367_s16  ;;  %v4121_v40 = vpop.eup %4120 }
0x378a   :  { %1268 = vrot.lane.b32.xlu2 %v5709_v38, %s4361_s27 }
0x3792   :  { %1591 = vperm.xlu2 %3843, %v4119_v31  }
0x379a   :  { %1600 = vperm.xlu2 %3843, %v4121_v40  }
0x37a2   :  { %2789 = vrot.lane.b32.xlu2 %v2786_v5, %s4359_s0  ;;  %v6409_v5 = vld [vmem:[#allocation28_spill] sm:$0xff] }
0x37aa   :  { %1739 = vrot.lane.b32.xlu2 %v1720_v37, %s4365_s8 }
0x37ac   :  { %v3196_v17 = vpop.permute.xlu2 %3195 }
0x37ad   :  { %v5730_v15 = vmul.f32 %v3196_v17, %v5655_v47 }
0x37af   :  { %3204 = vrot.lane.b32.xlu1 %v5730_v15, %s4359_s0 }
0x37b2   :  { %1760 = vperm.xlu2 %3843, %v6405_v60  }
0x37b4   :  { %v358_v42 = vpop.permute.xlu2 %357 }
0x37b5   :  { %v360_v59 = vsub.f32 %v4531_v7, %v358_v42 }
0x37b7   :  { %v361_v44 = vmul.f32 1.442695, %v360_v59  ;;  %v6410_v59 = vld [vmem:[#allocation29_spill] sm:$0xff] }
0x37b9   :  { %4122 = vpow2.f32 %v361_v44  ;;  %v1575_v44 = vsub.f32 %v6410_v59, %v5056_v2  ;;  %v3200_v2 = vld [vmem:[%s6275_s5 + $0x8] sm:$0xff] }
0x37ba   :  { %1781 = vrot.lane.b32.xlu2 %v6407_v34, %s4367_s16  ;;  %4124 = vpow2.f32 %v674_v36  ;;  %v3201_v36 = vld [vmem:[%s6275_s5 + $0x10] sm:$0xff] }
0x37bb   :  { %3862 = vset.pattern.permute.xlu2 %v4591_v11  ;;  %v1580_v50 = vmul.f32 1.442695, %v1575_v44  ;;  %v6415_v44 = vld [vmem:[#allocation37_spill] sm:$0xff] }
0x37bc   :  { %v687_v47 = vpop.permute.xlu2 %686 }
0x37bd   :  { %v695_v18 = vperm.slane %v687_v47, %v4648_v22  ;;  %v3202_v47 = vld [vmem:[%s6275_s5 + $0x18] sm:$0xff] }
0x37be   :  { %3220 = vmatpush.msrb.mxu1 %v3202_v47  ;;  %v6416_v47 = vld [vmem:[#allocation47_spill] sm:$0xff] }
0x37bf   :  { %v4123_v53 = vpop.eup %4122  ;;  %v5746_v32 = vsel %vm650_vm9, %v695_v18, %v694_v52  ;;  %v3199_v18 = vld [vmem:[%s6275_s5] sm:$0xff] }
0x37c0   :  { %364 = vrot.lane.b32.xlu1 %v4123_v53, %s4365_s8  ;;  %v4125_v27 = vpop.eup %4124  ;;  %3221 = vmatpush.msrb.mxu1 %v3201_v36  ;;  %v1725_v36 = vsub.f32 0.0, %v6416_v47 }
0x37c2   :  { %3222 = vmatpush.msrb.mxu1 %v3200_v2 }
0x37c4   :  { %v693_v49 = vpop.permute.xlu2 %692  ;;  %3223 = vmatpush.msrb.mxu1 %v3199_v18 }
0x37c8   :  { %689 = vperm.xlu1 %3844, %v4125_v27   ;;  %v2785_v27 = vperm.slane %v6400_v24, 0 }
0x37cc   :  { %v5749_v31 = vpop.permute.xlu2 %862 }
0x37d4   :  { %v5751_v40 = vpop.permute.xlu2 %3846 }
0x37d5   :  { %v3848_v3 = vunpack.i.l.bf16 %v5751_v40 }
0x37d7   :  { %v892_v16 = vsel %vm865_vm15, %v3848_v3, %v6408_v1 }
0x37d8   :  { %v894_v46 = vsel %vm893_vm6, %v892_v16, %v6409_v5 }
0x37d9   :  { %v896_v54 = vsel %vm895_vm7, %v894_v46, %v3853_v28  ;;  %v6411_v28 = vld [vmem:[#allocation39_spill] sm:$0xff] }
0x37da   :  { %v898_v8 = vsel %vm897_vm3, %v896_v54, %v3854_v4  ;;  %v698_v54 = vperm.slane %v693_v49, %v4648_v22 }
0x37dc   :  { %v890_v56 = vpop.permute.xlu2 %889 }
0x37dd   :  { %v900_v37 = vsel %vm899_vm12, %v898_v8, %v890_v56 }
0x37de   :  { %v902_v17 = vsel %vm901_vm2, %v900_v37, 0.0  ;;  %v6412_v37 = vld [vmem:[#allocation32_spill] sm:$0xff] }
0x37df   :  { %904 = vst.msk [vmem:[#allocation15] sm:$0x3] %vm6346_vm13, %v902_v17  ;;  %v1576_v17 = vsub.f32 %v6412_v37, %v6398_v10  ;;  %v3228_v37 = vld [vmem:[#allocation3] sm:$0xff] }
0x37e4   :  { %v1269_v0 = vpop.permute.xlu2 %1268 }
0x37e5   :  { %v1271_v60 = vsub.f32 %v4920_v39, %v1269_v0  ;;  %v6413_v0 = vld [vmem:[#allocation35_spill] sm:$0xff] }
0x37e6   :  { %v1695_v49 = vmul.f32 %v6415_v44, %v6413_v0 }
0x37e7   :  { %v1272_v42 = vmul.f32 1.442695, %v1271_v60  ;;  %v1693_v60 = vsub.f32 1.0, %v6413_v0 }
0x37e9   :  { %4126 = vpow2.f32 %v1272_v42  ;;  %v6414_v42 = vld [vmem:[#allocation38_spill] sm:$0xff] }
0x37ea   :  { %4128 = vpow2.f32 %v1580_v50  ;;  %v1694_v59 = vmul.f32 %v1693_v60, %v6414_v42  ;;  %v1582_v50 = vmul.f32 1.442695, %v1576_v17  ;;  %v3230_v60 = vld [vmem:[#allocation3 + $0x10] sm:$0xff] }
0x37ec   :  { %v1592_v29 = vpop.permute.xlu2 %1591  ;;  %4130 = vpow2.f32 %v1582_v50 }
0x37ef   :  { %v4127_v19 = vpop.eup %4126 }
0x37f0   :  { %1275 = vrot.lane.b32.xlu0 %v4127_v19, %s4365_s8  ;;  %v4129_v52 = vpop.eup %4128  ;;  %v1696_v19 = vadd.f32 %v1695_v49, %v1694_v59 }
0x37f2   :  { %v1697_v2 = vsub.f32 0.0, %v1696_v19 }
0x37f4   :  { %v5769_v34 = vpop.permute.xlu2 %1600 }
0x37f8   :  { %1594 = vperm.xlu0 %3842, %v4129_v52   ;;  %v4131_v52 = vpop.eup %4130 }
0x37fc   :  { %v2790_v53 = vpop.permute.xlu2 %2789 }
0x37fd   :  { %2794 = vst.msk [vmem:[#allocation2 + $0x1a] sm:$0x1] %vm6343_vm14, %v2790_v53 }
0x37fe   :  { %2796 = vst.msk [vmem:[#allocation3 + $0x1a] sm:$0x1] %vm6343_vm14, %v2790_v53 }
0x3800   :  { %2787 = vrot.lane.b32.xlu0 %v2785_v27, %s4359_s0  ;;  %v6417_v27 = vld [vmem:[#allocation36_spill] sm:$0xff] }
0x3801   :  { %3860 = vset.pattern.permute.xlu0 %v4591_v11 }
0x3804   :  { %v1740_v3 = vpop.permute.xlu2 %1739 }
0x3805   :  { %v5789_v1 = vadd.f32 %v1740_v3, %v6411_v28  ;;  %v3855_v3 = vpack.i.bf16 %v5721_v62, %v6417_v27  ;;  %v353_v62 = vsub.f32 %v4531_v7, %v5683_v58  ;;  %v3231_v49 = vld [vmem:[#allocation3 + $0x18] sm:$0xf]  ;;  %v3911_v7 = vld [vmem:[%s6276_s6] ss:$0 sm:$0xff] }
0x3821   :  { %v3205_v16 = vpop.permute.xlu1 %3204 }
0x3822   :  { %3786 = vmatmul.msk.f32.vlgmr.msrb.gmra.mxu1 %vm103_vm1, %v3205_v16  ;;  %v1602_v16 = vperm.slane %v1592_v29, %v4589_v9 }
0x3832   :  { %v365_v5 = vpop.permute.xlu1 %364 }
0x383a   :  { %v690_v46 = vpop.permute.xlu1 %689 }
0x383b   :  { %v697_v4 = vperm.slane %v690_v46, %v4589_v9 }
0x383d   :  { %v699_v24 = vsel %vm650_vm9, %v698_v54, %v697_v4  ;;  %v6418_v4 = vld [vmem:[#allocation49_spill] sm:$0xff] }
0x383e   :  { %v700_v56 = vsel %vm655_vm10, %v699_v24, %v5746_v32  ;;  %v1748_v32 = vadd.f32 %v1725_v36, %v1697_v2 }
0x383f   :  { %v702_v8 = vsel %vm95_vm4, %v700_v56, 0.0  ;;  %v354_v56 = vmul.f32 1.442695, %v353_v62 }
0x3840   :  { %703 = vadd.xlane.f32.xlu1 %v702_v8  ;;  %v1750_v18 = vrot.slane %v1748_v32, 1 }
0x3841   :  { %4132 = vpow2.f32 %v354_v56  ;;  %v5836_v56 = vld [vmem:[#allocation6] sm:$0x3] }
0x3842   :  { %v1752_v53 = vadd.f32 %v1750_v18, %v1748_v32  ;;  %vm3276_vm0 = vcmp.gt.f32.partialorder %v5836_v56, 0.0 }
0x3847   :  { %v4133_v47 = vpop.eup %4132 }
0x3848   :  { %v367_v36 = vadd.f32 %v4133_v47, %v365_v5  ;;  %v851_v47 = vrot.slane %v5692_v43, 1 }
0x3859   :  { %1597 = vperm.xlu1 %3844, %v4131_v52  }
0x3861   :  { %1755 = vrot.lane.b32.xlu1 %v1752_v53, %s4361_s27 }
0x3862   :  { %v5806_v10 = vpop.permute.xlu0 %1275  ;;  %3861 = vset.pattern.permute.xlu1 %v4598_v13 }
0x3869   :  { %3856 = vrot.lane.b32.xlu1 %v3855_v3, %s4366_s29 }
0x386a   :  { %v1595_v28 = vpop.permute.xlu0 %1594 }
0x386b   :  { %v1603_v46 = vperm.slane %v1595_v28, %v4648_v22 }
0x386d   :  { %v5815_v54 = vsel %vm650_vm9, %v1603_v46, %v1602_v16 }
0x3871   :  { %2146 = vrot.lane.b32.xlu1 %v6418_v4, %s4365_s8 }
0x3872   :  { %v2788_v24 = vpop.permute.xlu0 %2787 }
0x3873   :  { %2793 = vst.msk [vmem:[#allocation2 + $0xa] sm:$0x1] %vm6343_vm14, %v2788_v24 }
0x3874   :  { %2795 = vst.msk [vmem:[#allocation3 + $0xa] sm:$0x1] %vm6343_vm14, %v2788_v24  ;;  %vm86_vm14 = vcmask 8192  }
0x3875   :  { %87 = vst.msk [vmem:[#allocation16] sm:$0x1] %vm86_vm14, %v6354_v6 }
0x387b   :  { %v3229_v0 = vld [vmem:[#allocation3 + $0x8] sm:$0xf] }
0x389f   :  { %v3225_v8 = vpop.f32.mrf.mxu1 }
0x38a0   :  { %v3233_v29 = vrot.slane %v3225_v8, 1  ;;  %v3234_v17 = vperm.slane %v3225_v8, 0 }
0x38a2   :  { %v3235_v42 = vperm.slane %v3233_v29, 0  ;;  %v3238_v59 = vadd.f32 %v3234_v17, %v3228_v37  ;;  %v3239_v44 = vadd.f32 %v3234_v17, %v3229_v0  ;;  %v6419_v17 = vld [vmem:[#allocation24_spill] sm:$0xff] }
0x38a4   :  { %v3240_v50 = vadd.f32 %v3235_v42, %v3230_v60  ;;  %v3241_v19 = vadd.f32 %v3235_v42, %v3231_v49  ;;  %4134 = vtanh.f32 %v3238_v59  ;;  %v6420_v60 = vld [vmem:[#allocation27_spill] sm:$0xff] }
0x38a5   :  { %4136 = vtanh.f32 %v3239_v44  ;;  %v837_v42 = vadd.f32 %v6420_v60, %v6419_v17  ;;  %v3277_v44 = vsel %vm3276_vm0, -100.0, %v6354_v6 }
0x38a6   :  { %4138 = vtanh.f32 %v3240_v50 }
0x38a7   :  { %4140 = vtanh.f32 %v3241_v19  ;;  %v3278_v19 = vsel %vm3275_vm8, %v3277_v44, -1e+30 }
0x38a8   :  { %4142 = vlog2.f32 %v367_v36 }
0x38aa   :  { %v4135_v2 = vpop.eup %4134 }
0x38ab   :  { %v4137_v32 = vpop.eup %4136  ;;  %v3250_v52 = vmul.f32 %v4135_v2, %v3911_v7  ;;  %v3280_v2 = vperm.slane %v3278_v19, 0 }
0x38ac   :  { %v4139_v18 = vpop.eup %4138  ;;  %v5826_v53 = vmul.f32 %v4137_v32, %v3911_v7  ;;  %v853_v32 = vadd.f32 %v851_v47, %v5692_v43 }
0x38ad   :  { %v4141_v27 = vpop.eup %4140  ;;  %v3254_v3 = vsel %vm103_vm1, %v3250_v52, 0.0  ;;  %v5831_v28 = vmul.f32 %v4139_v18, %v3911_v7 }
0x38ae   :  { %3255 = vadd.xlane.f32.xlu1 %v3254_v3  ;;  %v5833_v16 = vmul.f32 %v4141_v27, %v3911_v7  ;;  %v4143_v5 = vpop.eup %4142  ;;  %v871_v27 = vperm.slane %v5696_v35, 0 }
0x38af   :  { %v369_v24 = vmul.f32 0.6931472, %v4143_v5 }
0x38b1   :  { %v370_v62 = vadd.f32 %v369_v24, %v5683_v58  ;;  %v1606_v24 = vperm.slane %v5769_v34, %v4648_v22  ;;  %v3849_v34 = vunpack.i.h.bf16 %v5751_v40 }
0x38b3   :  { %v704_v46 = vpop.xlane.xlu1 %703  ;;  %v377_v29 = vsub.f32 %v5683_v58, %v370_v62 }
0x38b4   :  { %4144 = vlog2.f32 %v704_v46  ;;  %v860_v46 = vld [vmem:[#allocation16] sm:$0x1] }
0x38b5   :  { %v834_v49 = vrot.slane %v377_v29, 1 }
0x38b7   :  { %v836_v36 = vadd.f32 %v834_v49, %v377_v29 }
0x38ba   :  { %v4145_v8 = vpop.eup %4144 }
0x38bb   :  { %v706_v37 = vmul.f32 0.6931472, %v4145_v8 }
0x38bd   :  { %v707_v0 = vadd.f32 %v706_v37, %v6419_v17  ;;  %v5863_v17 = vpop.permute.xlu2 %1760 }
0x38bf   :  { %v838_v59 = vmul.f32 2.0, %v707_v0  ;;  %v6421_v0 = vld [vmem:[#allocation42_spill] sm:$0xff] }
0x38c0   :  { %v1784_v60 = vsel %vm865_vm15, %v3849_v34, %v6421_v0  ;;  %v6423_v0 = vld [vmem:[#allocation58_spill] sm:$0xff] }
0x38c1   :  { %v839_v50 = vsub.f32 %v837_v42, %v838_v59 }
0x38c3   :  { %v841_v7 = vrot.slane %v839_v50, 1 }
0x38c5   :  { %v843_v58 = vadd.f32 %v841_v7, %v839_v50  ;;  %v1782_v47 = vpop.permute.xlu2 %1781 }
0x38c7   :  { %v844_v52 = vadd.f32 %v843_v58, %v836_v36  ;;  %3291 = vperm.xlu1 %3861, %v3280_v2  }
0x38c9   :  { %v854_v18 = vadd.f32 %v853_v32, %v844_v52  ;;  %v3260_v52 = vsel %vm103_vm1, %v5831_v28, 0.0 }
0x38cb   :  { %v866_v3 = vsel %vm865_vm15, %v854_v18, %v5749_v31  ;;  %v1598_v5 = vpop.permute.xlu1 %1597  ;;  %v3257_v18 = vsel %vm105_vm5, %v5826_v53, 0.0 }
0x38cc   :  { %v872_v62 = vmul.f32 %v871_v27, %v866_v3  ;;  %v1605_v8 = vperm.slane %v1598_v5, %v4589_v9  ;;  %v3263_v27 = vsel %vm105_vm5, %v5833_v16, 0.0  ;;  %v3293_v3 = vperm.slane %v3278_v19, 1 }
0x38ce   :  { %v1607_v37 = vsel %vm650_vm9, %v1606_v24, %v1605_v8  ;;  %v873_v29 = vadd.f32 %v872_v62, %v860_v46  ;;  %v2462_v62 = vsub.f32 %v5366_v26, %v5397_v63  ;;  %v2607_v8 = vsub.f32 1.0, %v5471_v57 }
0x38cf   :  { %v1608_v43 = vsel %vm655_vm10, %v1607_v37, %v5815_v54  ;;  %3865 = vset.pattern.permute.xlu1 %v6355_v21  ;;  %v6422_v54 = vld [vmem:[#allocation48_spill] sm:$0xff]  ;;  %v2609_v37 = vmul.f32 %v5485_v48, %v5471_v57 }
0x38d0   :  { %v1610_v35 = vsel %vm95_vm4, %v1608_v43, 0.0  ;;  %874 = vst.msk [vmem:[#allocation16] sm:$0x1] %vm86_vm14, %v873_v29  ;;  %v1785_v49 = vsel %vm893_vm6, %v1784_v60, %v6422_v54  ;;  %v2579_v29 = vsub.f32 1.0, %v5411_v33  ;;  %v2581_v60 = vmul.f32 %v6423_v0, %v5411_v33  ;;  %v6425_v33 = vld [vmem:[#allocation43_spill] sm:$0xff] }
0x38d1   :  { %1611 = vadd.xlane.f32.xlu0 %v1610_v35  ;;  %v2468_v35 = vmul.f32 1.442695, %v2462_v62 }
0x38d2   :  { %v2580_v34 = vmul.f32 %v2579_v29, %v5422_v20 }
0x38d3   :  { %v5861_v31 = vpop.permute.xlu1 %1755 }
0x38d4   :  { %v2582_v57 = vadd.f32 %v2581_v60, %v2580_v34 }
0x38db   :  { %v3857_v42 = vpop.permute.xlu1 %3856 }
0x38dc   :  { %v3859_v59 = vunpack.i.h.bf16 %v3857_v42  ;;  %v3858_v44 = vunpack.i.l.bf16 %v3857_v42 }
0x38de   :  { %v1786_v50 = vsel %vm895_vm7, %v1785_v49, %v3858_v44 }
0x38df   :  { %v1787_v7 = vsel %vm897_vm3, %v1786_v50, %v3859_v59  ;;  %v6424_v50 = vld [vmem:[#allocation33_spill] sm:$0xff] }
0x38e0   :  { %v1788_v36 = vsel %vm899_vm12, %v1787_v7, %v1782_v47  ;;  %v2583_v47 = vsub.f32 0.0, %v2582_v57  ;;  %v1730_v7 = vadd.f32 %v6425_v33, %v6424_v50 }
0x38e1   :  { %v1789_v58 = vsel %vm901_vm2, %v1788_v36, 0.0 }
0x38e2   :  { %1791 = vst.msk [vmem:[#allocation15 + $0x2] sm:$0x3] %vm6346_vm13, %v1789_v58 }
0x38e3   :  { %v2147_v40 = vpop.permute.xlu1 %2146 }
0x38e4   :  { %v5876_v32 = vmax.f32 %v6418_v4, %v2147_v40 }
0x38e5   :  { %3285 = vperm.xlu0 %3860, %v3280_v2   ;;  %v1264_v2 = vsub.f32 %v4920_v39, %v5709_v38 }
0x38e6   :  { %2154 = vrot.lane.b32.xlu2 %v5876_v32, %s4361_s27 }
0x38e7   :  { %v1265_v5 = vmul.f32 1.442695, %v1264_v2 }
0x38e9   :  { %4146 = vpow2.f32 %v1265_v5 }
0x38ed   :  { %3863 = vset.pattern.permute.xlu0 %v4598_v13 }
0x38ef   :  { %v4147_v28 = vpop.eup %4146 }
0x38f0   :  { %v1278_v53 = vadd.f32 %v4147_v28, %v5806_v10  ;;  %v2608_v10 = vmul.f32 %v2607_v8, %v5487_v61  ;;  %v1763_v8 = vperm.slane %v5863_v17, 0 }
0x38f2   :  { %4148 = vlog2.f32 %v1278_v53  ;;  %v2610_v42 = vadd.f32 %v2609_v37, %v2608_v10  ;;  %v1753_v10 = vld [vmem:[#allocation16] sm:$0x1] }
0x38f4   :  { %v2611_v61 = vsub.f32 0.0, %v2610_v42 }
0x38f6   :  { %v2634_v40 = vadd.f32 %v2611_v61, %v2583_v47  ;;  %v6427_v61 = vld [vmem:[#allocation53_spill] sm:$0xff] }
0x38f8   :  { %v4149_v19 = vpop.eup %4148  ;;  %v2636_v28 = vrot.slane %v2634_v40, 1 }
0x38f9   :  { %v1280_v43 = vmul.f32 0.6931472, %v4149_v19 }
0x38fa   :  { %v2638_v62 = vadd.f32 %v2636_v28, %v2634_v40 }
0x38fb   :  { %v1281_v44 = vadd.f32 %v1280_v43, %v5709_v38 }
0x38fd   :  { %v1288_v49 = vsub.f32 %v5709_v38, %v1281_v44 }
0x390f   :  { %3261 = vadd.xlane.f32.xlu0 %v3260_v52  ;;  %3258 = vadd.xlane.f32.xlu2 %v3257_v18  ;;  %v1727_v18 = vrot.slane %v1288_v49, 1 }
0x3911   :  { %v1729_v53 = vadd.f32 %v1727_v18, %v1288_v49 }
0x3917   :  { %3264 = vadd.xlane.f32.xlu0 %v3263_v27 }
0x3921   :  { %v3256_v26 = vpop.xlane.xlu1 %3255 }
0x3927   :  { %3298 = vperm.xlu2 %3862, %v3293_v3  }
0x392b   :  { %3304 = vperm.xlu0 %3863, %v3293_v3   ;;  %v1744_v3 = vrot.slane %v5789_v1, 1 }
0x392f   :  { %3864 = vset.pattern.permute.xlu2 %v6355_v21 }
0x3933   :  { %3866 = vset.pattern.permute.xlu0 %v6355_v21 }
0x3939   :  { %v3292_v42 = vpop.permute.xlu1 %3291 }
0x3940   :  { %v2155_v46 = vpop.permute.xlu2 %2154 }
0x3941   :  { %v2157_v16 = vsub.f32 %v6418_v4, %v2155_v46 }
0x3943   :  { %v2158_v24 = vmul.f32 1.442695, %v2157_v16 }
0x3944   :  { %v1612_v39 = vpop.xlane.xlu0 %1611 }
0x3945   :  { %4150 = vpow2.f32 %v2158_v24  ;;  %v1746_v24 = vadd.f32 %v1744_v3, %v5789_v1  ;;  %v5921_v1 = vld [vmem:[#allocation4] sm:$0x3] }
0x3946   :  { %4152 = vlog2.f32 %v1612_v39 }
0x3947   :  { %4154 = vpow2.f32 %v2468_v35 }
0x3948   :  { %4156 = vtanh.f32 %v3256_v26 }
0x394b   :  { %v4151_v59 = vpop.eup %4150 }
0x394c   :  { %v4153_v54 = vpop.eup %4152  ;;  %2161 = vrot.lane.b32.xlu0 %v4151_v59, %s4365_s8 }
0x394d   :  { %v1614_v48 = vmul.f32 0.6931472, %v4153_v54  ;;  %v4155_v58 = vpop.eup %4154 }
0x394e   :  { %v4157_v52 = vpop.eup %4156 }
0x394f   :  { %v1615_v20 = vadd.f32 %v1614_v48, %v6424_v50  ;;  %v3270_v5 = vmul.f32 2.5, %v4157_v52  ;;  %v6426_v48 = vld [vmem:[#allocation56_spill] sm:$0xff] }
0x3950   :  { %v2461_v49 = vsub.f32 %v6427_v61, %v6426_v48 }
0x3951   :  { %v1731_v36 = vmul.f32 2.0, %v1615_v20 }
0x3952   :  { %v2466_v20 = vmul.f32 1.442695, %v2461_v49 }
0x3953   :  { %v1732_v27 = vsub.f32 %v1730_v7, %v1731_v36  ;;  %v6428_v7 = vld [vmem:[#allocation54_spill] sm:$0xff] }
0x3954   :  { %2483 = vperm.xlu0 %3866, %v4155_v58   ;;  %v2463_v36 = vsub.f32 %v6428_v7, %v5397_v63 }
0x3955   :  { %v1734_v2 = vrot.slane %v1732_v27, 1 }
0x3956   :  { %v2470_v58 = vmul.f32 1.442695, %v2463_v36 }
0x3957   :  { %v1736_v38 = vadd.f32 %v1734_v2, %v1732_v27  ;;  %v3286_v46 = vpop.permute.xlu0 %3285 }
0x3958   :  { %v5910_v16 = vadd.f32 %v3286_v46, %v3270_v5 }
0x3959   :  { %v1737_v19 = vadd.f32 %v1736_v38, %v1729_v53 }
0x395a   :  { %3319 = vperm.xlu2 %3864, %v5910_v16  }
0x395b   :  { %v1747_v39 = vadd.f32 %v1746_v24, %v1737_v19 }
0x395c   :  { %2641 = vrot.lane.b32.xlu0 %v2638_v62, %s4361_s27  ;;  %v6429_v62 = vld [vmem:[#allocation52_spill] sm:$0xff] }
0x395d   :  { %v1758_v37 = vsel %vm865_vm15, %v1747_v39, %v5861_v31  ;;  %v2460_v39 = vsub.f32 %v6429_v62, %v6426_v48 }
0x395e   :  { %v1764_v29 = vmul.f32 %v1763_v8, %v1758_v37 }
0x395f   :  { %v2464_v8 = vmul.f32 1.442695, %v2460_v39  ;;  %v6437_v39 = vld [vmem:[#allocation59_spill] sm:$0xff] }
0x3960   :  { %v1765_v43 = vadd.f32 %v1764_v29, %v1753_v10  ;;  %v6430_v29 = vld [vmem:[#allocation65_spill] sm:$0xff]  ;;  %v6431_v10 = vld [vmem:[#allocation50_spill] sm:$0xff] }
0x3962   :  { %1766 = vst.msk [vmem:[#allocation16] sm:$0x1] %vm86_vm14, %v1765_v43  ;;  %v3867_v43 = vpack.i.bf16 %v5624_v25, %v6431_v10 }
0x3964   :  { %3032 = vrot.lane.b32.xlu0 %v5618_v55, %s4365_s8 }
0x396c   :  { %2884 = vrot.lane.b32.xlu0 %v5921_v1, %s4364_s28 }
0x3982   :  { %v3262_v35 = vpop.xlane.xlu0 %3261  ;;  %v3259_v17 = vpop.xlane.xlu2 %3258 }
0x3983   :  { %4158 = vtanh.f32 %v3262_v35  ;;  %v6432_v35 = vld [vmem:[#allocation57_spill] sm:$0xff] }
0x3984   :  { %4160 = vtanh.f32 %v3259_v17  ;;  %v6433_v17 = vld [vmem:[#allocation64_spill] sm:$0xff] }
0x3989   :  { %v4159_v34 = vpop.eup %4158 }
0x398a   :  { %v4161_v0 = vpop.eup %4160  ;;  %v3272_v31 = vmul.f32 2.5, %v4159_v34  ;;  %v3299_v60 = vpop.permute.xlu2 %3298  ;;  %v3872_v34 = vpack.i.bf16 %v6433_v17, %v6432_v35 }
0x398b   :  { %v3271_v26 = vmul.f32 2.5, %v4161_v0  ;;  %v3265_v54 = vpop.xlane.xlu0 %3264  ;;  %v6434_v0 = vld [vmem:[#allocation67_spill] sm:$0xff] }
0x398c   :  { %v5925_v59 = vadd.f32 %v3299_v60, %v3272_v31  ;;  %4162 = vtanh.f32 %v3265_v54  ;;  %v2797_v31 = vsel %vm2389_vm11, %v6434_v0, 1.0 }
0x398d   :  { %v5927_v44 = vadd.f32 %v3292_v42, %v3271_v26  ;;  %4164 = vpow2.f32 %v2466_v20  ;;  %v2798_v60 = vsel %vm95_vm4, %v2797_v31, inf }
0x398e   :  { %3325 = vperm.xlu2 %3864, %v5925_v59   ;;  %4166 = vpow2.f32 %v2470_v58 }
0x398f   :  { %3322 = vperm.xlu1 %3865, %v5927_v44   ;;  %4168 = vpow2.f32 %v2464_v8 }
0x3992   :  { %v4163_v57 = vpop.eup %4162 }
0x3993   :  { %v3273_v50 = vmul.f32 2.5, %v4163_v57  ;;  %v4165_v40 = vpop.eup %4164 }
0x3994   :  { %v4167_v52 = vpop.eup %4166 }
0x3995   :  { %v4169_v37 = vpop.eup %4168 }
0x399d   :  { %v3305_v47 = vpop.permute.xlu0 %3304 }
0x399e   :  { %v5933_v33 = vadd.f32 %v3305_v47, %v3273_v50  ;;  %v6435_v50 = vld [vmem:[#allocation23_spill] sm:$0xff] }
0x39a0   :  { %3328 = vperm.xlu1 %3865, %v5933_v33  }
0x39a8   :  { %2480 = vperm.xlu1 %3865, %v4165_v40  }
0x39b0   :  { %2486 = vperm.xlu1 %3865, %v4167_v52  }
0x39b4   :  { %v3320_v18 = vpop.permute.xlu2 %3319 }
0x39b5   :  { %v3330_v28 = vperm.slane %v3320_v18, %v4589_v9 }
0x39be   :  { %v5963_v42 = vpop.permute.xlu0 %2161 }
0x39c6   :  { %v2484_v7 = vpop.permute.xlu0 %2483 }
0x39c7   :  { %v2491_v52 = vperm.slane %v2484_v7, %v4589_v9 }
0x39e8   :  { %v3326_v3 = vpop.permute.xlu2 %3325 }
0x39e9   :  { %v3333_v53 = vperm.slane %v3326_v3, %v4589_v9 }
0x3a01   :  { %v3323_v27 = vpop.permute.xlu1 %3322 }
0x3a02   :  { %v3331_v2 = vperm.slane %v3323_v27, %v4648_v22 }
0x3a04   :  { %v3332_v63 = vsel %vm650_vm9, %v3331_v2, %v3330_v28 }
0x3a12   :  { %v3329_v5 = vpop.permute.xlu1 %3328 }
0x3a13   :  { %v3334_v38 = vperm.slane %v3329_v5, %v4648_v22  ;;  %v6436_v5 = vld [vmem:[#allocation25_spill] sm:$0xff] }
0x3a15   :  { %v3335_v46 = vsel %vm650_vm9, %v3334_v38, %v3333_v53 }
0x3a16   :  { %v5945_v24 = vsel %vm655_vm10, %v3335_v46, %v3332_v63 }
0x3a17   :  { %v3338_v19 = vsel %vm95_vm4, %v5945_v24, -inf }
0x3a18   :  { %3339 = vmax.xlane.f32.xlu2 %v3338_v19 }
0x3a1a   :  { %v2481_v26 = vpop.permute.xlu1 %2480 }
0x3a1b   :  { %v2489_v18 = vperm.slane %v2481_v26, %v4648_v22 }
0x3a22   :  { %v2487_v61 = vpop.permute.xlu1 %2486 }
0x3a23   :  { %v2492_v36 = vperm.slane %v2487_v61, %v4648_v22 }
0x3a25   :  { %v2493_v2 = vsel %vm650_vm9, %v2492_v36, %v2491_v52 }
0x3a30   :  { %2477 = vperm.xlu2 %3864, %v4169_v37  }
0x3a38   :  { %2625 = vrot.lane.b32.xlu2 %v6430_v29, %s4365_s8 }
0x3a40   :  { %3868 = vrot.lane.b32.xlu2 %v3867_v43, %s4365_s8  ;;  %v5998_v43 = vld [vmem:[%s6279_s9 + $0x6] sm:$0x3]  ;;  %s4368_s9 = smov [#allocation16]  }
0x3a48   :  { %3873 = vrot.lane.b32.xlu2 %v3872_v34, %s4366_s29 }
0x3a71   :  { %2799 = vmin.xlane.f32.xlu2 %v2798_v60 }
0x3a8b   :  { %v5965_v54 = vpop.xlane.xlu2 %3339 }
0x3a8c   :  { %v3447_v25 = vand.u32 2147483647, %v5965_v54  ;;  %v5969_v57 = vperm.slane %v5965_v54, 0  ;;  %v3442_v49 = vmul.f32 2.0, %v5965_v54  ;;  %v5987_v46 = vperm.slane %v5965_v54, 1 }
0x3a8d   :  { %v3456_v26 = vsub.f32 0.0, %v5965_v54 }
0x3a8e   :  { %v3448_v48 = vmul.f32 -2.0, %v3447_v25  ;;  %vm3388_vm0 = vcmp.eq.f32.partialorder %v5910_v16, %v5969_v57  ;;  %v3443_v58 = vmul.f32 0.5, %v3442_v49  ;;  %vm3389_vm11 = vcmp.eq.f32.partialorder %v5927_v44, %v5969_v57 }
0x3a8f   :  { %v3392_v20 = vsel %vm3388_vm0, %v6435_v50, 1e+09  ;;  %v3393_v28 = vsel %vm3389_vm11, %v6436_v5, 1e+09  ;;  %vm3390_vm0 = vcmp.eq.f32.partialorder %v5925_v59, %v5987_v46 }
0x3a90   :  { %v3449_v47 = vmul.f32 1.442695, %v3448_v48  ;;  %3401 = vperm.xlu0 %3866, %v3392_v20   ;;  %v3394_v10 = vsel %vm3390_vm0, %v6435_v50, 1e+09  ;;  %vm3391_vm0 = vcmp.eq.f32.partialorder %v5933_v33, %v5987_v46 }
0x3a91   :  { %v3395_v20 = vsel %vm3391_vm0, %v6436_v5, 1e+09  ;;  %vm6443_vm0 = vcmask 0  }
0x3a92   :  { %4170 = vpow2.f32 %v3449_v47 }
0x3a93   :  { %v2478_v40 = vpop.permute.xlu2 %2477  ;;  %4172 = vtanh.f32 %v3443_v58 }
0x3a94   :  { %v2488_v27 = vperm.slane %v2478_v40, %v4589_v9 }
0x3a96   :  { %v2490_v3 = vsel %vm650_vm9, %v2489_v18, %v2488_v27  ;;  %v6439_v27 = vld [vmem:[#allocation66_spill] sm:$0xff] }
0x3a97   :  { %v2494_v53 = vsel %vm655_vm10, %v2493_v2, %v2490_v3 }
0x3a98   :  { %v4171_v38 = vpop.eup %4170  ;;  %3404 = vperm.xlu0 %3866, %v3393_v28   ;;  %v2496_v63 = vsel %vm95_vm4, %v2494_v53, 0.0  ;;  %v6440_v28 = vld [vmem:[#allocation60_spill] sm:$0xff] }
0x3a99   :  { %2497 = vadd.xlane.f32.xlu1 %v2496_v63  ;;  %v3451_v19 = vadd.f32 1.0, %v4171_v38  ;;  %v4173_v37 = vpop.eup %4172  ;;  %v6441_v53 = vsub.f32 1.0, %v6440_v28  ;;  %v6442_v38 = vld [vmem:[#allocation61_spill] sm:$0xff] }
0x3a9a   :  { %v3445_v29 = vadd.f32 1.0, %v4173_v37  ;;  %v2808_v37 = vld [vmem:[#allocation8] sm:$0x1] }
0x3a9b   :  { %v2626_v62 = vpop.permute.xlu2 %2625  ;;  %4174 = vlog2.f32 %v3451_v19 }
0x3a9c   :  { %v5990_v8 = vadd.f32 %v2626_v62, %v6437_v39  ;;  %v6000_v35 = vmul.f32 0.5, %v3445_v29  ;;  %v2642_v62 = vpop.permute.xlu0 %2641 }
0x3a9e   :  { %vm3458_vm11 = vcmp.lt.f32.partialorder %v5998_v43, %v6000_v35 }
0x3a9f   :  { %v6007_v31 = vsel %vm3458_vm11, 1.0, %v6354_v6 }
0x3aa0   :  { %3407 = vperm.xlu0 %3866, %v3394_v10   ;;  %v3462_v50 = vsub.f32 1.0, %v6007_v31 }
0x3aa1   :  { %v4175_v17 = vpop.eup %4174 }
0x3aa2   :  { %v3453_v34 = vmul.f32 0.6931472, %v4175_v17 }
0x3aa3   :  { %v6004_v0 = vpop.permute.xlu2 %3868 }
0x3aa4   :  { %v3454_v60 = vadd.f32 %v3453_v34, %v3447_v25  ;;  %v3870_v48 = vunpack.i.l.bf16 %v6004_v0  ;;  %v6438_v25 = vld [vmem:[#allocation62_spill] sm:$0xff]  ;;  %v6039_v17 = vpop.permute.xlu0 %3032  ;;  %v2150_v34 = vsub.f32 %v6418_v4, %v5876_v32 }
0x3aa6   :  { %v6014_v61 = vsub.f32 %v5965_v54, %v3454_v60  ;;  %v6016_v49 = vsub.f32 %v3456_v26, %v3454_v60  ;;  %v2670_v36 = vsel %vm865_vm15, %v3870_v48, %v6438_v25  ;;  %v2151_v48 = vmul.f32 1.442695, %v2150_v34 }
0x3aa7   :  { %v2671_v3 = vsel %vm893_vm6, %v2670_v36, %v6439_v27 }
0x3aa8   :  { %3410 = vperm.xlu0 %3866, %v3395_v20   ;;  %v3461_v47 = vmul.f32 %v6007_v31, %v6014_v61  ;;  %v3463_v7 = vmul.f32 %v3462_v50, %v6016_v49  ;;  %4176 = vpow2.f32 %v2151_v48 }
0x3aaa   :  { %v6025_v58 = vadd.f32 %v3463_v7, %v3461_v47 }
0x3aab   :  { %v3874_v40 = vpop.permute.xlu2 %3873 }
0x3aac   :  { %v3876_v52 = vunpack.i.h.bf16 %v3874_v40  ;;  %v3875_v18 = vunpack.i.l.bf16 %v3874_v40  ;;  %v2885_v20 = vpop.permute.xlu0 %2884 }
0x3aae   :  { %v2672_v2 = vsel %vm895_vm7, %v2671_v3, %v3875_v18  ;;  %v4177_v47 = vpop.eup %4176 }
0x3aaf   :  { %v6031_v5 = vsel %vm897_vm3, %v2672_v2, %v3876_v52  ;;  %v2164_v7 = vadd.f32 %v4177_v47, %v5963_v42 }
0x3ab1   :  { %4178 = vlog2.f32 %v2164_v7 }
0x3ab2   :  { %2646 = vperm.xlu1 %3865, %v6441_v53  }
0x3ab7   :  { %v4179_v36 = vpop.eup %4178 }
0x3ab8   :  { %v2166_v3 = vmul.f32 0.6931472, %v4179_v36 }
0x3aba   :  { %2667 = vrot.lane.b32.xlu1 %v6442_v38, %s4367_s16  ;;  %v2167_v2 = vadd.f32 %v2166_v3, %v5876_v32 }
0x3abc   :  { %v2174_v38 = vsub.f32 %v5876_v32, %v2167_v2 }
0x3ae4   :  { %v2800_v63 = vpop.xlane.xlu2 %2799 }
0x3ae5   :  { %v2802_v19 = vrot.slane %v2800_v63, 1 }
0x3ae7   :  { %v2804_v39 = vmin.f32 %v2800_v63, %v2802_v19  ;;  %v6444_v63 = vld [vmem:[#allocation55_spill] sm:$0xff] }
0x3ae9   :  { %vm2805_vm11 = vcmp.gt.f32.partialorder %v2804_v39, 0.0  ;;  %v6445_v39 = vld [vmem:[#allocation63_spill] sm:$0xff] }
0x3aea   :  { %v3776_v29 = vsel %vm2805_vm11, 1.0, %v6354_v6  ;;  %vm6446_vm11 = vcmask 254976  }
0x3aeb   :  { %v2809_v10 = vmax.f32 %v2808_v37, %v3776_v29  ;;  %v2616_v37 = vadd.f32 %v6445_v39, %v6444_v63 }
0x3aed   :  { %2810 = vst.msk [vmem:[#allocation8] sm:$0x1] %vm6443_vm0, %v2809_v10  ;;  %v2613_v10 = vrot.slane %v2174_v38, 1  ;;  %vm6447_vm0 = vmmov %vm6446_vm11 }
0x3af4   :  { %v6043_v60 = vld [vmem:[#allocation8] sm:$0x1] }
0x3af5   :  { %v2812_v26 = vsub.f32 1.0, %v6043_v60 }
0x3af7   :  { %v6048_v50 = vperm.slane %v2812_v26, 0 }
0x3af9   :  { %2891 = vperm.xlu2 %3864, %v6048_v50  }
0x3b01   :  { %3877 = vset.pattern.permute.xlu2 %v4591_v11 }
0x3b02   :  { %v3402_v25 = vpop.permute.xlu0 %3401 }
0x3b03   :  { %v3412_v40 = vperm.slane %v3402_v25, %v4589_v9  ;;  %v2630_v25 = vrot.slane %v5990_v8, 1 }
0x3b0a   :  { %v3405_v4 = vpop.permute.xlu0 %3404 }
0x3b0b   :  { %v3413_v52 = vperm.slane %v3405_v4, %v4648_v22 }
0x3b0c   :  { %v2498_v18 = vpop.xlane.xlu1 %2497 }
0x3b0d   :  { %4180 = vlog2.f32 %v2498_v18  ;;  %v3414_v27 = vsel %vm650_vm9, %v3413_v52, %v3412_v40  ;;  %v2615_v40 = vadd.f32 %v2613_v10, %v2174_v38  ;;  %v2632_v18 = vadd.f32 %v2630_v25, %v5990_v8 }
0x3b0e   :  { %v2901_v8 = vsub.f32 %v5571_v30, %v5568_v12  ;;  %v4222_v12 = vld [vmem:[#allocation4 + $0x2] sm:$0x3] }
0x3b12   :  { %v3408_v28 = vpop.permute.xlu0 %3407 }
0x3b13   :  { %v4181_v53 = vpop.eup %4180  ;;  %v3415_v47 = vperm.slane %v3408_v28, %v4589_v9 }
0x3b14   :  { %v2500_v42 = vmul.f32 0.6931472, %v4181_v53 }
0x3b16   :  { %v2501_v19 = vadd.f32 %v2500_v42, %v6444_v63 }
0x3b18   :  { %v2617_v29 = vmul.f32 2.0, %v2501_v19  ;;  %v2639_v19 = vld [vmem:[#allocation16] sm:$0x1] }
0x3b1a   :  { %v2618_v34 = vsub.f32 %v2616_v37, %v2617_v29  ;;  %v3411_v48 = vpop.permute.xlu0 %3410 }
0x3b1b   :  { %v3416_v7 = vperm.slane %v3411_v48, %v4648_v22 }
0x3b1c   :  { %v2620_v4 = vrot.slane %v2618_v34, 1 }
0x3b1d   :  { %v3417_v36 = vsel %vm650_vm9, %v3416_v7, %v3415_v47  ;;  %v4224_v7 = vld [vmem:[#allocation5] sm:$0x3] }
0x3b1e   :  { %v2622_v32 = vadd.f32 %v2620_v4, %v2618_v34  ;;  %v3418_v52 = vsel %vm655_vm10, %v3417_v36, %v3414_v27  ;;  %v2992_v27 = vsub.f32 %v5595_v23, %v5592_v45  ;;  %v4223_v45 = vld [vmem:[#allocation5 + $0x2] sm:$0x3] }
0x3b20   :  { %v2623_v3 = vadd.f32 %v2622_v32, %v2615_v40  ;;  %v3420_v32 = vsel %vm95_vm4, %v3418_v52, inf }
0x3b22   :  { %v2633_v2 = vadd.f32 %v2632_v18, %v2623_v3  ;;  %v6099_v3 = vmax.f32 %v5618_v55, %v6039_v17  ;;  %v3871_v17 = vunpack.i.h.bf16 %v6004_v0 }
0x3b24   :  { %v2647_v53 = vpop.permute.xlu1 %2646  ;;  %v2644_v63 = vsel %vm865_vm15, %v2633_v2, %v2642_v62  ;;  %v2887_v62 = vsub.f32 %v5579_v41, %v2885_v20 }
0x3b25   :  { %v2649_v42 = vperm.slane %v2647_v53, 0 }
0x3b27   :  { %v2650_v28 = vmul.f32 %v2649_v42, %v2644_v63 }
0x3b29   :  { %v2651_v39 = vadd.f32 %v2650_v28, %v2639_v19 }
0x3b2b   :  { %2652 = vst.msk [vmem:[#allocation16] sm:$0x1] %vm86_vm14, %v2651_v39 }
0x3b2c   :  { %v2668_v37 = vpop.permute.xlu1 %2667 }
0x3b2d   :  { %v2674_v38 = vsel %vm899_vm12, %v6031_v5, %v2668_v37  ;;  %v3347_v37 = vsub.f32 %v5927_v44, %v5969_v57  ;;  %v3349_v44 = vsub.f32 %v5933_v33, %v5987_v46 }
0x3b2e   :  { %v2675_v29 = vsel %vm901_vm2, %v2674_v38, 0.0 }
0x3b2f   :  { %2677 = vst.msk [vmem:[#allocation15 + $0x4] sm:$0x3] %vm6346_vm13, %v2675_v29  ;;  %vm6448_vm13 = vmmov %vm6447_vm0  ;;  %v3352_v38 = vmul.f32 1.442695, %v3347_v37 }
0x3b53   :  { %v6078_v10 = vpop.permute.xlu2 %2891 }
0x3b54   :  { %v2993_v34 = vmul.f32 %v2992_v27, %v6078_v10  ;;  %v2894_v48 = vmul.f32 %v6078_v10, %v2887_v62  ;;  %v2902_v5 = vmul.f32 %v2901_v8, %v6078_v10 }
0x3b56   :  { %2995 = vrot.lane.b32.xlu2 %v2993_v34, %s4364_s28  ;;  %2896 = vrot.lane.b32.xlu0 %v2894_v48, %s4359_s0 }
0x3b57   :  { %2904 = vrot.lane.b32.xlu1 %v2902_v5, %s4364_s28 }
0x3b5e   :  { %2981 = vrot.lane.b32.xlu0 %v4222_v12, %s4364_s28 }
0x3bb0   :  { %v2996_v30 = vpop.permute.xlu2 %2995 }
0x3bb1   :  { %v2998_v41 = vadd.f32 %v4223_v45, %v2996_v30 }
0x3bb3   :  { %2999 = vst.msk [vmem:[#allocation5 + $0x2] sm:$0x3] %vm6446_vm11, %v2998_v41 }
0x3bc8   :  { %v2897_v23 = vpop.permute.xlu0 %2896 }
0x3bc9   :  { %v2899_v20 = vadd.f32 %v5921_v1, %v2897_v23  ;;  %v2905_v47 = vpop.permute.xlu1 %2904  ;;  %v3346_v1 = vsub.f32 %v5910_v16, %v5969_v57  ;;  %v3356_v57 = vmul.f32 1.442695, %v3349_v44 }
0x3bca   :  { %v2907_v25 = vadd.f32 %v4224_v7, %v2905_v47 }
0x3bcb   :  { %2900 = vst.msk [vmem:[#allocation4] sm:$0x3] %vm6447_vm0, %v2899_v20  ;;  %v3350_v18 = vmul.f32 1.442695, %v3346_v1 }
0x3bcc   :  { %2908 = vst.msk [vmem:[#allocation5] sm:$0x3] %vm6448_vm13, %v2907_v25  ;;  %vm6449_vm13 = vmmov %vm6447_vm0 }
0x3bcd   :  { %4182 = vpow2.f32 %v3350_v18 }
0x3bd0   :  { %v2982_v4 = vpop.permute.xlu0 %2981 }
0x3bd1   :  { %v2984_v36 = vsub.f32 %v5611_v51, %v2982_v4  ;;  %v3348_v51 = vsub.f32 %v5925_v59, %v5987_v46 }
0x3bd3   :  { %v2985_v40 = vmul.f32 %v2984_v36, %v6078_v10  ;;  %v3354_v2 = vmul.f32 1.442695, %v3348_v51  ;;  %v4183_v53 = vpop.eup %4182 }
0x3bd5   :  { %2987 = vrot.lane.b32.xlu0 %v2985_v40, %s4359_s0  ;;  %4184 = vpow2.f32 %v3354_v2 }
0x3bdb   :  { %v4185_v52 = vpop.eup %4184 }
0x3bff   :  { %3421 = vmin.xlane.f32.xlu0 %v3420_v32 }
0x3c13   :  { %3040 = vrot.lane.b32.xlu0 %v6099_v3, %s4361_s27 }
0x3c1b   :  { %3363 = vperm.xlu0 %3866, %v4183_v53  }
0x3c23   :  { %3369 = vperm.xlu0 %3866, %v4185_v52  }
0x3c2b   :  { %3878 = vset.pattern.permute.xlu0 %v4598_v13 }
0x3c47   :  { %v2988_v16 = vpop.permute.xlu0 %2987 }
0x3c48   :  { %v2990_v42 = vadd.f32 %v4222_v12, %v2988_v16 }
0x3c4a   :  { %2991 = vst.msk [vmem:[#allocation4 + $0x2] sm:$0x3] %vm6449_vm13, %v2990_v42 }
0x3c72   :  { %v6108_v63 = vpop.xlane.xlu0 %3421 }
0x3c73   :  { %v6112_v28 = vsel %vm865_vm15, %v3871_v17, %v6108_v63  ;;  %vm3423_vm11 = vcmp.eq.f32.partialorder %v4601_v14, %v6108_v63 }
0x3c74   :  { %v3424_v8 = vsel %vm3423_vm11, -3e+38, %v5945_v24 }
0x3c75   :  { %v3425_v27 = vsel %vm95_vm4, %v3424_v8, -inf }
0x3c85   :  { %v3041_v59 = vpop.permute.xlu0 %3040 }
0x3c86   :  { %v3043_v19 = vsub.f32 %v5618_v55, %v3041_v59 }
0x3c88   :  { %v3044_v39 = vmul.f32 1.442695, %v3043_v19  ;;  %v3036_v19 = vsub.f32 %v5618_v55, %v6099_v3 }
0x3c8a   :  { %4186 = vpow2.f32 %v3044_v39  ;;  %v3037_v44 = vmul.f32 1.442695, %v3036_v19  ;;  %v3564_v19 = vld [vmem:[#allocation2] sm:$0xff] }
0x3c8b   :  { %4188 = vpow2.f32 %v3352_v38  ;;  %v3465_v38 = vsub.f32 1.0, %v6000_v35 }
0x3c8c   :  { %4190 = vpow2.f32 %v3356_v57 }
0x3c8d   :  { %v3364_v30 = vpop.permute.xlu0 %3363 }
0x3c8e   :  { %v3374_v41 = vperm.slane %v3364_v30, %v4589_v9 }
0x3c90   :  { %v4187_v29 = vpop.eup %4186 }
0x3c91   :  { %3047 = vrot.lane.b32.xlu1 %v4187_v29, %s4365_s8  ;;  %v4189_v0 = vpop.eup %4188  ;;  %v3787_v29 = vsel %vm3423_vm11, 1.0, %v6354_v6  ;;  %vm6455_vm11 = vcmask 253952  }
0x3c92   :  { %v4191_v62 = vpop.eup %4190 }
0x3c95   :  { %v3370_v33 = vpop.permute.xlu0 %3369 }
0x3c99   :  { %3366 = vperm.xlu1 %3865, %v4189_v0  }
0x3cc3   :  { %3426 = vmax.xlane.f32.xlu1 %v3425_v27 }
0x3cdc   :  { %3372 = vperm.xlu1 %3865, %v4191_v62   ;;  %v3466_v62 = vmul.f32 %v3465_v38, %v6016_v49 }
0x3ce4   :  { %3879 = vset.pattern.permute.xlu1 %v4591_v11  ;;  %v3377_v11 = vperm.slane %v3370_v33, %v4589_v9 }
0x3d03   :  { %v6128_v34 = vpop.permute.xlu1 %3047 }
0x3d0b   :  { %v3367_v48 = vpop.permute.xlu1 %3366 }
0x3d0c   :  { %v3375_v46 = vperm.slane %v3367_v48, %v4648_v22 }
0x3d0e   :  { %v3376_v20 = vsel %vm650_vm9, %v3375_v46, %v3374_v41 }
0x3d36   :  { %v6130_v5 = vpop.xlane.xlu1 %3426 }
0x3d37   :  { %vm3428_vm0 = vcmp.eq.f32.partialorder %v3424_v8, %v6130_v5  ;;  %v3475_v4 = vand.u32 2147483647, %v6130_v5  ;;  %v3470_v1 = vmul.f32 2.0, %v6130_v5  ;;  %v3484_v42 = vsub.f32 0.0, %v6130_v5 }
0x3d38   :  { %v3429_v24 = vsel %vm3428_vm0, %v4601_v14, 1e+09 }
0x3d39   :  { %v3430_v12 = vsel %vm95_vm4, %v3429_v24, inf  ;;  %v3476_v36 = vmul.f32 -2.0, %v3475_v4  ;;  %v3471_v18 = vmul.f32 0.5, %v3470_v1 }
0x3d3a   :  { %3431 = vmin.xlane.f32.xlu2 %v3430_v12 }
0x3d3b   :  { %v3477_v40 = vmul.f32 1.442695, %v3476_v36 }
0x3d3d   :  { %4192 = vpow2.f32 %v3477_v40 }
0x3d43   :  { %v4193_v32 = vpop.eup %4192 }
0x3d44   :  { %v3479_v9 = vadd.f32 1.0, %v4193_v32 }
0x3d46   :  { %4194 = vlog2.f32 %v3479_v9  ;;  %v3502_v9 = vadd.f32 %v6130_v5, %v5965_v54 }
0x3d47   :  { %4196 = vtanh.f32 %v3471_v18 }
0x3d48   :  { %4198 = vpow2.f32 %v3037_v44 }
0x3d4e   :  { %v3373_v45 = vpop.permute.xlu1 %3372 }
0x3d4f   :  { %v3378_v23 = vperm.slane %v3373_v45, %v4648_v22  ;;  %v4195_v22 = vpop.eup %4194 }
0x3d50   :  { %v4197_v51 = vpop.eup %4196  ;;  %v3481_v2 = vmul.f32 0.6931472, %v4195_v22  ;;  %v3671_v22 = vperm.slane %v5730_v15, 0 }
0x3d51   :  { %v3379_v47 = vsel %vm650_vm9, %v3378_v23, %v3377_v11  ;;  %v3473_v53 = vadd.f32 1.0, %v4197_v51  ;;  %v4199_v11 = vpop.eup %4198 }
0x3d52   :  { %v3380_v7 = vsel %vm655_vm10, %v3379_v47, %v3376_v20  ;;  %v3482_v52 = vadd.f32 %v3481_v2, %v3475_v4  ;;  %v3050_v47 = vadd.f32 %v4199_v11, %v6128_v34  ;;  %v3567_v11 = vld [vmem:[#allocation2 + $0x18] sm:$0xf] }
0x3d53   :  { %v3382_v25 = vsel %vm95_vm4, %v3380_v7, 0.0  ;;  %v3474_v16 = vmul.f32 0.5, %v3473_v53 }
0x3d54   :  { %3383 = vadd.xlane.f32.xlu1 %v3382_v25  ;;  %v3483_v17 = vsub.f32 %v6130_v5, %v3482_v52  ;;  %v3485_v59 = vsub.f32 %v3484_v42, %v3482_v52  ;;  %4200 = vlog2.f32 %v3050_v47 }
0x3d55   :  { %v3493_v37 = vsub.f32 1.0, %v3474_v16  ;;  %vm3486_vm13 = vcmp.lt.f32.partialorder %v5998_v43, %v3474_v16  ;;  %v3467_v43 = vmul.f32 %v6014_v61, %v6000_v35 }
0x3d56   :  { %v3495_v27 = vmul.f32 %v3483_v17, %v3474_v16  ;;  %v3790_v57 = vsel %vm3486_vm13, 1.0, %v6354_v6 }
0x3d57   :  { %v3494_v8 = vmul.f32 %v3493_v37, %v3485_v59  ;;  %v3490_v46 = vsub.f32 1.0, %v3790_v57  ;;  %v3468_v45 = vadd.f32 %v3467_v43, %v3466_v62  ;;  %v3489_v49 = vmul.f32 %v3790_v57, %v3483_v17 }
0x3d59   :  { %v3496_v30 = vadd.f32 %v3495_v27, %v3494_v8  ;;  %v3491_v41 = vmul.f32 %v3490_v46, %v3485_v59  ;;  %v3469_v61 = vsub.f32 0.0, %v3468_v45  ;;  %v3565_v27 = vld [vmem:[#allocation2 + $0x8] sm:$0xf] }
0x3d5a   :  { %v4201_v25 = vpop.eup %4200 }
0x3d5b   :  { %v3497_v35 = vsub.f32 0.0, %v3496_v30  ;;  %v3492_v23 = vadd.f32 %v3491_v41, %v3489_v49  ;;  %v3052_v34 = vmul.f32 0.6931472, %v4201_v25 }
0x3d5d   :  { %v3520_v20 = vadd.f32 %v3497_v35, %v3469_v61 }
0x3dad   :  { %v6149_v39 = vpop.xlane.xlu2 %3431 }
0x3dae   :  { %vm3435_vm9 = vcmp.eq.f32.partialorder %v4601_v14, %v6149_v39 }
0x3daf   :  { %v3788_v0 = vsel %vm3435_vm9, 1.0, %v6354_v6  ;;  %vm6459_vm9 = vcmask 254976  }
0x3db0   :  { %v3438_v55 = vadd.f32 %v3788_v0, %v3787_v29 }
0x3db2   :  { %v3616_v48 = vsel %vm95_vm4, %v3438_v55, 0.0  ;;  %v3581_v24 = vperm.slane %v3438_v55, 1  ;;  %v3568_v12 = vperm.slane %v3438_v55, 0  ;;  %v3439_v63 = vmul.f32 %v3438_v55, %v6078_v10 }
0x3db3   :  { %3617 = vadd.xlane.f32.xlu0 %v3616_v48 }
0x3db4   :  { %3586 = vperm.xlu2 %3877, %v3581_v24   ;;  %3573 = vperm.xlu1 %3879, %v3568_v12   ;;  %v3440_v33 = vadd.f32 %v3439_v63, %v5836_v56  ;;  %v3522_v56 = vrot.slane %v3520_v20, 1  ;;  %v3566_v63 = vld [vmem:[#allocation2 + $0x10] sm:$0xff] }
0x3db6   :  { %3441 = vst.msk [vmem:[#allocation6] sm:$0x3] %vm95_vm4, %v3440_v33  ;;  %v3524_v7 = vadd.f32 %v3522_v56, %v3520_v20  ;;  %v3525_v20 = vld [vmem:[#allocation16] sm:$0x1] }
0x3dbc   :  { %3880 = vset.pattern.permute.xlu2 %v4598_v13  ;;  %3881 = vset.pattern.permute.xlu1 %v6355_v21  ;;  %v3053_v13 = vadd.f32 %v3052_v34, %v6099_v3  ;;  %v3882_v21 = vpack.i.bf16 %v3790_v57, %v6007_v31 }
0x3dbd   :  { %3511 = vrot.lane.b32.xlu2 %v3492_v23, %s4365_s8  ;;  %3532 = vperm.xlu1 %3881, %v2812_v26   ;;  %v3670_v26 = vrot.slane %v5730_v15, 1 }
0x3dbe   :  { %v3060_v40 = vsub.f32 %v6099_v3, %v3053_v13  ;;  %v3683_v3 = vsel %vm3275_vm8, %v3440_v33, 1.0 }
0x3dbf   :  { %v3672_v1 = vperm.slane %v3670_v26, 0  ;;  %v3684_v16 = vsel %vm95_vm4, %v3683_v3, inf }
0x3dc5   :  { %3579 = vperm.xlu2 %3880, %v3568_v12   ;;  %3527 = vrot.lane.b32.xlu1 %v3524_v7, %s4361_s27  ;;  %s3715_s27 = sshll.u32 %s4368_s9, 4  ;;  %s3716_s27 = int_to_ptr.vmem [resolvable:$true] %s3715_s27 }
0x3dc7   :  { %3592 = vperm.xlu0 %3878, %v3581_v24   ;;  %v3384_v4 = vpop.xlane.xlu1 %3383 }
0x3dc8   :  { %4202 = vlog2.f32 %v3384_v4 }
0x3dcd   :  { %3553 = vrot.lane.b32.xlu1 %v6048_v50, %s4367_s16  ;;  %v3499_v50 = vrot.slane %v3060_v40, 1 }
0x3dce   :  { %v4203_v60 = vpop.eup %4202 }
0x3dcf   :  { %v3386_v36 = vmul.f32 0.6931472, %v4203_v60  ;;  %3883 = vrot.lane.b32.xlu0 %v3882_v21, %s4366_s29  ;;  %v3501_v2 = vadd.f32 %v3499_v50, %v3060_v40  ;;  %v3557_v50 = vsel %vm893_vm6, %v6112_v28, %v6149_v39 }
0x3dd1   :  { %v3387_v32 = vadd.f32 %v3386_v36, %v5965_v54 }
0x3dd3   :  { %v3503_v18 = vmul.f32 2.0, %v3387_v32 }
0x3dd5   :  { %v3504_v51 = vsub.f32 %v3502_v9, %v3503_v18  ;;  %3675 = vrot.lane.b32.xlu1 %v3672_v1, %s4359_s0 }
0x3dd7   :  { %v3506_v31 = vrot.slane %v3504_v51, 1  ;;  %3673 = vrot.lane.b32.xlu0 %v3671_v22, %s4359_s0 }
0x3dd9   :  { %v3508_v53 = vadd.f32 %v3506_v31, %v3504_v51 }
0x3ddb   :  { %v3509_v52 = vadd.f32 %v3508_v53, %v3501_v2 }
0x3dee   :  { %3685 = vmin.xlane.f32.xlu2 %v3684_v16 }
0x3e0e   :  { %v3587_v54 = vpop.permute.xlu2 %3586 }
0x3e0f   :  { %v3596_v41 = vmul.f32 %v3587_v54, %v3566_v63 }
0x3e11   :  { %v3607_v34 = vsel %vm103_vm1, %v3596_v41, 0.0 }
0x3e17   :  { %v3512_v5 = vpop.permute.xlu2 %3511 }
0x3e18   :  { %v3514_v15 = vadd.f32 %v3512_v5, %v6025_v58 }
0x3e1a   :  { %v3516_v42 = vrot.slane %v3514_v15, 1 }
0x3e1c   :  { %v3518_v17 = vadd.f32 %v3516_v42, %v3514_v15 }
0x3e1e   :  { %v3519_v59 = vadd.f32 %v3518_v17, %v3509_v52 }
0x3e1f   :  { %v3580_v29 = vpop.permute.xlu2 %3579 }
0x3e20   :  { %v3595_v14 = vmul.f32 %v3580_v29, %v3565_v27  ;;  %v3620_v27 = vld [vmem:[#allocation7] sm:$0x3] }
0x3e22   :  { %v3599_v58 = vsel %vm105_vm5, %v3595_v14, 0.0 }
0x3e26   :  { %v3618_v37 = vpop.xlane.xlu0 %3617  ;;  %v3574_v38 = vpop.permute.xlu1 %3573 }
0x3e27   :  { %v6192_v0 = vadd.f32 1.0, %v3618_v37  ;;  %v3594_v8 = vmul.f32 %v3574_v38, %v3564_v19 }
0x3e29   :  { %v6195_v55 = vrot.slane %v6192_v0, 1  ;;  %4204 = vrcp.f32 %v6192_v0  ;;  %v3598_v44 = vsel %vm103_vm1, %v3594_v8, 0.0  ;;  %v3634_v1 = vand.u32 2147483647, %v6192_v0 }
0x3e2a   :  { %v3600_v57 = vadd.f32 %v3599_v58, %v3598_v44  ;;  %v3636_v9 = vand.u32 2147483648, %v6192_v0  ;;  %vm3630_vm1 = vweird.f32 %v6192_v0 }
0x3e2b   :  { %4206 = vrcp.f32 %v6195_v55  ;;  %v3651_v16 = vand.u32 2147483648, %v6195_v55  ;;  %v3649_v5 = vand.u32 2147483647, %v6195_v55 }
0x3e2c   :  { %v3601_v24 = vrot.slane %v3600_v57, 4  ;;  %v3637_v39 = vor.u32 1.1754944e-38, %v3636_v9 }
0x3e2d   :  { %v3652_v14 = vor.u32 1.1754944e-38, %v3651_v16 }
0x3e2e   :  { %v3602_v33 = vadd.f32 %v3601_v24, %v3600_v57 }
0x3e2f   :  { %v3533_v62 = vpop.permute.xlu1 %3532  ;;  %v6201_v43 = vpop.eup %4204 }
0x3e30   :  { %v3626_v48 = vmul.f32 %v6201_v43, %v6192_v0  ;;  %v3535_v46 = vperm.slane %v3533_v62, 0  ;;  %v3603_v7 = vrot.slane %v3602_v33, 2  ;;  %vm3631_vm4 = vweird.f32 %v6201_v43 }
0x3e31   :  { %v6205_v12 = vpop.eup %4206  ;;  %v3656_v62 = vrot.slane %v3620_v27, 1 }
0x3e32   :  { %v3627_v30 = vsub.f32 1.0, %v3626_v48  ;;  %v3641_v49 = vmul.f32 %v6205_v12, %v6195_v55  ;;  %v3604_v26 = vadd.f32 %v3603_v7, %v3602_v33  ;;  %vm3646_vm8 = vweird.f32 %v6205_v12 }
0x3e34   :  { %v3628_v56 = vmul.f32 %v6201_v43, %v3627_v30  ;;  %v3642_v4 = vsub.f32 1.0, %v3641_v49  ;;  %v3605_v52 = vrot.slane %v3604_v26, 1 }
0x3e36   :  { %v3629_v60 = vadd.f32 %v6201_v43, %v3628_v56  ;;  %v3643_v36 = vmul.f32 %v6205_v12, %v3642_v4  ;;  %v3606_v37 = vadd.f32 %v3605_v52, %v3604_v26 }
0x3e37   :  { %v3528_v45 = vpop.permute.xlu1 %3527 }
0x3e38   :  { %v3530_v35 = vsel %vm865_vm15, %v3519_v59, %v3528_v45  ;;  %v3644_v3 = vadd.f32 %v6205_v12, %v3643_v36  ;;  %vm3645_vm15 = vweird.f32 %v6195_v55 }
0x3e39   :  { %v3536_v61 = vmul.f32 %v3535_v46, %v3530_v35  ;;  %v3593_v23 = vpop.permute.xlu0 %3592  ;;  %vm6247_vm6 = vmor %vm3645_vm15, %vm3646_vm8  ;;  %v3694_v35 = vld [vmem:[#allocation8] sm:$0x1] }
0x3e3a   :  { %v3597_v47 = vmul.f32 %v3593_v23, %v3567_v11  ;;  %v3648_v38 = vsel %vm6247_vm6, %v6205_v12, %v3644_v3 }
0x3e3b   :  { %v3537_v25 = vadd.f32 %v3536_v61, %v3525_v20 }
0x3e3c   :  { %v3608_v13 = vsel %vm105_vm5, %v3597_v47, 0.0  ;;  %vm6226_vm5 = vmor %vm3630_vm1, %vm3631_vm4  ;;  %vm6460_vm4 = vcmask 0  }
0x3e3d   :  { %3538 = vst.msk [vmem:[#allocation16] sm:$0x1] %vm86_vm14, %v3537_v25  ;;  %v3609_v21 = vadd.f32 %v3608_v13, %v3607_v34  ;;  %v3633_v53 = vsel %vm6226_vm5, %v6201_v43, %v3629_v60  ;;  %vm3635_vm14 = vcmp.eq.f32.partialorder %v3634_v1, 8.507059e+37 }
0x3e3e   :  { %3720 = dma.vmem_to_hbm [thread:$0]  %s3716_s27, 16, %s3718_s21, [#allocation17]   ;;  %v3638_v17 = vsel %vm3635_vm14, %v3637_v39, %v3633_v53 }
0x3e3f   :  { %v3610_v40 = vrot.slane %v3609_v21, 4  ;;  %v3554_v32 = vpop.permute.xlu1 %3553  ;;  %v3639_v55 = vmul.f32 %v3638_v17, %v3606_v37 }
0x3e41   :  { %v3611_v18 = vadd.f32 %v3610_v40, %v3609_v21  ;;  %v3884_v22 = vpop.permute.xlu0 %3883  ;;  %v3659_v48 = vsub.f32 %v3639_v55, %v3620_v27 }
0x3e42   :  { %v3886_v31 = vunpack.i.h.bf16 %v3884_v22  ;;  %v3885_v2 = vunpack.i.l.bf16 %v3884_v22 }
0x3e43   :  { %v3612_v28 = vrot.slane %v3611_v18, 2  ;;  %v3661_v63 = vmul.f32 %v3659_v48, %v6078_v10 }
0x3e44   :  { %v3558_v54 = vsel %vm895_vm7, %v3557_v50, %v3885_v2  ;;  %vm6454_vm7 = vcmask 58368  }
0x3e45   :  { %v3613_v15 = vadd.f32 %v3612_v28, %v3611_v18  ;;  %v3559_v42 = vsel %vm897_vm3, %v3558_v54, %v3886_v31  ;;  %vm3650_vm3 = vcmp.eq.f32.partialorder %v3649_v5, 8.507059e+37 }
0x3e46   :  { %v3560_v19 = vsel %vm899_vm12, %v3559_v42, %v3554_v32  ;;  %v3653_v57 = vsel %vm3650_vm3, %v3652_v14, %v3648_v38  ;;  %vm6456_vm12 = vmmov %vm6455_vm11 }
0x3e47   :  { %v3614_v29 = vrot.slane %v3613_v15, 1  ;;  %v3561_v0 = vsel %vm901_vm2, %v3560_v19, 0.0  ;;  %v3676_v8 = vpop.permute.xlu1 %3675  ;;  %vm6457_vm2 = vmmov %vm6455_vm11 }
0x3e48   :  { %3563 = vst.msk [vmem:[#allocation15 + $0x6] sm:$0x3] %vm6454_vm7, %v3561_v0  ;;  %vm6458_vm0 = vmmov %vm6457_vm2 }
0x3e49   :  { %v3615_v44 = vadd.f32 %v3614_v29, %v3613_v15  ;;  %3680 = vst.msk [vmem:[#allocation2 + $0x1b] sm:$0x1] %vm6455_vm11, %v3676_v8  ;;  %v3674_v58 = vpop.permute.xlu0 %3673  ;;  %3709 = dma.vmem_to_hbm [thread:$0]  %s3702_s24, 128, %s3704_s23, [#allocation11], %s4359_s0, %s4359_s0, %s4370_s10  }
0x3e4a   :  { %3682 = vst.msk [vmem:[#allocation3 + $0x1b] sm:$0x1] %vm6456_vm12, %v3676_v8 }
0x3e4b   :  { %v3654_v43 = vmul.f32 %v3653_v57, %v3615_v44  ;;  %3679 = vst.msk [vmem:[#allocation2 + $0xb] sm:$0x1] %vm6457_vm2, %v3674_v58 }
0x3e4c   :  { %3681 = vst.msk [vmem:[#allocation3 + $0xb] sm:$0x1] %vm6458_vm0, %v3674_v58 }
0x3e4d   :  { %v3660_v24 = vsub.f32 %v3654_v43, %v3656_v62 }
0x3e4f   :  { %v3662_v12 = vmul.f32 %v3660_v24, %v6078_v10 }
0x3e51   :  { %v3665_v30 = vrot.slane %v3662_v12, 7 }
0x3e53   :  { %v3666_v33 = vsel %vm655_vm10, %v3665_v30, %v3661_v63 }
0x3e54   :  { %v3668_v46 = vadd.f32 %v3666_v33, %v3620_v27 }
0x3e56   :  { %3669 = vst.msk [vmem:[#allocation7] sm:$0x3] %vm6459_vm9, %v3668_v46 }
0x3e61   :  { %v3686_v45 = vpop.xlane.xlu2 %3685 }
0x3e62   :  { %v3688_v49 = vrot.slane %v3686_v45, 1 }
0x3e64   :  { %v3690_v41 = vmin.f32 %v3686_v45, %v3688_v49 }
0x3e66   :  { %vm3691_vm13 = vcmp.gt.f32.partialorder %v3690_v41, 0.0 }
0x3e67   :  { %v3791_v61 = vsel %vm3691_vm13, 1.0, %v6354_v6 }
0x3e68   :  { %v3695_v11 = vmax.f32 %v3694_v35, %v3791_v61 }
0x3e6a   :  { %3696 = vst.msk [vmem:[#allocation8] sm:$0x1] %vm6460_vm4, %v3695_v11 }
0x3e6b   :  { %4349 = dma.done.wait [#allocation11], 128  }
0x3e6c   :  { %4350 = vsyncadd [#allocation11], 4294967168 }
0x3e6d   :  { %4351 = dma.done.wait [#allocation17], 16  }
0x3e6e   :  { %4352 = vsyncadd [#allocation17], 4294967280 }
0x3e6f   :  { %3729 = vsyncpa [#allocation10], 1 }
0x3e70   :  { %3730 = vsyncpa [#allocation13], 1 }
0x3e71   :  { %3731 = vsyncpa [#allocation11], 1 }
0x3e72   :  { %3732 = vsyncpa [#allocation17], 1 }

</bundles_post_ra>
